<compile_context>
chip_gen: v7x
topology: tpu7x:2x2x1
jax: 0.10.0
libtpu: 0.0.40
codegen_flags: <defaults>
</compile_context>

<pallas_src>
import jax
import jax.numpy as jnp
from jax.experimental import pallas as pl
from jax.experimental.pallas import tpu as pltpu

# ---------------------------------------------------------------------------
# Problem sizes (small, consistent with a BEVFusion LiDAR branch)
# ---------------------------------------------------------------------------
B = 2        # batch
NV = 32      # non-empty voxels per sample
P = 8        # points per voxel
CPTS = 4     # raw point feature dim (x, y, z, intensity)
CVOX = 16    # voxel-encoder output channels
H = W = 16   # BEV grid
CB = 32      # backbone channels per block
CN = 32      # neck channels per scale

HW = H * W                     # 256  dense BEV positions
PHW = (H + 2) * (W + 2)        # 324  zero-padded BEV positions (pad=1)


# ---------------------------------------------------------------------------
# Fused Pallas kernel: VFE + middle encoder + backbone + neck for one sample
# ---------------------------------------------------------------------------
def _fused_bev_kernel(pts_ref, coor_ref, vfe_w_ref, vfe_b_ref, scat_ref,
                      bb1_w_ref, bb1_b_ref, bb2_w_ref, bb2_b_ref,
                      n1_w_ref, n1_b_ref, n2_w_ref, n2_b_ref,
                      vox_ref, bev_ref, bb_ref, neck_ref,
                      pad1_ref, pad2_ref):
    f32 = jnp.float32
    W2 = W + 2

    # ---- pts_voxel_encoder: ONE (P*NV, CPTS)@(CPTS, CVOX) matmul, bias once,
    #      ReLU, then max over the P point-slices (VPU maxes, no extra MXU).
    pts = pts_ref[0]                                             # (P*NV, CPTS)
    h = jnp.dot(pts, vfe_w_ref[...], preferred_element_type=f32)
    h = jnp.maximum(h + vfe_b_ref[...], 0.0)                     # (P*NV, CVOX)
    vox = h[0:NV, :]
    for p in range(1, P):                                        # static unroll
        vox = jnp.maximum(vox, h[p * NV:(p + 1) * NV, :])        # (NV, CVOX)
    vox_ref[0] = vox

    # ---- pts_middle_encoder: scatter voxels into the zero-PADDED BEV grid
    #      with a one-hot matmul (coords precomputed as padded flat indices).
    #      NOTE: duplicate voxel coords would sum here (torch .set overwrites);
    #      the synthetic coords are unique so results are identical.
    row_ids = jax.lax.broadcasted_iota(jnp.int32, (PHW, NV), 0)
    onehot = jnp.where(row_ids == coor_ref[0], 1.0, 0.0).astype(f32)   # (PHW, NV)
    bev_pad = jnp.dot(onehot, vox, preferred_element_type=f32)         # (PHW, CVOX)
    for y in range(H + 2):                       # rows into the 3-D VMEM slab
        pad1_ref[y] = bev_pad[y * W2:(y + 1) * W2, :]

    # dense (unpadded) BEV = interior window -> middle_encoder hook feature
    bev_ref[0] = pad1_ref[1:H + 1, 1:W + 1, :].reshape(HW, CVOX)

    # ---- pts_backbone conv1: 9 shifted taps from the padded slab, MXU acc.
    acc = jnp.zeros((HW, CB), f32)
    t = 0
    for dy in range(3):
        for dx in range(3):
            win = pad1_ref[dy:dy + H, dx:dx + W, :].reshape(HW, CVOX)
            acc = acc + jnp.dot(win, bb1_w_ref[t], preferred_element_type=f32)
            t += 1
    f1 = jnp.maximum(acc + bb1_b_ref[...], 0.0)                  # (HW, CB)

    # ---- pts_backbone conv2: pad f1 via a constant scatter matmul, 9 taps.
    f1_pad = jnp.dot(scat_ref[...], f1, preferred_element_type=f32)    # (PHW, CB)
    for y in range(H + 2):
        pad2_ref[y] = f1_pad[y * W2:(y + 1) * W2, :]
    acc = jnp.zeros((HW, CB), f32)
    t = 0
    for dy in range(3):
        for dx in range(3):
            win = pad2_ref[dy:dy + H, dx:dx + W, :].reshape(HW, CB)
            acc = acc + jnp.dot(win, bb2_w_ref[t], preferred_element_type=f32)
            t += 1
    f2 = jnp.maximum(acc + bb2_b_ref[...], 0.0)                  # (HW, CB)

    # ---- backbone hook: cat([f1, f2], channel) stored lane-dense (64 lanes).
    bb_ref[0] = jnp.concatenate([f1, f2], axis=-1)

    # ---- pts_neck: per-scale 1x1 conv + ReLU, channel concat (64 lanes).
    n1 = jnp.maximum(
        jnp.dot(f1, n1_w_ref[...], preferred_element_type=f32) + n1_b_ref[...], 0.0)
    n2 = jnp.maximum(
        jnp.dot(f2, n2_w_ref[...], preferred_element_type=f32) + n2_b_ref[...], 0.0)
    neck_ref[0] = jnp.concatenate([n1, n2], axis=-1)


def _pad_scatter_matrix():
    """(PHW, HW) constant: S[p, q] = 1 iff padded flat pos p is interior pos q."""
    rows = jnp.arange(PHW)[:, None]
    yy, xx = jnp.meshgrid(jnp.arange(H), jnp.arange(W), indexing="ij")
    interior = ((yy + 1) * (W + 2) + (xx + 1)).reshape(-1)        # (HW,)
    return jnp.where(rows == interior[None, :], 1.0, 0.0).astype(jnp.float32)


# ---------------------------------------------------------------------------
# Synthetic BEVFusion LiDAR branch + hook-capture semantics
# ---------------------------------------------------------------------------
def init_params(key):
    ks = jax.random.split(key, 5)
    return {
        "vfe_w": 0.1 * jax.random.normal(ks[0], (CPTS, CVOX), jnp.float32),
        "vfe_b": jnp.zeros((CVOX,), jnp.float32),
        "bb1_w": 0.1 * jax.random.normal(ks[1], (9 * CVOX, CB), jnp.float32),
        "bb1_b": jnp.zeros((CB,), jnp.float32),
        "bb2_w": 0.1 * jax.random.normal(ks[2], (9 * CB, CB), jnp.float32),
        "bb2_b": jnp.zeros((CB,), jnp.float32),
        "neck1_w": 0.1 * jax.random.normal(ks[3], (CB, CN), jnp.float32),
        "neck1_b": jnp.zeros((CN,), jnp.float32),
        "neck2_w": 0.1 * jax.random.normal(ks[4], (CB, CN), jnp.float32),
        "neck2_b": jnp.zeros((CN,), jnp.float32),
    }


@jax.jit
def extract_feat(params, points, coors):
    """Runs the synthetic BEVFusion LiDAR pipeline; returns (output, hooks).

    points: (B, NV, P, CPTS) float32
    coors : (B, NV, 2) int32 BEV (row, col) of each voxel
    """
    # layout plumbing (XLA glue, tiny tensors): point-major VFE input, padded
    # flat voxel coords, constant pad-scatter matrix.
    pts_pm = jnp.transpose(points, (0, 2, 1, 3)).reshape(B, P * NV, CPTS)
    coors_pad = ((coors[..., 0] + 1) * (W + 2) + (coors[..., 1] + 1)
                 ).astype(jnp.int32).reshape(B, 1, NV)
    scat = _pad_scatter_matrix()

    vox, bev_flat, bb_flat, neck_flat = pl.pallas_call(
        _fused_bev_kernel,
        out_shape=(
            jax.ShapeDtypeStruct((B, NV, CVOX), jnp.float32),
            jax.ShapeDtypeStruct((B, HW, CVOX), jnp.float32),
            jax.ShapeDtypeStruct((B, HW, 2 * CB), jnp.float32),
            jax.ShapeDtypeStruct((B, HW, 2 * CN), jnp.float32),
        ),
        grid_spec=pltpu.PrefetchScalarGridSpec(
            num_scalar_prefetch=0,
            grid=(B,),
            in_specs=[
                pl.BlockSpec((1, P * NV, CPTS), lambda b: (b, 0, 0)),
                pl.BlockSpec((1, 1, NV), lambda b: (b, 0, 0)),
                pl.BlockSpec((CPTS, CVOX), lambda b: (0, 0)),
                pl.BlockSpec((1, CVOX), lambda b: (0, 0)),
                pl.BlockSpec((PHW, HW), lambda b: (0, 0)),
                pl.BlockSpec((9, CVOX, CB), lambda b: (0, 0, 0)),
                pl.BlockSpec((1, CB), lambda b: (0, 0)),
                pl.BlockSpec((9, CB, CB), lambda b: (0, 0, 0)),
                pl.BlockSpec((1, CB), lambda b: (0, 0)),
                pl.BlockSpec((CB, CN), lambda b: (0, 0)),
                pl.BlockSpec((1, CN), lambda b: (0, 0)),
                pl.BlockSpec((CB, CN), lambda b: (0, 0)),
                pl.BlockSpec((1, CN), lambda b: (0, 0)),
            ],
            out_specs=[
                pl.BlockSpec((1, NV, CVOX), lambda b: (b, 0, 0)),
                pl.BlockSpec((1, HW, CVOX), lambda b: (b, 0, 0)),
                pl.BlockSpec((1, HW, 2 * CB), lambda b: (b, 0, 0)),
                pl.BlockSpec((1, HW, 2 * CN), lambda b: (b, 0, 0)),
            ],
            scratch_shapes=[
                pltpu.VMEM((H + 2, W + 2, CVOX), jnp.float32),   # padded BEV
                pltpu.VMEM((H + 2, W + 2, CB), jnp.float32),     # padded f1
            ],
        ),
        compiler_params=pltpu.CompilerParams(
            dimension_semantics=("parallel",)),
    )(
        pts_pm, coors_pad,
        params["vfe_w"], params["vfe_b"].reshape(1, CVOX),
        scat,
        params["bb1_w"].reshape(9, CVOX, CB), params["bb1_b"].reshape(1, CB),
        params["bb2_w"].reshape(9, CB, CB), params["bb2_b"].reshape(1, CB),
        params["neck1_w"], params["neck1_b"].reshape(1, CN),
        params["neck2_w"], params["neck2_b"].reshape(1, CN),
    )

    features = {
        "voxel_encoder": vox.reshape(B * NV, CVOX),
        "middle_encoder": jnp.transpose(
            bev_flat.reshape(B, H, W, CVOX), (0, 3, 1, 2)),
        "backbone": jnp.transpose(
            bb_flat.reshape(B, H, W, 2 * CB), (0, 3, 1, 2)),
    }
    neck_nchw = jnp.transpose(neck_flat.reshape(B, H, W, 2 * CN), (0, 3, 1, 2))
    features["neck"] = neck_nchw            # hook sees list of len 1 -> output[0]
    # extract_feat output = fused BEV feature (the neck output)
    return neck_nchw, features


class BEVFusionCLIPWrapperPallas:
    """JAX/Pallas analogue of BEVFusionCLIPWrapper.forward."""

    def __init__(self, params, is_teacher: bool = True):
        self.params = params
        self.is_teacher = is_teacher
        self.features = {}

    def forward(self, batch_inputs: dict, batch_input_metas=None):
        self.features = {}
        if batch_input_metas is None:
            batch_input_metas = []   # mirrors the torch warning path
        # TODO(synk): torch forward hooks, eval()/train() switching and the
        # CUDA-OOM try/except recovery are host-side glue with no kernel
        # equivalent; features are returned directly instead of via hooks.
        output, feats = extract_feat(
            self.params, batch_inputs["points"], batch_inputs["coors"])
        if self.is_teacher:                  # frozen teacher run under no_grad
            output = jax.lax.stop_gradient(output)
            feats = {k: jax.lax.stop_gradient(v) for k, v in feats.items()}
        extracted = feats
        self.features = {}
        return output, extracted


# ---------------------------------------------------------------------------
# Pure-JAX reference (mirrors the torch-semantic pipeline) for validation
# ---------------------------------------------------------------------------
_HIGHEST = jax.lax.Precision.HIGHEST


def _reference_extract_feat(params, points, coors):
    x = points.reshape(B * NV * P, CPTS)
    h = jnp.maximum(jnp.dot(x, params["vfe_w"], precision=_HIGHEST)
                    + params["vfe_b"], 0.0)
    vox = jnp.max(h.reshape(B * NV, P, CVOX), axis=1)

    bidx = jnp.repeat(jnp.arange(B), NV)
    fc = coors.reshape(B * NV, 2)
    bev = jnp.zeros((B, H, W, CVOX), jnp.float32)
    bev = bev.at[bidx, fc[:, 0], fc[:, 1]].set(vox)

    def conv3x3(xx, wf, bb):
        b_, h_, w_, c_ = xx.shape
        xp = jnp.pad(xx, ((0, 0), (1, 1), (1, 1), (0, 0)))
        cols = jnp.concatenate(
            [xp[:, dy:dy + h_, dx:dx + w_, :]
             for dy in range(3) for dx in range(3)], axis=-1
        ).reshape(b_ * h_ * w_, 9 * c_)
        y = jnp.maximum(jnp.dot(cols, wf, precision=_HIGHEST) + bb, 0.0)
        return y.reshape(b_, h_, w_, -1)

    f1 = conv3x3(bev, params["bb1_w"], params["bb1_b"])
    f2 = conv3x3(f1, params["bb2_w"], params["bb2_b"])
    n1 = jnp.maximum(jnp.dot(f1.reshape(-1, CB), params["neck1_w"],
                             precision=_HIGHEST) + params["neck1_b"],
                     0.0).reshape(B, H, W, CN)
    n2 = jnp.maximum(jnp.dot(f2.reshape(-1, CB), params["neck2_w"],
                             precision=_HIGHEST) + params["neck2_b"],
                     0.0).reshape(B, H, W, CN)

    feats = {
        "voxel_encoder": vox,
        "middle_encoder": jnp.transpose(bev, (0, 3, 1, 2)),
        "backbone": jnp.transpose(jnp.concatenate([f1, f2], -1), (0, 3, 1, 2)),
        "neck": jnp.transpose(jnp.concatenate([n1, n2], -1), (0, 3, 1, 2)),
    }
    return feats["neck"], feats


# ---------------------------------------------------------------------------
if __name__ == "__main__":
    key = jax.random.PRNGKey(0)
    k_params, k_pts, k_coords = jax.random.split(key, 3)

    params = init_params(k_params)

    # deterministic synthetic voxelized point cloud
    points = jax.random.normal(k_pts, (B, NV, P, CPTS), jnp.float32)
    coords = []
    for kk in jax.random.split(k_coords, B):
        perm = jax.random.permutation(kk, H * W)[:NV]
        coords.append(jnp.stack([perm // W, perm % W], axis=-1))
    coors = jnp.stack(coords).astype(jnp.int32)          # (B, NV, 2)

    wrapper = BEVFusionCLIPWrapperPallas(params, is_teacher=True)
    output, feats = wrapper.forward({"points": points, "coors": coors},
                                    batch_input_metas=[])

    jax.block_until_ready(output)
    for v in feats.values():
        jax.block_until_ready(v)

    # shape checks (match torch module hook semantics)
    assert output.shape == (B, 2 * CN, H, W)
    assert feats["voxel_encoder"].shape == (B * NV, CVOX)
    assert feats["middle_encoder"].shape == (B, CVOX, H, W)
    assert feats["backbone"].shape == (B, 2 * CB, H, W)
    assert feats["neck"].shape == (B, 2 * CN, H, W)

    # numerical check vs. pure-JAX reference of the same synthetic pipeline
    ref_out, ref_feats = _reference_extract_feat(params, points, coors)

    def _close(a, b):
        return bool(jnp.allclose(a, b, rtol=5e-3, atol=5e-3))

    assert _close(output, ref_out), "neck output mismatch"
    for name in ("voxel_encoder", "middle_encoder", "backbone", "neck"):
        assert _close(feats[name], ref_feats[name]), f"{name} mismatch"

    print("KERNEL_OK")
</pallas_src>

<mosaic_0001>
module attributes {stable_mosaic.version = 11 : i64} {
  func.func @_fused_bev_kernel(%arg0: i32, %arg1: memref<1x256x4xf32, #tpu.memory_space<vmem>>, %arg2: memref<1x1x32xi32, #tpu.memory_space<vmem>>, %arg3: memref<4x16xf32, #tpu.memory_space<vmem>>, %arg4: memref<1x16xf32, #tpu.memory_space<vmem>>, %arg5: memref<324x256xf32, #tpu.memory_space<vmem>>, %arg6: memref<9x16x32xf32, #tpu.memory_space<vmem>>, %arg7: memref<1x32xf32, #tpu.memory_space<vmem>>, %arg8: memref<9x32x32xf32, #tpu.memory_space<vmem>>, %arg9: memref<1x32xf32, #tpu.memory_space<vmem>>, %arg10: memref<32x32xf32, #tpu.memory_space<vmem>>, %arg11: memref<1x32xf32, #tpu.memory_space<vmem>>, %arg12: memref<32x32xf32, #tpu.memory_space<vmem>>, %arg13: memref<1x32xf32, #tpu.memory_space<vmem>>, %arg14: memref<1x32x16xf32, #tpu.memory_space<vmem>>, %arg15: memref<1x256x16xf32, #tpu.memory_space<vmem>>, %arg16: memref<1x256x64xf32, #tpu.memory_space<vmem>>, %arg17: memref<1x256x64xf32, #tpu.memory_space<vmem>>, %arg18: memref<18x18x16xf32, #tpu.memory_space<vmem>>, %arg19: memref<18x18x32xf32, #tpu.memory_space<vmem>>) attributes {dimension_semantics = [#tpu.dimension_semantics<parallel>], iteration_bounds = array<i64: 2>, scalar_prefetch = 0 : i64, scratch_operands = 2 : i64, tpu.core_type = #tpu.core_type<tc>, window_params = [{transform_indices = @transform_0, window_bounds = array<i64: 1, 256, 4>}, {transform_indices = @transform_1, window_bounds = array<i64: 1, 1, 32>}, {pipeline_mode = #tpu.pipeline_mode<synchronous>, transform_indices = @transform_2, window_bounds = array<i64: 4, 16>}, {pipeline_mode = #tpu.pipeline_mode<synchronous>, transform_indices = @transform_3, window_bounds = array<i64: 1, 16>}, {pipeline_mode = #tpu.pipeline_mode<synchronous>, transform_indices = @transform_4, window_bounds = array<i64: 324, 256>}, {pipeline_mode = #tpu.pipeline_mode<synchronous>, transform_indices = @transform_5, window_bounds = array<i64: 9, 16, 32>}, {pipeline_mode = #tpu.pipeline_mode<synchronous>, transform_indices = @transform_6, window_bounds = array<i64: 1, 32>}, {pipeline_mode = #tpu.pipeline_mode<synchronous>, transform_indices = @transform_7, window_bounds = array<i64: 9, 32, 32>}, {pipeline_mode = #tpu.pipeline_mode<synchronous>, transform_indices = @transform_8, window_bounds = array<i64: 1, 32>}, {pipeline_mode = #tpu.pipeline_mode<synchronous>, transform_indices = @transform_9, window_bounds = array<i64: 32, 32>}, {pipeline_mode = #tpu.pipeline_mode<synchronous>, transform_indices = @transform_10, window_bounds = array<i64: 1, 32>}, {pipeline_mode = #tpu.pipeline_mode<synchronous>, transform_indices = @transform_11, window_bounds = array<i64: 32, 32>}, {pipeline_mode = #tpu.pipeline_mode<synchronous>, transform_indices = @transform_12, window_bounds = array<i64: 1, 32>}, {transform_indices = @transform_13, window_bounds = array<i64: 1, 32, 16>}, {transform_indices = @transform_14, window_bounds = array<i64: 1, 256, 16>}, {transform_indices = @transform_15, window_bounds = array<i64: 1, 256, 64>}, {transform_indices = @transform_16, window_bounds = array<i64: 1, 256, 64>}]} {
    %c0 = arith.constant 0 : index
    %c0_0 = arith.constant 0 : index
    %c0_1 = arith.constant 0 : index
    %0 = vector.load %arg1[%c0, %c0_0, %c0_1] : memref<1x256x4xf32, #tpu.memory_space<vmem>>, vector<1x256x4xf32>
    %1 = vector.shape_cast %0 : vector<1x256x4xf32> to vector<256x4xf32>
    %c0_2 = arith.constant 0 : index
    %c0_3 = arith.constant 0 : index
    %2 = vector.load %arg3[%c0_2, %c0_3] : memref<4x16xf32, #tpu.memory_space<vmem>>, vector<4x16xf32>
    %cst = arith.constant dense<0.000000e+00> : vector<256x16xf32>
    %3 = tpu.matmul %1, %2, %cst {dimension_numbers = #tpu.dot_dimension_numbers<[1], [0], [0], [1], [0, 0, 1, 1], [], []>} : vector<256x4xf32>, vector<4x16xf32>, vector<256x16xf32> -> vector<256x16xf32>
    %c0_4 = arith.constant 0 : index
    %c0_5 = arith.constant 0 : index
    %4 = vector.load %arg4[%c0_4, %c0_5] : memref<1x16xf32, #tpu.memory_space<vmem>>, vector<1x16xf32>
    %5 = vector.broadcast %4 : vector<1x16xf32> to vector<256x16xf32>
    %6 = arith.addf %3, %5 : vector<256x16xf32>
    %cst_6 = arith.constant 0.000000e+00 : f32
    %7 = vector.broadcast %cst_6 : f32 to vector<256x16xf32>
    %8 = arith.maximumf %6, %7 : vector<256x16xf32>
    %9 = vector.extract_strided_slice %8 {offsets = [0, 0], sizes = [32, 16], strides = [1, 1]} : vector<256x16xf32> to vector<32x16xf32>
    %10 = vector.extract_strided_slice %8 {offsets = [32, 0], sizes = [32, 16], strides = [1, 1]} : vector<256x16xf32> to vector<32x16xf32>
    %11 = arith.maximumf %9, %10 : vector<32x16xf32>
    %12 = vector.extract_strided_slice %8 {offsets = [64, 0], sizes = [32, 16], strides = [1, 1]} : vector<256x16xf32> to vector<32x16xf32>
    %13 = arith.maximumf %11, %12 : vector<32x16xf32>
    %14 = vector.extract_strided_slice %8 {offsets = [96, 0], sizes = [32, 16], strides = [1, 1]} : vector<256x16xf32> to vector<32x16xf32>
    %15 = arith.maximumf %13, %14 : vector<32x16xf32>
    %16 = vector.extract_strided_slice %8 {offsets = [128, 0], sizes = [32, 16], strides = [1, 1]} : vector<256x16xf32> to vector<32x16xf32>
    %17 = arith.maximumf %15, %16 : vector<32x16xf32>
    %18 = vector.extract_strided_slice %8 {offsets = [160, 0], sizes = [32, 16], strides = [1, 1]} : vector<256x16xf32> to vector<32x16xf32>
    %19 = arith.maximumf %17, %18 : vector<32x16xf32>
    %20 = vector.extract_strided_slice %8 {offsets = [192, 0], sizes = [32, 16], strides = [1, 1]} : vector<256x16xf32> to vector<32x16xf32>
    %21 = arith.maximumf %19, %20 : vector<32x16xf32>
    %22 = vector.extract_strided_slice %8 {offsets = [224, 0], sizes = [32, 16], strides = [1, 1]} : vector<256x16xf32> to vector<32x16xf32>
    %23 = arith.maximumf %21, %22 : vector<32x16xf32>
    %c0_7 = arith.constant 0 : index
    %c0_8 = arith.constant 0 : index
    %c0_9 = arith.constant 0 : index
    %24 = vector.load %arg14[%c0_7, %c0_8, %c0_9] : memref<1x32x16xf32, #tpu.memory_space<vmem>>, vector<1x32x16xf32>
    %25 = vector.shape_cast %24 : vector<1x32x16xf32> to vector<32x16xf32>
    %26 = vector.shape_cast %23 : vector<32x16xf32> to vector<1x32x16xf32>
    tpu.vector_store %arg14[%c0_7, %c0_8, %c0_9], %26 {strides = array<i32>} : memref<1x32x16xf32, #tpu.memory_space<vmem>>, vector<1x32x16xf32>,
    %27 = tpu.iota {dimensions = array<i32: 0>} : vector<324x32xi32>
    %c0_10 = arith.constant 0 : index
    %c0_11 = arith.constant 0 : index
    %c0_12 = arith.constant 0 : index
    %28 = vector.load %arg2[%c0_10, %c0_11, %c0_12] : memref<1x1x32xi32, #tpu.memory_space<vmem>>, vector<1x1x32xi32>
    %29 = vector.shape_cast %28 : vector<1x1x32xi32> to vector<1x32xi32>
    %30 = vector.broadcast %29 : vector<1x32xi32> to vector<324x32xi32>
    %31 = arith.cmpi eq, %27, %30 : vector<324x32xi32>
    %cst_13 = arith.constant 1.000000e+00 : f32
    %cst_14 = arith.constant 0.000000e+00 : f32
    %32 = vector.broadcast %cst_13 : f32 to vector<324x32xf32>
    %33 = vector.broadcast %cst_14 : f32 to vector<324x32xf32>
    %34 = arith.select %31, %32, %33 : vector<324x32xi1>, vector<324x32xf32>
    %cst_15 = arith.constant dense<0.000000e+00> : vector<324x16xf32>
    %35 = tpu.matmul %34, %23, %cst_15 {dimension_numbers = #tpu.dot_dimension_numbers<[1], [0], [0], [1], [0, 0, 1, 1], [], []>} : vector<324x32xf32>, vector<32x16xf32>, vector<324x16xf32> -> vector<324x16xf32>
    %36 = vector.extract_strided_slice %35 {offsets = [0, 0], sizes = [18, 16], strides = [1, 1]} : vector<324x16xf32> to vector<18x16xf32>
    %c0_16 = arith.constant 0 : index
    %c0_17 = arith.constant 0 : index
    %c0_18 = arith.constant 0 : index
    %37 = vector.load %arg18[%c0_16, %c0_17, %c0_18] : memref<18x18x16xf32, #tpu.memory_space<vmem>>, vector<1x18x16xf32>
    %38 = vector.shape_cast %37 : vector<1x18x16xf32> to vector<18x16xf32>
    %39 = vector.shape_cast %36 : vector<18x16xf32> to vector<1x18x16xf32>
    tpu.vector_store %arg18[%c0_16, %c0_17, %c0_18], %39 {strides = array<i32>} : memref<18x18x16xf32, #tpu.memory_space<vmem>>, vector<1x18x16xf32>,
    %40 = vector.extract_strided_slice %35 {offsets = [18, 0], sizes = [18, 16], strides = [1, 1]} : vector<324x16xf32> to vector<18x16xf32>
    %c1 = arith.constant 1 : index
    %c0_19 = arith.constant 0 : index
    %c0_20 = arith.constant 0 : index
    %41 = vector.load %arg18[%c1, %c0_19, %c0_20] : memref<18x18x16xf32, #tpu.memory_space<vmem>>, vector<1x18x16xf32>
    %42 = vector.shape_cast %41 : vector<1x18x16xf32> to vector<18x16xf32>
    %43 = vector.shape_cast %40 : vector<18x16xf32> to vector<1x18x16xf32>
    tpu.vector_store %arg18[%c1, %c0_19, %c0_20], %43 {strides = array<i32>} : memref<18x18x16xf32, #tpu.memory_space<vmem>>, vector<1x18x16xf32>,
    %44 = vector.extract_strided_slice %35 {offsets = [36, 0], sizes = [18, 16], strides = [1, 1]} : vector<324x16xf32> to vector<18x16xf32>
    %c2 = arith.constant 2 : index
    %c0_21 = arith.constant 0 : index
    %c0_22 = arith.constant 0 : index
    %45 = vector.load %arg18[%c2, %c0_21, %c0_22] : memref<18x18x16xf32, #tpu.memory_space<vmem>>, vector<1x18x16xf32>
    %46 = vector.shape_cast %45 : vector<1x18x16xf32> to vector<18x16xf32>
    %47 = vector.shape_cast %44 : vector<18x16xf32> to vector<1x18x16xf32>
    tpu.vector_store %arg18[%c2, %c0_21, %c0_22], %47 {strides = array<i32>} : memref<18x18x16xf32, #tpu.memory_space<vmem>>, vector<1x18x16xf32>,
    %48 = vector.extract_strided_slice %35 {offsets = [54, 0], sizes = [18, 16], strides = [1, 1]} : vector<324x16xf32> to vector<18x16xf32>
    %c3 = arith.constant 3 : index
    %c0_23 = arith.constant 0 : index
    %c0_24 = arith.constant 0 : index
    %49 = vector.load %arg18[%c3, %c0_23, %c0_24] : memref<18x18x16xf32, #tpu.memory_space<vmem>>, vector<1x18x16xf32>
    %50 = vector.shape_cast %49 : vector<1x18x16xf32> to vector<18x16xf32>
    %51 = vector.shape_cast %48 : vector<18x16xf32> to vector<1x18x16xf32>
    tpu.vector_store %arg18[%c3, %c0_23, %c0_24], %51 {strides = array<i32>} : memref<18x18x16xf32, #tpu.memory_space<vmem>>, vector<1x18x16xf32>,
    %52 = vector.extract_strided_slice %35 {offsets = [72, 0], sizes = [18, 16], strides = [1, 1]} : vector<324x16xf32> to vector<18x16xf32>
    %c4 = arith.constant 4 : index
    %c0_25 = arith.constant 0 : index
    %c0_26 = arith.constant 0 : index
    %53 = vector.load %arg18[%c4, %c0_25, %c0_26] : memref<18x18x16xf32, #tpu.memory_space<vmem>>, vector<1x18x16xf32>
    %54 = vector.shape_cast %53 : vector<1x18x16xf32> to vector<18x16xf32>
    %55 = vector.shape_cast %52 : vector<18x16xf32> to vector<1x18x16xf32>
    tpu.vector_store %arg18[%c4, %c0_25, %c0_26], %55 {strides = array<i32>} : memref<18x18x16xf32, #tpu.memory_space<vmem>>, vector<1x18x16xf32>,
    %56 = vector.extract_strided_slice %35 {offsets = [90, 0], sizes = [18, 16], strides = [1, 1]} : vector<324x16xf32> to vector<18x16xf32>
    %c5 = arith.constant 5 : index
    %c0_27 = arith.constant 0 : index
    %c0_28 = arith.constant 0 : index
    %57 = vector.load %arg18[%c5, %c0_27, %c0_28] : memref<18x18x16xf32, #tpu.memory_space<vmem>>, vector<1x18x16xf32>
    %58 = vector.shape_cast %57 : vector<1x18x16xf32> to vector<18x16xf32>
    %59 = vector.shape_cast %56 : vector<18x16xf32> to vector<1x18x16xf32>
    tpu.vector_store %arg18[%c5, %c0_27, %c0_28], %59 {strides = array<i32>} : memref<18x18x16xf32, #tpu.memory_space<vmem>>, vector<1x18x16xf32>,
    %60 = vector.extract_strided_slice %35 {offsets = [108, 0], sizes = [18, 16], strides = [1, 1]} : vector<324x16xf32> to vector<18x16xf32>
    %c6 = arith.constant 6 : index
    %c0_29 = arith.constant 0 : index
    %c0_30 = arith.constant 0 : index
    %61 = vector.load %arg18[%c6, %c0_29, %c0_30] : memref<18x18x16xf32, #tpu.memory_space<vmem>>, vector<1x18x16xf32>
    %62 = vector.shape_cast %61 : vector<1x18x16xf32> to vector<18x16xf32>
    %63 = vector.shape_cast %60 : vector<18x16xf32> to vector<1x18x16xf32>
    tpu.vector_store %arg18[%c6, %c0_29, %c0_30], %63 {strides = array<i32>} : memref<18x18x16xf32, #tpu.memory_space<vmem>>, vector<1x18x16xf32>,
    %64 = vector.extract_strided_slice %35 {offsets = [126, 0], sizes = [18, 16], strides = [1, 1]} : vector<324x16xf32> to vector<18x16xf32>
    %c7 = arith.constant 7 : index
    %c0_31 = arith.constant 0 : index
    %c0_32 = arith.constant 0 : index
    %65 = vector.load %arg18[%c7, %c0_31, %c0_32] : memref<18x18x16xf32, #tpu.memory_space<vmem>>, vector<1x18x16xf32>
    %66 = vector.shape_cast %65 : vector<1x18x16xf32> to vector<18x16xf32>
    %67 = vector.shape_cast %64 : vector<18x16xf32> to vector<1x18x16xf32>
    tpu.vector_store %arg18[%c7, %c0_31, %c0_32], %67 {strides = array<i32>} : memref<18x18x16xf32, #tpu.memory_space<vmem>>, vector<1x18x16xf32>,
    %68 = vector.extract_strided_slice %35 {offsets = [144, 0], sizes = [18, 16], strides = [1, 1]} : vector<324x16xf32> to vector<18x16xf32>
    %c8 = arith.constant 8 : index
    %c0_33 = arith.constant 0 : index
    %c0_34 = arith.constant 0 : index
    %69 = vector.load %arg18[%c8, %c0_33, %c0_34] : memref<18x18x16xf32, #tpu.memory_space<vmem>>, vector<1x18x16xf32>
    %70 = vector.shape_cast %69 : vector<1x18x16xf32> to vector<18x16xf32>
    %71 = vector.shape_cast %68 : vector<18x16xf32> to vector<1x18x16xf32>
    tpu.vector_store %arg18[%c8, %c0_33, %c0_34], %71 {strides = array<i32>} : memref<18x18x16xf32, #tpu.memory_space<vmem>>, vector<1x18x16xf32>,
    %72 = vector.extract_strided_slice %35 {offsets = [162, 0], sizes = [18, 16], strides = [1, 1]} : vector<324x16xf32> to vector<18x16xf32>
    %c9 = arith.constant 9 : index
    %c0_35 = arith.constant 0 : index
    %c0_36 = arith.constant 0 : index
    %73 = vector.load %arg18[%c9, %c0_35, %c0_36] : memref<18x18x16xf32, #tpu.memory_space<vmem>>, vector<1x18x16xf32>
    %74 = vector.shape_cast %73 : vector<1x18x16xf32> to vector<18x16xf32>
    %75 = vector.shape_cast %72 : vector<18x16xf32> to vector<1x18x16xf32>
    tpu.vector_store %arg18[%c9, %c0_35, %c0_36], %75 {strides = array<i32>} : memref<18x18x16xf32, #tpu.memory_space<vmem>>, vector<1x18x16xf32>,
    %76 = vector.extract_strided_slice %35 {offsets = [180, 0], sizes = [18, 16], strides = [1, 1]} : vector<324x16xf32> to vector<18x16xf32>
    %c10 = arith.constant 10 : index
    %c0_37 = arith.constant 0 : index
    %c0_38 = arith.constant 0 : index
    %77 = vector.load %arg18[%c10, %c0_37, %c0_38] : memref<18x18x16xf32, #tpu.memory_space<vmem>>, vector<1x18x16xf32>
    %78 = vector.shape_cast %77 : vector<1x18x16xf32> to vector<18x16xf32>
    %79 = vector.shape_cast %76 : vector<18x16xf32> to vector<1x18x16xf32>
    tpu.vector_store %arg18[%c10, %c0_37, %c0_38], %79 {strides = array<i32>} : memref<18x18x16xf32, #tpu.memory_space<vmem>>, vector<1x18x16xf32>,
    %80 = vector.extract_strided_slice %35 {offsets = [198, 0], sizes = [18, 16], strides = [1, 1]} : vector<324x16xf32> to vector<18x16xf32>
    %c11 = arith.constant 11 : index
    %c0_39 = arith.constant 0 : index
    %c0_40 = arith.constant 0 : index
    %81 = vector.load %arg18[%c11, %c0_39, %c0_40] : memref<18x18x16xf32, #tpu.memory_space<vmem>>, vector<1x18x16xf32>
    %82 = vector.shape_cast %81 : vector<1x18x16xf32> to vector<18x16xf32>
    %83 = vector.shape_cast %80 : vector<18x16xf32> to vector<1x18x16xf32>
    tpu.vector_store %arg18[%c11, %c0_39, %c0_40], %83 {strides = array<i32>} : memref<18x18x16xf32, #tpu.memory_space<vmem>>, vector<1x18x16xf32>,
    %84 = vector.extract_strided_slice %35 {offsets = [216, 0], sizes = [18, 16], strides = [1, 1]} : vector<324x16xf32> to vector<18x16xf32>
    %c12 = arith.constant 12 : index
    %c0_41 = arith.constant 0 : index
    %c0_42 = arith.constant 0 : index
    %85 = vector.load %arg18[%c12, %c0_41, %c0_42] : memref<18x18x16xf32, #tpu.memory_space<vmem>>, vector<1x18x16xf32>
    %86 = vector.shape_cast %85 : vector<1x18x16xf32> to vector<18x16xf32>
    %87 = vector.shape_cast %84 : vector<18x16xf32> to vector<1x18x16xf32>
    tpu.vector_store %arg18[%c12, %c0_41, %c0_42], %87 {strides = array<i32>} : memref<18x18x16xf32, #tpu.memory_space<vmem>>, vector<1x18x16xf32>,
    %88 = vector.extract_strided_slice %35 {offsets = [234, 0], sizes = [18, 16], strides = [1, 1]} : vector<324x16xf32> to vector<18x16xf32>
    %c13 = arith.constant 13 : index
    %c0_43 = arith.constant 0 : index
    %c0_44 = arith.constant 0 : index
    %89 = vector.load %arg18[%c13, %c0_43, %c0_44] : memref<18x18x16xf32, #tpu.memory_space<vmem>>, vector<1x18x16xf32>
    %90 = vector.shape_cast %89 : vector<1x18x16xf32> to vector<18x16xf32>
    %91 = vector.shape_cast %88 : vector<18x16xf32> to vector<1x18x16xf32>
    tpu.vector_store %arg18[%c13, %c0_43, %c0_44], %91 {strides = array<i32>} : memref<18x18x16xf32, #tpu.memory_space<vmem>>, vector<1x18x16xf32>,
    %92 = vector.extract_strided_slice %35 {offsets = [252, 0], sizes = [18, 16], strides = [1, 1]} : vector<324x16xf32> to vector<18x16xf32>
    %c14 = arith.constant 14 : index
    %c0_45 = arith.constant 0 : index
    %c0_46 = arith.constant 0 : index
    %93 = vector.load %arg18[%c14, %c0_45, %c0_46] : memref<18x18x16xf32, #tpu.memory_space<vmem>>, vector<1x18x16xf32>
    %94 = vector.shape_cast %93 : vector<1x18x16xf32> to vector<18x16xf32>
    %95 = vector.shape_cast %92 : vector<18x16xf32> to vector<1x18x16xf32>
    tpu.vector_store %arg18[%c14, %c0_45, %c0_46], %95 {strides = array<i32>} : memref<18x18x16xf32, #tpu.memory_space<vmem>>, vector<1x18x16xf32>,
    %96 = vector.extract_strided_slice %35 {offsets = [270, 0], sizes = [18, 16], strides = [1, 1]} : vector<324x16xf32> to vector<18x16xf32>
    %c15 = arith.constant 15 : index
    %c0_47 = arith.constant 0 : index
    %c0_48 = arith.constant 0 : index
    %97 = vector.load %arg18[%c15, %c0_47, %c0_48] : memref<18x18x16xf32, #tpu.memory_space<vmem>>, vector<1x18x16xf32>
    %98 = vector.shape_cast %97 : vector<1x18x16xf32> to vector<18x16xf32>
    %99 = vector.shape_cast %96 : vector<18x16xf32> to vector<1x18x16xf32>
    tpu.vector_store %arg18[%c15, %c0_47, %c0_48], %99 {strides = array<i32>} : memref<18x18x16xf32, #tpu.memory_space<vmem>>, vector<1x18x16xf32>,
    %100 = vector.extract_strided_slice %35 {offsets = [288, 0], sizes = [18, 16], strides = [1, 1]} : vector<324x16xf32> to vector<18x16xf32>
    %c16 = arith.constant 16 : index
    %c0_49 = arith.constant 0 : index
    %c0_50 = arith.constant 0 : index
    %101 = vector.load %arg18[%c16, %c0_49, %c0_50] : memref<18x18x16xf32, #tpu.memory_space<vmem>>, vector<1x18x16xf32>
    %102 = vector.shape_cast %101 : vector<1x18x16xf32> to vector<18x16xf32>
    %103 = vector.shape_cast %100 : vector<18x16xf32> to vector<1x18x16xf32>
    tpu.vector_store %arg18[%c16, %c0_49, %c0_50], %103 {strides = array<i32>} : memref<18x18x16xf32, #tpu.memory_space<vmem>>, vector<1x18x16xf32>,
    %104 = vector.extract_strided_slice %35 {offsets = [306, 0], sizes = [18, 16], strides = [1, 1]} : vector<324x16xf32> to vector<18x16xf32>
    %c17 = arith.constant 17 : index
    %c0_51 = arith.constant 0 : index
    %c0_52 = arith.constant 0 : index
    %105 = vector.load %arg18[%c17, %c0_51, %c0_52] : memref<18x18x16xf32, #tpu.memory_space<vmem>>, vector<1x18x16xf32>
    %106 = vector.shape_cast %105 : vector<1x18x16xf32> to vector<18x16xf32>
    %107 = vector.shape_cast %104 : vector<18x16xf32> to vector<1x18x16xf32>
    tpu.vector_store %arg18[%c17, %c0_51, %c0_52], %107 {strides = array<i32>} : memref<18x18x16xf32, #tpu.memory_space<vmem>>, vector<1x18x16xf32>,
    %c1_53 = arith.constant 1 : index
    %c1_54 = arith.constant 1 : index
    %c0_55 = arith.constant 0 : index
    %108 = vector.load %arg18[%c1_53, %c1_54, %c0_55] : memref<18x18x16xf32, #tpu.memory_space<vmem>>, vector<16x16x16xf32>
    %109 = vector.shape_cast %108 : vector<16x16x16xf32> to vector<256x16xf32>
    %c0_56 = arith.constant 0 : index
    %c0_57 = arith.constant 0 : index
    %c0_58 = arith.constant 0 : index
    %110 = vector.load %arg15[%c0_56, %c0_57, %c0_58] : memref<1x256x16xf32, #tpu.memory_space<vmem>>, vector<1x256x16xf32>
    %111 = vector.shape_cast %110 : vector<1x256x16xf32> to vector<256x16xf32>
    %112 = vector.shape_cast %109 : vector<256x16xf32> to vector<1x256x16xf32>
    tpu.vector_store %arg15[%c0_56, %c0_57, %c0_58], %112 {strides = array<i32>} : memref<1x256x16xf32, #tpu.memory_space<vmem>>, vector<1x256x16xf32>,
    %cst_59 = arith.constant 0.000000e+00 : f32
    %113 = vector.broadcast %cst_59 : f32 to vector<256x32xf32>
    %c0_60 = arith.constant 0 : index
    %c0_61 = arith.constant 0 : index
    %c0_62 = arith.constant 0 : index
    %114 = vector.load %arg18[%c0_60, %c0_61, %c0_62] : memref<18x18x16xf32, #tpu.memory_space<vmem>>, vector<16x16x16xf32>
    %115 = vector.shape_cast %114 : vector<16x16x16xf32> to vector<256x16xf32>
    %c0_63 = arith.constant 0 : index
    %c0_64 = arith.constant 0 : index
    %c0_65 = arith.constant 0 : index
    %116 = vector.load %arg6[%c0_63, %c0_64, %c0_65] : memref<9x16x32xf32, #tpu.memory_space<vmem>>, vector<1x16x32xf32>
    %117 = vector.shape_cast %116 : vector<1x16x32xf32> to vector<16x32xf32>
    %cst_66 = arith.constant dense<0.000000e+00> : vector<256x32xf32>
    %118 = tpu.matmul %115, %117, %cst_66 {dimension_numbers = #tpu.dot_dimension_numbers<[1], [0], [0], [1], [0, 0, 1, 1], [], []>} : vector<256x16xf32>, vector<16x32xf32>, vector<256x32xf32> -> vector<256x32xf32>
    %119 = arith.addf %113, %118 : vector<256x32xf32>
    %c0_67 = arith.constant 0 : index
    %c1_68 = arith.constant 1 : index
    %c0_69 = arith.constant 0 : index
    %120 = vector.load %arg18[%c0_67, %c1_68, %c0_69] : memref<18x18x16xf32, #tpu.memory_space<vmem>>, vector<16x16x16xf32>
    %121 = vector.shape_cast %120 : vector<16x16x16xf32> to vector<256x16xf32>
    %c1_70 = arith.constant 1 : index
    %c0_71 = arith.constant 0 : index
    %c0_72 = arith.constant 0 : index
    %122 = vector.load %arg6[%c1_70, %c0_71, %c0_72] : memref<9x16x32xf32, #tpu.memory_space<vmem>>, vector<1x16x32xf32>
    %123 = vector.shape_cast %122 : vector<1x16x32xf32> to vector<16x32xf32>
    %cst_73 = arith.constant dense<0.000000e+00> : vector<256x32xf32>
    %124 = tpu.matmul %121, %123, %cst_73 {dimension_numbers = #tpu.dot_dimension_numbers<[1], [0], [0], [1], [0, 0, 1, 1], [], []>} : vector<256x16xf32>, vector<16x32xf32>, vector<256x32xf32> -> vector<256x32xf32>
    %125 = arith.addf %119, %124 : vector<256x32xf32>
    %c0_74 = arith.constant 0 : index
    %c2_75 = arith.constant 2 : index
    %c0_76 = arith.constant 0 : index
    %126 = vector.load %arg18[%c0_74, %c2_75, %c0_76] : memref<18x18x16xf32, #tpu.memory_space<vmem>>, vector<16x16x16xf32>
    %127 = vector.shape_cast %126 : vector<16x16x16xf32> to vector<256x16xf32>
    %c2_77 = arith.constant 2 : index
    %c0_78 = arith.constant 0 : index
    %c0_79 = arith.constant 0 : index
    %128 = vector.load %arg6[%c2_77, %c0_78, %c0_79] : memref<9x16x32xf32, #tpu.memory_space<vmem>>, vector<1x16x32xf32>
    %129 = vector.shape_cast %128 : vector<1x16x32xf32> to vector<16x32xf32>
    %cst_80 = arith.constant dense<0.000000e+00> : vector<256x32xf32>
    %130 = tpu.matmul %127, %129, %cst_80 {dimension_numbers = #tpu.dot_dimension_numbers<[1], [0], [0], [1], [0, 0, 1, 1], [], []>} : vector<256x16xf32>, vector<16x32xf32>, vector<256x32xf32> -> vector<256x32xf32>
    %131 = arith.addf %125, %130 : vector<256x32xf32>
    %c1_81 = arith.constant 1 : index
    %c0_82 = arith.constant 0 : index
    %c0_83 = arith.constant 0 : index
    %132 = vector.load %arg18[%c1_81, %c0_82, %c0_83] : memref<18x18x16xf32, #tpu.memory_space<vmem>>, vector<16x16x16xf32>
    %133 = vector.shape_cast %132 : vector<16x16x16xf32> to vector<256x16xf32>
    %c3_84 = arith.constant 3 : index
    %c0_85 = arith.constant 0 : index
    %c0_86 = arith.constant 0 : index
    %134 = vector.load %arg6[%c3_84, %c0_85, %c0_86] : memref<9x16x32xf32, #tpu.memory_space<vmem>>, vector<1x16x32xf32>
    %135 = vector.shape_cast %134 : vector<1x16x32xf32> to vector<16x32xf32>
    %cst_87 = arith.constant dense<0.000000e+00> : vector<256x32xf32>
    %136 = tpu.matmul %133, %135, %cst_87 {dimension_numbers = #tpu.dot_dimension_numbers<[1], [0], [0], [1], [0, 0, 1, 1], [], []>} : vector<256x16xf32>, vector<16x32xf32>, vector<256x32xf32> -> vector<256x32xf32>
    %137 = arith.addf %131, %136 : vector<256x32xf32>
    %c1_88 = arith.constant 1 : index
    %c1_89 = arith.constant 1 : index
    %c0_90 = arith.constant 0 : index
    %138 = vector.load %arg18[%c1_88, %c1_89, %c0_90] : memref<18x18x16xf32, #tpu.memory_space<vmem>>, vector<16x16x16xf32>
    %139 = vector.shape_cast %138 : vector<16x16x16xf32> to vector<256x16xf32>
    %c4_91 = arith.constant 4 : index
    %c0_92 = arith.constant 0 : index
    %c0_93 = arith.constant 0 : index
    %140 = vector.load %arg6[%c4_91, %c0_92, %c0_93] : memref<9x16x32xf32, #tpu.memory_space<vmem>>, vector<1x16x32xf32>
    %141 = vector.shape_cast %140 : vector<1x16x32xf32> to vector<16x32xf32>
    %cst_94 = arith.constant dense<0.000000e+00> : vector<256x32xf32>
    %142 = tpu.matmul %139, %141, %cst_94 {dimension_numbers = #tpu.dot_dimension_numbers<[1], [0], [0], [1], [0, 0, 1, 1], [], []>} : vector<256x16xf32>, vector<16x32xf32>, vector<256x32xf32> -> vector<256x32xf32>
    %143 = arith.addf %137, %142 : vector<256x32xf32>
    %c1_95 = arith.constant 1 : index
    %c2_96 = arith.constant 2 : index
    %c0_97 = arith.constant 0 : index
    %144 = vector.load %arg18[%c1_95, %c2_96, %c0_97] : memref<18x18x16xf32, #tpu.memory_space<vmem>>, vector<16x16x16xf32>
    %145 = vector.shape_cast %144 : vector<16x16x16xf32> to vector<256x16xf32>
    %c5_98 = arith.constant 5 : index
    %c0_99 = arith.constant 0 : index
    %c0_100 = arith.constant 0 : index
    %146 = vector.load %arg6[%c5_98, %c0_99, %c0_100] : memref<9x16x32xf32, #tpu.memory_space<vmem>>, vector<1x16x32xf32>
    %147 = vector.shape_cast %146 : vector<1x16x32xf32> to vector<16x32xf32>
    %cst_101 = arith.constant dense<0.000000e+00> : vector<256x32xf32>
    %148 = tpu.matmul %145, %147, %cst_101 {dimension_numbers = #tpu.dot_dimension_numbers<[1], [0], [0], [1], [0, 0, 1, 1], [], []>} : vector<256x16xf32>, vector<16x32xf32>, vector<256x32xf32> -> vector<256x32xf32>
    %149 = arith.addf %143, %148 : vector<256x32xf32>
    %c2_102 = arith.constant 2 : index
    %c0_103 = arith.constant 0 : index
    %c0_104 = arith.constant 0 : index
    %150 = vector.load %arg18[%c2_102, %c0_103, %c0_104] : memref<18x18x16xf32, #tpu.memory_space<vmem>>, vector<16x16x16xf32>
    %151 = vector.shape_cast %150 : vector<16x16x16xf32> to vector<256x16xf32>
    %c6_105 = arith.constant 6 : index
    %c0_106 = arith.constant 0 : index
    %c0_107 = arith.constant 0 : index
    %152 = vector.load %arg6[%c6_105, %c0_106, %c0_107] : memref<9x16x32xf32, #tpu.memory_space<vmem>>, vector<1x16x32xf32>
    %153 = vector.shape_cast %152 : vector<1x16x32xf32> to vector<16x32xf32>
    %cst_108 = arith.constant dense<0.000000e+00> : vector<256x32xf32>
    %154 = tpu.matmul %151, %153, %cst_108 {dimension_numbers = #tpu.dot_dimension_numbers<[1], [0], [0], [1], [0, 0, 1, 1], [], []>} : vector<256x16xf32>, vector<16x32xf32>, vector<256x32xf32> -> vector<256x32xf32>
    %155 = arith.addf %149, %154 : vector<256x32xf32>
    %c2_109 = arith.constant 2 : index
    %c1_110 = arith.constant 1 : index
    %c0_111 = arith.constant 0 : index
    %156 = vector.load %arg18[%c2_109, %c1_110, %c0_111] : memref<18x18x16xf32, #tpu.memory_space<vmem>>, vector<16x16x16xf32>
    %157 = vector.shape_cast %156 : vector<16x16x16xf32> to vector<256x16xf32>
    %c7_112 = arith.constant 7 : index
    %c0_113 = arith.constant 0 : index
    %c0_114 = arith.constant 0 : index
    %158 = vector.load %arg6[%c7_112, %c0_113, %c0_114] : memref<9x16x32xf32, #tpu.memory_space<vmem>>, vector<1x16x32xf32>
    %159 = vector.shape_cast %158 : vector<1x16x32xf32> to vector<16x32xf32>
    %cst_115 = arith.constant dense<0.000000e+00> : vector<256x32xf32>
    %160 = tpu.matmul %157, %159, %cst_115 {dimension_numbers = #tpu.dot_dimension_numbers<[1], [0], [0], [1], [0, 0, 1, 1], [], []>} : vector<256x16xf32>, vector<16x32xf32>, vector<256x32xf32> -> vector<256x32xf32>
    %161 = arith.addf %155, %160 : vector<256x32xf32>
    %c2_116 = arith.constant 2 : index
    %c2_117 = arith.constant 2 : index
    %c0_118 = arith.constant 0 : index
    %162 = vector.load %arg18[%c2_116, %c2_117, %c0_118] : memref<18x18x16xf32, #tpu.memory_space<vmem>>, vector<16x16x16xf32>
    %163 = vector.shape_cast %162 : vector<16x16x16xf32> to vector<256x16xf32>
    %c8_119 = arith.constant 8 : index
    %c0_120 = arith.constant 0 : index
    %c0_121 = arith.constant 0 : index
    %164 = vector.load %arg6[%c8_119, %c0_120, %c0_121] : memref<9x16x32xf32, #tpu.memory_space<vmem>>, vector<1x16x32xf32>
    %165 = vector.shape_cast %164 : vector<1x16x32xf32> to vector<16x32xf32>
    %cst_122 = arith.constant dense<0.000000e+00> : vector<256x32xf32>
    %166 = tpu.matmul %163, %165, %cst_122 {dimension_numbers = #tpu.dot_dimension_numbers<[1], [0], [0], [1], [0, 0, 1, 1], [], []>} : vector<256x16xf32>, vector<16x32xf32>, vector<256x32xf32> -> vector<256x32xf32>
    %167 = arith.addf %161, %166 : vector<256x32xf32>
    %c0_123 = arith.constant 0 : index
    %c0_124 = arith.constant 0 : index
    %168 = vector.load %arg7[%c0_123, %c0_124] : memref<1x32xf32, #tpu.memory_space<vmem>>, vector<1x32xf32>
    %169 = vector.broadcast %168 : vector<1x32xf32> to vector<256x32xf32>
    %170 = arith.addf %167, %169 : vector<256x32xf32>
    %cst_125 = arith.constant 0.000000e+00 : f32
    %171 = vector.broadcast %cst_125 : f32 to vector<256x32xf32>
    %172 = arith.maximumf %170, %171 : vector<256x32xf32>
    %c0_126 = arith.constant 0 : index
    %c0_127 = arith.constant 0 : index
    %173 = vector.load %arg5[%c0_126, %c0_127] : memref<324x256xf32, #tpu.memory_space<vmem>>, vector<324x256xf32>
    %cst_128 = arith.constant dense<0.000000e+00> : vector<324x32xf32>
    %174 = tpu.matmul %173, %172, %cst_128 {dimension_numbers = #tpu.dot_dimension_numbers<[1], [0], [0], [1], [0, 0, 1, 1], [], []>} : vector<324x256xf32>, vector<256x32xf32>, vector<324x32xf32> -> vector<324x32xf32>
    %175 = vector.extract_strided_slice %174 {offsets = [0, 0], sizes = [18, 32], strides = [1, 1]} : vector<324x32xf32> to vector<18x32xf32>
    %c0_129 = arith.constant 0 : index
    %c0_130 = arith.constant 0 : index
    %c0_131 = arith.constant 0 : index
    %176 = vector.load %arg19[%c0_129, %c0_130, %c0_131] : memref<18x18x32xf32, #tpu.memory_space<vmem>>, vector<1x18x32xf32>
    %177 = vector.shape_cast %176 : vector<1x18x32xf32> to vector<18x32xf32>
    %178 = vector.shape_cast %175 : vector<18x32xf32> to vector<1x18x32xf32>
    tpu.vector_store %arg19[%c0_129, %c0_130, %c0_131], %178 {strides = array<i32>} : memref<18x18x32xf32, #tpu.memory_space<vmem>>, vector<1x18x32xf32>,
    %179 = vector.extract_strided_slice %174 {offsets = [18, 0], sizes = [18, 32], strides = [1, 1]} : vector<324x32xf32> to vector<18x32xf32>
    %c1_132 = arith.constant 1 : index
    %c0_133 = arith.constant 0 : index
    %c0_134 = arith.constant 0 : index
    %180 = vector.load %arg19[%c1_132, %c0_133, %c0_134] : memref<18x18x32xf32, #tpu.memory_space<vmem>>, vector<1x18x32xf32>
    %181 = vector.shape_cast %180 : vector<1x18x32xf32> to vector<18x32xf32>
    %182 = vector.shape_cast %179 : vector<18x32xf32> to vector<1x18x32xf32>
    tpu.vector_store %arg19[%c1_132, %c0_133, %c0_134], %182 {strides = array<i32>} : memref<18x18x32xf32, #tpu.memory_space<vmem>>, vector<1x18x32xf32>,
    %183 = vector.extract_strided_slice %174 {offsets = [36, 0], sizes = [18, 32], strides = [1, 1]} : vector<324x32xf32> to vector<18x32xf32>
    %c2_135 = arith.constant 2 : index
    %c0_136 = arith.constant 0 : index
    %c0_137 = arith.constant 0 : index
    %184 = vector.load %arg19[%c2_135, %c0_136, %c0_137] : memref<18x18x32xf32, #tpu.memory_space<vmem>>, vector<1x18x32xf32>
    %185 = vector.shape_cast %184 : vector<1x18x32xf32> to vector<18x32xf32>
    %186 = vector.shape_cast %183 : vector<18x32xf32> to vector<1x18x32xf32>
    tpu.vector_store %arg19[%c2_135, %c0_136, %c0_137], %186 {strides = array<i32>} : memref<18x18x32xf32, #tpu.memory_space<vmem>>, vector<1x18x32xf32>,
    %187 = vector.extract_strided_slice %174 {offsets = [54, 0], sizes = [18, 32], strides = [1, 1]} : vector<324x32xf32> to vector<18x32xf32>
    %c3_138 = arith.constant 3 : index
    %c0_139 = arith.constant 0 : index
    %c0_140 = arith.constant 0 : index
    %188 = vector.load %arg19[%c3_138, %c0_139, %c0_140] : memref<18x18x32xf32, #tpu.memory_space<vmem>>, vector<1x18x32xf32>
    %189 = vector.shape_cast %188 : vector<1x18x32xf32> to vector<18x32xf32>
    %190 = vector.shape_cast %187 : vector<18x32xf32> to vector<1x18x32xf32>
    tpu.vector_store %arg19[%c3_138, %c0_139, %c0_140], %190 {strides = array<i32>} : memref<18x18x32xf32, #tpu.memory_space<vmem>>, vector<1x18x32xf32>,
    %191 = vector.extract_strided_slice %174 {offsets = [72, 0], sizes = [18, 32], strides = [1, 1]} : vector<324x32xf32> to vector<18x32xf32>
    %c4_141 = arith.constant 4 : index
    %c0_142 = arith.constant 0 : index
    %c0_143 = arith.constant 0 : index
    %192 = vector.load %arg19[%c4_141, %c0_142, %c0_143] : memref<18x18x32xf32, #tpu.memory_space<vmem>>, vector<1x18x32xf32>
    %193 = vector.shape_cast %192 : vector<1x18x32xf32> to vector<18x32xf32>
    %194 = vector.shape_cast %191 : vector<18x32xf32> to vector<1x18x32xf32>
    tpu.vector_store %arg19[%c4_141, %c0_142, %c0_143], %194 {strides = array<i32>} : memref<18x18x32xf32, #tpu.memory_space<vmem>>, vector<1x18x32xf32>,
    %195 = vector.extract_strided_slice %174 {offsets = [90, 0], sizes = [18, 32], strides = [1, 1]} : vector<324x32xf32> to vector<18x32xf32>
    %c5_144 = arith.constant 5 : index
    %c0_145 = arith.constant 0 : index
    %c0_146 = arith.constant 0 : index
    %196 = vector.load %arg19[%c5_144, %c0_145, %c0_146] : memref<18x18x32xf32, #tpu.memory_space<vmem>>, vector<1x18x32xf32>
    %197 = vector.shape_cast %196 : vector<1x18x32xf32> to vector<18x32xf32>
    %198 = vector.shape_cast %195 : vector<18x32xf32> to vector<1x18x32xf32>
    tpu.vector_store %arg19[%c5_144, %c0_145, %c0_146], %198 {strides = array<i32>} : memref<18x18x32xf32, #tpu.memory_space<vmem>>, vector<1x18x32xf32>,
    %199 = vector.extract_strided_slice %174 {offsets = [108, 0], sizes = [18, 32], strides = [1, 1]} : vector<324x32xf32> to vector<18x32xf32>
    %c6_147 = arith.constant 6 : index
    %c0_148 = arith.constant 0 : index
    %c0_149 = arith.constant 0 : index
    %200 = vector.load %arg19[%c6_147, %c0_148, %c0_149] : memref<18x18x32xf32, #tpu.memory_space<vmem>>, vector<1x18x32xf32>
    %201 = vector.shape_cast %200 : vector<1x18x32xf32> to vector<18x32xf32>
    %202 = vector.shape_cast %199 : vector<18x32xf32> to vector<1x18x32xf32>
    tpu.vector_store %arg19[%c6_147, %c0_148, %c0_149], %202 {strides = array<i32>} : memref<18x18x32xf32, #tpu.memory_space<vmem>>, vector<1x18x32xf32>,
    %203 = vector.extract_strided_slice %174 {offsets = [126, 0], sizes = [18, 32], strides = [1, 1]} : vector<324x32xf32> to vector<18x32xf32>
    %c7_150 = arith.constant 7 : index
    %c0_151 = arith.constant 0 : index
    %c0_152 = arith.constant 0 : index
    %204 = vector.load %arg19[%c7_150, %c0_151, %c0_152] : memref<18x18x32xf32, #tpu.memory_space<vmem>>, vector<1x18x32xf32>
    %205 = vector.shape_cast %204 : vector<1x18x32xf32> to vector<18x32xf32>
    %206 = vector.shape_cast %203 : vector<18x32xf32> to vector<1x18x32xf32>
    tpu.vector_store %arg19[%c7_150, %c0_151, %c0_152], %206 {strides = array<i32>} : memref<18x18x32xf32, #tpu.memory_space<vmem>>, vector<1x18x32xf32>,
    %207 = vector.extract_strided_slice %174 {offsets = [144, 0], sizes = [18, 32], strides = [1, 1]} : vector<324x32xf32> to vector<18x32xf32>
    %c8_153 = arith.constant 8 : index
    %c0_154 = arith.constant 0 : index
    %c0_155 = arith.constant 0 : index
    %208 = vector.load %arg19[%c8_153, %c0_154, %c0_155] : memref<18x18x32xf32, #tpu.memory_space<vmem>>, vector<1x18x32xf32>
    %209 = vector.shape_cast %208 : vector<1x18x32xf32> to vector<18x32xf32>
    %210 = vector.shape_cast %207 : vector<18x32xf32> to vector<1x18x32xf32>
    tpu.vector_store %arg19[%c8_153, %c0_154, %c0_155], %210 {strides = array<i32>} : memref<18x18x32xf32, #tpu.memory_space<vmem>>, vector<1x18x32xf32>,
    %211 = vector.extract_strided_slice %174 {offsets = [162, 0], sizes = [18, 32], strides = [1, 1]} : vector<324x32xf32> to vector<18x32xf32>
    %c9_156 = arith.constant 9 : index
    %c0_157 = arith.constant 0 : index
    %c0_158 = arith.constant 0 : index
    %212 = vector.load %arg19[%c9_156, %c0_157, %c0_158] : memref<18x18x32xf32, #tpu.memory_space<vmem>>, vector<1x18x32xf32>
    %213 = vector.shape_cast %212 : vector<1x18x32xf32> to vector<18x32xf32>
    %214 = vector.shape_cast %211 : vector<18x32xf32> to vector<1x18x32xf32>
    tpu.vector_store %arg19[%c9_156, %c0_157, %c0_158], %214 {strides = array<i32>} : memref<18x18x32xf32, #tpu.memory_space<vmem>>, vector<1x18x32xf32>,
    %215 = vector.extract_strided_slice %174 {offsets = [180, 0], sizes = [18, 32], strides = [1, 1]} : vector<324x32xf32> to vector<18x32xf32>
    %c10_159 = arith.constant 10 : index
    %c0_160 = arith.constant 0 : index
    %c0_161 = arith.constant 0 : index
    %216 = vector.load %arg19[%c10_159, %c0_160, %c0_161] : memref<18x18x32xf32, #tpu.memory_space<vmem>>, vector<1x18x32xf32>
    %217 = vector.shape_cast %216 : vector<1x18x32xf32> to vector<18x32xf32>
    %218 = vector.shape_cast %215 : vector<18x32xf32> to vector<1x18x32xf32>
    tpu.vector_store %arg19[%c10_159, %c0_160, %c0_161], %218 {strides = array<i32>} : memref<18x18x32xf32, #tpu.memory_space<vmem>>, vector<1x18x32xf32>,
    %219 = vector.extract_strided_slice %174 {offsets = [198, 0], sizes = [18, 32], strides = [1, 1]} : vector<324x32xf32> to vector<18x32xf32>
    %c11_162 = arith.constant 11 : index
    %c0_163 = arith.constant 0 : index
    %c0_164 = arith.constant 0 : index
    %220 = vector.load %arg19[%c11_162, %c0_163, %c0_164] : memref<18x18x32xf32, #tpu.memory_space<vmem>>, vector<1x18x32xf32>
    %221 = vector.shape_cast %220 : vector<1x18x32xf32> to vector<18x32xf32>
    %222 = vector.shape_cast %219 : vector<18x32xf32> to vector<1x18x32xf32>
    tpu.vector_store %arg19[%c11_162, %c0_163, %c0_164], %222 {strides = array<i32>} : memref<18x18x32xf32, #tpu.memory_space<vmem>>, vector<1x18x32xf32>,
    %223 = vector.extract_strided_slice %174 {offsets = [216, 0], sizes = [18, 32], strides = [1, 1]} : vector<324x32xf32> to vector<18x32xf32>
    %c12_165 = arith.constant 12 : index
    %c0_166 = arith.constant 0 : index
    %c0_167 = arith.constant 0 : index
    %224 = vector.load %arg19[%c12_165, %c0_166, %c0_167] : memref<18x18x32xf32, #tpu.memory_space<vmem>>, vector<1x18x32xf32>
    %225 = vector.shape_cast %224 : vector<1x18x32xf32> to vector<18x32xf32>
    %226 = vector.shape_cast %223 : vector<18x32xf32> to vector<1x18x32xf32>
    tpu.vector_store %arg19[%c12_165, %c0_166, %c0_167], %226 {strides = array<i32>} : memref<18x18x32xf32, #tpu.memory_space<vmem>>, vector<1x18x32xf32>,
    %227 = vector.extract_strided_slice %174 {offsets = [234, 0], sizes = [18, 32], strides = [1, 1]} : vector<324x32xf32> to vector<18x32xf32>
    %c13_168 = arith.constant 13 : index
    %c0_169 = arith.constant 0 : index
    %c0_170 = arith.constant 0 : index
    %228 = vector.load %arg19[%c13_168, %c0_169, %c0_170] : memref<18x18x32xf32, #tpu.memory_space<vmem>>, vector<1x18x32xf32>
    %229 = vector.shape_cast %228 : vector<1x18x32xf32> to vector<18x32xf32>
    %230 = vector.shape_cast %227 : vector<18x32xf32> to vector<1x18x32xf32>
    tpu.vector_store %arg19[%c13_168, %c0_169, %c0_170], %230 {strides = array<i32>} : memref<18x18x32xf32, #tpu.memory_space<vmem>>, vector<1x18x32xf32>,
    %231 = vector.extract_strided_slice %174 {offsets = [252, 0], sizes = [18, 32], strides = [1, 1]} : vector<324x32xf32> to vector<18x32xf32>
    %c14_171 = arith.constant 14 : index
    %c0_172 = arith.constant 0 : index
    %c0_173 = arith.constant 0 : index
    %232 = vector.load %arg19[%c14_171, %c0_172, %c0_173] : memref<18x18x32xf32, #tpu.memory_space<vmem>>, vector<1x18x32xf32>
    %233 = vector.shape_cast %232 : vector<1x18x32xf32> to vector<18x32xf32>
    %234 = vector.shape_cast %231 : vector<18x32xf32> to vector<1x18x32xf32>
    tpu.vector_store %arg19[%c14_171, %c0_172, %c0_173], %234 {strides = array<i32>} : memref<18x18x32xf32, #tpu.memory_space<vmem>>, vector<1x18x32xf32>,
    %235 = vector.extract_strided_slice %174 {offsets = [270, 0], sizes = [18, 32], strides = [1, 1]} : vector<324x32xf32> to vector<18x32xf32>
    %c15_174 = arith.constant 15 : index
    %c0_175 = arith.constant 0 : index
    %c0_176 = arith.constant 0 : index
    %236 = vector.load %arg19[%c15_174, %c0_175, %c0_176] : memref<18x18x32xf32, #tpu.memory_space<vmem>>, vector<1x18x32xf32>
    %237 = vector.shape_cast %236 : vector<1x18x32xf32> to vector<18x32xf32>
    %238 = vector.shape_cast %235 : vector<18x32xf32> to vector<1x18x32xf32>
    tpu.vector_store %arg19[%c15_174, %c0_175, %c0_176], %238 {strides = array<i32>} : memref<18x18x32xf32, #tpu.memory_space<vmem>>, vector<1x18x32xf32>,
    %239 = vector.extract_strided_slice %174 {offsets = [288, 0], sizes = [18, 32], strides = [1, 1]} : vector<324x32xf32> to vector<18x32xf32>
    %c16_177 = arith.constant 16 : index
    %c0_178 = arith.constant 0 : index
    %c0_179 = arith.constant 0 : index
    %240 = vector.load %arg19[%c16_177, %c0_178, %c0_179] : memref<18x18x32xf32, #tpu.memory_space<vmem>>, vector<1x18x32xf32>
    %241 = vector.shape_cast %240 : vector<1x18x32xf32> to vector<18x32xf32>
    %242 = vector.shape_cast %239 : vector<18x32xf32> to vector<1x18x32xf32>
    tpu.vector_store %arg19[%c16_177, %c0_178, %c0_179], %242 {strides = array<i32>} : memref<18x18x32xf32, #tpu.memory_space<vmem>>, vector<1x18x32xf32>,
    %243 = vector.extract_strided_slice %174 {offsets = [306, 0], sizes = [18, 32], strides = [1, 1]} : vector<324x32xf32> to vector<18x32xf32>
    %c17_180 = arith.constant 17 : index
    %c0_181 = arith.constant 0 : index
    %c0_182 = arith.constant 0 : index
    %244 = vector.load %arg19[%c17_180, %c0_181, %c0_182] : memref<18x18x32xf32, #tpu.memory_space<vmem>>, vector<1x18x32xf32>
    %245 = vector.shape_cast %244 : vector<1x18x32xf32> to vector<18x32xf32>
    %246 = vector.shape_cast %243 : vector<18x32xf32> to vector<1x18x32xf32>
    tpu.vector_store %arg19[%c17_180, %c0_181, %c0_182], %246 {strides = array<i32>} : memref<18x18x32xf32, #tpu.memory_space<vmem>>, vector<1x18x32xf32>,
    %cst_183 = arith.constant 0.000000e+00 : f32
    %247 = vector.broadcast %cst_183 : f32 to vector<256x32xf32>
    %c0_184 = arith.constant 0 : index
    %c0_185 = arith.constant 0 : index
    %c0_186 = arith.constant 0 : index
    %248 = vector.load %arg19[%c0_184, %c0_185, %c0_186] : memref<18x18x32xf32, #tpu.memory_space<vmem>>, vector<16x16x32xf32>
    %249 = vector.shape_cast %248 : vector<16x16x32xf32> to vector<256x32xf32>
    %c0_187 = arith.constant 0 : index
    %c0_188 = arith.constant 0 : index
    %c0_189 = arith.constant 0 : index
    %250 = vector.load %arg8[%c0_187, %c0_188, %c0_189] : memref<9x32x32xf32, #tpu.memory_space<vmem>>, vector<1x32x32xf32>
    %251 = vector.shape_cast %250 : vector<1x32x32xf32> to vector<32x32xf32>
    %cst_190 = arith.constant dense<0.000000e+00> : vector<256x32xf32>
    %252 = tpu.matmul %249, %251, %cst_190 {dimension_numbers = #tpu.dot_dimension_numbers<[1], [0], [0], [1], [0, 0, 1, 1], [], []>} : vector<256x32xf32>, vector<32x32xf32>, vector<256x32xf32> -> vector<256x32xf32>
    %253 = arith.addf %247, %252 : vector<256x32xf32>
    %c0_191 = arith.constant 0 : index
    %c1_192 = arith.constant 1 : index
    %c0_193 = arith.constant 0 : index
    %254 = vector.load %arg19[%c0_191, %c1_192, %c0_193] : memref<18x18x32xf32, #tpu.memory_space<vmem>>, vector<16x16x32xf32>
    %255 = vector.shape_cast %254 : vector<16x16x32xf32> to vector<256x32xf32>
    %c1_194 = arith.constant 1 : index
    %c0_195 = arith.constant 0 : index
    %c0_196 = arith.constant 0 : index
    %256 = vector.load %arg8[%c1_194, %c0_195, %c0_196] : memref<9x32x32xf32, #tpu.memory_space<vmem>>, vector<1x32x32xf32>
    %257 = vector.shape_cast %256 : vector<1x32x32xf32> to vector<32x32xf32>
    %cst_197 = arith.constant dense<0.000000e+00> : vector<256x32xf32>
    %258 = tpu.matmul %255, %257, %cst_197 {dimension_numbers = #tpu.dot_dimension_numbers<[1], [0], [0], [1], [0, 0, 1, 1], [], []>} : vector<256x32xf32>, vector<32x32xf32>, vector<256x32xf32> -> vector<256x32xf32>
    %259 = arith.addf %253, %258 : vector<256x32xf32>
    %c0_198 = arith.constant 0 : index
    %c2_199 = arith.constant 2 : index
    %c0_200 = arith.constant 0 : index
    %260 = vector.load %arg19[%c0_198, %c2_199, %c0_200] : memref<18x18x32xf32, #tpu.memory_space<vmem>>, vector<16x16x32xf32>
    %261 = vector.shape_cast %260 : vector<16x16x32xf32> to vector<256x32xf32>
    %c2_201 = arith.constant 2 : index
    %c0_202 = arith.constant 0 : index
    %c0_203 = arith.constant 0 : index
    %262 = vector.load %arg8[%c2_201, %c0_202, %c0_203] : memref<9x32x32xf32, #tpu.memory_space<vmem>>, vector<1x32x32xf32>
    %263 = vector.shape_cast %262 : vector<1x32x32xf32> to vector<32x32xf32>
    %cst_204 = arith.constant dense<0.000000e+00> : vector<256x32xf32>
    %264 = tpu.matmul %261, %263, %cst_204 {dimension_numbers = #tpu.dot_dimension_numbers<[1], [0], [0], [1], [0, 0, 1, 1], [], []>} : vector<256x32xf32>, vector<32x32xf32>, vector<256x32xf32> -> vector<256x32xf32>
    %265 = arith.addf %259, %264 : vector<256x32xf32>
    %c1_205 = arith.constant 1 : index
    %c0_206 = arith.constant 0 : index
    %c0_207 = arith.constant 0 : index
    %266 = vector.load %arg19[%c1_205, %c0_206, %c0_207] : memref<18x18x32xf32, #tpu.memory_space<vmem>>, vector<16x16x32xf32>
    %267 = vector.shape_cast %266 : vector<16x16x32xf32> to vector<256x32xf32>
    %c3_208 = arith.constant 3 : index
    %c0_209 = arith.constant 0 : index
    %c0_210 = arith.constant 0 : index
    %268 = vector.load %arg8[%c3_208, %c0_209, %c0_210] : memref<9x32x32xf32, #tpu.memory_space<vmem>>, vector<1x32x32xf32>
    %269 = vector.shape_cast %268 : vector<1x32x32xf32> to vector<32x32xf32>
    %cst_211 = arith.constant dense<0.000000e+00> : vector<256x32xf32>
    %270 = tpu.matmul %267, %269, %cst_211 {dimension_numbers = #tpu.dot_dimension_numbers<[1], [0], [0], [1], [0, 0, 1, 1], [], []>} : vector<256x32xf32>, vector<32x32xf32>, vector<256x32xf32> -> vector<256x32xf32>
    %271 = arith.addf %265, %270 : vector<256x32xf32>
    %c1_212 = arith.constant 1 : index
    %c1_213 = arith.constant 1 : index
    %c0_214 = arith.constant 0 : index
    %272 = vector.load %arg19[%c1_212, %c1_213, %c0_214] : memref<18x18x32xf32, #tpu.memory_space<vmem>>, vector<16x16x32xf32>
    %273 = vector.shape_cast %272 : vector<16x16x32xf32> to vector<256x32xf32>
    %c4_215 = arith.constant 4 : index
    %c0_216 = arith.constant 0 : index
    %c0_217 = arith.constant 0 : index
    %274 = vector.load %arg8[%c4_215, %c0_216, %c0_217] : memref<9x32x32xf32, #tpu.memory_space<vmem>>, vector<1x32x32xf32>
    %275 = vector.shape_cast %274 : vector<1x32x32xf32> to vector<32x32xf32>
    %cst_218 = arith.constant dense<0.000000e+00> : vector<256x32xf32>
    %276 = tpu.matmul %273, %275, %cst_218 {dimension_numbers = #tpu.dot_dimension_numbers<[1], [0], [0], [1], [0, 0, 1, 1], [], []>} : vector<256x32xf32>, vector<32x32xf32>, vector<256x32xf32> -> vector<256x32xf32>
    %277 = arith.addf %271, %276 : vector<256x32xf32>
    %c1_219 = arith.constant 1 : index
    %c2_220 = arith.constant 2 : index
    %c0_221 = arith.constant 0 : index
    %278 = vector.load %arg19[%c1_219, %c2_220, %c0_221] : memref<18x18x32xf32, #tpu.memory_space<vmem>>, vector<16x16x32xf32>
    %279 = vector.shape_cast %278 : vector<16x16x32xf32> to vector<256x32xf32>
    %c5_222 = arith.constant 5 : index
    %c0_223 = arith.constant 0 : index
    %c0_224 = arith.constant 0 : index
    %280 = vector.load %arg8[%c5_222, %c0_223, %c0_224] : memref<9x32x32xf32, #tpu.memory_space<vmem>>, vector<1x32x32xf32>
    %281 = vector.shape_cast %280 : vector<1x32x32xf32> to vector<32x32xf32>
    %cst_225 = arith.constant dense<0.000000e+00> : vector<256x32xf32>
    %282 = tpu.matmul %279, %281, %cst_225 {dimension_numbers = #tpu.dot_dimension_numbers<[1], [0], [0], [1], [0, 0, 1, 1], [], []>} : vector<256x32xf32>, vector<32x32xf32>, vector<256x32xf32> -> vector<256x32xf32>
    %283 = arith.addf %277, %282 : vector<256x32xf32>
    %c2_226 = arith.constant 2 : index
    %c0_227 = arith.constant 0 : index
    %c0_228 = arith.constant 0 : index
    %284 = vector.load %arg19[%c2_226, %c0_227, %c0_228] : memref<18x18x32xf32, #tpu.memory_space<vmem>>, vector<16x16x32xf32>
    %285 = vector.shape_cast %284 : vector<16x16x32xf32> to vector<256x32xf32>
    %c6_229 = arith.constant 6 : index
    %c0_230 = arith.constant 0 : index
    %c0_231 = arith.constant 0 : index
    %286 = vector.load %arg8[%c6_229, %c0_230, %c0_231] : memref<9x32x32xf32, #tpu.memory_space<vmem>>, vector<1x32x32xf32>
    %287 = vector.shape_cast %286 : vector<1x32x32xf32> to vector<32x32xf32>
    %cst_232 = arith.constant dense<0.000000e+00> : vector<256x32xf32>
    %288 = tpu.matmul %285, %287, %cst_232 {dimension_numbers = #tpu.dot_dimension_numbers<[1], [0], [0], [1], [0, 0, 1, 1], [], []>} : vector<256x32xf32>, vector<32x32xf32>, vector<256x32xf32> -> vector<256x32xf32>
    %289 = arith.addf %283, %288 : vector<256x32xf32>
    %c2_233 = arith.constant 2 : index
    %c1_234 = arith.constant 1 : index
    %c0_235 = arith.constant 0 : index
    %290 = vector.load %arg19[%c2_233, %c1_234, %c0_235] : memref<18x18x32xf32, #tpu.memory_space<vmem>>, vector<16x16x32xf32>
    %291 = vector.shape_cast %290 : vector<16x16x32xf32> to vector<256x32xf32>
    %c7_236 = arith.constant 7 : index
    %c0_237 = arith.constant 0 : index
    %c0_238 = arith.constant 0 : index
    %292 = vector.load %arg8[%c7_236, %c0_237, %c0_238] : memref<9x32x32xf32, #tpu.memory_space<vmem>>, vector<1x32x32xf32>
    %293 = vector.shape_cast %292 : vector<1x32x32xf32> to vector<32x32xf32>
    %cst_239 = arith.constant dense<0.000000e+00> : vector<256x32xf32>
    %294 = tpu.matmul %291, %293, %cst_239 {dimension_numbers = #tpu.dot_dimension_numbers<[1], [0], [0], [1], [0, 0, 1, 1], [], []>} : vector<256x32xf32>, vector<32x32xf32>, vector<256x32xf32> -> vector<256x32xf32>
    %295 = arith.addf %289, %294 : vector<256x32xf32>
    %c2_240 = arith.constant 2 : index
    %c2_241 = arith.constant 2 : index
    %c0_242 = arith.constant 0 : index
    %296 = vector.load %arg19[%c2_240, %c2_241, %c0_242] : memref<18x18x32xf32, #tpu.memory_space<vmem>>, vector<16x16x32xf32>
    %297 = vector.shape_cast %296 : vector<16x16x32xf32> to vector<256x32xf32>
    %c8_243 = arith.constant 8 : index
    %c0_244 = arith.constant 0 : index
    %c0_245 = arith.constant 0 : index
    %298 = vector.load %arg8[%c8_243, %c0_244, %c0_245] : memref<9x32x32xf32, #tpu.memory_space<vmem>>, vector<1x32x32xf32>
    %299 = vector.shape_cast %298 : vector<1x32x32xf32> to vector<32x32xf32>
    %cst_246 = arith.constant dense<0.000000e+00> : vector<256x32xf32>
    %300 = tpu.matmul %297, %299, %cst_246 {dimension_numbers = #tpu.dot_dimension_numbers<[1], [0], [0], [1], [0, 0, 1, 1], [], []>} : vector<256x32xf32>, vector<32x32xf32>, vector<256x32xf32> -> vector<256x32xf32>
    %301 = arith.addf %295, %300 : vector<256x32xf32>
    %c0_247 = arith.constant 0 : index
    %c0_248 = arith.constant 0 : index
    %302 = vector.load %arg9[%c0_247, %c0_248] : memref<1x32xf32, #tpu.memory_space<vmem>>, vector<1x32xf32>
    %303 = vector.broadcast %302 : vector<1x32xf32> to vector<256x32xf32>
    %304 = arith.addf %301, %303 : vector<256x32xf32>
    %cst_249 = arith.constant 0.000000e+00 : f32
    %305 = vector.broadcast %cst_249 : f32 to vector<256x32xf32>
    %306 = arith.maximumf %304, %305 : vector<256x32xf32>
    %307 = tpu.concatenate %172, %306 in 1 : vector<256x32xf32>, vector<256x32xf32> -> vector<256x64xf32>
    %c0_250 = arith.constant 0 : index
    %c0_251 = arith.constant 0 : index
    %c0_252 = arith.constant 0 : index
    %308 = vector.load %arg16[%c0_250, %c0_251, %c0_252] : memref<1x256x64xf32, #tpu.memory_space<vmem>>, vector<1x256x64xf32>
    %309 = vector.shape_cast %308 : vector<1x256x64xf32> to vector<256x64xf32>
    %310 = vector.shape_cast %307 : vector<256x64xf32> to vector<1x256x64xf32>
    tpu.vector_store %arg16[%c0_250, %c0_251, %c0_252], %310 {strides = array<i32>} : memref<1x256x64xf32, #tpu.memory_space<vmem>>, vector<1x256x64xf32>,
    %c0_253 = arith.constant 0 : index
    %c0_254 = arith.constant 0 : index
    %311 = vector.load %arg10[%c0_253, %c0_254] : memref<32x32xf32, #tpu.memory_space<vmem>>, vector<32x32xf32>
    %cst_255 = arith.constant dense<0.000000e+00> : vector<256x32xf32>
    %312 = tpu.matmul %172, %311, %cst_255 {dimension_numbers = #tpu.dot_dimension_numbers<[1], [0], [0], [1], [0, 0, 1, 1], [], []>} : vector<256x32xf32>, vector<32x32xf32>, vector<256x32xf32> -> vector<256x32xf32>
    %c0_256 = arith.constant 0 : index
    %c0_257 = arith.constant 0 : index
    %313 = vector.load %arg11[%c0_256, %c0_257] : memref<1x32xf32, #tpu.memory_space<vmem>>, vector<1x32xf32>
    %314 = vector.broadcast %313 : vector<1x32xf32> to vector<256x32xf32>
    %315 = arith.addf %312, %314 : vector<256x32xf32>
    %cst_258 = arith.constant 0.000000e+00 : f32
    %316 = vector.broadcast %cst_258 : f32 to vector<256x32xf32>
    %317 = arith.maximumf %315, %316 : vector<256x32xf32>
    %c0_259 = arith.constant 0 : index
    %c0_260 = arith.constant 0 : index
    %318 = vector.load %arg12[%c0_259, %c0_260] : memref<32x32xf32, #tpu.memory_space<vmem>>, vector<32x32xf32>
    %cst_261 = arith.constant dense<0.000000e+00> : vector<256x32xf32>
    %319 = tpu.matmul %306, %318, %cst_261 {dimension_numbers = #tpu.dot_dimension_numbers<[1], [0], [0], [1], [0, 0, 1, 1], [], []>} : vector<256x32xf32>, vector<32x32xf32>, vector<256x32xf32> -> vector<256x32xf32>
    %c0_262 = arith.constant 0 : index
    %c0_263 = arith.constant 0 : index
    %320 = vector.load %arg13[%c0_262, %c0_263] : memref<1x32xf32, #tpu.memory_space<vmem>>, vector<1x32xf32>
    %321 = vector.broadcast %320 : vector<1x32xf32> to vector<256x32xf32>
    %322 = arith.addf %319, %321 : vector<256x32xf32>
    %cst_264 = arith.constant 0.000000e+00 : f32
    %323 = vector.broadcast %cst_264 : f32 to vector<256x32xf32>
    %324 = arith.maximumf %322, %323 : vector<256x32xf32>
    %325 = tpu.concatenate %317, %324 in 1 : vector<256x32xf32>, vector<256x32xf32> -> vector<256x64xf32>
    %c0_265 = arith.constant 0 : index
    %c0_266 = arith.constant 0 : index
    %c0_267 = arith.constant 0 : index
    %326 = vector.load %arg17[%c0_265, %c0_266, %c0_267] : memref<1x256x64xf32, #tpu.memory_space<vmem>>, vector<1x256x64xf32>
    %327 = vector.shape_cast %326 : vector<1x256x64xf32> to vector<256x64xf32>
    %328 = vector.shape_cast %325 : vector<256x64xf32> to vector<1x256x64xf32>
    tpu.vector_store %arg17[%c0_265, %c0_266, %c0_267], %328 {strides = array<i32>} : memref<1x256x64xf32, #tpu.memory_space<vmem>>, vector<1x256x64xf32>,
    return
  }
  func.func @transform_0(%arg0: i32) -> (i32, i32, i32) {
    %c0_i32 = arith.constant 0 : i32
    %c0_i32_0 = arith.constant 0 : i32
    %c0_i32_1 = arith.constant 0 : i32
    return %arg0, %c0_i32, %c0_i32_0 : i32, i32, i32
  }
  func.func @transform_1(%arg0: i32) -> (i32, i32, i32) {
    %c0_i32 = arith.constant 0 : i32
    %c0_i32_0 = arith.constant 0 : i32
    %c0_i32_1 = arith.constant 0 : i32
    return %arg0, %c0_i32, %c0_i32_0 : i32, i32, i32
  }
  func.func @transform_2(%arg0: i32) -> (i32, i32) {
    %c0_i32 = arith.constant 0 : i32
    %c0_i32_0 = arith.constant 0 : i32
    %c0_i32_1 = arith.constant 0 : i32
    return %c0_i32, %c0_i32_0 : i32, i32
  }
  func.func @transform_3(%arg0: i32) -> (i32, i32) {
    %c0_i32 = arith.constant 0 : i32
    %c0_i32_0 = arith.constant 0 : i32
    %c0_i32_1 = arith.constant 0 : i32
    return %c0_i32, %c0_i32_0 : i32, i32
  }
  func.func @transform_4(%arg0: i32) -> (i32, i32) {
    %c0_i32 = arith.constant 0 : i32
    %c0_i32_0 = arith.constant 0 : i32
    %c0_i32_1 = arith.constant 0 : i32
    return %c0_i32, %c0_i32_0 : i32, i32
  }
  func.func @transform_5(%arg0: i32) -> (i32, i32, i32) {
    %c0_i32 = arith.constant 0 : i32
    %c0_i32_0 = arith.constant 0 : i32
    %c0_i32_1 = arith.constant 0 : i32
    %c0_i32_2 = arith.constant 0 : i32
    return %c0_i32, %c0_i32_0, %c0_i32_1 : i32, i32, i32
  }
  func.func @transform_6(%arg0: i32) -> (i32, i32) {
    %c0_i32 = arith.constant 0 : i32
    %c0_i32_0 = arith.constant 0 : i32
    %c0_i32_1 = arith.constant 0 : i32
    return %c0_i32, %c0_i32_0 : i32, i32
  }
  func.func @transform_7(%arg0: i32) -> (i32, i32, i32) {
    %c0_i32 = arith.constant 0 : i32
    %c0_i32_0 = arith.constant 0 : i32
    %c0_i32_1 = arith.constant 0 : i32
    %c0_i32_2 = arith.constant 0 : i32
    return %c0_i32, %c0_i32_0, %c0_i32_1 : i32, i32, i32
  }
  func.func @transform_8(%arg0: i32) -> (i32, i32) {
    %c0_i32 = arith.constant 0 : i32
    %c0_i32_0 = arith.constant 0 : i32
    %c0_i32_1 = arith.constant 0 : i32
    return %c0_i32, %c0_i32_0 : i32, i32
  }
  func.func @transform_9(%arg0: i32) -> (i32, i32) {
    %c0_i32 = arith.constant 0 : i32
    %c0_i32_0 = arith.constant 0 : i32
    %c0_i32_1 = arith.constant 0 : i32
    return %c0_i32, %c0_i32_0 : i32, i32
  }
  func.func @transform_10(%arg0: i32) -> (i32, i32) {
    %c0_i32 = arith.constant 0 : i32
    %c0_i32_0 = arith.constant 0 : i32
    %c0_i32_1 = arith.constant 0 : i32
    return %c0_i32, %c0_i32_0 : i32, i32
  }
  func.func @transform_11(%arg0: i32) -> (i32, i32) {
    %c0_i32 = arith.constant 0 : i32
    %c0_i32_0 = arith.constant 0 : i32
    %c0_i32_1 = arith.constant 0 : i32
    return %c0_i32, %c0_i32_0 : i32, i32
  }
  func.func @transform_12(%arg0: i32) -> (i32, i32) {
    %c0_i32 = arith.constant 0 : i32
    %c0_i32_0 = arith.constant 0 : i32
    %c0_i32_1 = arith.constant 0 : i32
    return %c0_i32, %c0_i32_0 : i32, i32
  }
  func.func @transform_13(%arg0: i32) -> (i32, i32, i32) {
    %c0_i32 = arith.constant 0 : i32
    %c0_i32_0 = arith.constant 0 : i32
    %c0_i32_1 = arith.constant 0 : i32
    return %arg0, %c0_i32, %c0_i32_0 : i32, i32, i32
  }
  func.func @transform_14(%arg0: i32) -> (i32, i32, i32) {
    %c0_i32 = arith.constant 0 : i32
    %c0_i32_0 = arith.constant 0 : i32
    %c0_i32_1 = arith.constant 0 : i32
    return %arg0, %c0_i32, %c0_i32_0 : i32, i32, i32
  }
  func.func @transform_15(%arg0: i32) -> (i32, i32, i32) {
    %c0_i32 = arith.constant 0 : i32
    %c0_i32_0 = arith.constant 0 : i32
    %c0_i32_1 = arith.constant 0 : i32
    return %arg0, %c0_i32, %c0_i32_0 : i32, i32, i32
  }
  func.func @transform_16(%arg0: i32) -> (i32, i32, i32) {
    %c0_i32 = arith.constant 0 : i32
    %c0_i32_0 = arith.constant 0 : i32
    %c0_i32_1 = arith.constant 0 : i32
    return %arg0, %c0_i32, %c0_i32_0 : i32, i32, i32
  }
}

</mosaic_0001>

<bundles_post_ra>
// kernel: extract_feat.1
= control target key start
LH: loop header
LB: loop body
LE: loop exit
PB: predicated region body
PF: predicated region fallthrough
CT: control target
= control target key end

     0   :  { %s17465_s0 = inlined_call_operand.vmem [shape: f32[2,256,4], index: 0, kind: input, shape index: {}]   ;;  %s17466_s1 = inlined_call_operand.vmem [shape: s32[2,1,32], index: 1, kind: input, shape index: {}]   ;;  %s17467_s2 = inlined_call_operand.vmem [shape: f32[4,16], index: 2, kind: input, shape index: {}]   ;;  %s17468_s3 = inlined_call_operand.vmem [shape: f32[1,16], index: 3, kind: input, shape index: {}]   ;;  %s17469_s4 = inlined_call_operand.vmem [shape: f32[324,256], index: 4, kind: input, shape index: {}]   ;;  %s17470_s5 = inlined_call_operand.vmem [shape: f32[9,16,32], index: 5, kind: input, shape index: {}]   ;;  %s17471_s6 = inlined_call_operand.vmem [shape: f32[1,32], index: 6, kind: input, shape index: {}]   ;;  %s17472_s7 = inlined_call_operand.vmem [shape: f32[9,32,32], index: 7, kind: input, shape index: {}]   ;;  %s17473_s8 = inlined_call_operand.vmem [shape: f32[1,32], index: 8, kind: input, shape index: {}]   ;;  %s17474_s9 = inlined_call_operand.vmem [shape: f32[32,32], index: 9, kind: input, shape index: {}]   ;;  %s17475_s10 = inlined_call_operand.vmem [shape: f32[1,32], index: 10, kind: input, shape index: {}]   ;;  %s17476_s11 = inlined_call_operand.vmem [shape: f32[32,32], index: 11, kind: input, shape index: {}]   ;;  %s17477_s12 = inlined_call_operand.vmem [shape: f32[1,32], index: 12, kind: input, shape index: {}]   ;;  %s17478_s13 = inlined_call_operand.vmem [shape: f32[2,32,16], index: 13, kind: output, shape index: {0}]   ;;  %s17479_s14 = inlined_call_operand.vmem [shape: f32[2,256,16], index: 14, kind: output, shape index: {1}]   ;;  %s17480_s15 = inlined_call_operand.hbm [shape: f32[2,256,64], index: 15, kind: output, shape index: {2}]   ;;  %s17481_s16 = inlined_call_operand.vmem [shape: f32[2,256,64], index: 16, kind: output, shape index: {3}]  }
   0x1   :  { %17642 = sst [smem:[#allocation106_spill]] %s17465_s0 }
   0x2   :  { %17643 = sst [smem:[#allocation107_spill]] %s17466_s1 }
   0x3   :  { %17644 = sst [smem:[#allocation108_spill]] %s17467_s2 }
   0x4   :  { %17645 = sst [smem:[#allocation109_spill]] %s17468_s3 }
   0x5   :  { %22 = vsyncpa [#allocation5], 0 }
   0x6   :  { %24 = vsyncpa [#allocation5 + $0x1], 0  ;;  %s14105_s21 = smov 0   ;;  %s14107_s22 = smov 0  }
   0x7   :  { %s14109_s23 = smov 0   ;;  %s14111_s24 = smov 0  }
   0x8 LB: > { %17646 = sst [smem:[#allocation7_spill]] %s14007_s23  ;;  %s14126_s25 = sadd.s32 4294967295, %s14011_s24   ;;  %s14011_s24 = sphi %s14111_s24, %s17929_s24   ;;  %s14007_s23 = sphi %s14109_s23, %s17926_s23   ;;  %s14003_s22 = sphi %s14107_s22, %s17928_s22   ;;  %s13999_s21 = sphi %s14105_s21, %s17927_s21  }
   0x9   : > { %s10374_s26 = sadd.s32 4294967294, %s14011_s24   ;;  %s14130_s27 = sadd.s32 1, %s14011_s24  }
   0xa   : > { %s372_s28 = sadd.s32 1, %s14007_s23  ;;  %s369_s29 = ssub.s32 %s14011_s24, %s14130_s27 }
   0xb   : > { %p382_p0 = scmp.ne.s32.totalorder %s14007_s23, %s14003_s22  ;;  %p370_p1 = scmp.eq.s32.totalorder %s369_s29, 0 }
   0xc   : > { %p383_p2 = scmp.eq.s32.totalorder %s14126_s25, 1  ;;  %p388_p3 = scmp.ne.s32.totalorder %s14003_s22, %s13999_s21 }
   0xd   : > { %p389_p4 = scmp.eq.s32.totalorder %s10374_s26, 1  ;;  %p10377_p7 = scmp.ge.s32.totalorder %s14011_s24, 1 }
   0xe   : > { %s14141_s30 = scalar_select %p370_p1, %s14007_s23, %s372_s28  }
   0xf   : > { %p14143_p5 = por %p383_p2, %p382_p0  ;;  %p14147_p6 = por %p389_p4, %p388_p3 }
  0x10   : > { %17647 = sst [smem:[#allocation8_spill]] %s14141_s30  ;;  %p480_p8 = scmp.lt.s32.totalorder %s14011_s24, 3 }
  0x12   : > { %p481_p9 = pnand %p10377_p7, %p480_p8 }
  0x14   : > { %484 = sbr.rel (%p481_p9) target bundleno = 2809 (0xaf9), region = 72 }
  0x1b   : > { %s17650_s2 = sld [smem:[#allocation108_spill]]  ;;  %vm708_vm0 = vcmask 1043456   ;;  %p548_p10 = scmp.lt.s32.totalorder %s14126_s25, 1  ;;  %vm611_vm1 = vcmask 31744   ;;  %v17483_v33 = vmov 0.0|0.0   ;;  %vm14014_vm2 = vmmov 0  }
  0x1c   : > { %s17651_s30 = sld [smem:[#allocation106_spill]]  ;;  %13388 = vmatprep.subr.bf16.mxu1 %v17483_v33  ;;  %v14015_v34 = vmov 0.0   ;;  %s17652_s3 = sld [smem:[#allocation109_spill]]  ;;  %vm997_vm3 = vcmask 130048   ;;  %vm1131_vm6 = vcmask 261120  }
  0x1d   : > { %s14158_s20 = scalar_select %p548_p10, %s14126_s25, 1  ;;  %12054 = vmatprep.mubr.msk.f32.mxu1 %vm14014_vm2, %v14015_v34 }
  0x1e   : > { %s17653_s1 = sld [smem:[#allocation107_spill]]  ;;  %s11164_s28 = sshll.u32 %s14126_s25, 12 }
  0x1f   : > { %s14161_s26 = sshll.u32 %s14158_s20, 8  ;;  %s17236_s18 = scalar_lea.hbm %s17480_s15, %s11164_s28 }
  0x21   : > { %v603_v0 = vld [vmem:[%s17650_s2] sm:$0xf] }
  0x22   : > { %11945 = vmatprep.subr.msk.mxu0 %vm708_vm0, %v603_v0  ;;  %s14167_s23 = scalar_lea.vmem %s17651_s30, %s14161_s26  ;;  %v14242_v37 = vld [vmem:[%s17652_s3] ss:$0 sm:$0xff] }
  0x23   : > { %11946 = vmatpush3.msk.msra.mxu0 %vm708_vm0, %v603_v0  ;;  %v571_v1 = vld [vmem:[%s14167_s23] sm:$0xff]  ;;  %v572_v2 = vld [vmem:[%s14167_s23 + $0x8] sm:$0xff]  ;;  %v573_v3 = vld [vmem:[%s14167_s23 + $0x10] sm:$0xff] }
  0x24   : > { %11947 = vmatprep.mubr.msk.f32.mxu0 %vm611_vm1, %v571_v1  ;;  %v574_v4 = vld [vmem:[%s14167_s23 + $0x18] sm:$0xff]  ;;  %v575_v5 = vld [vmem:[%s14167_s23 + $0x20] sm:$0xff]  ;;  %v576_v6 = vld [vmem:[%s14167_s23 + $0x28] sm:$0xff]  ;;  %13210 = vmatprep.subr.bf16.mxu0 %v17483_v33  ;;  %s555_s2 = scalar_lea.vmem %s17653_s1, %s14158_s20  ;;  %s14017_s1 = smov [#allocation4]  }
  0x25   : > { %11948 = vmatmul.mubr.msk.f32.vlgmr.msra.gmra.mrb[0].mxu0 %vm611_vm1, %v572_v2  ;;  %v577_v7 = vld [vmem:[%s14167_s23 + $0x30] sm:$0xff]  ;;  %v578_v8 = vld [vmem:[%s14167_s23 + $0x38] sm:$0xff]  ;;  %v579_v9 = vld [vmem:[%s14167_s23 + $0x40] sm:$0xff]  ;;  %s13953_s3 = sshll.u32 %s14017_s1, 4  ;;  %s13954_s3 = int_to_ptr.vmem [resolvable:$false] %s13953_s3 }
  0x26   : > { %11950 = vmatprep.mubr.msk.f32.mxu0 %vm611_vm1, %v573_v3  ;;  %v580_v10 = vld [vmem:[%s14167_s23 + $0x48] sm:$0xff]  ;;  %v581_v11 = vld [vmem:[%s14167_s23 + $0x50] sm:$0xff]  ;;  %v582_v12 = vld [vmem:[%s14167_s23 + $0x58] sm:$0xff]  ;;  %s13955_s28 = scalar_lea.vmem %s13954_s3, 8192 }
  0x27   : > { %v583_v13 = vld [vmem:[%s14167_s23 + $0x60] sm:$0xff]  ;;  %v584_v14 = vld [vmem:[%s14167_s23 + $0x68] sm:$0xff]  ;;  %v585_v15 = vld [vmem:[%s14167_s23 + $0x70] sm:$0xff] }
  0x28   : > { %v586_v16 = vld [vmem:[%s14167_s23 + $0x78] sm:$0xff]  ;;  %v587_v17 = vld [vmem:[%s14167_s23 + $0x80] sm:$0xff]  ;;  %v588_v18 = vld [vmem:[%s14167_s23 + $0x88] sm:$0xff] }
  0x29   : > { %11951 = vmatmul.mubr.msk.f32.gmra.mrb[2].mxu0 %vm611_vm1, %v574_v4  ;;  %v589_v19 = vld [vmem:[%s14167_s23 + $0x90] sm:$0xff]  ;;  %v590_v20 = vld [vmem:[%s14167_s23 + $0x98] sm:$0xff]  ;;  %v591_v21 = vld [vmem:[%s14167_s23 + $0xa0] sm:$0xff] }
  0x2a   : > { %11953 = vmatprep.mubr.msk.f32.mxu0 %vm611_vm1, %v575_v5  ;;  %v592_v22 = vld [vmem:[%s14167_s23 + $0xa8] sm:$0xff]  ;;  %v593_v23 = vld [vmem:[%s14167_s23 + $0xb0] sm:$0xff]  ;;  %v594_v24 = vld [vmem:[%s14167_s23 + $0xb8] sm:$0xff] }
  0x2b   : > { %v595_v25 = vld [vmem:[%s14167_s23 + $0xc0] sm:$0xff]  ;;  %v596_v26 = vld [vmem:[%s14167_s23 + $0xc8] sm:$0xff]  ;;  %v597_v27 = vld [vmem:[%s14167_s23 + $0xd0] sm:$0xff] }
  0x2c   : > { %v598_v28 = vld [vmem:[%s14167_s23 + $0xd8] sm:$0xff]  ;;  %v599_v29 = vld [vmem:[%s14167_s23 + $0xe0] sm:$0xff]  ;;  %v600_v30 = vld [vmem:[%s14167_s23 + $0xe8] sm:$0xff] }
  0x2d   : > { %11954 = vmatmul.mubr.msk.f32.gmra.mrb[4].mxu0 %vm611_vm1, %v576_v6  ;;  %v601_v31 = vld [vmem:[%s14167_s23 + $0xf0] sm:$0xff]  ;;  %v602_v32 = vld [vmem:[%s14167_s23 + $0xf8] sm:$0xff]  ;;  %s11161_s23 = sshll.u32 %s14158_s20, 5 }
  0x2e   : > { %11956 = vmatprep.mubr.msk.f32.mxu0 %vm611_vm1, %v577_v7  ;;  %s560_s29 = scalar_lea.vmem %s17478_s13, %s11161_s23  ;;  %s14558_s23 = scalar_lea.vmem %s17479_s14, %s14161_s26 }
  0x31   : > { %11957 = vmatmul.mubr.msk.f32.gmra.mrb[6].mxu0 %vm611_vm1, %v578_v8 }
  0x32   : > { %11959 = vmatprep.mubr.msk.f32.mxu0 %vm611_vm1, %v579_v9 }
  0x35   : > { %11960 = vmatmul.mubr.msk.f32.gmra.mrb[8].mxu0 %vm611_vm1, %v580_v10 }
  0x36   : > { %11962 = vmatprep.mubr.msk.f32.mxu0 %vm611_vm1, %v581_v11 }
  0x39   : > { %11963 = vmatmul.mubr.msk.f32.gmra.mrb[10].mxu0 %vm611_vm1, %v582_v12 }
  0x3a   : > { %11965 = vmatprep.mubr.msk.f32.mxu0 %vm611_vm1, %v583_v13 }
  0x3d   : > { %11966 = vmatmul.mubr.msk.f32.gmra.mrb[12].mxu0 %vm611_vm1, %v584_v14 }
  0x3e   : > { %11968 = vmatprep.mubr.msk.f32.mxu0 %vm611_vm1, %v585_v15 }
  0x41   : > { %11969 = vmatmul.mubr.msk.f32.gmra.mrb[14].mxu0 %vm611_vm1, %v586_v16 }
  0x42   : > { %11971 = vmatprep.mubr.msk.f32.mxu0 %vm611_vm1, %v587_v17 }
  0x45   : > { %11972 = vmatmul.mubr.msk.f32.gmra.mrb[16].mxu0 %vm611_vm1, %v588_v18 }
  0x46   : > { %11974 = vmatprep.mubr.msk.f32.mxu0 %vm611_vm1, %v589_v19 }
  0x49   : > { %11975 = vmatmul.mubr.msk.f32.gmra.mrb[18].mxu0 %vm611_vm1, %v590_v20 }
  0x4a   : > { %11977 = vmatprep.mubr.msk.f32.mxu0 %vm611_vm1, %v591_v21 }
  0x4d   : > { %11978 = vmatmul.mubr.msk.f32.gmra.mrb[20].mxu0 %vm611_vm1, %v592_v22 }
  0x4e   : > { %11980 = vmatprep.mubr.msk.f32.mxu0 %vm611_vm1, %v593_v23 }
  0x51   : > { %11981 = vmatmul.mubr.msk.f32.gmra.mrb[22].mxu0 %vm611_vm1, %v594_v24 }
  0x52   : > { %11983 = vmatprep.mubr.msk.f32.mxu0 %vm611_vm1, %v595_v25 }
  0x55   : > { %11984 = vmatmul.mubr.msk.f32.gmra.mrb[24].mxu0 %vm611_vm1, %v596_v26 }
  0x56   : > { %11986 = vmatprep.mubr.msk.f32.mxu0 %vm611_vm1, %v597_v27 }
  0x59   : > { %11987 = vmatmul.mubr.msk.f32.gmra.mrb[26].mxu0 %vm611_vm1, %v598_v28 }
  0x5a   : > { %11989 = vmatprep.mubr.msk.f32.mxu0 %vm611_vm1, %v599_v29 }
  0x5d   : > { %11990 = vmatmul.mubr.msk.f32.gmra.mrb[28].mxu0 %vm611_vm1, %v600_v30 }
  0x5e   : > { %11992 = vmatprep.mubr.msk.f32.mxu0 %vm611_vm1, %v601_v31 }
  0x61   : > { %11993 = vmatmul.mubr.msk.f32.gmra.mrb[30].mxu0 %vm611_vm1, %v602_v32 }
  0x62   : > { %12003 = vmatprep.mubr.msk.f32.mxu0 %vm14014_vm2, %v14015_v34 }
  0xf8   : > { %v11949_v35 = vpop.f32.mrb[0].mxu0 }
  0xf9   : > { %v778_v36 = vpop.f32.mrb[1].mxu0  ;;  %v784_v40 = vadd.f32 %v11949_v35, %v14242_v37 }
  0xfa   : > { %v779_v41 = vadd.f32 %v14242_v37, %v778_v36 }
  0xfb   : > { %v938_v46 = vmax.f32 %v784_v40, 0.0 }
  0xfc   : > { %v11952_v38 = vpop.f32.mrb[2].mxu0  ;;  %v937_v49 = vmax.f32 %v779_v41, 0.0 }
  0xfd   : > { %v788_v39 = vpop.f32.mrb[3].mxu0  ;;  %v794_v47 = vadd.f32 %v11952_v38, %v14242_v37 }
  0xfe   : > { %v789_v50 = vadd.f32 %v14242_v37, %v788_v39 }
  0xff   : > { %v940_v58 = vmax.f32 %v794_v47, 0.0 }
 0x100   : > { %v11955_v42 = vpop.f32.mrb[4].mxu0  ;;  %v939_v60 = vmax.f32 %v789_v50, 0.0 }
 0x101   : > { %v804_v43 = vadd.f32 %v11955_v42, %v14242_v37  ;;  %v798_v44 = vpop.f32.mrb[5].mxu0 }
 0x102   : > { %v799_v45 = vadd.f32 %v14242_v37, %v798_v44 }
 0x103   : > { %v942_v48 = vmax.f32 %v804_v43, 0.0 }
 0x104   : > { %v941_v51 = vmax.f32 %v799_v45, 0.0  ;;  %v11958_v52 = vpop.f32.mrb[6].mxu0 }
 0x105   : > { %v970_v53 = vmax.f32 %v938_v46, %v942_v48  ;;  %v814_v54 = vadd.f32 %v11958_v52, %v14242_v37  ;;  %v808_v55 = vpop.f32.mrb[7].mxu0 }
 0x106   : > { %v969_v56 = vmax.f32 %v937_v49, %v941_v51  ;;  %v809_v57 = vadd.f32 %v14242_v37, %v808_v55 }
 0x107   : > { %v944_v59 = vmax.f32 %v814_v54, 0.0 }
 0x108   : > { %v943_v61 = vmax.f32 %v809_v57, 0.0  ;;  %v11961_v62 = vpop.f32.mrb[8].mxu0 }
 0x109   : > { %v972_v63 = vmax.f32 %v940_v58, %v944_v59  ;;  %v824_v0 = vadd.f32 %v11961_v62, %v14242_v37  ;;  %v818_v1 = vpop.f32.mrb[9].mxu0 }
 0x10a   : > { %v971_v2 = vmax.f32 %v939_v60, %v943_v61  ;;  %v819_v3 = vadd.f32 %v14242_v37, %v818_v1 }
 0x10b   : > { %v946_v4 = vmax.f32 %v824_v0, 0.0 }
 0x10c   : > { %v945_v5 = vmax.f32 %v819_v3, 0.0  ;;  %v11964_v6 = vpop.f32.mrb[10].mxu0 }
 0x10d   : > { %v974_v7 = vmax.f32 %v970_v53, %v946_v4  ;;  %v834_v8 = vadd.f32 %v11964_v6, %v14242_v37  ;;  %v828_v9 = vpop.f32.mrb[11].mxu0 }
 0x10e   : > { %v973_v10 = vmax.f32 %v969_v56, %v945_v5  ;;  %v829_v11 = vadd.f32 %v14242_v37, %v828_v9 }
 0x10f   : > { %v948_v12 = vmax.f32 %v834_v8, 0.0 }
 0x110   : > { %v947_v13 = vmax.f32 %v829_v11, 0.0  ;;  %v11967_v14 = vpop.f32.mrb[12].mxu0 }
 0x111   : > { %v976_v15 = vmax.f32 %v972_v63, %v948_v12  ;;  %v844_v16 = vadd.f32 %v11967_v14, %v14242_v37  ;;  %v838_v17 = vpop.f32.mrb[13].mxu0 }
 0x112   : > { %v975_v18 = vmax.f32 %v971_v2, %v947_v13  ;;  %v839_v19 = vadd.f32 %v14242_v37, %v838_v17 }
 0x113   : > { %v950_v20 = vmax.f32 %v844_v16, 0.0 }
 0x114   : > { %v949_v21 = vmax.f32 %v839_v19, 0.0  ;;  %v11970_v22 = vpop.f32.mrb[14].mxu0 }
 0x115   : > { %v978_v23 = vmax.f32 %v974_v7, %v950_v20  ;;  %v854_v24 = vadd.f32 %v11970_v22, %v14242_v37  ;;  %v848_v25 = vpop.f32.mrb[15].mxu0 }
 0x116   : > { %v977_v26 = vmax.f32 %v973_v10, %v949_v21  ;;  %v849_v27 = vadd.f32 %v14242_v37, %v848_v25  ;;  %v1002_v21 = vlaneseq }
 0x117   : > { %v952_v28 = vmax.f32 %v854_v24, 0.0 }
 0x118   : > { %v951_v29 = vmax.f32 %v849_v27, 0.0  ;;  %v11973_v30 = vpop.f32.mrb[16].mxu0 }
 0x119   : > { %v980_v31 = vmax.f32 %v976_v15, %v952_v28  ;;  %v864_v32 = vadd.f32 %v11973_v30, %v14242_v37  ;;  %v858_v35 = vpop.f32.mrb[17].mxu0  ;;  %v14283_v30 = vshrl.u32 %v1002_v21, 7 }
 0x11a   : > { %v979_v36 = vmax.f32 %v975_v18, %v951_v29  ;;  %v859_v38 = vadd.f32 %v14242_v37, %v858_v35 }
 0x11b   : > { %v954_v39 = vmax.f32 %v864_v32, 0.0 }
 0x11c   : > { %v953_v40 = vmax.f32 %v859_v38, 0.0  ;;  %v11976_v41 = vpop.f32.mrb[18].mxu0  ;;  %v14288_v38 = vld [vmem:[%s555_s2] ss:$0 sm:$0xff]  ;;  %s538_s2 = sand.u32 1, %s14003_s22  }
 0x11d   : > { %v982_v42 = vmax.f32 %v978_v23, %v954_v39  ;;  %v874_v43 = vadd.f32 %v11976_v41, %v14242_v37  ;;  %v868_v44 = vpop.f32.mrb[19].mxu0  ;;  %vm1049_vm4 = vcmp.eq.s32.totalorder %v14283_v30, %v14288_v38  ;;  %s10378_s20 = sshll.u32 %s538_s2, 8  ;;  %s17247_s25 = scalar_lea.sflag [#allocation5], %s538_s2 }
 0x11e   : > { %v981_v45 = vmax.f32 %v977_v26, %v953_v40  ;;  %v869_v46 = vadd.f32 %v14242_v37, %v868_v44  ;;  %s17045_s19 = scalar_lea.vmem [#allocation4], %s10378_s20 }
 0x11f   : > { %v956_v47 = vmax.f32 %v874_v43, 0.0  ;;  %v1021_v43 = vadd.s32 144, %v14283_v30  ;;  %s10225_s20 = sshll.u32 %s17045_s19, 4  ;;  %s17239_s20 = int_to_ptr.vmem [resolvable:$true] %s10225_s20 }
 0x120   : > { %v955_v48 = vmax.f32 %v869_v46, 0.0  ;;  %v11979_v49 = vpop.f32.mrb[20].mxu0  ;;  %p13956_p0 = scmp.lt.s32.totalorder %s17239_s20, %s13954_s3 }
 0x121   : > { %v984_v50 = vmax.f32 %v980_v31, %v956_v47  ;;  %v884_v51 = vadd.f32 %v11979_v49, %v14242_v37  ;;  %v878_v52 = vpop.f32.mrb[21].mxu0  ;;  %v1005_v47 = vadd.s32 16, %v14283_v30  ;;  %vm1067_vm8 = vcmp.eq.s32.totalorder %v1021_v43, %v14288_v38 }
 0x122   : > { %v983_v53 = vmax.f32 %v979_v36, %v955_v48  ;;  %v879_v54 = vadd.f32 %v14242_v37, %v878_v52  ;;  %v1020_v36 = vadd.s32 136, %v14283_v30  ;;  %v1022_v48 = vadd.s32 152, %v14283_v30 }
 0x123   : > { %v958_v55 = vmax.f32 %v884_v51, 0.0  ;;  %vm1051_vm9 = vcmp.eq.s32.totalorder %v1005_v47, %v14288_v38  ;;  %v1006_v51 = vadd.s32 24, %v14283_v30  ;;  %v1023_v52 = vadd.s32 160, %v14283_v30 }
 0x124   : > { %v957_v56 = vmax.f32 %v879_v54, 0.0  ;;  %v11982_v57 = vpop.f32.mrb[22].mxu0  ;;  %vm1066_vm5 = vcmp.eq.s32.totalorder %v1020_v36, %v14288_v38  ;;  %vm1068_vm10 = vcmp.eq.s32.totalorder %v1022_v48, %v14288_v38  ;;  %v1019_v43 = vadd.s32 128, %v14283_v30 }
 0x125   : > { %v986_v58 = vmax.f32 %v982_v42, %v958_v55  ;;  %v894_v59 = vadd.f32 %v11982_v57, %v14242_v37  ;;  %v888_v60 = vpop.f32.mrb[23].mxu0  ;;  %v1107_v46 = vsel %vm1066_vm5, 1.0, %v14015_v34  ;;  %v1109_v54 = vsel %vm1068_vm10, 1.0, %v14015_v34 }
 0x126   : > { %v985_v61 = vmax.f32 %v981_v45, %v957_v56  ;;  %v889_v62 = vadd.f32 %v14242_v37, %v888_v60  ;;  %v1090_v45 = vsel %vm1049_vm4, 1.0, %v14015_v34  ;;  %vm1052_vm11 = vcmp.eq.s32.totalorder %v1006_v51, %v14288_v38 }
 0x127   : > { %v960_v63 = vmax.f32 %v894_v59, 0.0  ;;  %v1007_v55 = vadd.s32 32, %v14283_v30  ;;  %vm1069_vm12 = vcmp.eq.s32.totalorder %v1023_v52, %v14288_v38  ;;  %v1024_v56 = vadd.s32 168, %v14283_v30 }
 0x128   : > { %v959_v0 = vmax.f32 %v889_v62, 0.0  ;;  %v11985_v1 = vpop.f32.mrb[24].mxu0  ;;  %v1093_v57 = vsel %vm1052_vm11, 1.0, %v14015_v34  ;;  %v1008_v59 = vadd.s32 40, %v14283_v30  ;;  %v1025_v60 = vadd.s32 176, %v14283_v30 }
 0x129   : > { %v988_v2 = vmax.f32 %v984_v50, %v960_v63  ;;  %v904_v3 = vadd.f32 %v11985_v1, %v14242_v37  ;;  %v898_v4 = vpop.f32.mrb[25].mxu0  ;;  %v1108_v50 = vsel %vm1067_vm8, 1.0, %v14015_v34  ;;  %vm1053_vm13 = vcmp.eq.s32.totalorder %v1007_v55, %v14288_v38 }
 0x12a   : > { %v987_v5 = vmax.f32 %v983_v53, %v959_v0  ;;  %v899_v6 = vadd.f32 %v14242_v37, %v898_v4  ;;  %v1092_v53 = vsel %vm1051_vm9, 1.0, %v14015_v34  ;;  %vm1070_vm14 = vcmp.eq.s32.totalorder %v1024_v56, %v14288_v38 }
 0x12b   : > { %v962_v7 = vmax.f32 %v904_v3, 0.0  ;;  %v1111_v62 = vsel %vm1070_vm14, 1.0, %v14015_v34  ;;  %vm1054_vm15 = vcmp.eq.s32.totalorder %v1008_v59, %v14288_v38  ;;  %v1009_v63 = vadd.s32 48, %v14283_v30 }
 0x12c   : > { %v961_v8 = vmax.f32 %v899_v6, 0.0  ;;  %v11988_v9 = vpop.f32.mrb[26].mxu0  ;;  %vm1071_vm0 = vcmp.eq.s32.totalorder %v1025_v60, %v14288_v38  ;;  %v1026_v0 = vadd.s32 184, %v14283_v30  ;;  %v1095_v1 = vsel %vm1054_vm15, 1.0, %v14015_v34 }
 0x12d   : > { %v990_v10 = vmax.f32 %v986_v58, %v962_v7  ;;  %v914_v11 = vadd.f32 %v11988_v9, %v14242_v37  ;;  %v908_v12 = vpop.f32.mrb[27].mxu0  ;;  %v1110_v58 = vsel %vm1069_vm12, 1.0, %v14015_v34  ;;  %vm1055_vm1 = vcmp.eq.s32.totalorder %v1009_v63, %v14288_v38  ;;  %v1699_v63 = vld [vmem:[%s17470_s5 + $0x8] sm:$0xff] }
 0x12e   : > { %v989_v13 = vmax.f32 %v985_v61, %v961_v8  ;;  %v909_v14 = vadd.f32 %v14242_v37, %v908_v12  ;;  %v1094_v61 = vsel %vm1053_vm13, 1.0, %v14015_v34  ;;  %v1010_v3 = vadd.s32 56, %v14283_v30 }
 0x12f   : > { %v964_v15 = vmax.f32 %v914_v11, 0.0  ;;  %vm1072_vm4 = vcmp.eq.s32.totalorder %v1026_v0, %v14288_v38  ;;  %v1027_v4 = vadd.s32 192, %v14283_v30  ;;  %v1011_v7 = vadd.s32 64, %v14283_v30 }
 0x130   : > { %v963_v16 = vmax.f32 %v909_v14, 0.0  ;;  %v11991_v17 = vpop.f32.mrb[28].mxu0  ;;  %v1113_v6 = vsel %vm1072_vm4, 1.0, %v14015_v34  ;;  %vm1056_vm5 = vcmp.eq.s32.totalorder %v1010_v3, %v14288_v38  ;;  %v1028_v8 = vadd.s32 200, %v14283_v30 }
 0x131   : > { %v992_v18 = vmax.f32 %v988_v2, %v964_v15  ;;  %v924_v19 = vadd.f32 %v11991_v17, %v14242_v37  ;;  %v918_v20 = vpop.f32.mrb[29].mxu0  ;;  %v1112_v2 = vsel %vm1071_vm0, 1.0, %v14015_v34  ;;  %v1097_v9 = vsel %vm1056_vm5, 1.0, %v14015_v34 }
 0x132   : > { %v991_v22 = vmax.f32 %v987_v5, %v963_v16  ;;  %v919_v23 = vadd.f32 %v14242_v37, %v918_v20  ;;  %v1096_v5 = vsel %vm1055_vm1, 1.0, %v14015_v34  ;;  %vm1057_vm8 = vcmp.eq.s32.totalorder %v1011_v7, %v14288_v38 }
 0x133   : > { %v966_v24 = vmax.f32 %v924_v19, 0.0  ;;  %v1012_v11 = vadd.s32 72, %v14283_v30  ;;  %vm1074_vm9 = vcmp.eq.s32.totalorder %v1028_v8, %v14288_v38  ;;  %v1029_v12 = vadd.s32 208, %v14283_v30 }
 0x134   : > { %v965_v25 = vmax.f32 %v919_v23, 0.0  ;;  %v11994_v26 = vpop.f32.mrb[30].mxu0  ;;  %v1115_v14 = vsel %vm1074_vm9, 1.0, %v14015_v34  ;;  %v1013_v15 = vadd.s32 80, %v14283_v30  ;;  %v1030_v16 = vadd.s32 216, %v14283_v30 }
 0x135   : > { %v994_v27 = vmax.f32 %v990_v10, %v966_v24  ;;  %v934_v28 = vadd.f32 %v11994_v26, %v14242_v37  ;;  %v928_v29 = vpop.f32.mrb[31].mxu0  ;;  %vm1058_vm10 = vcmp.eq.s32.totalorder %v1012_v11, %v14288_v38  ;;  %vm1075_vm11 = vcmp.eq.s32.totalorder %v1029_v12, %v14288_v38 }
 0x136   : > { %v993_v31 = vmax.f32 %v989_v13, %v965_v25  ;;  %v929_v32 = vadd.f32 %v14242_v37, %v928_v29  ;;  %v1004_v37 = vadd.s32 8, %v14283_v30  ;;  %v1098_v13 = vsel %vm1057_vm8, 1.0, %v14015_v34 }
 0x137   : > { %999 = vst.msk [vmem:[%s560_s29 + $0x8] sm:$0xff] %vm997_vm3, %v994_v27  ;;  %v968_v35 = vmax.f32 %v934_v28, 0.0  ;;  %v1099_v17 = vsel %vm1058_vm10, 1.0, %v14015_v34  ;;  %vm1059_vm12 = vcmp.eq.s32.totalorder %v1013_v15, %v14288_v38  ;;  %v1014_v19 = vadd.s32 88, %v14283_v30 }
 0x138   : > { %998 = vst.msk [vmem:[%s560_s29] sm:$0xff] %vm997_vm3, %v993_v31  ;;  %v13211_v39 = vpack.c.bf16 %v994_v27, %v993_v31  ;;  %v967_v40 = vmax.f32 %v929_v32, 0.0  ;;  %vm1050_vm7 = vcmp.eq.s32.totalorder %v1004_v37, %v14288_v38  ;;  %vm1076_vm13 = vcmp.eq.s32.totalorder %v1030_v16, %v14288_v38 }
 0x139   : > { %v996_v41 = vmax.f32 %v992_v18, %v968_v35  ;;  %v1091_v49 = vsel %vm1050_vm7, 1.0, %v14015_v34  ;;  %vm1073_vm7 = vcmp.eq.s32.totalorder %v1027_v4, %v14288_v38  ;;  %v1116_v18 = vsel %vm1075_vm11, 1.0, %v14015_v34 }
 0x13a   : > { %v995_v42 = vmax.f32 %v991_v22, %v967_v40  ;;  %13212 = vmatpush3.bf16.msra.mxu0 %v13211_v39  ;;  %13390 = vmatpush3.bf16.msra.mxu1 %v13211_v39  ;;  %v1114_v10 = vsel %vm1073_vm7, 1.0, %v14015_v34  ;;  %v1031_v20 = vadd.s32 224, %v14283_v30  ;;  %v1100_v21 = vsel %vm1059_vm12, 1.0, %v14015_v34 }
 0x13b   : > { %1001 = vst.msk [vmem:[%s560_s29 + $0x18] sm:$0xff] %vm997_vm3, %v996_v41  ;;  %13213 = vmatprep.subr.bf16.mxu0 %v17483_v33  ;;  %13389 = vmatprep.subr.bf16.mxu1 %v17483_v33  ;;  %v1117_v22 = vsel %vm1076_vm13, 1.0, %v14015_v34  ;;  %vm1060_vm14 = vcmp.eq.s32.totalorder %v1014_v19, %v14288_v38  ;;  %v1015_v23 = vadd.s32 96, %v14283_v30  ;;  %v1032_v24 = vadd.s32 232, %v14283_v30 }
 0x13c   : > { %1000 = vst.msk [vmem:[%s560_s29 + $0x10] sm:$0xff] %vm997_vm3, %v995_v42  ;;  %v13214_v44 = vpack.c.bf16 %v996_v41, %v995_v42  ;;  %vm1077_vm15 = vcmp.eq.s32.totalorder %v1031_v20, %v14288_v38  ;;  %v1101_v25 = vsel %vm1060_vm14, 1.0, %v14015_v34  ;;  %v1016_v27 = vadd.s32 104, %v14283_v30 }
 0x13d   : > { %v1118_v26 = vsel %vm1077_vm15, 1.0, %v14015_v34  ;;  %vm1061_vm0 = vcmp.eq.s32.totalorder %v1015_v23, %v14288_v38  ;;  %vm1078_vm1 = vcmp.eq.s32.totalorder %v1032_v24, %v14288_v38  ;;  %v1033_v28 = vadd.s32 240, %v14283_v30 }
 0x13e   : > { %13215 = vmatpush3.bf16.msra.mxu0 %v13214_v44  ;;  %13391 = vmatpush3.bf16.msra.mxu1 %v13214_v44  ;;  %v1102_v29 = vsel %vm1061_vm0, 1.0, %v14015_v34  ;;  %v1119_v31 = vsel %vm1078_vm1, 1.0, %v14015_v34  ;;  %vm1062_vm4 = vcmp.eq.s32.totalorder %v1016_v27, %v14288_v38  ;;  %v1017_v32 = vadd.s32 112, %v14283_v30 }
 0x13f   : > { %13252 = vmatprep.subr.bf16.mxu1 %v17483_v33  ;;  %vm1079_vm5 = vcmp.eq.s32.totalorder %v1033_v28, %v14288_v38  ;;  %v1034_v35 = vadd.s32 248, %v14283_v30  ;;  %v1103_v36 = vsel %vm1062_vm4, 1.0, %v14015_v34  ;;  %v1018_v40 = vadd.s32 120, %v14283_v30 }
 0x140   : > { %v1120_v39 = vsel %vm1079_vm5, 1.0, %v14015_v34  ;;  %vm1063_vm7 = vcmp.eq.s32.totalorder %v1017_v32, %v14288_v38  ;;  %v1035_v41 = vadd.s32 256, %v14283_v30  ;;  %v1036_v44 = vadd.s32 264, %v14283_v30 }
 0x141   : > { %12004 = vmatmul.mubr.msk.f32.vlgmr.msra.gmra.mrb[32].mxu0 %vm1131_vm6, %v1090_v45  ;;  %12055 = vmatmul.mubr.msk.f32.vlgmr.msra.gmra.mrb[0].mxu1 %vm1131_vm6, %v1107_v46  ;;  %vm1080_vm8 = vcmp.eq.s32.totalorder %v1034_v35, %v14288_v38  ;;  %v1104_v42 = vsel %vm1063_vm7, 1.0, %v14015_v34  ;;  %vm1064_vm9 = vcmp.eq.s32.totalorder %v1018_v40, %v14288_v38  ;;  %vm1065_vm11 = vcmp.eq.s32.totalorder %v1019_v43, %v14288_v38 }
 0x142   : > { %12006 = vmatprep.mubr.msk.f32.mxu0 %vm14014_vm2, %v14015_v34  ;;  %12057 = vmatprep.mubr.msk.f32.mxu1 %vm14014_vm2, %v14015_v34  ;;  %v1121_v37 = vsel %vm1080_vm8, 1.0, %v14015_v34  ;;  %vm1081_vm10 = vcmp.eq.s32.totalorder %v1035_v41, %v14288_v38  ;;  %v1105_v45 = vsel %vm1064_vm9, 1.0, %v14015_v34  ;;  %vm1082_vm12 = vcmp.eq.s32.totalorder %v1036_v44, %v14288_v38 }
 0x143   : > { %v1122_v46 = vsel %vm1081_vm10, 1.0, %v14015_v34  ;;  %v1037_v47 = vadd.s32 272, %v14283_v30  ;;  %v1106_v48 = vsel %vm1065_vm11, 1.0, %v14015_v34  ;;  %v1039_v56 = vadd.s32 288, %v14283_v30 }
 0x144   : > { %v1041_v60 = vadd.s32 304, %v14283_v30  ;;  %vm1527_vm4 = vcmask 123904   ;;  %vm1530_vm5 = vcmask 130050   ;;  %vm1533_vm8 = vcmask 125952  }
 0x145   : > { %12007 = vmatmul.mubr.msk.f32.gmra.mrb[34].mxu0 %vm1131_vm6, %v1091_v49  ;;  %12058 = vmatmul.mubr.msk.f32.gmra.mrb[2].mxu1 %vm1131_vm6, %v1108_v50  ;;  %v1123_v49 = vsel %vm1082_vm12, 1.0, %v14015_v34  ;;  %vm1083_vm13 = vcmp.eq.s32.totalorder %v1037_v47, %v14288_v38  ;;  %v1038_v50 = vadd.s32 280, %v14283_v30  ;;  %vm1085_vm15 = vcmp.eq.s32.totalorder %v1039_v56, %v14288_v38 }
 0x146   : > { %12009 = vmatprep.mubr.msk.f32.mxu0 %vm14014_vm2, %v14015_v34  ;;  %12060 = vmatprep.mubr.msk.f32.mxu1 %vm14014_vm2, %v14015_v34  ;;  %v1124_v51 = vsel %vm1083_vm13, 1.0, %v14015_v34  ;;  %vm1087_vm1 = vcmp.eq.s32.totalorder %v1041_v60, %v14288_v38  ;;  %vm1536_vm9 = vcmask 130052   ;;  %vm1542_vm10 = vcmask 130054   ;;  %v10529_v60 = vld [vmem:[%s17470_s5 + $0x20] sm:$0xff] }
 0x147   : > { %vm1084_vm14 = vcmp.eq.s32.totalorder %v1038_v50, %v14288_v38  ;;  %vm5521_vm12 = vcmask 261122   ;;  %vm5524_vm13 = vcmask 257024  }
 0x148   : > { %v1125_v52 = vsel %vm1084_vm14, 1.0, %v14015_v34  ;;  %vm5527_vm14 = vcmask 261124  }
 0x149   : > { %12010 = vmatmul.mubr.msk.f32.gmra.mrb[36].mxu0 %vm1131_vm6, %v1092_v53  ;;  %12061 = vmatmul.mubr.msk.f32.gmra.mrb[4].mxu1 %vm1131_vm6, %v1109_v54  ;;  %v10463_v53 = vld [vmem:[%s17470_s5 + $0x10] sm:$0xff]  ;;  %v10464_v54 = vld [vmem:[%s17470_s5 + $0x18] sm:$0xff] }
 0x14a   : > { %12012 = vmatprep.mubr.msk.f32.mxu0 %vm14014_vm2, %v14015_v34  ;;  %12063 = vmatprep.mubr.msk.f32.mxu1 %vm14014_vm2, %v14015_v34  ;;  %v13216_v55 = vpack.c.bf16 %v10464_v54, %v10463_v53 }
 0x14c   : > { %13217 = vmatprep.subr.bf16.mxu0 %v13216_v55 }
 0x14d   : > { %12013 = vmatmul.mubr.msk.f32.gmra.mrb[38].mxu0 %vm1131_vm6, %v1093_v57  ;;  %12064 = vmatmul.mubr.msk.f32.gmra.mrb[6].mxu1 %vm1131_vm6, %v1110_v58  ;;  %v1126_v57 = vsel %vm1085_vm15, 1.0, %v14015_v34  ;;  %v1040_v58 = vadd.s32 296, %v14283_v30  ;;  %vm5530_vm15 = vcmask 259072  }
 0x14e   : > { %12015 = vmatprep.mubr.msk.f32.mxu0 %vm14014_vm2, %v14015_v34  ;;  %12066 = vmatprep.mubr.msk.f32.mxu1 %vm14014_vm2, %v14015_v34 }
 0x14f   : > { %13219 = vmatpush3.bf16.msra.mxu0 %v13216_v55  ;;  %vm1086_vm0 = vcmp.eq.s32.totalorder %v1040_v58, %v14288_v38 }
 0x150   : > { %v1127_v59 = vsel %vm1086_vm0, 1.0, %v14015_v34  ;;  %vm5533_vm0 = vcmask 261126  }
 0x151   : > { %12016 = vmatmul.mubr.msk.f32.gmra.mrb[40].mxu0 %vm1131_vm6, %v1094_v61  ;;  %12067 = vmatmul.mubr.msk.f32.gmra.mrb[8].mxu1 %vm1131_vm6, %v1111_v62  ;;  %v1128_v61 = vsel %vm1087_vm1, 1.0, %v14015_v34  ;;  %v1698_v62 = vld [vmem:[%s17470_s5] sm:$0xff]  ;;  %vm9269_vm1 = vcmask 523264  }
 0x152   : > { %12018 = vmatprep.mubr.msk.f32.mxu0 %vm14014_vm2, %v14015_v34  ;;  %12069 = vmatprep.mubr.msk.f32.mxu1 %vm14014_vm2, %v14015_v34  ;;  %v13220_v0 = vpack.c.bf16 %v1699_v63, %v1698_v62 }
 0x154   : > { %13221 = vmatprep.subr.bf16.mxu0 %v13220_v0 }
 0x155   : > { %12019 = vmatmul.mubr.msk.f32.gmra.mrb[42].mxu0 %vm1131_vm6, %v1095_v1  ;;  %12070 = vmatmul.mubr.msk.f32.gmra.mrb[10].mxu1 %vm1131_vm6, %v1112_v2 }
 0x156   : > { %12021 = vmatprep.mubr.msk.f32.mxu0 %vm14014_vm2, %v14015_v34  ;;  %12072 = vmatprep.mubr.msk.f32.mxu1 %vm14014_vm2, %v14015_v34 }
 0x159   : > { %12022 = vmatmul.mubr.msk.f32.gmra.mrb[44].mxu0 %vm1131_vm6, %v1096_v5  ;;  %12073 = vmatmul.mubr.msk.f32.gmra.mrb[12].mxu1 %vm1131_vm6, %v1113_v6 }
 0x15a   : > { %12024 = vmatprep.mubr.msk.f32.mxu0 %vm14014_vm2, %v14015_v34  ;;  %12075 = vmatprep.mubr.msk.f32.mxu1 %vm14014_vm2, %v14015_v34 }
 0x15d   : > { %12025 = vmatmul.mubr.msk.f32.gmra.mrb[46].mxu0 %vm1131_vm6, %v1097_v9  ;;  %12076 = vmatmul.mubr.msk.f32.gmra.mrb[14].mxu1 %vm1131_vm6, %v1114_v10 }
 0x15e   : > { %12027 = vmatprep.mubr.msk.f32.mxu0 %vm14014_vm2, %v14015_v34  ;;  %12078 = vmatprep.mubr.msk.f32.mxu1 %vm14014_vm2, %v14015_v34 }
 0x161   : > { %12028 = vmatmul.mubr.msk.f32.gmra.mrb[48].mxu0 %vm1131_vm6, %v1098_v13  ;;  %12079 = vmatmul.mubr.msk.f32.gmra.mrb[16].mxu1 %vm1131_vm6, %v1115_v14  ;;  %v1042_v13 = vadd.s32 312, %v14283_v30 }
 0x162   : > { %12030 = vmatprep.mubr.msk.f32.mxu0 %vm14014_vm2, %v14015_v34  ;;  %12081 = vmatprep.mubr.msk.f32.mxu1 %vm14014_vm2, %v14015_v34 }
 0x163   : > { %vm1088_vm7 = vcmp.eq.s32.totalorder %v1042_v13, %v14288_v38 }
 0x164   : > { %v1129_v19 = vsel %vm1088_vm7, 1.0, %v14015_v34 }
 0x165   : > { %12031 = vmatmul.mubr.msk.f32.gmra.mrb[50].mxu0 %vm1131_vm6, %v1099_v17  ;;  %12082 = vmatmul.mubr.msk.f32.gmra.mrb[18].mxu1 %vm1131_vm6, %v1116_v18 }
 0x166   : > { %12033 = vmatprep.mubr.msk.f32.mxu0 %vm14014_vm2, %v14015_v34  ;;  %12084 = vmatprep.mubr.msk.f32.mxu1 %vm14014_vm2, %v14015_v34 }
 0x169   : > { %12034 = vmatmul.mubr.msk.f32.gmra.mrb[52].mxu0 %vm1131_vm6, %v1100_v21  ;;  %12085 = vmatmul.mubr.msk.f32.gmra.mrb[20].mxu1 %vm1131_vm6, %v1117_v22 }
 0x16a   : > { %12036 = vmatprep.mubr.msk.f32.mxu0 %vm14014_vm2, %v14015_v34  ;;  %12087 = vmatprep.mubr.msk.f32.mxu1 %vm14014_vm2, %v14015_v34 }
 0x16d   : > { %12037 = vmatmul.mubr.msk.f32.gmra.mrb[54].mxu0 %vm1131_vm6, %v1101_v25  ;;  %12088 = vmatmul.mubr.msk.f32.gmra.mrb[22].mxu1 %vm1131_vm6, %v1118_v26 }
 0x16e   : > { %12039 = vmatprep.mubr.msk.f32.mxu0 %vm14014_vm2, %v14015_v34  ;;  %12090 = vmatprep.mubr.msk.f32.mxu1 %vm14014_vm2, %v14015_v34 }
 0x171   : > { %12040 = vmatmul.mubr.msk.f32.gmra.mrb[56].mxu0 %vm1131_vm6, %v1102_v29  ;;  %12091 = vmatmul.mubr.msk.f32.gmra.mrb[24].mxu1 %vm1131_vm6, %v1119_v31 }
 0x172   : > { %12042 = vmatprep.mubr.msk.f32.mxu0 %vm14014_vm2, %v14015_v34  ;;  %12093 = vmatprep.mubr.msk.f32.mxu1 %vm14014_vm2, %v14015_v34 }
 0x175   : > { %12043 = vmatmul.mubr.msk.f32.gmra.mrb[58].mxu0 %vm1131_vm6, %v1103_v36  ;;  %12094 = vmatmul.mubr.msk.f32.gmra.mrb[26].mxu1 %vm1131_vm6, %v1120_v39 }
 0x176   : > { %12045 = vmatprep.mubr.msk.f32.mxu0 %vm14014_vm2, %v14015_v34  ;;  %12096 = vmatprep.mubr.msk.f32.mxu1 %vm14014_vm2, %v14015_v34 }
 0x179   : > { %12046 = vmatmul.mubr.msk.f32.gmra.mrb[60].mxu0 %vm1131_vm6, %v1104_v42  ;;  %12097 = vmatmul.mubr.msk.f32.gmra.mrb[28].mxu1 %vm1131_vm6, %v1121_v37 }
 0x17a   : > { %12048 = vmatprep.mubr.msk.f32.mxu0 %vm14014_vm2, %v14015_v34  ;;  %12099 = vmatprep.mubr.msk.f32.mxu1 %vm14014_vm2, %v14015_v34 }
 0x17d   : > { %12049 = vmatmul.mubr.msk.f32.gmra.mrb[62].mxu0 %vm1131_vm6, %v1105_v45  ;;  %12100 = vmatmul.mubr.msk.f32.gmra.mrb[30].mxu1 %vm1131_vm6, %v1122_v46 }
 0x17e   : > { %12051 = vmatprep.mubr.msk.f32.mxu0 %vm14014_vm2, %v14015_v34  ;;  %12102 = vmatprep.mubr.msk.f32.mxu1 %vm14014_vm2, %v14015_v34 }
 0x181   : > { %12052 = vmatmul.mubr.msk.f32.gmra.mrb[64].mxu0 %vm1131_vm6, %v1106_v48  ;;  %12103 = vmatmul.mubr.msk.f32.gmra.mrb[32].mxu1 %vm1131_vm6, %v1123_v49 }
 0x182   : > { %12105 = vmatprep.mubr.msk.f32.mxu1 %vm14014_vm2, %v14015_v34 }
 0x185   : > { %12106 = vmatmul.mubr.msk.f32.gmra.mrb[34].mxu1 %vm1131_vm6, %v1124_v51 }
 0x186   : > { %12108 = vmatprep.mubr.msk.f32.mxu1 %vm14014_vm2, %v14015_v34 }
 0x189   : > { %12109 = vmatmul.mubr.msk.f32.gmra.mrb[36].mxu1 %vm1131_vm6, %v1125_v52 }
 0x18a   : > { %12111 = vmatprep.mubr.msk.f32.mxu1 %vm14014_vm2, %v14015_v34 }
 0x18d   : > { %12112 = vmatmul.mubr.msk.f32.gmra.mrb[38].mxu1 %vm1131_vm6, %v1126_v57 }
 0x18e   : > { %12114 = vmatprep.mubr.msk.f32.mxu1 %vm14014_vm2, %v14015_v34 }
 0x191   : > { %12115 = vmatmul.mubr.msk.f32.gmra.mrb[40].mxu1 %vm1131_vm6, %v1127_v59 }
 0x192   : > { %12117 = vmatprep.mubr.msk.f32.mxu1 %vm14014_vm2, %v14015_v34 }
 0x195   : > { %12118 = vmatmul.mubr.msk.f32.gmra.mrb[42].mxu1 %vm1131_vm6, %v1128_v61  ;;  %v10530_v61 = vld [vmem:[%s17470_s5 + $0x28] sm:$0xff] }
 0x196   : > { %12120 = vmatprep.mubr.msk.f32.mxu1 %vm14014_vm2, %v14015_v34  ;;  %v14650_v62 = vpack.c.bf16 %v10530_v61, %v10529_v60 }
 0x199   : > { %12121 = vmatmul.mubr.msk.f32.gmra.mrb[44].mxu1 %vm1131_vm6, %v1129_v19 }
 0x19a   : > { %12123 = vmatprep.mubr.msk.f32.mxu1 %vm14014_vm2, %v14015_v34  ;;  %vm1539_vm2 = vcmask 128000  }
 0x214   : > { %v1321_v1 = vpop.f32.mrb[32].mxu0  ;;  %v1406_v2 = vpop.f32.mrb[0].mxu1 }
 0x215   : > { %1525 = vst.msk [vmem:[#allocation2] sm:$0xff] %vm997_vm3, %v1321_v1  ;;  %v12005_v3 = vpop.f32.mrb[33].mxu0  ;;  %1561 = vst.msk [vmem:[#allocation2 + $0xb2] sm:$0xff] %vm997_vm3, %v1406_v2  ;;  %v12056_v4 = vpop.f32.mrb[1].mxu1 }
 0x218   : > { %v1326_v5 = vpop.f32.mrb[34].mxu0  ;;  %v1411_v6 = vpop.f32.mrb[2].mxu1 }
 0x219   : > { %1526 = vst.msk [vmem:[#allocation2 + $0x8] sm:$0xff] %vm997_vm3, %v1326_v5  ;;  %v12008_v7 = vpop.f32.mrb[35].mxu0  ;;  %1563 = vst.msk [vmem:[#allocation2 + $0xc0] sm:$0xff] %vm997_vm3, %v1411_v6  ;;  %v12059_v8 = vpop.f32.mrb[3].mxu1 }
 0x21c   : > { %v1331_v9 = vpop.f32.mrb[36].mxu0  ;;  %v1416_v10 = vpop.f32.mrb[4].mxu1 }
 0x21d   : > { %1528 = vst.msk [vmem:[#allocation2 + $0x10] sm:$0x3] %vm1527_vm4, %v1331_v9  ;;  %v12011_v11 = vpop.f32.mrb[37].mxu0  ;;  %v12062_v12 = vpop.f32.mrb[5].mxu1 }
 0x21e   : > { %1531 = vst.msk [vmem:[#allocation2 + $0x16] sm:$0xfc] %vm1530_vm5, %v1331_v9 }
 0x21f   : > { %1564 = vst.msk [vmem:[#allocation2 + $0xc8] sm:$0xff] %vm997_vm3, %v1416_v10 }
 0x220   : > { %v1336_v14 = vpop.f32.mrb[38].mxu0  ;;  %v1700_v15 = vld [vmem:[#allocation2 + $0x1] sm:$0xff]  ;;  %v1421_v16 = vpop.f32.mrb[6].mxu1 }
 0x221   : > { %1532 = vst.msk [vmem:[#allocation2 + $0x1e] sm:$0xff] %vm997_vm3, %v1336_v14  ;;  %12130 = vmatprep.mubr.msk.f32.mxu0 %vm997_vm3, %v1700_v15  ;;  %v12014_v17 = vpop.f32.mrb[39].mxu0  ;;  %v12065_v18 = vpop.f32.mrb[7].mxu1 }
 0x222   : > { %1565 = vst.msk [vmem:[#allocation2 + $0xd0] sm:$0x3] %vm1527_vm4, %v1421_v16 }
 0x223   : > { %1567 = vst.msk [vmem:[#allocation2 + $0xd6] sm:$0xfc] %vm1530_vm5, %v1421_v16 }
 0x224   : > { %v1341_v20 = vpop.f32.mrb[40].mxu0  ;;  %v1701_v21 = vld [vmem:[#allocation2 + $0x9] sm:$0xff]  ;;  %v1426_v23 = vpop.f32.mrb[8].mxu1 }
 0x225   : > { %1534 = vst.msk [vmem:[#allocation2 + $0x26] sm:$0xf] %vm1533_vm8, %v1341_v20  ;;  %12131 = vmatmul.mubr.msk.f32.vlgmr.msra.gmra.mrb[66].mxu0 %vm997_vm3, %v1701_v21  ;;  %v12017_v24 = vpop.f32.mrb[41].mxu0  ;;  %v12068_v25 = vpop.f32.mrb[9].mxu1 }
 0x226   : > { %v14560_v22 = vld [vmem:[#allocation2 + $0xc1] sm:$0xff]  ;;  %1537 = vst.msk [vmem:[#allocation2 + $0x2c] sm:$0xf0] %vm1536_vm9, %v1341_v20  ;;  %13223 = vmatpush3.bf16.msra.mxu0 %v13220_v0 }
 0x227   : > { %1648 = vst.msk [vmem:[%s14558_s23 + $0x70] sm:$0xff] %vm997_vm3, %v14560_v22  ;;  %1568 = vst.msk [vmem:[#allocation2 + $0xde] sm:$0xff] %vm997_vm3, %v1426_v23  ;;  %13225 = vmatprep.subr.bf16.mxu0 %v14650_v62 }
 0x228   : > { %v14571_v26 = vld [vmem:[#allocation2 + $0x19] sm:$0xff]  ;;  %v1346_v27 = vpop.f32.mrb[42].mxu0  ;;  %v1431_v29 = vpop.f32.mrb[10].mxu1 }
 0x229   : > { %v14573_v28 = vld [vmem:[#allocation2 + $0xc9] sm:$0xff]  ;;  %1634 = vst.msk [vmem:[%s14558_s23] sm:$0xff] %vm997_vm3, %v14571_v26  ;;  %1538 = vst.msk [vmem:[#allocation2 + $0x34] sm:$0xff] %vm997_vm3, %v1346_v27  ;;  %12133 = vmatprep.mubr.msk.f32.mxu0 %vm997_vm3, %v14571_v26  ;;  %v12020_v31 = vpop.f32.mrb[43].mxu0  ;;  %v12071_v32 = vpop.f32.mrb[11].mxu1 }
 0x22a   : > { %1649 = vst.msk [vmem:[%s14558_s23 + $0x78] sm:$0xff] %vm997_vm3, %v14573_v28 }
 0x22b   : > { %1569 = vst.msk [vmem:[#allocation2 + $0xe6] sm:$0xf] %vm1533_vm8, %v1431_v29 }
 0x22c   : > { %1571 = vst.msk [vmem:[#allocation2 + $0xec] sm:$0xf0] %vm1536_vm9, %v1431_v29  ;;  %v14586_v35 = vld [vmem:[#allocation2 + $0x21] sm:$0xff]  ;;  %v1351_v36 = vpop.f32.mrb[44].mxu0  ;;  %v1436_v40 = vpop.f32.mrb[12].mxu1 }
 0x22d   : > { %1635 = vst.msk [vmem:[%s14558_s23 + $0x8] sm:$0xff] %vm997_vm3, %v14586_v35  ;;  %v12023_v41 = vpop.f32.mrb[45].mxu0  ;;  %12134 = vmatmul.mubr.msk.f32.gmra.mrb[68].mxu0 %vm997_vm3, %v14586_v35  ;;  %1572 = vst.msk [vmem:[#allocation2 + $0xf4] sm:$0xff] %vm997_vm3, %v1436_v40  ;;  %v12074_v42 = vpop.f32.mrb[13].mxu1 }
 0x22e   : > { %v14588_v39 = vld [vmem:[#allocation2 + $0xd9] sm:$0xff]  ;;  %1540 = vst.msk [vmem:[#allocation2 + $0x3c] sm:$0x3f] %vm1539_vm2, %v1351_v36 }
 0x22f   : > { %1543 = vst.msk [vmem:[#allocation2 + $0x42] sm:$0xc0] %vm1542_vm10, %v1351_v36 }
 0x230   : > { %1650 = vst.msk [vmem:[%s14558_s23 + $0x80] sm:$0xff] %vm997_vm3, %v14588_v39  ;;  %v14601_v37 = vld [vmem:[#allocation2 + $0x31] sm:$0xff]  ;;  %v1356_v43 = vpop.f32.mrb[46].mxu0  ;;  %v1441_v45 = vpop.f32.mrb[14].mxu1 }
 0x231   : > { %1636 = vst.msk [vmem:[%s14558_s23 + $0x10] sm:$0xff] %vm997_vm3, %v14601_v37  ;;  %1544 = vst.msk [vmem:[#allocation2 + $0x4a] sm:$0xff] %vm997_vm3, %v1356_v43  ;;  %v12026_v46 = vpop.f32.mrb[47].mxu0  ;;  %12136 = vmatprep.mubr.msk.f32.mxu0 %vm997_vm3, %v14601_v37  ;;  %v12077_v47 = vpop.f32.mrb[15].mxu1 }
 0x232   : > { %v14603_v44 = vld [vmem:[#allocation2 + $0xe1] sm:$0xff]  ;;  %1573 = vst.msk [vmem:[#allocation2 + $0xfc] sm:$0x3f] %vm1539_vm2, %v1441_v45 }
 0x233   : > { %1651 = vst.msk [vmem:[%s14558_s23 + $0x88] sm:$0xff] %vm997_vm3, %v14603_v44 }
 0x234   : > { %1575 = vst.msk [vmem:[#allocation2 + $0x102] sm:$0xc0] %vm1542_vm10, %v1441_v45  ;;  %v1361_v49 = vpop.f32.mrb[48].mxu0  ;;  %v14618_v50 = vld [vmem:[#allocation2 + $0xf1] sm:$0xff]  ;;  %v1446_v51 = vpop.f32.mrb[16].mxu1 }
 0x235   : > { %v14616_v48 = vld [vmem:[#allocation2 + $0x39] sm:$0xff]  ;;  %1545 = vst.msk [vmem:[#allocation2 + $0x52] sm:$0xff] %vm997_vm3, %v1361_v49  ;;  %v12029_v52 = vpop.f32.mrb[49].mxu0  ;;  %1652 = vst.msk [vmem:[%s14558_s23 + $0x90] sm:$0xff] %vm997_vm3, %v14618_v50  ;;  %v12080_v53 = vpop.f32.mrb[17].mxu1 }
 0x236   : > { %1637 = vst.msk [vmem:[%s14558_s23 + $0x18] sm:$0xff] %vm997_vm3, %v14616_v48  ;;  %12137 = vmatmul.mubr.msk.f32.gmra.mrb[70].mxu0 %vm997_vm3, %v14616_v48  ;;  %1576 = vst.msk [vmem:[#allocation2 + $0x10a] sm:$0xff] %vm997_vm3, %v1446_v51 }
 0x238   : > { %v14630_v54 = vld [vmem:[#allocation2 + $0x49] sm:$0xff]  ;;  %v1366_v55 = vpop.f32.mrb[50].mxu0  ;;  %v1451_v57 = vpop.f32.mrb[18].mxu1 }
 0x239   : > { %v14632_v56 = vld [vmem:[#allocation2 + $0xf9] sm:$0xff]  ;;  %1638 = vst.msk [vmem:[%s14558_s23 + $0x20] sm:$0xff] %vm997_vm3, %v14630_v54  ;;  %1547 = vst.msk [vmem:[#allocation2 + $0x60] sm:$0xff] %vm997_vm3, %v1366_v55  ;;  %v12032_v58 = vpop.f32.mrb[51].mxu0  ;;  %12139 = vmatprep.mubr.msk.f32.mxu0 %vm997_vm3, %v14630_v54  ;;  %v12083_v59 = vpop.f32.mrb[19].mxu1 }
 0x23a   : > { %1653 = vst.msk [vmem:[%s14558_s23 + $0x98] sm:$0xff] %vm997_vm3, %v14632_v56  ;;  %1577 = vst.msk [vmem:[#allocation2 + $0x112] sm:$0xff] %vm997_vm3, %v1451_v57 }
 0x23c   : > { %v14652_v63 = vld [vmem:[#allocation2 + $0x51] sm:$0xff]  ;;  %v1371_v0 = vpop.f32.mrb[52].mxu0  ;;  %v1456_v2 = vpop.f32.mrb[20].mxu1 }
 0x23d   : > { %v14654_v1 = vld [vmem:[#allocation2 + $0x109] sm:$0xff]  ;;  %1639 = vst.msk [vmem:[%s14558_s23 + $0x28] sm:$0xff] %vm997_vm3, %v14652_v63  ;;  %1548 = vst.msk [vmem:[#allocation2 + $0x68] sm:$0xff] %vm997_vm3, %v1371_v0  ;;  %v12035_v3 = vpop.f32.mrb[53].mxu0  ;;  %12140 = vmatmul.mubr.msk.f32.gmra.mrb[72].mxu0 %vm997_vm3, %v14652_v63  ;;  %v12086_v4 = vpop.f32.mrb[21].mxu1 }
 0x23e   : > { %1654 = vst.msk [vmem:[%s14558_s23 + $0xa0] sm:$0xff] %vm997_vm3, %v14654_v1  ;;  %1579 = vst.msk [vmem:[#allocation2 + $0x120] sm:$0xff] %vm997_vm3, %v1456_v2  ;;  %v10563_v4 = vld [vmem:[%s17470_s5 + $0x30] sm:$0xff] }
 0x240   : > { %v1376_v5 = vpop.f32.mrb[54].mxu0  ;;  %v1461_v7 = vpop.f32.mrb[22].mxu1 }
 0x241   : > { %v14667_v6 = vld [vmem:[#allocation2 + $0x111] sm:$0xff]  ;;  %1549 = vst.msk [vmem:[#allocation2 + $0x70] sm:$0x3] %vm1527_vm4, %v1376_v5  ;;  %v12038_v8 = vpop.f32.mrb[55].mxu0  ;;  %v12089_v9 = vpop.f32.mrb[23].mxu1 }
 0x242   : > { %1551 = vst.msk [vmem:[#allocation2 + $0x76] sm:$0xfc] %vm1530_vm5, %v1376_v5  ;;  %v10564_v5 = vld [vmem:[%s17470_s5 + $0x38] sm:$0xff]  ;;  %v1667_v9 = vld [vmem:[#allocation2 + $0x8] sm:$0xff] }
 0x243   : > { %1655 = vst.msk [vmem:[%s14558_s23 + $0xa8] sm:$0xff] %vm997_vm3, %v14667_v6  ;;  %1580 = vst.msk [vmem:[#allocation2 + $0x128] sm:$0xff] %vm997_vm3, %v1461_v7  ;;  %v1666_v7 = vld [vmem:[#allocation2] sm:$0xff]  ;;  %v14827_v8 = vpack.c.bf16 %v10564_v5, %v10563_v4 }
 0x244   : > { %v14675_v10 = vld [vmem:[#allocation2 + $0x61] sm:$0xff]  ;;  %v1381_v11 = vpop.f32.mrb[56].mxu0  ;;  %v1466_v12 = vpop.f32.mrb[24].mxu1 }
 0x245   : > { %1640 = vst.msk [vmem:[%s14558_s23 + $0x30] sm:$0xff] %vm997_vm3, %v14675_v10  ;;  %1552 = vst.msk [vmem:[#allocation2 + $0x7e] sm:$0xff] %vm997_vm3, %v1381_v11  ;;  %v12041_v13 = vpop.f32.mrb[57].mxu0  ;;  %12142 = vmatprep.mubr.msk.f32.mxu0 %vm997_vm3, %v14675_v10  ;;  %v12092_v14 = vpop.f32.mrb[25].mxu1  ;;  %v14830_v11 = vld [vmem:[#allocation2 + $0x18] sm:$0xff] }
 0x246   : > { %1581 = vst.msk [vmem:[#allocation2 + $0x130] sm:$0x3] %vm1527_vm4, %v1466_v12  ;;  %v14840_v13 = vld [vmem:[#allocation2 + $0x30] sm:$0xff]  ;;  %v14844_v14 = vld [vmem:[#allocation2 + $0x38] sm:$0xff] }
 0x247   : > { %1583 = vst.msk [vmem:[#allocation2 + $0x136] sm:$0xfc] %vm1530_vm5, %v1466_v12  ;;  %v14836_v12 = vld [vmem:[#allocation2 + $0x20] sm:$0xff] }
 0x248   : > { %v14685_v15 = vld [vmem:[#allocation2 + $0x69] sm:$0xff]  ;;  %v1386_v16 = vpop.f32.mrb[58].mxu0  ;;  %v1471_v18 = vpop.f32.mrb[26].mxu1 }
 0x249   : > { %1641 = vst.msk [vmem:[%s14558_s23 + $0x38] sm:$0xff] %vm997_vm3, %v14685_v15  ;;  %v12044_v19 = vpop.f32.mrb[59].mxu0  ;;  %12143 = vmatmul.mubr.msk.f32.gmra.mrb[74].mxu0 %vm997_vm3, %v14685_v15  ;;  %1584 = vst.msk [vmem:[#allocation2 + $0x13e] sm:$0xff] %vm997_vm3, %v1471_v18  ;;  %v12095_v20 = vpop.f32.mrb[27].mxu1  ;;  %v14856_v18 = vld [vmem:[#allocation2 + $0x60] sm:$0xff] }
 0x24a   : > { %v14687_v17 = vld [vmem:[#allocation2 + $0x121] sm:$0xff]  ;;  %1553 = vst.msk [vmem:[#allocation2 + $0x86] sm:$0xf] %vm1533_vm8, %v1386_v16 }
 0x24b   : > { %1555 = vst.msk [vmem:[#allocation2 + $0x8c] sm:$0xf0] %vm1536_vm9, %v1386_v16  ;;  %v14848_v16 = vld [vmem:[#allocation2 + $0x48] sm:$0xff] }
 0x24c   : > { %1656 = vst.msk [vmem:[%s14558_s23 + $0xb0] sm:$0xff] %vm997_vm3, %v14687_v17  ;;  %v14700_v21 = vld [vmem:[#allocation2 + $0x79] sm:$0xff]  ;;  %v1391_v23 = vpop.f32.mrb[60].mxu0  ;;  %v1476_v25 = vpop.f32.mrb[28].mxu1  ;;  %v14860_v19 = vld [vmem:[#allocation2 + $0x68] sm:$0xff] }
 0x24d   : > { %v14702_v24 = vld [vmem:[#allocation2 + $0x129] sm:$0xff]  ;;  %1642 = vst.msk [vmem:[%s14558_s23 + $0x40] sm:$0xff] %vm997_vm3, %v14700_v21  ;;  %1556 = vst.msk [vmem:[#allocation2 + $0x94] sm:$0xff] %vm997_vm3, %v1391_v23  ;;  %v12047_v27 = vpop.f32.mrb[61].mxu0  ;;  %12145 = vmatprep.mubr.msk.f32.mxu0 %vm997_vm3, %v14700_v21  ;;  %v12098_v29 = vpop.f32.mrb[29].mxu1  ;;  %v14864_v20 = vld [vmem:[#allocation2 + $0x78] sm:$0xff] }
 0x24e   : > { %1657 = vst.msk [vmem:[%s14558_s23 + $0xb8] sm:$0xff] %vm997_vm3, %v14702_v24 }
 0x24f   : > { %1585 = vst.msk [vmem:[#allocation2 + $0x146] sm:$0xf] %vm1533_vm8, %v1476_v25 }
 0x250   : > { %1587 = vst.msk [vmem:[#allocation2 + $0x14c] sm:$0xf0] %vm1536_vm9, %v1476_v25  ;;  %v1396_v32 = vpop.f32.mrb[62].mxu0  ;;  %v14717_v36 = vld [vmem:[#allocation2 + $0x139] sm:$0xff]  ;;  %v1481_v40 = vpop.f32.mrb[30].mxu1 }
 0x251   : > { %v14715_v31 = vld [vmem:[#allocation2 + $0x81] sm:$0xff]  ;;  %1557 = vst.msk [vmem:[#allocation2 + $0x9c] sm:$0x3f] %vm1539_vm2, %v1396_v32  ;;  %v12050_v41 = vpop.f32.mrb[63].mxu0  ;;  %v12101_v42 = vpop.f32.mrb[31].mxu1 }
 0x252   : > { %1643 = vst.msk [vmem:[%s14558_s23 + $0x48] sm:$0xff] %vm997_vm3, %v14715_v31  ;;  %12146 = vmatmul.mubr.msk.f32.gmra.mrb[76].mxu0 %vm997_vm3, %v14715_v31  ;;  %1658 = vst.msk [vmem:[%s14558_s23 + $0xc0] sm:$0xff] %vm997_vm3, %v14717_v36  ;;  %v14868_v23 = vld [vmem:[#allocation2 + $0x80] sm:$0xff] }
 0x253   : > { %1559 = vst.msk [vmem:[#allocation2 + $0xa2] sm:$0xc0] %vm1542_vm10, %v1396_v32  ;;  %v1043_v32 = vadd.s32 320, %v14283_v30  ;;  %v14889_v41 = vld [vmem:[#allocation2 + $0xc0] sm:$0xff]  ;;  %v14900_v30 = vld [vmem:[#allocation2 + $0xd8] sm:$0xff] }
 0x254   : > { %1588 = vst.msk [vmem:[#allocation2 + $0x154] sm:$0xff] %vm997_vm3, %v1481_v40  ;;  %v14730_v43 = vld [vmem:[#allocation2 + $0x91] sm:$0xff]  ;;  %v1401_v45 = vpop.f32.mrb[64].mxu0  ;;  %v1486_v47 = vpop.f32.mrb[32].mxu1 }
 0x255   : > { %1644 = vst.msk [vmem:[%s14558_s23 + $0x50] sm:$0xff] %vm997_vm3, %v14730_v43  ;;  %1560 = vst.msk [vmem:[#allocation2 + $0xaa] sm:$0xff] %vm997_vm3, %v1401_v45  ;;  %12148 = vmatprep.mubr.msk.f32.mxu0 %vm997_vm3, %v14730_v43  ;;  %v12053_v49 = vpop.f32.mrb[65].mxu0  ;;  %v12104_v51 = vpop.f32.mrb[33].mxu1  ;;  %v14872_v25 = vld [vmem:[#allocation2 + $0x90] sm:$0xff]  ;;  %vm1089_vm11 = vcmp.eq.s32.totalorder %v1043_v32, %v14288_v38  ;;  %v14896_v45 = vld [vmem:[#allocation2 + $0xc8] sm:$0xff] }
 0x256   : > { %v14732_v46 = vld [vmem:[#allocation2 + $0x141] sm:$0xff]  ;;  %1589 = vst.msk [vmem:[#allocation2 + $0x15c] sm:$0x3f] %vm1539_vm2, %v1486_v47  ;;  %v1130_v42 = vsel %vm1089_vm11, 1.0, %v14015_v34  ;;  %v14908_v38 = vld [vmem:[#allocation2 + $0xf0] sm:$0xff]  ;;  %v14912_v34 = vld [vmem:[#allocation2 + $0xf8] sm:$0xff] }
 0x257   : > { %1659 = vst.msk [vmem:[%s14558_s23 + $0xc8] sm:$0xff] %vm997_vm3, %v14732_v46  ;;  %12124 = vmatmul.mubr.msk.f32.gmra.mrb[46].mxu1 %vm1131_vm6, %v1130_v42  ;;  %v14916_v49 = vld [vmem:[#allocation2 + $0x108] sm:$0xff]  ;;  %v14920_v51 = vld [vmem:[#allocation2 + $0x110] sm:$0xff] }
 0x258   : > { %1591 = vst.msk [vmem:[#allocation2 + $0x162] sm:$0xc0] %vm1542_vm10, %v1486_v47  ;;  %v14745_v52 = vld [vmem:[#allocation2 + $0x99] sm:$0xff]  ;;  %v1491_v55 = vpop.f32.mrb[34].mxu1 }
 0x259   : > { %1645 = vst.msk [vmem:[%s14558_s23 + $0x58] sm:$0xff] %vm997_vm3, %v14745_v52  ;;  %12149 = vmatmul.mubr.msk.f32.gmra.mrb[78].mxu0 %vm997_vm3, %v14745_v52  ;;  %1592 = vst.msk [vmem:[#allocation2 + $0x16a] sm:$0xff] %vm997_vm3, %v1491_v55  ;;  %v12107_v57 = vpop.f32.mrb[35].mxu1  ;;  %v14876_v27 = vld [vmem:[#allocation2 + $0x98] sm:$0xff]  ;;  %v14904_v47 = vld [vmem:[#allocation2 + $0xe0] sm:$0xff] }
 0x25a   : > { %v14924_v55 = vld [vmem:[#allocation2 + $0x120] sm:$0xff]  ;;  %v14928_v57 = vld [vmem:[#allocation2 + $0x128] sm:$0xff] }
 0x25b   : > { %v14747_v53 = vld [vmem:[#allocation2 + $0x151] sm:$0xff] }
 0x25c   : > { %17654 = vst [vmem:[#allocation9_spill] sm:$0xff] %v14747_v53  ;;  %1660 = vst.msk [vmem:[%s14558_s23 + $0xd0] sm:$0xff] %vm997_vm3, %v14747_v53  ;;  %v14758_v58 = vld [vmem:[#allocation2 + $0xa9] sm:$0xff]  ;;  %v14760_v59 = vld [vmem:[#allocation2 + $0xb1] sm:$0xff]  ;;  %v1496_v61 = vpop.f32.mrb[36].mxu1 }
 0x25d   : > { %v14762_v60 = vld [vmem:[#allocation2 + $0x159] sm:$0xff]  ;;  %1646 = vst.msk [vmem:[%s14558_s23 + $0x60] sm:$0xff] %vm997_vm3, %v14758_v58  ;;  %1647 = vst.msk [vmem:[%s14558_s23 + $0x68] sm:$0xff] %vm997_vm3, %v14760_v59  ;;  %12151 = vmatprep.mubr.msk.f32.mxu0 %vm997_vm3, %v14758_v58  ;;  %v12110_v0 = vpop.f32.mrb[37].mxu1  ;;  %v14880_v29 = vld [vmem:[#allocation2 + $0xa8] sm:$0xff] }
 0x25e   : > { %17655 = vst [vmem:[#allocation10_spill] sm:$0xff] %v14762_v60  ;;  %1661 = vst.msk [vmem:[%s14558_s23 + $0xd8] sm:$0xff] %vm997_vm3, %v14762_v60  ;;  %12152 = vmatmul.mubr.msk.f32.gmra.mrb[80].mxu0 %vm997_vm3, %v14760_v59  ;;  %v14885_v40 = vld [vmem:[#allocation2 + $0xb0] sm:$0xff]  ;;  %v14932_v0 = vld [vmem:[#allocation2 + $0x138] sm:$0xff] }
 0x25f   : > { %1593 = vst.msk [vmem:[#allocation2 + $0x172] sm:$0xff] %vm997_vm3, %v1496_v61  ;;  %12154 = vmatprep.mubr.msk.f32.mxu0 %vm997_vm3, %v14560_v22  ;;  %v14942_v32 = vld [vmem:[#allocation2 + $0x150] sm:$0xff] }
 0x260   : > { %v14780_v2 = vld [vmem:[#allocation2 + $0x169] sm:$0xff]  ;;  %v1501_v61 = vpop.f32.mrb[38].mxu1 }
 0x261   : > { %17656 = vst [vmem:[#allocation11_spill] sm:$0xff] %v14780_v2  ;;  %1662 = vst.msk [vmem:[%s14558_s23 + $0xe0] sm:$0xff] %vm997_vm3, %v14780_v2  ;;  %v12113_v4 = vpop.f32.mrb[39].mxu1 }
 0x262   : > { %12155 = vmatmul.mubr.msk.f32.gmra.mrb[82].mxu0 %vm997_vm3, %v14573_v28  ;;  %1595 = vst.msk [vmem:[#allocation2 + $0x180] sm:$0xff] %vm997_vm3, %v1501_v61  ;;  %v14948_v4 = vld [vmem:[#allocation2 + $0x158] sm:$0xff] }
 0x263   : > { %12157 = vmatprep.mubr.msk.f32.mxu0 %vm997_vm3, %v14588_v39 }
 0x264   : > { %v1506_v5 = vpop.f32.mrb[40].mxu1 }
 0x265   : > { %1596 = vst.msk [vmem:[#allocation2 + $0x188] sm:$0xff] %vm997_vm3, %v1506_v5  ;;  %v14952_v5 = vld [vmem:[#allocation2 + $0x168] sm:$0xff] }
 0x266   : > { %v14789_v3 = vld [vmem:[#allocation2 + $0x171] sm:$0xff]  ;;  %12158 = vmatmul.mubr.msk.f32.gmra.mrb[84].mxu0 %vm997_vm3, %v14603_v44 }
 0x267   : > { %17657 = vst [vmem:[#allocation12_spill] sm:$0xff] %v14789_v3  ;;  %1663 = vst.msk [vmem:[%s14558_s23 + $0xe8] sm:$0xff] %vm997_vm3, %v14789_v3  ;;  %12160 = vmatprep.mubr.msk.f32.mxu0 %vm997_vm3, %v14618_v50  ;;  %v14961_v33 = vld [vmem:[#allocation2 + $0x170] sm:$0xff] }
 0x26a   : > { %12161 = vmatmul.mubr.msk.f32.gmra.mrb[86].mxu0 %vm997_vm3, %v14632_v56 }
 0x26b   : > { %12163 = vmatprep.mubr.msk.f32.mxu0 %vm997_vm3, %v14654_v1 }
 0x26e   : > { %12164 = vmatmul.mubr.msk.f32.gmra.mrb[88].mxu0 %vm997_vm3, %v14667_v6 }
 0x26f   : > { %12166 = vmatprep.mubr.msk.f32.mxu0 %vm997_vm3, %v14687_v17 }
 0x272   : > { %12167 = vmatmul.mubr.msk.f32.gmra.mrb[90].mxu0 %vm997_vm3, %v14702_v24 }
 0x273   : > { %12169 = vmatprep.mubr.msk.f32.mxu0 %vm997_vm3, %v14717_v36 }
 0x276   : > { %12170 = vmatmul.mubr.msk.f32.gmra.mrb[92].mxu0 %vm997_vm3, %v14732_v46 }
 0x277   : > { %12172 = vmatprep.mubr.msk.f32.mxu0 %vm997_vm3, %v14747_v53  ;;  %v14980_v53 = vld [vmem:[#allocation2 + $0x1a] sm:$0xff] }
 0x278   : > { %17659 = vst [vmem:[#allocation14_spill] sm:$0xff] %v14980_v53 }
 0x27a   : > { %12173 = vmatmul.mubr.msk.f32.gmra.mrb[94].mxu0 %vm997_vm3, %v14762_v60 }
 0x27b   : > { %12175 = vmatprep.mubr.msk.f32.mxu0 %vm997_vm3, %v14780_v2 }
 0x27e   : > { %12176 = vmatmul.mubr.msk.f32.gmra.mrb[96].mxu0 %vm997_vm3, %v14789_v3  ;;  %v2377_v3 = vld [vmem:[#allocation2 + $0x2] sm:$0xff] }
 0x27f   : > { %12182 = vmatprep.mubr.msk.f32.mxu0 %vm997_vm3, %v1666_v7  ;;  %v12116_v7 = vpop.f32.mrb[41].mxu1 }
 0x280   : > { %v1511_v42 = vpop.f32.mrb[42].mxu1  ;;  %v14956_v7 = vld [vmem:[#allocation2 + $0x181] sm:$0xff] }
 0x281   : > { %1597 = vst.msk [vmem:[#allocation2 + $0x190] sm:$0x3] %vm1527_vm4, %v1511_v42  ;;  %v12119_v61 = vpop.f32.mrb[43].mxu1  ;;  %17658 = vst [vmem:[#allocation13_spill] sm:$0xff] %v14956_v7 }
 0x282   : > { %12183 = vmatmul.mubr.msk.f32.vlgmr.msra.gmra.mrb[66].mxu0 %vm997_vm3, %v1667_v9  ;;  %v14938_v9 = vld [vmem:[#allocation2 + $0x140] sm:$0xff]  ;;  %1599 = vst.msk [vmem:[#allocation2 + $0x196] sm:$0xfc] %vm1530_vm5, %v1511_v42  ;;  %v10598_v61 = vld [vmem:[%s17470_s5 + $0x48] sm:$0xff] }
 0x283   : > { %12185 = vmatprep.mubr.msk.f32.mxu0 %vm997_vm3, %v14830_v11  ;;  %13227 = vmatpush3.bf16.msra.mxu0 %v14650_v62  ;;  %v14852_v62 = vld [vmem:[#allocation2 + $0x50] sm:$0xff]  ;;  %1664 = vst.msk [vmem:[%s14558_s23 + $0xf0] sm:$0xff] %vm997_vm3, %v14956_v7  ;;  %v10597_v42 = vld [vmem:[%s17470_s5 + $0x40] sm:$0xff] }
 0x284   : > { %13229 = vmatprep.subr.bf16.mxu0 %v14827_v8  ;;  %v14974_v60 = vpack.c.bf16 %v10598_v61, %v10597_v42  ;;  %v2378_v7 = vld [vmem:[#allocation2 + $0xa] sm:$0xff]  ;;  %v14990_v42 = vld [vmem:[#allocation2 + $0x32] sm:$0xff] }
 0x285   : > { %17661 = vst [vmem:[#allocation16_spill] sm:$0xff] %v14990_v42  ;;  %v14998_v61 = vld [vmem:[#allocation2 + $0x4a] sm:$0xff] }
 0x286   : > { %12186 = vmatmul.mubr.msk.f32.gmra.mrb[68].mxu0 %vm997_vm3, %v14836_v12  ;;  %17663 = vst [vmem:[#allocation18_spill] sm:$0xff] %v14998_v61 }
 0x287   : > { %12188 = vmatprep.mubr.msk.f32.mxu0 %vm997_vm3, %v14840_v13 }
 0x288   : > { %v14972_v2 = vld [vmem:[#allocation2 + $0x189] sm:$0xff] }
 0x289   : > { %1665 = vst.msk [vmem:[%s14558_s23 + $0xf8] sm:$0xff] %vm997_vm3, %v14972_v2  ;;  %s17640_s23 = smov 32  }
 0x28a   : > { %12189 = vmatmul.mubr.msk.f32.gmra.mrb[70].mxu0 %vm997_vm3, %v14844_v14 }
 0x28b   : > { %12191 = vmatprep.mubr.msk.f32.mxu0 %vm997_vm3, %v14848_v16 }
 0x28e   : > { %12192 = vmatmul.mubr.msk.f32.gmra.mrb[72].mxu0 %vm997_vm3, %v14852_v62 }
 0x28f   : > { %12194 = vmatprep.mubr.msk.f32.mxu0 %vm997_vm3, %v14856_v18 }
 0x292   : > { %12195 = vmatmul.mubr.msk.f32.gmra.mrb[74].mxu0 %vm997_vm3, %v14860_v19 }
 0x293   : > { %12197 = vmatprep.mubr.msk.f32.mxu0 %vm997_vm3, %v14864_v20 }
 0x296   : > { %12198 = vmatmul.mubr.msk.f32.gmra.mrb[76].mxu0 %vm997_vm3, %v14868_v23 }
 0x297   : > { %12200 = vmatprep.mubr.msk.f32.mxu0 %vm997_vm3, %v14872_v25 }
 0x29a   : > { %12201 = vmatmul.mubr.msk.f32.gmra.mrb[78].mxu0 %vm997_vm3, %v14876_v27 }
 0x29b   : > { %12203 = vmatprep.mubr.msk.f32.mxu0 %vm997_vm3, %v14880_v29 }
 0x29e   : > { %12204 = vmatmul.mubr.msk.f32.gmra.mrb[80].mxu0 %vm997_vm3, %v14885_v40 }
 0x29f   : > { %12206 = vmatprep.mubr.msk.f32.mxu0 %vm997_vm3, %v14889_v41 }
 0x2a2   : > { %12207 = vmatmul.mubr.msk.f32.gmra.mrb[82].mxu0 %vm997_vm3, %v14896_v45 }
 0x2a3   : > { %12209 = vmatprep.mubr.msk.f32.mxu0 %vm997_vm3, %v14900_v30 }
 0x2a6   : > { %12210 = vmatmul.mubr.msk.f32.gmra.mrb[84].mxu0 %vm997_vm3, %v14904_v47 }
 0x2a7   : > { %12212 = vmatprep.mubr.msk.f32.mxu0 %vm997_vm3, %v14908_v38 }
 0x2aa   : > { %12213 = vmatmul.mubr.msk.f32.gmra.mrb[86].mxu0 %vm997_vm3, %v14912_v34 }
 0x2ab   : > { %12215 = vmatprep.mubr.msk.f32.mxu0 %vm997_vm3, %v14916_v49 }
 0x2ae   : > { %12216 = vmatmul.mubr.msk.f32.gmra.mrb[88].mxu0 %vm997_vm3, %v14920_v51 }
 0x2af   : > { %12218 = vmatprep.mubr.msk.f32.mxu0 %vm997_vm3, %v14924_v55 }
 0x2b2   : > { %12219 = vmatmul.mubr.msk.f32.gmra.mrb[90].mxu0 %vm997_vm3, %v14928_v57 }
 0x2b3   : > { %12221 = vmatprep.mubr.msk.f32.mxu0 %vm997_vm3, %v14932_v0 }
 0x2b6   : > { %12222 = vmatmul.mubr.msk.f32.gmra.mrb[92].mxu0 %vm997_vm3, %v14938_v9 }
 0x2b7   : > { %12224 = vmatprep.mubr.msk.f32.mxu0 %vm997_vm3, %v14942_v32 }
 0x2ba   : > { %12225 = vmatmul.mubr.msk.f32.gmra.mrb[94].mxu0 %vm997_vm3, %v14948_v4 }
 0x2bb   : > { %12227 = vmatprep.mubr.msk.f32.mxu0 %vm997_vm3, %v14952_v5 }
 0x2be   : > { %12228 = vmatmul.mubr.msk.f32.gmra.mrb[96].mxu0 %vm997_vm3, %v14961_v33 }
 0x2bf   : > { %12234 = vmatprep.mubr.msk.f32.mxu0 %vm997_vm3, %v2377_v3  ;;  %v14986_v3 = vld [vmem:[#allocation2 + $0x22] sm:$0xff] }
 0x2c0   : > { %17660 = vst [vmem:[#allocation15_spill] sm:$0xff] %v14986_v3 }
 0x2c2   : > { %12235 = vmatmul.mubr.msk.f32.vlgmr.msra.gmra.mrb[66].mxu0 %vm997_vm3, %v2378_v7  ;;  %v14994_v7 = vld [vmem:[#allocation2 + $0x3a] sm:$0xff] }
 0x2c3   : > { %12237 = vmatprep.mubr.msk.f32.mxu0 %vm997_vm3, %v14980_v53  ;;  %13231 = vmatpush3.bf16.msra.mxu0 %v14827_v8  ;;  %17662 = vst [vmem:[#allocation17_spill] sm:$0xff] %v14994_v7  ;;  %v15002_v8 = vld [vmem:[#allocation2 + $0x52] sm:$0xff] }
 0x2c4   : > { %13233 = vmatprep.subr.bf16.mxu0 %v14974_v60  ;;  %17664 = vst [vmem:[#allocation19_spill] sm:$0xff] %v15002_v8 }
 0x2c6   : > { %12238 = vmatmul.mubr.msk.f32.gmra.mrb[68].mxu0 %vm997_vm3, %v14986_v3  ;;  %v15006_v3 = vld [vmem:[#allocation2 + $0x62] sm:$0xff] }
 0x2c7   : > { %12240 = vmatprep.mubr.msk.f32.mxu0 %vm997_vm3, %v14990_v42  ;;  %17665 = vst [vmem:[#allocation20_spill] sm:$0xff] %v15006_v3  ;;  %v15010_v42 = vld [vmem:[#allocation2 + $0x6a] sm:$0xff] }
 0x2c8   : > { %17666 = vst [vmem:[#allocation21_spill] sm:$0xff] %v15010_v42 }
 0x2ca   : > { %12241 = vmatmul.mubr.msk.f32.gmra.mrb[70].mxu0 %vm997_vm3, %v14994_v7  ;;  %v15014_v7 = vld [vmem:[#allocation2 + $0x7a] sm:$0xff] }
 0x2cb   : > { %12243 = vmatprep.mubr.msk.f32.mxu0 %vm997_vm3, %v14998_v61  ;;  %17667 = vst [vmem:[#allocation22_spill] sm:$0xff] %v15014_v7  ;;  %v15018_v61 = vld [vmem:[#allocation2 + $0x82] sm:$0xff] }
 0x2cc   : > { %17668 = vst [vmem:[#allocation23_spill] sm:$0xff] %v15018_v61 }
 0x2ce   : > { %12244 = vmatmul.mubr.msk.f32.gmra.mrb[72].mxu0 %vm997_vm3, %v15002_v8  ;;  %v15022_v8 = vld [vmem:[#allocation2 + $0x92] sm:$0xff] }
 0x2cf   : > { %12246 = vmatprep.mubr.msk.f32.mxu0 %vm997_vm3, %v15006_v3  ;;  %17669 = vst [vmem:[#allocation24_spill] sm:$0xff] %v15022_v8  ;;  %v15026_v3 = vld [vmem:[#allocation2 + $0x9a] sm:$0xff] }
 0x2d0   : > { %17670 = vst [vmem:[#allocation25_spill] sm:$0xff] %v15026_v3 }
 0x2d2   : > { %12247 = vmatmul.mubr.msk.f32.gmra.mrb[74].mxu0 %vm997_vm3, %v15010_v42  ;;  %v15030_v42 = vld [vmem:[#allocation2 + $0xaa] sm:$0xff] }
 0x2d3   : > { %12249 = vmatprep.mubr.msk.f32.mxu0 %vm997_vm3, %v15014_v7  ;;  %17671 = vst [vmem:[#allocation26_spill] sm:$0xff] %v15030_v42  ;;  %v15034_v7 = vld [vmem:[#allocation2 + $0xb2] sm:$0xff] }
 0x2d4   : > { %17672 = vst [vmem:[#allocation27_spill] sm:$0xff] %v15034_v7 }
 0x2d6   : > { %12250 = vmatmul.mubr.msk.f32.gmra.mrb[76].mxu0 %vm997_vm3, %v15018_v61  ;;  %v15038_v61 = vld [vmem:[#allocation2 + $0xc2] sm:$0xff] }
 0x2d7   : > { %12252 = vmatprep.mubr.msk.f32.mxu0 %vm997_vm3, %v15022_v8  ;;  %17673 = vst [vmem:[#allocation28_spill] sm:$0xff] %v15038_v61  ;;  %v15042_v8 = vld [vmem:[#allocation2 + $0xca] sm:$0xff] }
 0x2d8   : > { %17674 = vst [vmem:[#allocation29_spill] sm:$0xff] %v15042_v8 }
 0x2da   : > { %12253 = vmatmul.mubr.msk.f32.gmra.mrb[78].mxu0 %vm997_vm3, %v15026_v3  ;;  %v15046_v3 = vld [vmem:[#allocation2 + $0xda] sm:$0xff] }
 0x2db   : > { %12255 = vmatprep.mubr.msk.f32.mxu0 %vm997_vm3, %v15030_v42  ;;  %17675 = vst [vmem:[#allocation30_spill] sm:$0xff] %v15046_v3  ;;  %v15050_v42 = vld [vmem:[#allocation2 + $0xe2] sm:$0xff] }
 0x2dc   : > { %17676 = vst [vmem:[#allocation31_spill] sm:$0xff] %v15050_v42 }
 0x2de   : > { %12256 = vmatmul.mubr.msk.f32.gmra.mrb[80].mxu0 %vm997_vm3, %v15034_v7  ;;  %v15054_v7 = vld [vmem:[#allocation2 + $0xf2] sm:$0xff] }
 0x2df   : > { %12258 = vmatprep.mubr.msk.f32.mxu0 %vm997_vm3, %v15038_v61  ;;  %17677 = vst [vmem:[#allocation32_spill] sm:$0xff] %v15054_v7  ;;  %v15058_v61 = vld [vmem:[#allocation2 + $0xfa] sm:$0xff] }
 0x2e0   : > { %17678 = vst [vmem:[#allocation33_spill] sm:$0xff] %v15058_v61 }
 0x2e2   : > { %12259 = vmatmul.mubr.msk.f32.gmra.mrb[82].mxu0 %vm997_vm3, %v15042_v8  ;;  %v15062_v8 = vld [vmem:[#allocation2 + $0x10a] sm:$0xff] }
 0x2e3   : > { %12261 = vmatprep.mubr.msk.f32.mxu0 %vm997_vm3, %v15046_v3  ;;  %17679 = vst [vmem:[#allocation34_spill] sm:$0xff] %v15062_v8  ;;  %v15066_v3 = vld [vmem:[#allocation2 + $0x112] sm:$0xff] }
 0x2e4   : > { %17680 = vst [vmem:[#allocation35_spill] sm:$0xff] %v15066_v3 }
 0x2e6   : > { %12262 = vmatmul.mubr.msk.f32.gmra.mrb[84].mxu0 %vm997_vm3, %v15050_v42  ;;  %v15070_v42 = vld [vmem:[#allocation2 + $0x122] sm:$0xff] }
 0x2e7   : > { %12264 = vmatprep.mubr.msk.f32.mxu0 %vm997_vm3, %v15054_v7  ;;  %17681 = vst [vmem:[#allocation36_spill] sm:$0xff] %v15070_v42  ;;  %v15074_v7 = vld [vmem:[#allocation2 + $0x12a] sm:$0xff] }
 0x2e8   : > { %17682 = vst [vmem:[#allocation37_spill] sm:$0xff] %v15074_v7 }
 0x2ea   : > { %12265 = vmatmul.mubr.msk.f32.gmra.mrb[86].mxu0 %vm997_vm3, %v15058_v61  ;;  %v15078_v61 = vld [vmem:[#allocation2 + $0x13a] sm:$0xff] }
 0x2eb   : > { %12267 = vmatprep.mubr.msk.f32.mxu0 %vm997_vm3, %v15062_v8  ;;  %17683 = vst [vmem:[#allocation38_spill] sm:$0xff] %v15078_v61  ;;  %v15082_v8 = vld [vmem:[#allocation2 + $0x142] sm:$0xff] }
 0x2ec   : > { %17684 = vst [vmem:[#allocation39_spill] sm:$0xff] %v15082_v8 }
 0x2ee   : > { %12268 = vmatmul.mubr.msk.f32.gmra.mrb[88].mxu0 %vm997_vm3, %v15066_v3  ;;  %v15086_v3 = vld [vmem:[#allocation2 + $0x152] sm:$0xff] }
 0x2ef   : > { %12270 = vmatprep.mubr.msk.f32.mxu0 %vm997_vm3, %v15070_v42  ;;  %17685 = vst [vmem:[#allocation40_spill] sm:$0xff] %v15086_v3  ;;  %v1516_v42 = vpop.f32.mrb[44].mxu1 }
 0x2f0   : > { %1600 = vst.msk [vmem:[#allocation2 + $0x19e] sm:$0xff] %vm997_vm3, %v1516_v42  ;;  %v12122_v53 = vpop.f32.mrb[45].mxu1 }
 0x2f1   : > { %v10632_v53 = vld [vmem:[%s17470_s5 + $0x58] sm:$0xff] }
 0x2f2   : > { %12271 = vmatmul.mubr.msk.f32.gmra.mrb[90].mxu0 %vm997_vm3, %v15074_v7  ;;  %v15091_v7 = vld [vmem:[#allocation2 + $0x15a] sm:$0xff] }
 0x2f3   : > { %12273 = vmatprep.mubr.msk.f32.mxu0 %vm997_vm3, %v15078_v61  ;;  %17686 = vst [vmem:[#allocation41_spill] sm:$0xff] %v15091_v7  ;;  %v15095_v61 = vld [vmem:[#allocation2 + $0x16a] sm:$0xff] }
 0x2f6   : > { %12274 = vmatmul.mubr.msk.f32.gmra.mrb[92].mxu0 %vm997_vm3, %v15082_v8  ;;  %v15099_v8 = vld [vmem:[#allocation2 + $0x172] sm:$0xff] }
 0x2f7   : > { %12276 = vmatprep.mubr.msk.f32.mxu0 %vm997_vm3, %v15086_v3  ;;  %17687 = vst [vmem:[#allocation42_spill] sm:$0xff] %v15099_v8  ;;  %v10631_v3 = vld [vmem:[%s17470_s5 + $0x50] sm:$0xff] }
 0x2f8   : > { %v13236_v42 = vpack.c.bf16 %v10632_v53, %v10631_v3  ;;  %v10666_v3 = vld [vmem:[%s17470_s5 + $0x68] sm:$0xff] }
 0x2fa   : > { %12277 = vmatmul.mubr.msk.f32.gmra.mrb[94].mxu0 %vm997_vm3, %v15091_v7 }
 0x2fb   : > { %12279 = vmatprep.mubr.msk.f32.mxu0 %vm997_vm3, %v15095_v61 }
 0x2fe   : > { %12280 = vmatmul.mubr.msk.f32.gmra.mrb[96].mxu0 %vm997_vm3, %v15099_v8 }
 0x2ff   : > { %12286 = vmatprep.mubr.msk.f32.mxu0 %vm997_vm3, %v14830_v11  ;;  %v15174_v11 = vld [vmem:[#allocation2 + $0x188] sm:$0xff] }
 0x302   : > { %12287 = vmatmul.mubr.msk.f32.vlgmr.msra.gmra.mrb[66].mxu0 %vm997_vm3, %v14836_v12  ;;  %v10665_v12 = vld [vmem:[%s17470_s5 + $0x60] sm:$0xff] }
 0x303   : > { %12289 = vmatprep.mubr.msk.f32.mxu0 %vm997_vm3, %v14840_v13  ;;  %13235 = vmatpush3.bf16.msra.mxu0 %v14974_v60  ;;  %v15168_v60 = vld [vmem:[#allocation2 + $0x180] sm:$0xff]  ;;  %v13240_v53 = vpack.c.bf16 %v10666_v3, %v10665_v12  ;;  %v17710_v12 = vld [vmem:[#allocation31_spill] sm:$0xff]  ;;  %v17711_v3 = vld [vmem:[#allocation32_spill] sm:$0xff] }
 0x304   : > { %13237 = vmatprep.subr.bf16.mxu0 %v13236_v42 }
 0x306   : > { %12290 = vmatmul.mubr.msk.f32.gmra.mrb[68].mxu0 %vm997_vm3, %v14844_v14 }
 0x307   : > { %12292 = vmatprep.mubr.msk.f32.mxu0 %vm997_vm3, %v14848_v16 }
 0x30a   : > { %12293 = vmatmul.mubr.msk.f32.gmra.mrb[70].mxu0 %vm997_vm3, %v14852_v62 }
 0x30b   : > { %12295 = vmatprep.mubr.msk.f32.mxu0 %vm997_vm3, %v14856_v18 }
 0x30e   : > { %12296 = vmatmul.mubr.msk.f32.gmra.mrb[72].mxu0 %vm997_vm3, %v14860_v19 }
 0x30f   : > { %12298 = vmatprep.mubr.msk.f32.mxu0 %vm997_vm3, %v14864_v20 }
 0x312   : > { %12299 = vmatmul.mubr.msk.f32.gmra.mrb[74].mxu0 %vm997_vm3, %v14868_v23 }
 0x313   : > { %12301 = vmatprep.mubr.msk.f32.mxu0 %vm997_vm3, %v14872_v25 }
 0x316   : > { %12302 = vmatmul.mubr.msk.f32.gmra.mrb[76].mxu0 %vm997_vm3, %v14876_v27 }
 0x317   : > { %12304 = vmatprep.mubr.msk.f32.mxu0 %vm997_vm3, %v14880_v29 }
 0x31a   : > { %12305 = vmatmul.mubr.msk.f32.gmra.mrb[78].mxu0 %vm997_vm3, %v14885_v40 }
 0x31b   : > { %12307 = vmatprep.mubr.msk.f32.mxu0 %vm997_vm3, %v14889_v41 }
 0x31e   : > { %12308 = vmatmul.mubr.msk.f32.gmra.mrb[80].mxu0 %vm997_vm3, %v14896_v45 }
 0x31f   : > { %12310 = vmatprep.mubr.msk.f32.mxu0 %vm997_vm3, %v14900_v30 }
 0x322   : > { %12311 = vmatmul.mubr.msk.f32.gmra.mrb[82].mxu0 %vm997_vm3, %v14904_v47 }
 0x323   : > { %12313 = vmatprep.mubr.msk.f32.mxu0 %vm997_vm3, %v14908_v38 }
 0x326   : > { %12314 = vmatmul.mubr.msk.f32.gmra.mrb[84].mxu0 %vm997_vm3, %v14912_v34 }
 0x327   : > { %12316 = vmatprep.mubr.msk.f32.mxu0 %vm997_vm3, %v14916_v49 }
 0x32a   : > { %12317 = vmatmul.mubr.msk.f32.gmra.mrb[86].mxu0 %vm997_vm3, %v14920_v51 }
 0x32b   : > { %12319 = vmatprep.mubr.msk.f32.mxu0 %vm997_vm3, %v14924_v55 }
 0x32e   : > { %12320 = vmatmul.mubr.msk.f32.gmra.mrb[88].mxu0 %vm997_vm3, %v14928_v57 }
 0x32f   : > { %12322 = vmatprep.mubr.msk.f32.mxu0 %vm997_vm3, %v14932_v0 }
 0x332   : > { %12323 = vmatmul.mubr.msk.f32.gmra.mrb[90].mxu0 %vm997_vm3, %v14938_v9 }
 0x333   : > { %12325 = vmatprep.mubr.msk.f32.mxu0 %vm997_vm3, %v14942_v32 }
 0x336   : > { %12326 = vmatmul.mubr.msk.f32.gmra.mrb[92].mxu0 %vm997_vm3, %v14948_v4 }
 0x337   : > { %12328 = vmatprep.mubr.msk.f32.mxu0 %vm997_vm3, %v14952_v5 }
 0x33a   : > { %12329 = vmatmul.mubr.msk.f32.gmra.mrb[94].mxu0 %vm997_vm3, %v14961_v33 }
 0x33b   : > { %12331 = vmatprep.mubr.msk.f32.mxu0 %vm997_vm3, %v15168_v60 }
 0x33e   : > { %12332 = vmatmul.mubr.msk.f32.gmra.mrb[96].mxu0 %vm997_vm3, %v15174_v11 }
 0x33f   : > { %12338 = vmatprep.mubr.msk.f32.mxu0 %vm997_vm3, %v14571_v26  ;;  %v1521_v26 = vpop.f32.mrb[46].mxu1 }
 0x340   : > { %1601 = vst.msk [vmem:[#allocation2 + $0x1a6] sm:$0xf] %vm1533_vm8, %v1521_v26  ;;  %v17714_v26 = vld [vmem:[#allocation35_spill] sm:$0xff] }
 0x342   : > { %12339 = vmatmul.mubr.msk.f32.vlgmr.msra.gmra.mrb[66].mxu0 %vm997_vm3, %v14586_v35  ;;  %v17689_v35 = vld [vmem:[#allocation10_spill] sm:$0xff] }
 0x343   : > { %12341 = vmatprep.mubr.msk.f32.mxu0 %vm997_vm3, %v14601_v37  ;;  %13239 = vmatpush3.bf16.msra.mxu0 %v13236_v42  ;;  %v17691_v37 = vld [vmem:[#allocation12_spill] sm:$0xff]  ;;  %v17709_v42 = vld [vmem:[#allocation30_spill] sm:$0xff] }
 0x344   : > { %13241 = vmatprep.subr.bf16.mxu0 %v13240_v53 }
 0x346   : > { %12342 = vmatmul.mubr.msk.f32.gmra.mrb[68].mxu0 %vm997_vm3, %v14616_v48  ;;  %v10699_v48 = vld [vmem:[%s17470_s5 + $0x70] sm:$0xff] }
 0x347   : > { %12344 = vmatprep.mubr.msk.f32.mxu0 %vm997_vm3, %v14630_v54  ;;  %v17693_v54 = vld [vmem:[#allocation14_spill] sm:$0xff] }
 0x34a   : > { %12345 = vmatmul.mubr.msk.f32.gmra.mrb[70].mxu0 %vm997_vm3, %v14652_v63  ;;  %v17694_v63 = vld [vmem:[#allocation15_spill] sm:$0xff] }
 0x34b   : > { %12347 = vmatprep.mubr.msk.f32.mxu0 %vm997_vm3, %v14675_v10  ;;  %v17697_v10 = vld [vmem:[#allocation18_spill] sm:$0xff] }
 0x34e   : > { %12348 = vmatmul.mubr.msk.f32.gmra.mrb[72].mxu0 %vm997_vm3, %v14685_v15  ;;  %v17698_v15 = vld [vmem:[#allocation19_spill] sm:$0xff] }
 0x34f   : > { %12350 = vmatprep.mubr.msk.f32.mxu0 %vm997_vm3, %v14700_v21  ;;  %v17700_v21 = vld [vmem:[#allocation21_spill] sm:$0xff] }
 0x352   : > { %12351 = vmatmul.mubr.msk.f32.gmra.mrb[74].mxu0 %vm997_vm3, %v14715_v31  ;;  %v17702_v31 = vld [vmem:[#allocation23_spill] sm:$0xff] }
 0x353   : > { %12353 = vmatprep.mubr.msk.f32.mxu0 %vm997_vm3, %v14730_v43  ;;  %v17704_v43 = vld [vmem:[#allocation25_spill] sm:$0xff] }
 0x356   : > { %12354 = vmatmul.mubr.msk.f32.gmra.mrb[76].mxu0 %vm997_vm3, %v14745_v52  ;;  %v17706_v52 = vld [vmem:[#allocation27_spill] sm:$0xff] }
 0x357   : > { %12356 = vmatprep.mubr.msk.f32.mxu0 %vm997_vm3, %v14758_v58  ;;  %v17707_v58 = vld [vmem:[#allocation28_spill] sm:$0xff] }
 0x35a   : > { %12357 = vmatmul.mubr.msk.f32.gmra.mrb[78].mxu0 %vm997_vm3, %v14760_v59  ;;  %v17708_v59 = vld [vmem:[#allocation29_spill] sm:$0xff] }
 0x35b   : > { %12359 = vmatprep.mubr.msk.f32.mxu0 %vm997_vm3, %v14560_v22  ;;  %v17688_v22 = vld [vmem:[#allocation9_spill] sm:$0xff] }
 0x35e   : > { %12360 = vmatmul.mubr.msk.f32.gmra.mrb[80].mxu0 %vm997_vm3, %v14573_v28  ;;  %v12125_v28 = vpop.f32.mrb[47].mxu1 }
 0x35f   : > { %12362 = vmatprep.mubr.msk.f32.mxu0 %vm997_vm3, %v14588_v39  ;;  %v17690_v39 = vld [vmem:[#allocation11_spill] sm:$0xff]  ;;  %v17715_v28 = vld [vmem:[#allocation36_spill] sm:$0xff] }
 0x362   : > { %12363 = vmatmul.mubr.msk.f32.gmra.mrb[82].mxu0 %vm997_vm3, %v14603_v44  ;;  %v17692_v44 = vld [vmem:[#allocation13_spill] sm:$0xff] }
 0x363   : > { %12365 = vmatprep.mubr.msk.f32.mxu0 %vm997_vm3, %v14618_v50  ;;  %v10700_v50 = vld [vmem:[%s17470_s5 + $0x78] sm:$0xff] }
 0x366   : > { %12366 = vmatmul.mubr.msk.f32.gmra.mrb[84].mxu0 %vm997_vm3, %v14632_v56  ;;  %v13244_v56 = vpack.c.bf16 %v10700_v50, %v10699_v48  ;;  %v17719_v48 = vld [vmem:[#allocation40_spill] sm:$0xff]  ;;  %v15315_v50 = vld [vmem:[#allocation2 + $0x182] sm:$0xff] }
 0x367   : > { %12368 = vmatprep.mubr.msk.f32.mxu0 %vm997_vm3, %v14654_v1  ;;  %v17695_v1 = vld [vmem:[#allocation16_spill] sm:$0xff] }
 0x36a   : > { %12369 = vmatmul.mubr.msk.f32.gmra.mrb[86].mxu0 %vm997_vm3, %v14667_v6  ;;  %v17696_v6 = vld [vmem:[#allocation17_spill] sm:$0xff] }
 0x36b   : > { %12371 = vmatprep.mubr.msk.f32.mxu0 %vm997_vm3, %v14687_v17  ;;  %v17699_v17 = vld [vmem:[#allocation20_spill] sm:$0xff] }
 0x36e   : > { %12372 = vmatmul.mubr.msk.f32.gmra.mrb[88].mxu0 %vm997_vm3, %v14702_v24  ;;  %v17701_v24 = vld [vmem:[#allocation22_spill] sm:$0xff] }
 0x36f   : > { %12374 = vmatprep.mubr.msk.f32.mxu0 %vm997_vm3, %v14717_v36  ;;  %v17703_v36 = vld [vmem:[#allocation24_spill] sm:$0xff] }
 0x372   : > { %12375 = vmatmul.mubr.msk.f32.gmra.mrb[90].mxu0 %vm997_vm3, %v14732_v46  ;;  %v17705_v46 = vld [vmem:[#allocation26_spill] sm:$0xff] }
 0x373   : > { %12377 = vmatprep.mubr.msk.f32.mxu0 %vm997_vm3, %v17688_v22  ;;  %v17713_v22 = vld [vmem:[#allocation34_spill] sm:$0xff] }
 0x376   : > { %12378 = vmatmul.mubr.msk.f32.gmra.mrb[92].mxu0 %vm997_vm3, %v17689_v35  ;;  %v17716_v35 = vld [vmem:[#allocation37_spill] sm:$0xff] }
 0x377   : > { %12380 = vmatprep.mubr.msk.f32.mxu0 %vm997_vm3, %v17690_v39  ;;  %v17717_v39 = vld [vmem:[#allocation38_spill] sm:$0xff] }
 0x37a   : > { %12381 = vmatmul.mubr.msk.f32.gmra.mrb[94].mxu0 %vm997_vm3, %v17691_v37  ;;  %v17718_v37 = vld [vmem:[#allocation39_spill] sm:$0xff] }
 0x37b   : > { %12383 = vmatprep.mubr.msk.f32.mxu0 %vm997_vm3, %v17692_v44 }
 0x37e   : > { %12384 = vmatmul.mubr.msk.f32.gmra.mrb[96].mxu0 %vm997_vm3, %v14972_v2 }
 0x37f   : > { %12390 = vmatprep.mubr.msk.f32.mxu0 %vm997_vm3, %v17693_v54  ;;  %v15319_v54 = vld [vmem:[#allocation2 + $0x18a] sm:$0xff] }
 0x382   : > { %12391 = vmatmul.mubr.msk.f32.vlgmr.msra.gmra.mrb[66].mxu0 %vm997_vm3, %v17694_v63  ;;  %v10733_v63 = vld [vmem:[%s17470_s5 + $0x80] sm:$0xff] }
 0x383   : > { %12393 = vmatprep.mubr.msk.f32.mxu0 %vm997_vm3, %v17695_v1  ;;  %13243 = vmatpush3.bf16.msra.mxu0 %v13240_v53  ;;  %v17712_v53 = vld [vmem:[#allocation33_spill] sm:$0xff] }
 0x384   : > { %13245 = vmatprep.subr.bf16.mxu0 %v13244_v56 }
 0x386   : > { %12394 = vmatmul.mubr.msk.f32.gmra.mrb[68].mxu0 %vm997_vm3, %v17696_v6 }
 0x387   : > { %12396 = vmatprep.mubr.msk.f32.mxu0 %vm997_vm3, %v17697_v10 }
 0x38a   : > { %12397 = vmatmul.mubr.msk.f32.gmra.mrb[70].mxu0 %vm997_vm3, %v17698_v15 }
 0x38b   : > { %12399 = vmatprep.mubr.msk.f32.mxu0 %vm997_vm3, %v17699_v17 }
 0x38e   : > { %12400 = vmatmul.mubr.msk.f32.gmra.mrb[72].mxu0 %vm997_vm3, %v17700_v21 }
 0x38f   : > { %12402 = vmatprep.mubr.msk.f32.mxu0 %vm997_vm3, %v17701_v24 }
 0x392   : > { %12403 = vmatmul.mubr.msk.f32.gmra.mrb[74].mxu0 %vm997_vm3, %v17702_v31 }
 0x393   : > { %12405 = vmatprep.mubr.msk.f32.mxu0 %vm997_vm3, %v17703_v36 }
 0x396   : > { %12406 = vmatmul.mubr.msk.f32.gmra.mrb[76].mxu0 %vm997_vm3, %v17704_v43 }
 0x397   : > { %12408 = vmatprep.mubr.msk.f32.mxu0 %vm997_vm3, %v17705_v46 }
 0x39a   : > { %12409 = vmatmul.mubr.msk.f32.gmra.mrb[78].mxu0 %vm997_vm3, %v17706_v52 }
 0x39b   : > { %12411 = vmatprep.mubr.msk.f32.mxu0 %vm997_vm3, %v17707_v58 }
 0x39e   : > { %12412 = vmatmul.mubr.msk.f32.gmra.mrb[80].mxu0 %vm997_vm3, %v17708_v59 }
 0x39f   : > { %12414 = vmatprep.mubr.msk.f32.mxu0 %vm997_vm3, %v17709_v42 }
 0x3a2   : > { %12415 = vmatmul.mubr.msk.f32.gmra.mrb[82].mxu0 %vm997_vm3, %v17710_v12 }
 0x3a3   : > { %12417 = vmatprep.mubr.msk.f32.mxu0 %vm997_vm3, %v17711_v3 }
 0x3a6   : > { %12418 = vmatmul.mubr.msk.f32.gmra.mrb[84].mxu0 %vm997_vm3, %v17712_v53 }
 0x3a7   : > { %12420 = vmatprep.mubr.msk.f32.mxu0 %vm997_vm3, %v17713_v22 }
 0x3aa   : > { %12421 = vmatmul.mubr.msk.f32.gmra.mrb[86].mxu0 %vm997_vm3, %v17714_v26 }
 0x3ab   : > { %12423 = vmatprep.mubr.msk.f32.mxu0 %vm997_vm3, %v17715_v28 }
 0x3ae   : > { %12424 = vmatmul.mubr.msk.f32.gmra.mrb[88].mxu0 %vm997_vm3, %v17716_v35 }
 0x3af   : > { %12426 = vmatprep.mubr.msk.f32.mxu0 %vm997_vm3, %v17717_v39 }
 0x3b2   : > { %12427 = vmatmul.mubr.msk.f32.gmra.mrb[90].mxu0 %vm997_vm3, %v17718_v37 }
 0x3b3   : > { %12429 = vmatprep.mubr.msk.f32.mxu0 %vm997_vm3, %v17719_v48 }
 0x3b6   : > { %12430 = vmatmul.mubr.msk.f32.gmra.mrb[92].mxu0 %vm997_vm3, %v15091_v7  ;;  %v10734_v7 = vld [vmem:[%s17470_s5 + $0x88] sm:$0xff] }
 0x3b7   : > { %12432 = vmatprep.mubr.msk.f32.mxu0 %vm997_vm3, %v15095_v61 }
 0x3ba   : > { %12433 = vmatmul.mubr.msk.f32.gmra.mrb[94].mxu0 %vm997_vm3, %v15099_v8  ;;  %v13248_v8 = vpack.c.bf16 %v10734_v7, %v10733_v63  ;;  %v4340_v7 = vld [vmem:[#allocation2 + $0x141] sm:$0xff]  ;;  %v4347_v63 = vld [vmem:[#allocation2 + $0x199] sm:$0xff] }
 0x3bb   : > { %12435 = vmatprep.mubr.msk.f32.mxu0 %vm997_vm3, %v15315_v50 }
 0x3be   : > { %12436 = vmatmul.mubr.msk.f32.gmra.mrb[96].mxu0 %vm997_vm3, %v15319_v54 }
 0x3bf   : > { %12442 = vmatprep.mubr.msk.f32.mxu0 %vm997_vm3, %v14840_v13  ;;  %v3959_v13 = vld [vmem:[#allocation2 + $0x198] sm:$0xff] }
 0x3c2   : > { %12443 = vmatmul.mubr.msk.f32.vlgmr.msra.gmra.mrb[66].mxu0 %vm997_vm3, %v14844_v14  ;;  %v3960_v14 = vld [vmem:[#allocation2 + $0x1a0] sm:$0xff] }
 0x3c3   : > { %12445 = vmatprep.mubr.msk.f32.mxu0 %vm997_vm3, %v14848_v16  ;;  %13247 = vmatpush3.bf16.msra.mxu0 %v13244_v56  ;;  %v4317_v16 = vld [vmem:[#allocation2 + $0x31] sm:$0xff] }
 0x3c4   : > { %13249 = vmatprep.subr.bf16.mxu0 %v13248_v8  ;;  %v4344_v56 = vld [vmem:[#allocation2 + $0x171] sm:$0xff] }
 0x3c6   : > { %12446 = vmatmul.mubr.msk.f32.gmra.mrb[68].mxu0 %vm997_vm3, %v14852_v62  ;;  %v9302_v62 = vld [vmem:[%s17474_s9] sm:$0xff] }
 0x3c7   : > { %12448 = vmatprep.mubr.msk.f32.mxu0 %vm997_vm3, %v14856_v18 }
 0x3ca   : > { %12449 = vmatmul.mubr.msk.f32.gmra.mrb[70].mxu0 %vm997_vm3, %v14860_v19  ;;  %v4318_v19 = vld [vmem:[#allocation2 + $0x39] sm:$0xff] }
 0x3cb   : > { %12451 = vmatprep.mubr.msk.f32.mxu0 %vm997_vm3, %v14864_v20  ;;  %v4319_v20 = vld [vmem:[#allocation2 + $0x49] sm:$0xff] }
 0x3ce   : > { %12452 = vmatmul.mubr.msk.f32.gmra.mrb[72].mxu0 %vm997_vm3, %v14868_v23  ;;  %v4320_v23 = vld [vmem:[#allocation2 + $0x51] sm:$0xff] }
 0x3cf   : > { %12454 = vmatprep.mubr.msk.f32.mxu0 %vm997_vm3, %v14872_v25  ;;  %v4321_v25 = vld [vmem:[#allocation2 + $0x61] sm:$0xff] }
 0x3d2   : > { %12455 = vmatmul.mubr.msk.f32.gmra.mrb[74].mxu0 %vm997_vm3, %v14876_v27  ;;  %v4322_v27 = vld [vmem:[#allocation2 + $0x69] sm:$0xff] }
 0x3d3   : > { %12457 = vmatprep.mubr.msk.f32.mxu0 %vm997_vm3, %v14880_v29  ;;  %v4323_v29 = vld [vmem:[#allocation2 + $0x79] sm:$0xff] }
 0x3d6   : > { %12458 = vmatmul.mubr.msk.f32.gmra.mrb[76].mxu0 %vm997_vm3, %v14885_v40  ;;  %v4324_v40 = vld [vmem:[#allocation2 + $0x81] sm:$0xff] }
 0x3d7   : > { %12460 = vmatprep.mubr.msk.f32.mxu0 %vm997_vm3, %v14889_v41  ;;  %v4325_v41 = vld [vmem:[#allocation2 + $0x91] sm:$0xff] }
 0x3da   : > { %12461 = vmatmul.mubr.msk.f32.gmra.mrb[78].mxu0 %vm997_vm3, %v14896_v45  ;;  %v4326_v45 = vld [vmem:[#allocation2 + $0x99] sm:$0xff] }
 0x3db   : > { %12463 = vmatprep.mubr.msk.f32.mxu0 %vm997_vm3, %v14900_v30  ;;  %v4327_v30 = vld [vmem:[#allocation2 + $0xa9] sm:$0xff] }
 0x3de   : > { %12464 = vmatmul.mubr.msk.f32.gmra.mrb[80].mxu0 %vm997_vm3, %v14904_v47  ;;  %v4328_v47 = vld [vmem:[#allocation2 + $0xb1] sm:$0xff] }
 0x3df   : > { %12466 = vmatprep.mubr.msk.f32.mxu0 %vm997_vm3, %v14908_v38  ;;  %v4329_v38 = vld [vmem:[#allocation2 + $0xc1] sm:$0xff] }
 0x3e2   : > { %12467 = vmatmul.mubr.msk.f32.gmra.mrb[82].mxu0 %vm997_vm3, %v14912_v34  ;;  %v4330_v34 = vld [vmem:[#allocation2 + $0xc9] sm:$0xff] }
 0x3e3   : > { %12469 = vmatprep.mubr.msk.f32.mxu0 %vm997_vm3, %v14916_v49  ;;  %v4331_v49 = vld [vmem:[#allocation2 + $0xd9] sm:$0xff] }
 0x3e6   : > { %12470 = vmatmul.mubr.msk.f32.gmra.mrb[84].mxu0 %vm997_vm3, %v14920_v51  ;;  %v4332_v51 = vld [vmem:[#allocation2 + $0xe1] sm:$0xff] }
 0x3e7   : > { %12472 = vmatprep.mubr.msk.f32.mxu0 %vm997_vm3, %v14924_v55  ;;  %v4333_v55 = vld [vmem:[#allocation2 + $0xf1] sm:$0xff] }
 0x3ea   : > { %12473 = vmatmul.mubr.msk.f32.gmra.mrb[86].mxu0 %vm997_vm3, %v14928_v57  ;;  %v4334_v57 = vld [vmem:[#allocation2 + $0xf9] sm:$0xff] }
 0x3eb   : > { %12475 = vmatprep.mubr.msk.f32.mxu0 %vm997_vm3, %v14932_v0  ;;  %v4335_v0 = vld [vmem:[#allocation2 + $0x109] sm:$0xff] }
 0x3ee   : > { %12476 = vmatmul.mubr.msk.f32.gmra.mrb[88].mxu0 %vm997_vm3, %v14938_v9  ;;  %v4336_v9 = vld [vmem:[#allocation2 + $0x111] sm:$0xff] }
 0x3ef   : > { %12478 = vmatprep.mubr.msk.f32.mxu0 %vm997_vm3, %v14942_v32  ;;  %v4337_v32 = vld [vmem:[#allocation2 + $0x121] sm:$0xff] }
 0x3f2   : > { %12479 = vmatmul.mubr.msk.f32.gmra.mrb[90].mxu0 %vm997_vm3, %v14948_v4  ;;  %v4338_v4 = vld [vmem:[#allocation2 + $0x129] sm:$0xff] }
 0x3f3   : > { %12481 = vmatprep.mubr.msk.f32.mxu0 %vm997_vm3, %v14952_v5  ;;  %v4339_v5 = vld [vmem:[#allocation2 + $0x139] sm:$0xff] }
 0x3f6   : > { %12482 = vmatmul.mubr.msk.f32.gmra.mrb[92].mxu0 %vm997_vm3, %v14961_v33  ;;  %v9303_v33 = vld [vmem:[%s17474_s9 + $0x8] sm:$0xff] }
 0x3f7   : > { %12484 = vmatprep.mubr.msk.f32.mxu0 %vm997_vm3, %v15168_v60  ;;  %v15398_v18 = vpack.c.bf16 %v9303_v33, %v9302_v62  ;;  %v4342_v60 = vld [vmem:[#allocation2 + $0x159] sm:$0xff] }
 0x3fa   : > { %12485 = vmatmul.mubr.msk.f32.gmra.mrb[94].mxu0 %vm997_vm3, %v15174_v11  ;;  %v4343_v11 = vld [vmem:[#allocation2 + $0x169] sm:$0xff] }
 0x3fb   : > { %12487 = vmatprep.mubr.msk.f32.mxu0 %vm997_vm3, %v3959_v13  ;;  %v4348_v13 = vld [vmem:[#allocation2 + $0x1a1] sm:$0xff] }
 0x3fe   : > { %12488 = vmatmul.mubr.msk.f32.gmra.mrb[96].mxu0 %vm997_vm3, %v3960_v14 }
 0x3ff   : > { %12494 = vmatprep.mubr.msk.f32.mxu0 %vm997_vm3, %v4317_v16 }
 0x402   : > { %12495 = vmatmul.mubr.msk.f32.vlgmr.msra.gmra.mrb[66].mxu0 %vm997_vm3, %v4318_v19 }
 0x403   : > { %12497 = vmatprep.mubr.msk.f32.mxu0 %vm997_vm3, %v4319_v20  ;;  %13251 = vmatpush3.bf16.msra.mxu0 %v13248_v8  ;;  %v4341_v8 = vld [vmem:[#allocation2 + $0x151] sm:$0xff] }
 0x404   : > { %13373 = vmatprep.subr.bf16.mxu0 %v15398_v18 }
 0x406   : > { %12498 = vmatmul.mubr.msk.f32.gmra.mrb[68].mxu0 %vm997_vm3, %v4320_v23 }
 0x407   : > { %12500 = vmatprep.mubr.msk.f32.mxu0 %vm997_vm3, %v4321_v25 }
 0x40a   : > { %12501 = vmatmul.mubr.msk.f32.gmra.mrb[70].mxu0 %vm997_vm3, %v4322_v27 }
 0x40b   : > { %12503 = vmatprep.mubr.msk.f32.mxu0 %vm997_vm3, %v4323_v29 }
 0x40e   : > { %12504 = vmatmul.mubr.msk.f32.gmra.mrb[72].mxu0 %vm997_vm3, %v4324_v40 }
 0x40f   : > { %12506 = vmatprep.mubr.msk.f32.mxu0 %vm997_vm3, %v4325_v41 }
 0x412   : > { %12507 = vmatmul.mubr.msk.f32.gmra.mrb[74].mxu0 %vm997_vm3, %v4326_v45 }
 0x413   : > { %12509 = vmatprep.mubr.msk.f32.mxu0 %vm997_vm3, %v4327_v30 }
 0x416   : > { %12510 = vmatmul.mubr.msk.f32.gmra.mrb[76].mxu0 %vm997_vm3, %v4328_v47 }
 0x417   : > { %12512 = vmatprep.mubr.msk.f32.mxu0 %vm997_vm3, %v4329_v38 }
 0x41a   : > { %12513 = vmatmul.mubr.msk.f32.gmra.mrb[78].mxu0 %vm997_vm3, %v4330_v34 }
 0x41b   : > { %12515 = vmatprep.mubr.msk.f32.mxu0 %vm997_vm3, %v4331_v49 }
 0x41e   : > { %12516 = vmatmul.mubr.msk.f32.gmra.mrb[80].mxu0 %vm997_vm3, %v4332_v51 }
 0x41f   : > { %12518 = vmatprep.mubr.msk.f32.mxu0 %vm997_vm3, %v4333_v55 }
 0x422   : > { %12519 = vmatmul.mubr.msk.f32.gmra.mrb[82].mxu0 %vm997_vm3, %v4334_v57 }
 0x423   : > { %12521 = vmatprep.mubr.msk.f32.mxu0 %vm997_vm3, %v4335_v0 }
 0x426   : > { %12522 = vmatmul.mubr.msk.f32.gmra.mrb[84].mxu0 %vm997_vm3, %v4336_v9 }
 0x427   : > { %12524 = vmatprep.mubr.msk.f32.mxu0 %vm997_vm3, %v4337_v32 }
 0x42a   : > { %12525 = vmatmul.mubr.msk.f32.gmra.mrb[86].mxu0 %vm997_vm3, %v4338_v4 }
 0x42b   : > { %12527 = vmatprep.mubr.msk.f32.mxu0 %vm997_vm3, %v4339_v5 }
 0x42e   : > { %12528 = vmatmul.mubr.msk.f32.gmra.mrb[88].mxu0 %vm997_vm3, %v4340_v7 }
 0x42f   : > { %12530 = vmatprep.mubr.msk.f32.mxu0 %vm997_vm3, %v4341_v8 }
 0x432   : > { %12531 = vmatmul.mubr.msk.f32.gmra.mrb[90].mxu0 %vm997_vm3, %v4342_v60 }
 0x433   : > { %12533 = vmatprep.mubr.msk.f32.mxu0 %vm997_vm3, %v4343_v11 }
 0x436   : > { %12534 = vmatmul.mubr.msk.f32.gmra.mrb[92].mxu0 %vm997_vm3, %v4344_v56 }
 0x437   : > { %12536 = vmatprep.mubr.msk.f32.mxu0 %vm997_vm3, %v17692_v44  ;;  %v17721_v44 = vld [vmem:[#allocation42_spill] sm:$0xff] }
 0x43a   : > { %12537 = vmatmul.mubr.msk.f32.gmra.mrb[94].mxu0 %vm997_vm3, %v14972_v2  ;;  %v17720_v2 = vld [vmem:[#allocation41_spill] sm:$0xff] }
 0x43b   : > { %12539 = vmatprep.mubr.msk.f32.mxu0 %vm997_vm3, %v4347_v63 }
 0x43e   : > { %12540 = vmatmul.mubr.msk.f32.gmra.mrb[96].mxu0 %vm997_vm3, %v4348_v13 }
 0x43f   : > { %12546 = vmatprep.mubr.msk.f32.mxu0 %vm997_vm3, %v17695_v1  ;;  %v4735_v1 = vld [vmem:[#allocation2 + $0x19a] sm:$0xff] }
 0x442   : > { %12547 = vmatmul.mubr.msk.f32.vlgmr.msra.gmra.mrb[66].mxu0 %vm997_vm3, %v17696_v6  ;;  %v4736_v6 = vld [vmem:[#allocation2 + $0x1a2] sm:$0xff] }
 0x443   : > { %12549 = vmatprep.mubr.msk.f32.mxu0 %vm997_vm3, %v17697_v10  ;;  %13375 = vmatpush3.bf16.msra.mxu0 %v15398_v18  ;;  %v9304_v10 = vld [vmem:[%s17474_s9 + $0x10] sm:$0xff] }
 0x446   : > { %12550 = vmatmul.mubr.msk.f32.gmra.mrb[68].mxu0 %vm997_vm3, %v17698_v15 }
 0x447   : > { %12552 = vmatprep.mubr.msk.f32.mxu0 %vm997_vm3, %v17699_v17  ;;  %v5165_v17 = vld [vmem:[%s17469_s4 + $0x8] sm:$0xff] }
 0x448   : > { %5310 = vmatprep.mubr.f32.mxu1 %v5165_v17 }
 0x44a   : > { %12553 = vmatmul.mubr.msk.f32.gmra.mrb[70].mxu0 %vm997_vm3, %v17700_v21  ;;  %v15509_v21 = vld [vmem:[%s17471_s6] ss:$0 sm:$0xff] }
 0x44b   : > { %12555 = vmatprep.mubr.msk.f32.mxu0 %vm997_vm3, %v17701_v24 }
 0x44e   : > { %12556 = vmatmul.mubr.msk.f32.gmra.mrb[72].mxu0 %vm997_vm3, %v17702_v31 }
 0x44f   : > { %12558 = vmatprep.mubr.msk.f32.mxu0 %vm997_vm3, %v17703_v36 }
 0x452   : > { %12559 = vmatmul.mubr.msk.f32.gmra.mrb[74].mxu0 %vm997_vm3, %v17704_v43 }
 0x453   : > { %12561 = vmatprep.mubr.msk.f32.mxu0 %vm997_vm3, %v17705_v46 }
 0x456   : > { %12562 = vmatmul.mubr.msk.f32.gmra.mrb[76].mxu0 %vm997_vm3, %v17706_v52 }
 0x457   : > { %12564 = vmatprep.mubr.msk.f32.mxu0 %vm997_vm3, %v17707_v58 }
 0x45a   : > { %12565 = vmatmul.mubr.msk.f32.gmra.mrb[78].mxu0 %vm997_vm3, %v17708_v59 }
 0x45b   : > { %12567 = vmatprep.mubr.msk.f32.mxu0 %vm997_vm3, %v17709_v42 }
 0x45e   : > { %12568 = vmatmul.mubr.msk.f32.gmra.mrb[80].mxu0 %vm997_vm3, %v17710_v12 }
 0x45f   : > { %12570 = vmatprep.mubr.msk.f32.mxu0 %vm997_vm3, %v17711_v3 }
 0x462   : > { %12571 = vmatmul.mubr.msk.f32.gmra.mrb[82].mxu0 %vm997_vm3, %v17712_v53 }
 0x463   : > { %12573 = vmatprep.mubr.msk.f32.mxu0 %vm997_vm3, %v17713_v22 }
 0x466   : > { %12574 = vmatmul.mubr.msk.f32.gmra.mrb[84].mxu0 %vm997_vm3, %v17714_v26 }
 0x467   : > { %12576 = vmatprep.mubr.msk.f32.mxu0 %vm997_vm3, %v17715_v28 }
 0x46a   : > { %12577 = vmatmul.mubr.msk.f32.gmra.mrb[86].mxu0 %vm997_vm3, %v17716_v35 }
 0x46b   : > { %12579 = vmatprep.mubr.msk.f32.mxu0 %vm997_vm3, %v17717_v39  ;;  %v17726_v39 = vmov 0.0|0.0  }
 0x46e   : > { %12580 = vmatmul.mubr.msk.f32.gmra.mrb[88].mxu0 %vm997_vm3, %v17718_v37 }
 0x46f   : > { %12582 = vmatprep.mubr.msk.f32.mxu0 %vm997_vm3, %v17719_v48 }
 0x472   : > { %12583 = vmatmul.mubr.msk.f32.gmra.mrb[90].mxu0 %vm997_vm3, %v17720_v2 }
 0x473   : > { %12585 = vmatprep.mubr.msk.f32.mxu0 %vm997_vm3, %v15095_v61  ;;  %v9305_v61 = vld [vmem:[%s17474_s9 + $0x18] sm:$0xff] }
 0x474   : > { %v13376_v15 = vpack.c.bf16 %v9305_v61, %v9304_v10 }
 0x476   : > { %12586 = vmatmul.mubr.msk.f32.gmra.mrb[92].mxu0 %vm997_vm3, %v17721_v44  ;;  %13377 = vmatprep.subr.bf16.mxu0 %v13376_v15 }
 0x477   : > { %12588 = vmatprep.mubr.msk.f32.mxu0 %vm997_vm3, %v15315_v50  ;;  %13379 = vmatpush3.bf16.msra.mxu0 %v13376_v15 }
 0x47a   : > { %12589 = vmatmul.mubr.msk.f32.gmra.mrb[94].mxu0 %vm997_vm3, %v15319_v54 }
 0x47b   : > { %12591 = vmatprep.mubr.msk.f32.mxu0 %vm997_vm3, %v4735_v1 }
 0x47e   : > { %12592 = vmatmul.mubr.msk.f32.gmra.mrb[96].mxu0 %vm997_vm3, %v4736_v6  ;;  %vm5518_vm3 = vcmask 254976  }
 0x515   : > { %v12548_v24 = vpop.f32.mrb[66].mxu0 }
 0x516   : > { %v5101_v31 = vadd.f32 %v12548_v24, %v15509_v21  ;;  %v4902_v36 = vpop.f32.mrb[67].mxu0 }
 0x517   : > { %v5100_v43 = vadd.f32 %v15509_v21, %v4902_v36 }
 0x518   : > { %v15513_v46 = vmax.f32 %v5101_v31, 0.0 }
 0x519   : > { %v15515_v52 = vmax.f32 %v5100_v43, 0.0  ;;  %v12551_v58 = vpop.f32.mrb[68].mxu0 }
 0x51a   : > { %17722 = vst [vmem:[#allocation9_spill] sm:$0xff] %v15513_v46  ;;  %v5103_v59 = vadd.f32 %v12551_v58, %v15509_v21  ;;  %v4912_v42 = vpop.f32.mrb[69].mxu0 }
 0x51b   : > { %17723 = vst [vmem:[#allocation10_spill] sm:$0xff] %v15515_v52  ;;  %v13253_v12 = vpack.c.bf16 %v15513_v46, %v15515_v52  ;;  %v5102_v3 = vadd.f32 %v15509_v21, %v4912_v42  ;;  %13106 = vmatprep.mubr.msk.f32.mxu0 %vm1131_vm6, %v15515_v52  ;;  %v10875_v52 = vld [vmem:[%s17472_s7 + $0x78] sm:$0xff] }
 0x51c   : > { %v15523_v53 = vmax.f32 %v5103_v59, 0.0  ;;  %13107 = vmatmul.mubr.msk.f32.vlgmr.msra.gmra.mrb[98].mxu0 %vm1131_vm6, %v15513_v46 }
 0x51d   : > { %v15527_v22 = vmax.f32 %v5102_v3, 0.0  ;;  %v12554_v26 = vpop.f32.mrb[70].mxu0  ;;  %13254 = vmatpush1.bf16.msra.mxu1 %v13253_v12 }
 0x51e   : > { %17724 = vst [vmem:[#allocation11_spill] sm:$0xff] %v15523_v53  ;;  %v5105_v28 = vadd.f32 %v12554_v26, %v15509_v21  ;;  %v4922_v35 = vpop.f32.mrb[71].mxu0  ;;  %13255 = vmatprep.subr.bf16.mxu1 %v17726_v39 }
 0x51f   : > { %17725 = vst [vmem:[#allocation12_spill] sm:$0xff] %v15527_v22  ;;  %v13256_v37 = vpack.c.bf16 %v15523_v53, %v15527_v22  ;;  %v5104_v48 = vadd.f32 %v15509_v21, %v4922_v35  ;;  %13109 = vmatprep.mubr.msk.f32.mxu0 %vm1131_vm6, %v15527_v22 }
 0x520   : > { %v15536_v50 = vmax.f32 %v5105_v28, 0.0  ;;  %13110 = vmatmul.mubr.msk.f32.gmra.mrb[100].mxu0 %vm1131_vm6, %v15523_v53  ;;  %v10874_v53 = vld [vmem:[%s17472_s7 + $0x70] sm:$0xff] }
 0x521   : > { %v15540_v54 = vmax.f32 %v5104_v48, 0.0  ;;  %v12557_v14 = vpop.f32.mrb[72].mxu0  ;;  %13257 = vmatpush1.bf16.msra.mxu1 %v13256_v37 }
 0x522   : > { %17727 = vst [vmem:[#allocation13_spill] sm:$0xff] %v15536_v50  ;;  %v5107_v16 = vadd.f32 %v12557_v14, %v15509_v21  ;;  %v4932_v62 = vpop.f32.mrb[73].mxu0  ;;  %13258 = vmatprep.subr.bf16.mxu1 %v17726_v39 }
 0x523   : > { %17728 = vst [vmem:[#allocation14_spill] sm:$0xff] %v15540_v54  ;;  %v13259_v33 = vpack.c.bf16 %v15536_v50, %v15540_v54  ;;  %v5106_v18 = vadd.f32 %v15509_v21, %v4932_v62  ;;  %13112 = vmatprep.mubr.msk.f32.mxu0 %vm1131_vm6, %v15540_v54 }
 0x524   : > { %v15549_v19 = vmax.f32 %v5107_v16, 0.0  ;;  %13113 = vmatmul.mubr.msk.f32.gmra.mrb[102].mxu0 %vm1131_vm6, %v15536_v50 }
 0x525   : > { %v15553_v20 = vmax.f32 %v5106_v18, 0.0  ;;  %v12560_v23 = vpop.f32.mrb[74].mxu0  ;;  %13260 = vmatpush1.bf16.msra.mxu1 %v13259_v33 }
 0x526   : > { %17729 = vst [vmem:[#allocation15_spill] sm:$0xff] %v15549_v19  ;;  %v5109_v25 = vadd.f32 %v12560_v23, %v15509_v21  ;;  %v4942_v27 = vpop.f32.mrb[75].mxu0  ;;  %13261 = vmatprep.subr.bf16.mxu1 %v17726_v39 }
 0x527   : > { %17730 = vst [vmem:[#allocation16_spill] sm:$0xff] %v15553_v20  ;;  %v13262_v29 = vpack.c.bf16 %v15549_v19, %v15553_v20  ;;  %v5108_v40 = vadd.f32 %v15509_v21, %v4942_v27  ;;  %13115 = vmatprep.mubr.msk.f32.mxu0 %vm1131_vm6, %v15553_v20 }
 0x528   : > { %v15562_v41 = vmax.f32 %v5109_v25, 0.0  ;;  %13116 = vmatmul.mubr.msk.f32.gmra.mrb[104].mxu0 %vm1131_vm6, %v15549_v19 }
 0x529   : > { %v15566_v45 = vmax.f32 %v5108_v40, 0.0  ;;  %v12563_v30 = vpop.f32.mrb[76].mxu0  ;;  %13263 = vmatpush1.bf16.msra.mxu1 %v13262_v29 }
 0x52a   : > { %17731 = vst [vmem:[#allocation17_spill] sm:$0xff] %v15562_v41  ;;  %v5111_v47 = vadd.f32 %v12563_v30, %v15509_v21  ;;  %v4952_v38 = vpop.f32.mrb[77].mxu0  ;;  %13264 = vmatprep.subr.bf16.mxu1 %v17726_v39 }
 0x52b   : > { %17732 = vst [vmem:[#allocation18_spill] sm:$0xff] %v15566_v45  ;;  %v13265_v34 = vpack.c.bf16 %v15562_v41, %v15566_v45  ;;  %v5110_v49 = vadd.f32 %v15509_v21, %v4952_v38  ;;  %13118 = vmatprep.mubr.msk.f32.mxu0 %vm1131_vm6, %v15566_v45 }
 0x52c   : > { %v15575_v51 = vmax.f32 %v5111_v47, 0.0  ;;  %13119 = vmatmul.mubr.msk.f32.gmra.mrb[106].mxu0 %vm1131_vm6, %v15562_v41 }
 0x52d   : > { %v15579_v55 = vmax.f32 %v5110_v49, 0.0  ;;  %v12566_v57 = vpop.f32.mrb[78].mxu0  ;;  %13266 = vmatpush1.bf16.msra.mxu1 %v13265_v34 }
 0x52e   : > { %17733 = vst [vmem:[#allocation19_spill] sm:$0xff] %v15575_v51  ;;  %v5113_v0 = vadd.f32 %v12566_v57, %v15509_v21  ;;  %v4962_v9 = vpop.f32.mrb[79].mxu0  ;;  %13267 = vmatprep.subr.bf16.mxu1 %v17726_v39 }
 0x52f   : > { %17734 = vst [vmem:[#allocation20_spill] sm:$0xff] %v15579_v55  ;;  %v13268_v32 = vpack.c.bf16 %v15575_v51, %v15579_v55  ;;  %v5112_v4 = vadd.f32 %v15509_v21, %v4962_v9  ;;  %13121 = vmatprep.mubr.msk.f32.mxu0 %vm1131_vm6, %v15579_v55 }
 0x530   : > { %v15588_v5 = vmax.f32 %v5113_v0, 0.0  ;;  %13122 = vmatmul.mubr.msk.f32.gmra.mrb[108].mxu0 %vm1131_vm6, %v15575_v51 }
 0x531   : > { %v15592_v7 = vmax.f32 %v5112_v4, 0.0  ;;  %v12569_v8 = vpop.f32.mrb[80].mxu0  ;;  %13269 = vmatpush1.bf16.msra.mxu1 %v13268_v32 }
 0x532   : > { %17735 = vst [vmem:[#allocation21_spill] sm:$0xff] %v15588_v5  ;;  %v5115_v60 = vadd.f32 %v12569_v8, %v15509_v21  ;;  %v4972_v11 = vpop.f32.mrb[81].mxu0  ;;  %13270 = vmatprep.subr.bf16.mxu1 %v17726_v39 }
 0x533   : > { %17736 = vst [vmem:[#allocation22_spill] sm:$0xff] %v15592_v7  ;;  %v13271_v56 = vpack.c.bf16 %v15588_v5, %v15592_v7  ;;  %v5114_v63 = vadd.f32 %v15509_v21, %v4972_v11  ;;  %13124 = vmatprep.mubr.msk.f32.mxu0 %vm1131_vm6, %v15592_v7 }
 0x534   : > { %v15601_v13 = vmax.f32 %v5115_v60, 0.0  ;;  %13125 = vmatmul.mubr.msk.f32.gmra.mrb[110].mxu0 %vm1131_vm6, %v15588_v5 }
 0x535   : > { %v15605_v2 = vmax.f32 %v5114_v63, 0.0  ;;  %v12572_v44 = vpop.f32.mrb[82].mxu0  ;;  %13272 = vmatpush1.bf16.msra.mxu1 %v13271_v56 }
 0x536   : > { %17737 = vst [vmem:[#allocation23_spill] sm:$0xff] %v15601_v13  ;;  %v5117_v1 = vadd.f32 %v12572_v44, %v15509_v21  ;;  %v4982_v6 = vpop.f32.mrb[83].mxu0  ;;  %13273 = vmatprep.subr.bf16.mxu1 %v17726_v39 }
 0x537   : > { %17738 = vst [vmem:[#allocation24_spill] sm:$0xff] %v15605_v2  ;;  %v13274_v10 = vpack.c.bf16 %v15601_v13, %v15605_v2  ;;  %v5116_v61 = vadd.f32 %v15509_v21, %v4982_v6  ;;  %13127 = vmatprep.mubr.msk.f32.mxu0 %vm1131_vm6, %v15605_v2 }
 0x538   : > { %v15614_v15 = vmax.f32 %v5117_v1, 0.0  ;;  %13128 = vmatmul.mubr.msk.f32.gmra.mrb[112].mxu0 %vm1131_vm6, %v15601_v13 }
 0x539   : > { %v15618_v17 = vmax.f32 %v5116_v61, 0.0  ;;  %v12575_v24 = vpop.f32.mrb[84].mxu0  ;;  %13275 = vmatpush1.bf16.msra.mxu1 %v13274_v10 }
 0x53a   : > { %17739 = vst [vmem:[#allocation25_spill] sm:$0xff] %v15614_v15  ;;  %v5119_v31 = vadd.f32 %v12575_v24, %v15509_v21  ;;  %v4992_v36 = vpop.f32.mrb[85].mxu0  ;;  %13276 = vmatprep.subr.bf16.mxu1 %v17726_v39 }
 0x53b   : > { %17740 = vst [vmem:[#allocation26_spill] sm:$0xff] %v15618_v17  ;;  %v13277_v43 = vpack.c.bf16 %v15614_v15, %v15618_v17  ;;  %v5118_v58 = vadd.f32 %v15509_v21, %v4992_v36  ;;  %13130 = vmatprep.mubr.msk.f32.mxu0 %vm1131_vm6, %v15618_v17 }
 0x53c   : > { %v15627_v59 = vmax.f32 %v5119_v31, 0.0  ;;  %13131 = vmatmul.mubr.msk.f32.gmra.mrb[114].mxu0 %vm1131_vm6, %v15614_v15 }
 0x53d   : > { %v15631_v42 = vmax.f32 %v5118_v58, 0.0  ;;  %v12578_v12 = vpop.f32.mrb[86].mxu0  ;;  %13278 = vmatpush1.bf16.msra.mxu1 %v13277_v43 }
 0x53e   : > { %17741 = vst [vmem:[#allocation27_spill] sm:$0xff] %v15627_v59  ;;  %v5121_v3 = vadd.f32 %v12578_v12, %v15509_v21  ;;  %v5002_v26 = vpop.f32.mrb[87].mxu0  ;;  %13279 = vmatprep.subr.bf16.mxu1 %v17726_v39 }
 0x53f   : > { %17742 = vst [vmem:[#allocation28_spill] sm:$0xff] %v15631_v42  ;;  %v13280_v28 = vpack.c.bf16 %v15627_v59, %v15631_v42  ;;  %v5120_v35 = vadd.f32 %v15509_v21, %v5002_v26  ;;  %13133 = vmatprep.mubr.msk.f32.mxu0 %vm1131_vm6, %v15631_v42  ;;  %v5169_v26 = vld [vmem:[%s17469_s4 + $0x28] sm:$0xff] }
 0x540   : > { %v15640_v37 = vmax.f32 %v5121_v3, 0.0  ;;  %13134 = vmatmul.mubr.msk.f32.gmra.mrb[116].mxu0 %vm1131_vm6, %v15627_v59  ;;  %v5167_v3 = vld [vmem:[%s17469_s4 + $0x18] sm:$0xff] }
 0x541   : > { %v15644_v48 = vmax.f32 %v5120_v35, 0.0  ;;  %v12581_v14 = vpop.f32.mrb[88].mxu0  ;;  %13281 = vmatpush1.bf16.msra.mxu1 %v13280_v28  ;;  %v5168_v28 = vld [vmem:[%s17469_s4 + $0x20] sm:$0xff]  ;;  %v5171_v35 = vld [vmem:[%s17469_s4 + $0x38] sm:$0xff] }
 0x542   : > { %17743 = vst [vmem:[#allocation29_spill] sm:$0xff] %v15640_v37  ;;  %v5123_v16 = vadd.f32 %v12581_v14, %v15509_v21  ;;  %v5012_v62 = vpop.f32.mrb[89].mxu0  ;;  %13282 = vmatprep.subr.bf16.mxu1 %v17726_v39  ;;  %v5170_v14 = vld [vmem:[%s17469_s4 + $0x30] sm:$0xff] }
 0x543   : > { %17744 = vst [vmem:[#allocation30_spill] sm:$0xff] %v15644_v48  ;;  %v13283_v33 = vpack.c.bf16 %v15640_v37, %v15644_v48  ;;  %v5122_v18 = vadd.f32 %v15509_v21, %v5012_v62  ;;  %13136 = vmatprep.mubr.msk.f32.mxu0 %vm1131_vm6, %v15644_v48  ;;  %v5172_v62 = vld [vmem:[%s17469_s4 + $0x40] sm:$0xff] }
 0x544   : > { %v15653_v23 = vmax.f32 %v5123_v16, 0.0  ;;  %13137 = vmatmul.mubr.msk.f32.gmra.mrb[118].mxu0 %vm1131_vm6, %v15640_v37  ;;  %v5173_v16 = vld [vmem:[%s17469_s4 + $0x48] sm:$0xff] }
 0x545   : > { %v15657_v25 = vmax.f32 %v5122_v18, 0.0  ;;  %v12584_v27 = vpop.f32.mrb[90].mxu0  ;;  %13284 = vmatpush1.bf16.msra.mxu1 %v13283_v33  ;;  %v5175_v33 = vld [vmem:[%s17469_s4 + $0x58] sm:$0xff]  ;;  %v5174_v18 = vld [vmem:[%s17469_s4 + $0x50] sm:$0xff] }
 0x546   : > { %17745 = vst [vmem:[#allocation31_spill] sm:$0xff] %v15653_v23  ;;  %v5125_v29 = vadd.f32 %v12584_v27, %v15509_v21  ;;  %v5022_v40 = vpop.f32.mrb[91].mxu0  ;;  %13285 = vmatprep.subr.bf16.mxu1 %v17726_v39  ;;  %v5177_v27 = vld [vmem:[%s17469_s4 + $0x68] sm:$0xff] }
 0x547   : > { %17746 = vst [vmem:[#allocation32_spill] sm:$0xff] %v15657_v25  ;;  %v13286_v30 = vpack.c.bf16 %v15653_v23, %v15657_v25  ;;  %v5124_v47 = vadd.f32 %v15509_v21, %v5022_v40  ;;  %13139 = vmatprep.mubr.msk.f32.mxu0 %vm1131_vm6, %v15657_v25  ;;  %v5179_v40 = vld [vmem:[%s17469_s4 + $0x78] sm:$0xff] }
 0x548   : > { %v15666_v38 = vmax.f32 %v5125_v29, 0.0  ;;  %13140 = vmatmul.mubr.msk.f32.gmra.mrb[120].mxu0 %vm1131_vm6, %v15653_v23  ;;  %v5176_v29 = vld [vmem:[%s17469_s4 + $0x60] sm:$0xff] }
 0x549   : > { %v15670_v34 = vmax.f32 %v5124_v47, 0.0  ;;  %v12587_v49 = vpop.f32.mrb[92].mxu0  ;;  %13287 = vmatpush1.bf16.msra.mxu1 %v13286_v30  ;;  %v5178_v30 = vld [vmem:[%s17469_s4 + $0x70] sm:$0xff]  ;;  %v5181_v47 = vld [vmem:[%s17469_s4 + $0x88] sm:$0xff] }
 0x54a   : > { %17747 = vst [vmem:[#allocation33_spill] sm:$0xff] %v15666_v38  ;;  %v5127_v57 = vadd.f32 %v12587_v49, %v15509_v21  ;;  %v5032_v0 = vpop.f32.mrb[93].mxu0  ;;  %13288 = vmatprep.subr.bf16.mxu1 %v17726_v39  ;;  %v5180_v49 = vld [vmem:[%s17469_s4 + $0x80] sm:$0xff] }
 0x54b   : > { %17748 = vst [vmem:[#allocation34_spill] sm:$0xff] %v15670_v34  ;;  %v13289_v9 = vpack.c.bf16 %v15666_v38, %v15670_v34  ;;  %v5126_v32 = vadd.f32 %v15509_v21, %v5032_v0  ;;  %13142 = vmatprep.mubr.msk.f32.mxu0 %vm1131_vm6, %v15670_v34  ;;  %v5182_v0 = vld [vmem:[%s17469_s4 + $0x90] sm:$0xff] }
 0x54c   : > { %v15679_v4 = vmax.f32 %v5127_v57, 0.0  ;;  %13143 = vmatmul.mubr.msk.f32.gmra.mrb[122].mxu0 %vm1131_vm6, %v15666_v38  ;;  %v5183_v57 = vld [vmem:[%s17469_s4 + $0x98] sm:$0xff] }
 0x54d   : > { %v15683_v8 = vmax.f32 %v5126_v32, 0.0  ;;  %v12590_v60 = vpop.f32.mrb[94].mxu0  ;;  %13290 = vmatpush1.bf16.msra.mxu1 %v13289_v9  ;;  %v5185_v9 = vld [vmem:[%s17469_s4 + $0xa8] sm:$0xff]  ;;  %v5184_v32 = vld [vmem:[%s17469_s4 + $0xa0] sm:$0xff] }
 0x54e   : > { %17749 = vst [vmem:[#allocation35_spill] sm:$0xff] %v15679_v4  ;;  %v5129_v11 = vadd.f32 %v12590_v60, %v15509_v21  ;;  %v5042_v56 = vpop.f32.mrb[95].mxu0  ;;  %13291 = vmatprep.subr.bf16.mxu1 %v17726_v39  ;;  %v5187_v60 = vld [vmem:[%s17469_s4 + $0xb8] sm:$0xff] }
 0x54f   : > { %17750 = vst [vmem:[#allocation36_spill] sm:$0xff] %v15683_v8  ;;  %v13292_v63 = vpack.c.bf16 %v15679_v4, %v15683_v8  ;;  %v5128_v44 = vadd.f32 %v15509_v21, %v5042_v56  ;;  %13145 = vmatprep.mubr.msk.f32.mxu0 %vm1131_vm6, %v15683_v8  ;;  %v5189_v56 = vld [vmem:[%s17469_s4 + $0xc8] sm:$0xff] }
 0x550   : > { %v15692_v1 = vmax.f32 %v5129_v11, 0.0  ;;  %13146 = vmatmul.mubr.msk.f32.gmra.mrb[124].mxu0 %vm1131_vm6, %v15679_v4  ;;  %v5186_v11 = vld [vmem:[%s17469_s4 + $0xb0] sm:$0xff]  ;;  %v10872_v4 = vld [vmem:[%s17472_s7 + $0x60] sm:$0xff]  ;;  %v10873_v8 = vld [vmem:[%s17472_s7 + $0x68] sm:$0xff] }
 0x551   : > { %v15696_v6 = vmax.f32 %v5128_v44, 0.0  ;;  %v12593_v10 = vpop.f32.mrb[96].mxu0  ;;  %13293 = vmatpush1.bf16.msra.mxu1 %v13292_v63  ;;  %v5188_v63 = vld [vmem:[%s17469_s4 + $0xc0] sm:$0xff]  ;;  %v5191_v44 = vld [vmem:[%s17469_s4 + $0xd8] sm:$0xff] }
 0x552   : > { %17751 = vst [vmem:[#allocation37_spill] sm:$0xff] %v15692_v1  ;;  %v5131_v61 = vadd.f32 %v12593_v10, %v15509_v21  ;;  %v5052_v24 = vpop.f32.mrb[97].mxu0  ;;  %13294 = vmatprep.subr.bf16.mxu1 %v17726_v39  ;;  %v5190_v10 = vld [vmem:[%s17469_s4 + $0xd0] sm:$0xff] }
 0x553   : > { %17752 = vst [vmem:[#allocation38_spill] sm:$0xff] %v15696_v6  ;;  %v13295_v31 = vpack.c.bf16 %v15692_v1, %v15696_v6  ;;  %v5130_v36 = vadd.f32 %v15509_v21, %v5052_v24  ;;  %13148 = vmatprep.mubr.msk.f32.mxu0 %vm1131_vm6, %v15696_v6  ;;  %v5164_v21 = vld [vmem:[%s17469_s4] sm:$0xff] }
 0x554   : > { %v15705_v43 = vmax.f32 %v5131_v61, 0.0  ;;  %13149 = vmatmul.mubr.msk.f32.gmra.mrb[126].mxu0 %vm1131_vm6, %v15692_v1  ;;  %v5193_v61 = vld [vmem:[%s17469_s4 + $0xe8] sm:$0xff]  ;;  %v5192_v24 = vld [vmem:[%s17469_s4 + $0xe0] sm:$0xff] }
 0x555   : > { %v15709_v58 = vmax.f32 %v5130_v36, 0.0  ;;  %13296 = vmatpush1.bf16.msra.mxu1 %v13295_v31  ;;  %v5195_v31 = vld [vmem:[%s17469_s4 + $0xf8] sm:$0xff]  ;;  %v5194_v36 = vld [vmem:[%s17469_s4 + $0xf0] sm:$0xff] }
 0x556   : > { %17753 = vst [vmem:[#allocation39_spill] sm:$0xff] %v15705_v43  ;;  %13297 = vmatprep.subr.bf16.mxu1 %v17726_v39  ;;  %v5166_v39 = vld [vmem:[%s17469_s4 + $0x10] sm:$0xff] }
 0x557   : > { %17754 = vst [vmem:[#allocation40_spill] sm:$0xff] %v15709_v58  ;;  %v13298_v12 = vpack.c.bf16 %v15705_v43, %v15709_v58  ;;  %13151 = vmatprep.mubr.msk.f32.mxu0 %vm1131_vm6, %v15709_v58 }
 0x558   : > { %13152 = vmatmul.mubr.msk.f32.gmra.mrb[128].mxu0 %vm1131_vm6, %v15705_v43 }
 0x559   : > { %13299 = vmatpush1.bf16.msra.mxu1 %v13298_v12  ;;  %v5197_v12 = vld [vmem:[%s17469_s4 + $0x108] sm:$0xff] }
 0x55c   : > { %5311 = vmatmul.mubr.f32.vlgmr.msra.gmra.mrb[48].mxu1 %v5164_v21  ;;  %v5196_v21 = vld [vmem:[%s17469_s4 + $0x100] sm:$0xff] }
 0x55d   : > { %5315 = vmatprep.mubr.f32.mxu1 %v5167_v3  ;;  %v5199_v3 = vld [vmem:[%s17469_s4 + $0x118] sm:$0xff] }
 0x560   : > { %5316 = vmatmul.mubr.f32.gmra.mrb[50].mxu1 %v5166_v39  ;;  %v5198_v39 = vld [vmem:[%s17469_s4 + $0x110] sm:$0xff] }
 0x561   : > { %5320 = vmatprep.mubr.f32.mxu1 %v5169_v26  ;;  %v5201_v26 = vld [vmem:[%s17469_s4 + $0x128] sm:$0xff] }
 0x564   : > { %5321 = vmatmul.mubr.f32.gmra.mrb[52].mxu1 %v5168_v28  ;;  %v10768_v28 = vld [vmem:[%s17472_s7 + $0x20] sm:$0xff] }
 0x565   : > { %5325 = vmatprep.mubr.f32.mxu1 %v5171_v35  ;;  %v10769_v35 = vld [vmem:[%s17472_s7 + $0x28] sm:$0xff] }
 0x568   : > { %5326 = vmatmul.mubr.f32.gmra.mrb[54].mxu1 %v5170_v14  ;;  %v13300_v14 = vpack.c.bf16 %v10769_v35, %v10768_v28  ;;  %v5226_v28 = vld [vmem:[%s17469_s4 + $0x1f0] sm:$0xff]  ;;  %v5229_v35 = vld [vmem:[%s17469_s4 + $0x208] sm:$0xff] }
 0x569   : > { %5330 = vmatprep.mubr.f32.mxu1 %v5173_v16  ;;  %v5200_v16 = vld [vmem:[%s17469_s4 + $0x120] sm:$0xff] }
 0x56a   : > { %13301 = vmatprep.subr.bf16.mxu1 %v13300_v14 }
 0x56b   : > { %13303 = vmatpush3.bf16.msra.mxu1 %v13300_v14  ;;  %v5228_v14 = vld [vmem:[%s17469_s4 + $0x200] sm:$0xff] }
 0x56c   : > { %5331 = vmatmul.mubr.f32.gmra.mrb[56].mxu1 %v5172_v62  ;;  %v5203_v62 = vld [vmem:[%s17469_s4 + $0x138] sm:$0xff] }
 0x56d   : > { %5335 = vmatprep.mubr.f32.mxu1 %v5175_v33  ;;  %v5202_v33 = vld [vmem:[%s17469_s4 + $0x130] sm:$0xff] }
 0x570   : > { %5336 = vmatmul.mubr.f32.gmra.mrb[58].mxu1 %v5174_v18  ;;  %v5205_v18 = vld [vmem:[%s17469_s4 + $0x148] sm:$0xff] }
 0x571   : > { %5340 = vmatprep.mubr.f32.mxu1 %v5177_v27  ;;  %v5204_v27 = vld [vmem:[%s17469_s4 + $0x140] sm:$0xff] }
 0x574   : > { %5341 = vmatmul.mubr.f32.gmra.mrb[60].mxu1 %v5176_v29  ;;  %v5207_v29 = vld [vmem:[%s17469_s4 + $0x158] sm:$0xff] }
 0x575   : > { %5345 = vmatprep.mubr.f32.mxu1 %v5179_v40  ;;  %v5206_v40 = vld [vmem:[%s17469_s4 + $0x150] sm:$0xff] }
 0x578   : > { %5346 = vmatmul.mubr.f32.gmra.mrb[62].mxu1 %v5178_v30  ;;  %v5209_v30 = vld [vmem:[%s17469_s4 + $0x168] sm:$0xff] }
 0x579   : > { %5350 = vmatprep.mubr.f32.mxu1 %v5181_v47  ;;  %v5208_v47 = vld [vmem:[%s17469_s4 + $0x160] sm:$0xff] }
 0x57c   : > { %5351 = vmatmul.mubr.f32.gmra.mrb[64].mxu1 %v5180_v49  ;;  %v5211_v49 = vld [vmem:[%s17469_s4 + $0x178] sm:$0xff] }
 0x57d   : > { %5355 = vmatprep.mubr.f32.mxu1 %v5183_v57  ;;  %v5210_v57 = vld [vmem:[%s17469_s4 + $0x170] sm:$0xff] }
 0x580   : > { %5356 = vmatmul.mubr.f32.gmra.mrb[66].mxu1 %v5182_v0  ;;  %v5213_v0 = vld [vmem:[%s17469_s4 + $0x188] sm:$0xff] }
 0x581   : > { %5360 = vmatprep.mubr.f32.mxu1 %v5185_v9  ;;  %v10770_v9 = vld [vmem:[%s17472_s7 + $0x30] sm:$0xff] }
 0x584   : > { %5361 = vmatmul.mubr.f32.gmra.mrb[68].mxu1 %v5184_v32  ;;  %v10771_v32 = vld [vmem:[%s17472_s7 + $0x38] sm:$0xff] }
 0x585   : > { %5365 = vmatprep.mubr.f32.mxu1 %v5187_v60  ;;  %v5212_v60 = vld [vmem:[%s17469_s4 + $0x180] sm:$0xff] }
 0x588   : > { %5366 = vmatmul.mubr.f32.gmra.mrb[70].mxu1 %v5186_v11  ;;  %v13304_v11 = vpack.c.bf16 %v10771_v32, %v10770_v9  ;;  %v5240_v32 = vld [vmem:[%s17469_s4 + $0x260] sm:$0xff] }
 0x589   : > { %5370 = vmatprep.mubr.f32.mxu1 %v5189_v56  ;;  %v5215_v56 = vld [vmem:[%s17469_s4 + $0x198] sm:$0xff] }
 0x58a   : > { %13305 = vmatprep.subr.bf16.mxu1 %v13304_v11 }
 0x58b   : > { %13307 = vmatpush3.bf16.msra.mxu1 %v13304_v11 }
 0x58c   : > { %5371 = vmatmul.mubr.f32.gmra.mrb[72].mxu1 %v5188_v63  ;;  %v5214_v63 = vld [vmem:[%s17469_s4 + $0x190] sm:$0xff] }
 0x58d   : > { %5375 = vmatprep.mubr.f32.mxu1 %v5191_v44  ;;  %v5217_v44 = vld [vmem:[%s17469_s4 + $0x1a8] sm:$0xff] }
 0x590   : > { %5376 = vmatmul.mubr.f32.gmra.mrb[74].mxu1 %v5190_v10  ;;  %v5216_v10 = vld [vmem:[%s17469_s4 + $0x1a0] sm:$0xff] }
 0x591   : > { %5380 = vmatprep.mubr.f32.mxu1 %v5193_v61  ;;  %v5219_v61 = vld [vmem:[%s17469_s4 + $0x1b8] sm:$0xff] }
 0x594   : > { %5381 = vmatmul.mubr.f32.gmra.mrb[76].mxu1 %v5192_v24  ;;  %v5218_v24 = vld [vmem:[%s17469_s4 + $0x1b0] sm:$0xff] }
 0x595   : > { %5385 = vmatprep.mubr.f32.mxu1 %v5195_v31  ;;  %v5221_v31 = vld [vmem:[%s17469_s4 + $0x1c8] sm:$0xff] }
 0x598   : > { %5386 = vmatmul.mubr.f32.gmra.mrb[78].mxu1 %v5194_v36  ;;  %v5220_v36 = vld [vmem:[%s17469_s4 + $0x1c0] sm:$0xff] }
 0x599   : > { %5390 = vmatprep.mubr.f32.mxu1 %v5197_v12  ;;  %v5223_v12 = vld [vmem:[%s17469_s4 + $0x1d8] sm:$0xff] }
 0x59c   : > { %5391 = vmatmul.mubr.f32.gmra.mrb[80].mxu1 %v5196_v21  ;;  %v5222_v21 = vld [vmem:[%s17469_s4 + $0x1d0] sm:$0xff] }
 0x59d   : > { %5395 = vmatprep.mubr.f32.mxu1 %v5199_v3  ;;  %v5225_v3 = vld [vmem:[%s17469_s4 + $0x1e8] sm:$0xff] }
 0x5a0   : > { %5396 = vmatmul.mubr.f32.gmra.mrb[82].mxu1 %v5198_v39  ;;  %v5224_v39 = vld [vmem:[%s17469_s4 + $0x1e0] sm:$0xff] }
 0x5a1   : > { %5400 = vmatprep.mubr.f32.mxu1 %v5201_v26  ;;  %v5227_v26 = vld [vmem:[%s17469_s4 + $0x1f8] sm:$0xff] }
 0x5a4   : > { %5401 = vmatmul.mubr.f32.gmra.mrb[84].mxu1 %v5200_v16  ;;  %v5231_v16 = vld [vmem:[%s17469_s4 + $0x218] sm:$0xff] }
 0x5a5   : > { %5405 = vmatprep.mubr.f32.mxu1 %v5203_v62  ;;  %v5230_v62 = vld [vmem:[%s17469_s4 + $0x210] sm:$0xff] }
 0x5a8   : > { %5406 = vmatmul.mubr.f32.gmra.mrb[86].mxu1 %v5202_v33  ;;  %v5233_v33 = vld [vmem:[%s17469_s4 + $0x228] sm:$0xff] }
 0x5a9   : > { %5410 = vmatprep.mubr.f32.mxu1 %v5205_v18  ;;  %v5232_v18 = vld [vmem:[%s17469_s4 + $0x220] sm:$0xff] }
 0x5ac   : > { %5411 = vmatmul.mubr.f32.gmra.mrb[88].mxu1 %v5204_v27  ;;  %v5235_v27 = vld [vmem:[%s17469_s4 + $0x238] sm:$0xff] }
 0x5ad   : > { %5415 = vmatprep.mubr.f32.mxu1 %v5207_v29  ;;  %v5234_v29 = vld [vmem:[%s17469_s4 + $0x230] sm:$0xff] }
 0x5b0   : > { %5416 = vmatmul.mubr.f32.gmra.mrb[90].mxu1 %v5206_v40  ;;  %v5237_v40 = vld [vmem:[%s17469_s4 + $0x248] sm:$0xff] }
 0x5b1   : > { %5420 = vmatprep.mubr.f32.mxu1 %v5209_v30  ;;  %v5236_v30 = vld [vmem:[%s17469_s4 + $0x240] sm:$0xff] }
 0x5b4   : > { %5421 = vmatmul.mubr.f32.gmra.mrb[92].mxu1 %v5208_v47  ;;  %v5239_v47 = vld [vmem:[%s17469_s4 + $0x258] sm:$0xff] }
 0x5b5   : > { %5425 = vmatprep.mubr.f32.mxu1 %v5211_v49  ;;  %v5238_v49 = vld [vmem:[%s17469_s4 + $0x250] sm:$0xff] }
 0x5b8   : > { %5426 = vmatmul.mubr.f32.gmra.mrb[94].mxu1 %v5210_v57  ;;  %v5241_v57 = vld [vmem:[%s17469_s4 + $0x268] sm:$0xff] }
 0x5b9   : > { %5430 = vmatprep.mubr.f32.mxu1 %v5213_v0 }
 0x5bc   : > { %5431 = vmatmul.mubr.f32.gmra.mrb[96].mxu1 %v5212_v60  ;;  %v5243_v60 = vld [vmem:[%s17469_s4 + $0x278] sm:$0xff] }
 0x5bd   : > { %5435 = vmatprep.mubr.f32.mxu1 %v5215_v56 }
 0x5c0   : > { %5436 = vmatmul.mubr.f32.gmra.mrb[98].mxu1 %v5214_v63  ;;  %v5242_v63 = vld [vmem:[%s17469_s4 + $0x270] sm:$0xff] }
 0x5c1   : > { %5440 = vmatprep.mubr.f32.mxu1 %v5217_v44  ;;  %v5245_v44 = vld [vmem:[%s17469_s4 + $0x288] sm:$0xf] }
 0x5c4   : > { %5441 = vmatmul.mubr.f32.gmra.mrb[100].mxu1 %v5216_v10 }
 0x5c5   : > { %5445 = vmatprep.mubr.f32.mxu1 %v5219_v61 }
 0x5c8   : > { %5446 = vmatmul.mubr.f32.gmra.mrb[102].mxu1 %v5218_v24  ;;  %v5244_v24 = vld [vmem:[%s17469_s4 + $0x280] sm:$0xf] }
 0x5c9   : > { %5450 = vmatprep.mubr.f32.mxu1 %v5221_v31 }
 0x5cc   : > { %5451 = vmatmul.mubr.f32.gmra.mrb[104].mxu1 %v5220_v36 }
 0x5cd   : > { %5455 = vmatprep.mubr.f32.mxu1 %v5223_v12 }
 0x5d0   : > { %5456 = vmatmul.mubr.f32.gmra.mrb[106].mxu1 %v5222_v21 }
 0x5d1   : > { %5460 = vmatprep.mubr.f32.mxu1 %v5225_v3 }
 0x5d4   : > { %5461 = vmatmul.mubr.f32.gmra.mrb[108].mxu1 %v5224_v39 }
 0x5d5   : > { %5465 = vmatprep.mubr.f32.mxu1 %v5227_v26 }
 0x5d8   : > { %5466 = vmatmul.mubr.f32.gmra.mrb[110].mxu1 %v5226_v28 }
 0x5d9   : > { %5470 = vmatprep.mubr.f32.mxu1 %v5229_v35 }
 0x5dc   : > { %5471 = vmatmul.mubr.f32.gmra.mrb[112].mxu1 %v5228_v14 }
 0x5dd   : > { %5475 = vmatprep.mubr.f32.mxu1 %v5231_v16 }
 0x5e0   : > { %5476 = vmatmul.mubr.f32.gmra.mrb[114].mxu1 %v5230_v62 }
 0x5e1   : > { %5480 = vmatprep.mubr.f32.mxu1 %v5233_v33 }
 0x5e4   : > { %5481 = vmatmul.mubr.f32.gmra.mrb[116].mxu1 %v5232_v18 }
 0x5e5   : > { %5485 = vmatprep.mubr.f32.mxu1 %v5235_v27 }
 0x5e8   : > { %5486 = vmatmul.mubr.f32.gmra.mrb[118].mxu1 %v5234_v29 }
 0x5e9   : > { %5490 = vmatprep.mubr.f32.mxu1 %v5237_v40 }
 0x5ec   : > { %5491 = vmatmul.mubr.f32.gmra.mrb[120].mxu1 %v5236_v30 }
 0x5ed   : > { %5495 = vmatprep.mubr.f32.mxu1 %v5239_v47 }
 0x5ef   : > { %v15958_v0 = vpop.f32.mrb[98].mxu0 }
 0x5f0   : > { %17755 = vst [vmem:[#allocation41_spill] sm:$0xff] %v15958_v0  ;;  %v15960_v9 = vpop.f32.mrb[99].mxu0  ;;  %5496 = vmatmul.mubr.f32.gmra.mrb[122].mxu1 %v5238_v49 }
 0x5f1   : > { %17756 = vst [vmem:[#allocation42_spill] sm:$0xff] %v15960_v9  ;;  %5500 = vmatprep.mubr.f32.mxu1 %v5241_v57 }
 0x5f3   : > { %v15968_v11 = vpop.f32.mrb[100].mxu0 }
 0x5f4   : > { %17757 = vst [vmem:[#allocation43_spill] sm:$0xff] %v15968_v11  ;;  %v15970_v56 = vpop.f32.mrb[101].mxu0  ;;  %5501 = vmatmul.mubr.f32.gmra.mrb[124].mxu1 %v5240_v32 }
 0x5f5   : > { %17758 = vst [vmem:[#allocation44_spill] sm:$0xff] %v15970_v56  ;;  %5505 = vmatprep.mubr.f32.mxu1 %v5243_v60 }
 0x5f7   : > { %v15978_v10 = vpop.f32.mrb[102].mxu0 }
 0x5f8   : > { %17759 = vst [vmem:[#allocation45_spill] sm:$0xff] %v15978_v10  ;;  %v15980_v61 = vpop.f32.mrb[103].mxu0  ;;  %5506 = vmatmul.mubr.f32.gmra.mrb[126].mxu1 %v5242_v63 }
 0x5f9   : > { %17760 = vst [vmem:[#allocation46_spill] sm:$0xff] %v15980_v61  ;;  %5510 = vmatprep.mubr.f32.mxu1 %v5245_v44 }
 0x5fb   : > { %v15985_v31 = vpop.f32.mrb[104].mxu0 }
 0x5fc   : > { %17761 = vst [vmem:[#allocation47_spill] sm:$0xff] %v15985_v31  ;;  %v15987_v36 = vpop.f32.mrb[105].mxu0  ;;  %5511 = vmatmul.mubr.f32.gmra.mrb[128].mxu1 %v5244_v24 }
 0x5fd   : > { %17762 = vst [vmem:[#allocation48_spill] sm:$0xff] %v15987_v36 }
 0x5ff   : > { %v15989_v12 = vpop.f32.mrb[106].mxu0 }
 0x600   : > { %17763 = vst [vmem:[#allocation49_spill] sm:$0xff] %v15989_v12  ;;  %v15991_v21 = vpop.f32.mrb[107].mxu0 }
 0x601   : > { %17764 = vst [vmem:[#allocation50_spill] sm:$0xff] %v15991_v21 }
 0x603   : > { %v15993_v3 = vpop.f32.mrb[108].mxu0 }
 0x604   : > { %17765 = vst [vmem:[#allocation51_spill] sm:$0xff] %v15993_v3  ;;  %v15995_v39 = vpop.f32.mrb[109].mxu0 }
 0x605   : > { %17766 = vst [vmem:[#allocation52_spill] sm:$0xff] %v15995_v39 }
 0x607   : > { %v15997_v26 = vpop.f32.mrb[110].mxu0 }
 0x608   : > { %17767 = vst [vmem:[#allocation53_spill] sm:$0xff] %v15997_v26  ;;  %v15999_v28 = vpop.f32.mrb[111].mxu0 }
 0x609   : > { %17768 = vst [vmem:[#allocation54_spill] sm:$0xff] %v15999_v28 }
 0x60b   : > { %v16001_v35 = vpop.f32.mrb[112].mxu0 }
 0x60c   : > { %17769 = vst [vmem:[#allocation55_spill] sm:$0xff] %v16001_v35  ;;  %v16003_v14 = vpop.f32.mrb[113].mxu0 }
 0x60d   : > { %17770 = vst [vmem:[#allocation56_spill] sm:$0xff] %v16003_v14 }
 0x60f   : > { %v16005_v16 = vpop.f32.mrb[114].mxu0 }
 0x610   : > { %17771 = vst [vmem:[#allocation57_spill] sm:$0xff] %v16005_v16  ;;  %v16007_v62 = vpop.f32.mrb[115].mxu0 }
 0x611   : > { %17772 = vst [vmem:[#allocation58_spill] sm:$0xff] %v16007_v62 }
 0x613   : > { %v16009_v33 = vpop.f32.mrb[116].mxu0 }
 0x614   : > { %17773 = vst [vmem:[#allocation59_spill] sm:$0xff] %v16009_v33  ;;  %v16011_v18 = vpop.f32.mrb[117].mxu0 }
 0x615   : > { %17774 = vst [vmem:[#allocation60_spill] sm:$0xff] %v16011_v18 }
 0x617   : > { %v16013_v27 = vpop.f32.mrb[118].mxu0 }
 0x618   : > { %17775 = vst [vmem:[#allocation61_spill] sm:$0xff] %v16013_v27  ;;  %v16015_v29 = vpop.f32.mrb[119].mxu0 }
 0x619   : > { %17776 = vst [vmem:[#allocation62_spill] sm:$0xff] %v16015_v29 }
 0x61b   : > { %v16017_v40 = vpop.f32.mrb[120].mxu0 }
 0x61c   : > { %17777 = vst [vmem:[#allocation63_spill] sm:$0xff] %v16017_v40  ;;  %v16019_v30 = vpop.f32.mrb[121].mxu0 }
 0x61d   : > { %17778 = vst [vmem:[#allocation64_spill] sm:$0xff] %v16019_v30 }
 0x61f   : > { %v16021_v47 = vpop.f32.mrb[122].mxu0 }
 0x620   : > { %17779 = vst [vmem:[#allocation65_spill] sm:$0xff] %v16021_v47  ;;  %v16023_v49 = vpop.f32.mrb[123].mxu0 }
 0x621   : > { %17780 = vst [vmem:[#allocation66_spill] sm:$0xff] %v16023_v49 }
 0x623   : > { %v16025_v57 = vpop.f32.mrb[124].mxu0 }
 0x624   : > { %17781 = vst [vmem:[#allocation67_spill] sm:$0xff] %v16025_v57  ;;  %v16027_v32 = vpop.f32.mrb[125].mxu0 }
 0x625   : > { %17782 = vst [vmem:[#allocation68_spill] sm:$0xff] %v16027_v32 }
 0x627   : > { %v16029_v60 = vpop.f32.mrb[126].mxu0 }
 0x628   : > { %17783 = vst [vmem:[#allocation69_spill] sm:$0xff] %v16029_v60  ;;  %v16031_v63 = vpop.f32.mrb[127].mxu0 }
 0x629   : > { %17784 = vst [vmem:[#allocation70_spill] sm:$0xff] %v16031_v63 }
 0x62b   : > { %v16033_v44 = vpop.f32.mrb[128].mxu0 }
 0x62c   : > { %17785 = vst [vmem:[#allocation71_spill] sm:$0xff] %v16033_v44  ;;  %v16035_v24 = vpop.f32.mrb[129].mxu0 }
 0x62d   : > { %17786 = vst [vmem:[#allocation72_spill] sm:$0xff] %v16035_v24 }
 0x62f   : > { %v5312_v29 = vpop.f32.mrb[48].mxu1 }
 0x630   : > { %5516 = vst.msk [vmem:[#allocation3] sm:$0xff] %vm1131_vm6, %v5312_v29  ;;  %v5314_v30 = vpop.f32.mrb[49].mxu1 }
 0x631   : > { %v5626_v30 = vld [vmem:[%s17472_s7 + $0x8] sm:$0xff] }
 0x633   : > { %v5317_v40 = vpop.f32.mrb[50].mxu1 }
 0x634   : > { %5517 = vst.msk [vmem:[#allocation3 + $0x8] sm:$0xff] %vm1131_vm6, %v5317_v40  ;;  %v5319_v49 = vpop.f32.mrb[51].mxu1  ;;  %v5625_v40 = vld [vmem:[%s17472_s7] sm:$0xff] }
 0x635   : > { %v13308_v49 = vpack.c.bf16 %v5626_v30, %v5625_v40  ;;  %v5627_v30 = vld [vmem:[%s17472_s7 + $0x10] sm:$0xff] }
 0x637   : > { %v5322_v57 = vpop.f32.mrb[52].mxu1  ;;  %13309 = vmatprep.subr.bf16.mxu1 %v13308_v49 }
 0x638   : > { %5519 = vst.msk [vmem:[#allocation3 + $0x10] sm:$0x3] %vm5518_vm3, %v5322_v57  ;;  %v5324_v63 = vpop.f32.mrb[53].mxu1 }
 0x639   : > { %5522 = vst.msk [vmem:[#allocation3 + $0x16] sm:$0xfc] %vm5521_vm12, %v5322_v57 }
 0x63b   : > { %v5327_v60 = vpop.f32.mrb[54].mxu1  ;;  %v5629_v44 = vld [vmem:[#allocation3 + $0x1] sm:$0xff] }
 0x63c   : > { %5523 = vst.msk [vmem:[#allocation3 + $0x1e] sm:$0xff] %vm1131_vm6, %v5327_v60  ;;  %12602 = vmatprep.mubr.msk.f32.mxu1 %vm1131_vm6, %v5629_v44  ;;  %v5329_v29 = vpop.f32.mrb[55].mxu1  ;;  %v5594_v6 = vld [vmem:[#allocation3 + $0x8] sm:$0xff] }
 0x63d   : > { %v6308_v46 = vld [vmem:[#allocation3 + $0x2] sm:$0xff] }
 0x63f   : > { %v5332_v57 = vpop.f32.mrb[56].mxu1  ;;  %v5630_v63 = vld [vmem:[#allocation3 + $0x9] sm:$0xff] }
 0x640   : > { %5525 = vst.msk [vmem:[#allocation3 + $0x26] sm:$0xf] %vm5524_vm13, %v5332_v57  ;;  %12603 = vmatmul.mubr.msk.f32.vlgmr.msra.gmra.mrb[130].mxu1 %vm1131_vm6, %v5630_v63  ;;  %v5334_v60 = vpop.f32.mrb[57].mxu1 }
 0x641   : > { %5528 = vst.msk [vmem:[#allocation3 + $0x2c] sm:$0xf0] %vm5527_vm14, %v5332_v57  ;;  %13311 = vmatpush3.bf16.msra.mxu1 %v13308_v49  ;;  %v5628_v57 = vld [vmem:[%s17472_s7 + $0x18] sm:$0xff] }
 0x642   : > { %v13312_v49 = vpack.c.bf16 %v5628_v57, %v5627_v30 }
 0x643   : > { %v5337_v44 = vpop.f32.mrb[58].mxu1  ;;  %v16052_v29 = vld [vmem:[#allocation3 + $0x19] sm:$0xff] }
 0x644   : > { %5529 = vst.msk [vmem:[#allocation3 + $0x34] sm:$0xff] %vm1131_vm6, %v5337_v44  ;;  %12605 = vmatprep.mubr.msk.f32.mxu1 %vm1131_vm6, %v16052_v29  ;;  %v5339_v40 = vpop.f32.mrb[59].mxu1  ;;  %13313 = vmatprep.subr.bf16.mxu1 %v13312_v49  ;;  %v16242_v38 = vld [vmem:[#allocation3 + $0x18] sm:$0xff] }
 0x645   : > { %13315 = vmatpush3.bf16.msra.mxu1 %v13312_v49 }
 0x647   : > { %v5342_v63 = vpop.f32.mrb[60].mxu1  ;;  %v16063_v60 = vld [vmem:[#allocation3 + $0x21] sm:$0xff] }
 0x648   : > { %5531 = vst.msk [vmem:[#allocation3 + $0x3c] sm:$0x3f] %vm5530_vm15, %v5342_v63  ;;  %12606 = vmatmul.mubr.msk.f32.gmra.mrb[132].mxu1 %vm1131_vm6, %v16063_v60  ;;  %v5344_v44 = vpop.f32.mrb[61].mxu1  ;;  %v16250_v23 = vld [vmem:[#allocation3 + $0x20] sm:$0xff] }
 0x649   : > { %5534 = vst.msk [vmem:[#allocation3 + $0x42] sm:$0xc0] %vm5533_vm0, %v5342_v63 }
 0x64b   : > { %v5347_v40 = vpop.f32.mrb[62].mxu1  ;;  %v16069_v24 = vld [vmem:[#allocation3 + $0x31] sm:$0xff] }
 0x64c   : > { %5535 = vst.msk [vmem:[#allocation3 + $0x4a] sm:$0xff] %vm1131_vm6, %v5347_v40  ;;  %12608 = vmatprep.mubr.msk.f32.mxu1 %vm1131_vm6, %v16069_v24  ;;  %v5349_v30 = vpop.f32.mrb[63].mxu1  ;;  %v16255_v25 = vld [vmem:[#allocation3 + $0x30] sm:$0xff] }
 0x64f   : > { %v5352_v57 = vpop.f32.mrb[64].mxu1  ;;  %v16074_v32 = vld [vmem:[#allocation3 + $0x39] sm:$0xff] }
 0x650   : > { %5536 = vst.msk [vmem:[#allocation3 + $0x52] sm:$0xff] %vm1131_vm6, %v5352_v57  ;;  %12609 = vmatmul.mubr.msk.f32.gmra.mrb[134].mxu1 %vm1131_vm6, %v16074_v32  ;;  %v5354_v63 = vpop.f32.mrb[65].mxu1 }
 0x653   : > { %v5357_v44 = vpop.f32.mrb[66].mxu1  ;;  %v16079_v49 = vld [vmem:[#allocation3 + $0x49] sm:$0xff] }
 0x654   : > { %5538 = vst.msk [vmem:[#allocation3 + $0x60] sm:$0xff] %vm1131_vm6, %v5357_v44  ;;  %v5359_v47 = vpop.f32.mrb[67].mxu1  ;;  %12611 = vmatprep.mubr.msk.f32.mxu1 %vm1131_vm6, %v16079_v49 }
 0x657   : > { %v5362_v40 = vpop.f32.mrb[68].mxu1  ;;  %v16084_v30 = vld [vmem:[#allocation3 + $0x51] sm:$0xff] }
 0x658   : > { %5539 = vst.msk [vmem:[#allocation3 + $0x68] sm:$0xff] %vm1131_vm6, %v5362_v40  ;;  %v5364_v27 = vpop.f32.mrb[69].mxu1  ;;  %12612 = vmatmul.mubr.msk.f32.gmra.mrb[136].mxu1 %vm1131_vm6, %v16084_v30 }
 0x65b   : > { %v5367_v57 = vpop.f32.mrb[70].mxu1 }
 0x65c   : > { %5540 = vst.msk [vmem:[#allocation3 + $0x70] sm:$0x3] %vm5518_vm3, %v5367_v57  ;;  %v5369_v63 = vpop.f32.mrb[71].mxu1 }
 0x65d   : > { %5542 = vst.msk [vmem:[#allocation3 + $0x76] sm:$0xfc] %vm5521_vm12, %v5367_v57 }
 0x65f   : > { %v5372_v44 = vpop.f32.mrb[72].mxu1  ;;  %v16091_v47 = vld [vmem:[#allocation3 + $0x61] sm:$0xff] }
 0x660   : > { %5543 = vst.msk [vmem:[#allocation3 + $0x7e] sm:$0xff] %vm1131_vm6, %v5372_v44  ;;  %v5374_v18 = vpop.f32.mrb[73].mxu1  ;;  %12614 = vmatprep.mubr.msk.f32.mxu1 %vm1131_vm6, %v16091_v47 }
 0x663   : > { %v5377_v40 = vpop.f32.mrb[74].mxu1  ;;  %v16096_v27 = vld [vmem:[#allocation3 + $0x69] sm:$0xff] }
 0x664   : > { %5544 = vst.msk [vmem:[#allocation3 + $0x86] sm:$0xf] %vm5524_vm13, %v5377_v40  ;;  %v5379_v33 = vpop.f32.mrb[75].mxu1  ;;  %12615 = vmatmul.mubr.msk.f32.gmra.mrb[138].mxu1 %vm1131_vm6, %v16096_v27 }
 0x665   : > { %5546 = vst.msk [vmem:[#allocation3 + $0x8c] sm:$0xf0] %vm5527_vm14, %v5377_v40 }
 0x667   : > { %v5382_v57 = vpop.f32.mrb[76].mxu1  ;;  %v16102_v63 = vld [vmem:[#allocation3 + $0x79] sm:$0xff] }
 0x668   : > { %5547 = vst.msk [vmem:[#allocation3 + $0x94] sm:$0xff] %vm1131_vm6, %v5382_v57  ;;  %v5384_v18 = vpop.f32.mrb[77].mxu1  ;;  %12617 = vmatprep.mubr.msk.f32.mxu1 %vm1131_vm6, %v16102_v63  ;;  %v16284_v48 = vld [vmem:[#allocation3 + $0x78] sm:$0xff] }
 0x66b   : > { %v5387_v44 = vpop.f32.mrb[78].mxu1  ;;  %v16107_v62 = vld [vmem:[#allocation3 + $0x81] sm:$0xff] }
 0x66c   : > { %5548 = vst.msk [vmem:[#allocation3 + $0x9c] sm:$0x3f] %vm5530_vm15, %v5387_v44  ;;  %v5389_v33 = vpop.f32.mrb[79].mxu1  ;;  %12618 = vmatmul.mubr.msk.f32.gmra.mrb[140].mxu1 %vm1131_vm6, %v16107_v62 }
 0x66d   : > { %5550 = vst.msk [vmem:[#allocation3 + $0xa2] sm:$0xc0] %vm5533_vm0, %v5387_v44 }
 0x66f   : > { %v5392_v40 = vpop.f32.mrb[80].mxu1  ;;  %v16113_v16 = vld [vmem:[#allocation3 + $0x91] sm:$0xff] }
 0x670   : > { %5551 = vst.msk [vmem:[#allocation3 + $0xaa] sm:$0xff] %vm1131_vm6, %v5392_v40  ;;  %v5394_v57 = vpop.f32.mrb[81].mxu1  ;;  %12620 = vmatprep.mubr.msk.f32.mxu1 %vm1131_vm6, %v16113_v16 }
 0x673   : > { %v5397_v18 = vpop.f32.mrb[82].mxu1  ;;  %v16118_v14 = vld [vmem:[#allocation3 + $0x99] sm:$0xff] }
 0x674   : > { %5552 = vst.msk [vmem:[#allocation3 + $0xb2] sm:$0xff] %vm1131_vm6, %v5397_v18  ;;  %v5399_v35 = vpop.f32.mrb[83].mxu1  ;;  %12621 = vmatmul.mubr.msk.f32.gmra.mrb[142].mxu1 %vm1131_vm6, %v16118_v14 }
 0x677   : > { %v5402_v44 = vpop.f32.mrb[84].mxu1  ;;  %v16123_v33 = vld [vmem:[#allocation3 + $0xa9] sm:$0xff] }
 0x678   : > { %5554 = vst.msk [vmem:[#allocation3 + $0xc0] sm:$0xff] %vm1131_vm6, %v5402_v44  ;;  %v5404_v28 = vpop.f32.mrb[85].mxu1  ;;  %12623 = vmatprep.mubr.msk.f32.mxu1 %vm1131_vm6, %v16123_v33  ;;  %v10837_v44 = vld [vmem:[%s17472_s7 + $0x48] sm:$0xff] }
 0x679   : > { %v10836_v28 = vld [vmem:[%s17472_s7 + $0x40] sm:$0xff] }
 0x67a   : > { %v16141_v39 = vpack.c.bf16 %v10837_v44, %v10836_v28 }
 0x67b   : > { %v5407_v40 = vpop.f32.mrb[86].mxu1  ;;  %v16128_v57 = vld [vmem:[#allocation3 + $0xb1] sm:$0xff] }
 0x67c   : > { %5555 = vst.msk [vmem:[#allocation3 + $0xc8] sm:$0xff] %vm1131_vm6, %v5407_v40  ;;  %v5409_v26 = vpop.f32.mrb[87].mxu1  ;;  %12624 = vmatmul.mubr.msk.f32.gmra.mrb[144].mxu1 %vm1131_vm6, %v16128_v57  ;;  %13317 = vmatprep.subr.bf16.mxu1 %v16141_v39  ;;  %v16304_v59 = vld [vmem:[#allocation3 + $0xb0] sm:$0xff] }
 0x67f   : > { %v5412_v35 = vpop.f32.mrb[88].mxu1  ;;  %v16308_v42 = vld [vmem:[#allocation3 + $0xc0] sm:$0xff] }
 0x680   : > { %5556 = vst.msk [vmem:[#allocation3 + $0xd0] sm:$0x3] %vm5518_vm3, %v5412_v35  ;;  %v5414_v18 = vpop.f32.mrb[89].mxu1 }
 0x681   : > { %5558 = vst.msk [vmem:[#allocation3 + $0xd6] sm:$0xfc] %vm5521_vm12, %v5412_v35 }
 0x683   : > { %v5417_v26 = vpop.f32.mrb[90].mxu1  ;;  %v16143_v40 = vld [vmem:[#allocation3 + $0xc1] sm:$0xff] }
 0x684   : > { %5559 = vst.msk [vmem:[#allocation3 + $0xde] sm:$0xff] %vm1131_vm6, %v5417_v26  ;;  %v5419_v3 = vpop.f32.mrb[91].mxu1  ;;  %12626 = vmatprep.mubr.msk.f32.mxu1 %vm1131_vm6, %v16143_v40  ;;  %v16312_v15 = vld [vmem:[#allocation3 + $0xc8] sm:$0xff] }
 0x687   : > { %v5422_v35 = vpop.f32.mrb[92].mxu1  ;;  %v16149_v18 = vld [vmem:[#allocation3 + $0xc9] sm:$0xff] }
 0x688   : > { %5560 = vst.msk [vmem:[#allocation3 + $0xe6] sm:$0xf] %vm5524_vm13, %v5422_v35  ;;  %v5424_v28 = vpop.f32.mrb[93].mxu1  ;;  %12627 = vmatmul.mubr.msk.f32.gmra.mrb[146].mxu1 %vm1131_vm6, %v16149_v18 }
 0x689   : > { %5562 = vst.msk [vmem:[#allocation3 + $0xec] sm:$0xf0] %vm5527_vm14, %v5422_v35 }
 0x68b   : > { %v5427_v44 = vpop.f32.mrb[94].mxu1  ;;  %v16155_v21 = vld [vmem:[#allocation3 + $0xd9] sm:$0xff] }
 0x68c   : > { %5563 = vst.msk [vmem:[#allocation3 + $0xf4] sm:$0xff] %vm1131_vm6, %v5427_v44  ;;  %v5429_v3 = vpop.f32.mrb[95].mxu1  ;;  %12629 = vmatprep.mubr.msk.f32.mxu1 %vm1131_vm6, %v16155_v21  ;;  %v16316_v17 = vld [vmem:[#allocation3 + $0xd8] sm:$0xff] }
 0x68f   : > { %v5432_v26 = vpop.f32.mrb[96].mxu1  ;;  %v16160_v12 = vld [vmem:[#allocation3 + $0xe1] sm:$0xff] }
 0x690   : > { %5564 = vst.msk [vmem:[#allocation3 + $0xfc] sm:$0x3f] %vm5530_vm15, %v5432_v26  ;;  %v5434_v35 = vpop.f32.mrb[97].mxu1  ;;  %12630 = vmatmul.mubr.msk.f32.gmra.mrb[148].mxu1 %vm1131_vm6, %v16160_v12  ;;  %v16320_v13 = vld [vmem:[#allocation3 + $0xe0] sm:$0xff] }
 0x691   : > { %5566 = vst.msk [vmem:[#allocation3 + $0x102] sm:$0xc0] %vm5533_vm0, %v5432_v26 }
 0x693   : > { %v5437_v28 = vpop.f32.mrb[98].mxu1  ;;  %v16166_v36 = vld [vmem:[#allocation3 + $0xf1] sm:$0xff] }
 0x694   : > { %5567 = vst.msk [vmem:[#allocation3 + $0x10a] sm:$0xff] %vm1131_vm6, %v5437_v28  ;;  %v5439_v44 = vpop.f32.mrb[99].mxu1  ;;  %12632 = vmatprep.mubr.msk.f32.mxu1 %vm1131_vm6, %v16166_v36  ;;  %v16324_v2 = vld [vmem:[#allocation3 + $0xf0] sm:$0xff] }
 0x697   : > { %v5442_v3 = vpop.f32.mrb[100].mxu1  ;;  %v16171_v31 = vld [vmem:[#allocation3 + $0xf9] sm:$0xff] }
 0x698   : > { %5568 = vst.msk [vmem:[#allocation3 + $0x112] sm:$0xff] %vm1131_vm6, %v5442_v3  ;;  %v5444_v61 = vpop.f32.mrb[101].mxu1  ;;  %12633 = vmatmul.mubr.msk.f32.gmra.mrb[150].mxu1 %vm1131_vm6, %v16171_v31  ;;  %v16328_v5 = vld [vmem:[#allocation3 + $0xf8] sm:$0xff] }
 0x69b   : > { %v5447_v26 = vpop.f32.mrb[102].mxu1  ;;  %v16176_v35 = vld [vmem:[#allocation3 + $0x109] sm:$0xff] }
 0x69c   : > { %5570 = vst.msk [vmem:[#allocation3 + $0x120] sm:$0xff] %vm1131_vm6, %v5447_v26  ;;  %v5449_v10 = vpop.f32.mrb[103].mxu1  ;;  %12635 = vmatprep.mubr.msk.f32.mxu1 %vm1131_vm6, %v16176_v35  ;;  %v16332_v7 = vld [vmem:[#allocation3 + $0x108] sm:$0xff] }
 0x69f   : > { %v5452_v28 = vpop.f32.mrb[104].mxu1  ;;  %v16181_v44 = vld [vmem:[#allocation3 + $0x111] sm:$0xff] }
 0x6a0   : > { %5571 = vst.msk [vmem:[#allocation3 + $0x128] sm:$0xff] %vm1131_vm6, %v5452_v28  ;;  %v5454_v56 = vpop.f32.mrb[105].mxu1  ;;  %12636 = vmatmul.mubr.msk.f32.gmra.mrb[152].mxu1 %vm1131_vm6, %v16181_v44  ;;  %v16336_v51 = vld [vmem:[#allocation3 + $0x110] sm:$0xff] }
 0x6a3   : > { %v5457_v61 = vpop.f32.mrb[106].mxu1  ;;  %v16340_v55 = vld [vmem:[#allocation3 + $0x120] sm:$0xff] }
 0x6a4   : > { %5572 = vst.msk [vmem:[#allocation3 + $0x130] sm:$0x3] %vm5518_vm3, %v5457_v61  ;;  %v5459_v3 = vpop.f32.mrb[107].mxu1 }
 0x6a5   : > { %5574 = vst.msk [vmem:[#allocation3 + $0x136] sm:$0xfc] %vm5521_vm12, %v5457_v61 }
 0x6a7   : > { %v5462_v26 = vpop.f32.mrb[108].mxu1  ;;  %v16188_v10 = vld [vmem:[#allocation3 + $0x121] sm:$0xff] }
 0x6a8   : > { %5575 = vst.msk [vmem:[#allocation3 + $0x13e] sm:$0xff] %vm1131_vm6, %v5462_v26  ;;  %v5464_v11 = vpop.f32.mrb[109].mxu1  ;;  %12638 = vmatprep.mubr.msk.f32.mxu1 %vm1131_vm6, %v16188_v10  ;;  %v16344_v41 = vld [vmem:[#allocation3 + $0x128] sm:$0xff] }
 0x6ab   : > { %v5467_v28 = vpop.f32.mrb[110].mxu1  ;;  %v16193_v56 = vld [vmem:[#allocation3 + $0x129] sm:$0xff] }
 0x6ac   : > { %5576 = vst.msk [vmem:[#allocation3 + $0x146] sm:$0xf] %vm5524_vm13, %v5467_v28  ;;  %v5469_v9 = vpop.f32.mrb[111].mxu1  ;;  %12639 = vmatmul.mubr.msk.f32.gmra.mrb[154].mxu1 %vm1131_vm6, %v16193_v56 }
 0x6ad   : > { %5578 = vst.msk [vmem:[#allocation3 + $0x14c] sm:$0xf0] %vm5527_vm14, %v5467_v28 }
 0x6af   : > { %v5472_v61 = vpop.f32.mrb[112].mxu1  ;;  %v16199_v3 = vld [vmem:[#allocation3 + $0x139] sm:$0xff] }
 0x6b0   : > { %5579 = vst.msk [vmem:[#allocation3 + $0x154] sm:$0xff] %vm1131_vm6, %v5472_v61  ;;  %v5474_v11 = vpop.f32.mrb[113].mxu1  ;;  %12641 = vmatprep.mubr.msk.f32.mxu1 %vm1131_vm6, %v16199_v3  ;;  %v16348_v45 = vld [vmem:[#allocation3 + $0x138] sm:$0xff] }
 0x6b3   : > { %v5477_v26 = vpop.f32.mrb[114].mxu1  ;;  %v16204_v0 = vld [vmem:[#allocation3 + $0x141] sm:$0xff] }
 0x6b4   : > { %17787 = vst [vmem:[#allocation73_spill] sm:$0xff] %v16204_v0  ;;  %5580 = vst.msk [vmem:[#allocation3 + $0x15c] sm:$0x3f] %vm5530_vm15, %v5477_v26  ;;  %v5479_v9 = vpop.f32.mrb[115].mxu1  ;;  %12642 = vmatmul.mubr.msk.f32.gmra.mrb[156].mxu1 %vm1131_vm6, %v16204_v0  ;;  %v16352_v19 = vld [vmem:[#allocation3 + $0x140] sm:$0xff] }
 0x6b5   : > { %5582 = vst.msk [vmem:[#allocation3 + $0x162] sm:$0xc0] %vm5533_vm0, %v5477_v26  ;;  %v16386_v0 = vld [vmem:[#allocation3 + $0x1a] sm:$0xff] }
 0x6b7   : > { %v5482_v28 = vpop.f32.mrb[116].mxu1  ;;  %v16210_v43 = vld [vmem:[#allocation3 + $0x151] sm:$0xff] }
 0x6b8   : > { %17788 = vst [vmem:[#allocation74_spill] sm:$0xff] %v16210_v43  ;;  %5583 = vst.msk [vmem:[#allocation3 + $0x16a] sm:$0xff] %vm1131_vm6, %v5482_v28  ;;  %v5484_v61 = vpop.f32.mrb[117].mxu1  ;;  %12644 = vmatprep.mubr.msk.f32.mxu1 %vm1131_vm6, %v16210_v43  ;;  %v10838_v28 = vld [vmem:[%s17472_s7 + $0x50] sm:$0xff]  ;;  %v16356_v20 = vld [vmem:[#allocation3 + $0x150] sm:$0xff] }
 0x6b9   : > { %v10839_v61 = vld [vmem:[%s17472_s7 + $0x58] sm:$0xff]  ;;  %v10909_v43 = vld [vmem:[%s17472_s7 + $0x88] sm:$0xff] }
 0x6bb   : > { %v5487_v11 = vpop.f32.mrb[118].mxu1  ;;  %v16215_v58 = vld [vmem:[#allocation3 + $0x159] sm:$0xff] }
 0x6bc   : > { %17789 = vst [vmem:[#allocation75_spill] sm:$0xff] %v16215_v58  ;;  %5584 = vst.msk [vmem:[#allocation3 + $0x172] sm:$0xff] %vm1131_vm6, %v5487_v11  ;;  %12645 = vmatmul.mubr.msk.f32.gmra.mrb[158].mxu1 %vm1131_vm6, %v16215_v58  ;;  %v5489_v26 = vpop.f32.mrb[119].mxu1  ;;  %v5593_v11 = vld [vmem:[#allocation3] sm:$0xff]  ;;  %v16360_v50 = vld [vmem:[#allocation3 + $0x158] sm:$0xff] }
 0x6bd   : > { %v13320_v26 = vpack.c.bf16 %v10839_v61, %v10838_v28  ;;  %v16248_v61 = vpack.c.bf16 %v10873_v8, %v10872_v4  ;;  %v16260_v4 = vld [vmem:[#allocation3 + $0x38] sm:$0xff]  ;;  %v10908_v58 = vld [vmem:[%s17472_s7 + $0x80] sm:$0xff] }
 0x6bf   : > { %v16220_v9 = vld [vmem:[#allocation3 + $0x169] sm:$0xff]  ;;  %v5492_v34 = vpop.f32.mrb[120].mxu1 }
 0x6c0   : > { %17790 = vst [vmem:[#allocation76_spill] sm:$0xff] %v16220_v9  ;;  %12647 = vmatprep.mubr.msk.f32.mxu1 %vm1131_vm6, %v16220_v9  ;;  %5586 = vst.msk [vmem:[#allocation3 + $0x180] sm:$0xff] %vm1131_vm6, %v5492_v34  ;;  %v5494_v28 = vpop.f32.mrb[121].mxu1  ;;  %v16364_v54 = vld [vmem:[#allocation3 + $0x168] sm:$0xff] }
 0x6c1   : > { %v6309_v9 = vld [vmem:[#allocation3 + $0xa] sm:$0xff] }
 0x6c3   : > { %v16224_v1 = vld [vmem:[#allocation3 + $0x171] sm:$0xff] }
 0x6c4   : > { %17791 = vst [vmem:[#allocation77_spill] sm:$0xff] %v16224_v1  ;;  %12648 = vmatmul.mubr.msk.f32.gmra.mrb[160].mxu1 %vm1131_vm6, %v16224_v1  ;;  %v16368_v22 = vld [vmem:[#allocation3 + $0x170] sm:$0xff]  ;;  %v13328_v1 = vpack.c.bf16 %v10875_v52, %v10874_v53  ;;  %v16393_v52 = vld [vmem:[#allocation3 + $0x22] sm:$0xff] }
 0x6c5   : > { %12658 = vmatprep.mubr.msk.f32.mxu1 %vm1131_vm6, %v5593_v11  ;;  %v5497_v11 = vpop.f32.mrb[122].mxu1  ;;  %v16397_v53 = vld [vmem:[#allocation3 + $0x32] sm:$0xff] }
 0x6c6   : > { %5587 = vst.msk [vmem:[#allocation3 + $0x188] sm:$0xff] %vm1131_vm6, %v5497_v11  ;;  %17792 = vst [vmem:[#allocation78_spill] sm:$0xff] %v16397_v53 }
 0x6c8   : > { %12659 = vmatmul.mubr.msk.f32.vlgmr.msra.gmra.mrb[130].mxu1 %vm1131_vm6, %v5594_v6  ;;  %v5499_v6 = vpop.f32.mrb[123].mxu1 }
 0x6c9   : > { %12661 = vmatprep.mubr.msk.f32.mxu1 %vm1131_vm6, %v16242_v38  ;;  %13319 = vmatpush3.bf16.msra.mxu1 %v16141_v39  ;;  %v5502_v34 = vpop.f32.mrb[124].mxu1  ;;  %v16266_v39 = vld [vmem:[#allocation3 + $0x48] sm:$0xff]  ;;  %v16275_v6 = vld [vmem:[#allocation3 + $0x60] sm:$0xff] }
 0x6ca   : > { %13321 = vmatprep.subr.bf16.mxu1 %v13320_v26  ;;  %5588 = vst.msk [vmem:[#allocation3 + $0x190] sm:$0x3] %vm5518_vm3, %v5502_v34  ;;  %v5504_v8 = vpop.f32.mrb[125].mxu1 }
 0x6cb   : > { %5590 = vst.msk [vmem:[#allocation3 + $0x196] sm:$0xfc] %vm5521_vm12, %v5502_v34  ;;  %v5507_v28 = vpop.f32.mrb[126].mxu1  ;;  %v16279_v8 = vld [vmem:[#allocation3 + $0x68] sm:$0xff] }
 0x6cc   : > { %12662 = vmatmul.mubr.msk.f32.gmra.mrb[132].mxu1 %vm1131_vm6, %v16250_v23  ;;  %5591 = vst.msk [vmem:[#allocation3 + $0x19e] sm:$0xff] %vm1131_vm6, %v5507_v28  ;;  %v5509_v11 = vpop.f32.mrb[127].mxu1  ;;  %v16288_v28 = vld [vmem:[#allocation3 + $0x80] sm:$0xff] }
 0x6cd   : > { %12664 = vmatprep.mubr.msk.f32.mxu1 %vm1131_vm6, %v16255_v25  ;;  %13323 = vmatpush3.bf16.msra.mxu1 %v13320_v26  ;;  %v16270_v26 = vld [vmem:[#allocation3 + $0x50] sm:$0xff] }
 0x6ce   : > { %13325 = vmatprep.subr.bf16.mxu1 %v16248_v61  ;;  %v16292_v11 = vld [vmem:[#allocation3 + $0x90] sm:$0xff] }
 0x6cf   : > { %v5512_v34 = vpop.f32.mrb[128].mxu1 }
 0x6d0   : > { %12665 = vmatmul.mubr.msk.f32.gmra.mrb[134].mxu1 %vm1131_vm6, %v16260_v4  ;;  %5592 = vst.msk [vmem:[#allocation3 + $0x1a6] sm:$0xf] %vm5524_vm13, %v5512_v34  ;;  %v5514_v37 = vpop.f32.mrb[129].mxu1  ;;  %v16296_v34 = vld [vmem:[#allocation3 + $0x98] sm:$0xff] }
 0x6d1   : > { %12667 = vmatprep.mubr.msk.f32.mxu1 %vm1131_vm6, %v16266_v39  ;;  %v16300_v37 = vld [vmem:[#allocation3 + $0xa8] sm:$0xff] }
 0x6d4   : > { %12668 = vmatmul.mubr.msk.f32.gmra.mrb[136].mxu1 %vm1131_vm6, %v16270_v26 }
 0x6d5   : > { %12670 = vmatprep.mubr.msk.f32.mxu1 %vm1131_vm6, %v16275_v6 }
 0x6d8   : > { %12671 = vmatmul.mubr.msk.f32.gmra.mrb[138].mxu1 %vm1131_vm6, %v16279_v8 }
 0x6d9   : > { %12673 = vmatprep.mubr.msk.f32.mxu1 %vm1131_vm6, %v16284_v48 }
 0x6dc   : > { %12674 = vmatmul.mubr.msk.f32.gmra.mrb[140].mxu1 %vm1131_vm6, %v16288_v28 }
 0x6dd   : > { %12676 = vmatprep.mubr.msk.f32.mxu1 %vm1131_vm6, %v16292_v11 }
 0x6e0   : > { %12677 = vmatmul.mubr.msk.f32.gmra.mrb[142].mxu1 %vm1131_vm6, %v16296_v34 }
 0x6e1   : > { %12679 = vmatprep.mubr.msk.f32.mxu1 %vm1131_vm6, %v16300_v37 }
 0x6e4   : > { %12680 = vmatmul.mubr.msk.f32.gmra.mrb[144].mxu1 %vm1131_vm6, %v16304_v59 }
 0x6e5   : > { %12682 = vmatprep.mubr.msk.f32.mxu1 %vm1131_vm6, %v16308_v42 }
 0x6e8   : > { %12683 = vmatmul.mubr.msk.f32.gmra.mrb[146].mxu1 %vm1131_vm6, %v16312_v15 }
 0x6e9   : > { %12685 = vmatprep.mubr.msk.f32.mxu1 %vm1131_vm6, %v16316_v17 }
 0x6ec   : > { %12686 = vmatmul.mubr.msk.f32.gmra.mrb[148].mxu1 %vm1131_vm6, %v16320_v13 }
 0x6ed   : > { %12688 = vmatprep.mubr.msk.f32.mxu1 %vm1131_vm6, %v16324_v2 }
 0x6f0   : > { %12689 = vmatmul.mubr.msk.f32.gmra.mrb[150].mxu1 %vm1131_vm6, %v16328_v5 }
 0x6f1   : > { %12691 = vmatprep.mubr.msk.f32.mxu1 %vm1131_vm6, %v16332_v7 }
 0x6f4   : > { %12692 = vmatmul.mubr.msk.f32.gmra.mrb[152].mxu1 %vm1131_vm6, %v16336_v51 }
 0x6f5   : > { %12694 = vmatprep.mubr.msk.f32.mxu1 %vm1131_vm6, %v16340_v55 }
 0x6f8   : > { %12695 = vmatmul.mubr.msk.f32.gmra.mrb[154].mxu1 %vm1131_vm6, %v16344_v41 }
 0x6f9   : > { %12697 = vmatprep.mubr.msk.f32.mxu1 %vm1131_vm6, %v16348_v45 }
 0x6fc   : > { %12698 = vmatmul.mubr.msk.f32.gmra.mrb[156].mxu1 %vm1131_vm6, %v16352_v19 }
 0x6fd   : > { %12700 = vmatprep.mubr.msk.f32.mxu1 %vm1131_vm6, %v16356_v20 }
 0x700   : > { %12701 = vmatmul.mubr.msk.f32.gmra.mrb[158].mxu1 %vm1131_vm6, %v16360_v50 }
 0x701   : > { %12703 = vmatprep.mubr.msk.f32.mxu1 %vm1131_vm6, %v16364_v54 }
 0x704   : > { %12704 = vmatmul.mubr.msk.f32.gmra.mrb[160].mxu1 %vm1131_vm6, %v16368_v22 }
 0x705   : > { %12714 = vmatprep.mubr.msk.f32.mxu1 %vm1131_vm6, %v6308_v46  ;;  %v16391_v46 = vpack.c.bf16 %v10909_v43, %v10908_v58  ;;  %v16406_v43 = vld [vmem:[#allocation3 + $0x4a] sm:$0xff]  ;;  %v16410_v58 = vld [vmem:[#allocation3 + $0x52] sm:$0xff] }
 0x706   : > { %17794 = vst [vmem:[#allocation80_spill] sm:$0xff] %v16406_v43  ;;  %17795 = vst [vmem:[#allocation81_spill] sm:$0xff] %v16410_v58 }
 0x708   : > { %12715 = vmatmul.mubr.msk.f32.vlgmr.msra.gmra.mrb[130].mxu1 %vm1131_vm6, %v6309_v9  ;;  %v16402_v9 = vld [vmem:[#allocation3 + $0x3a] sm:$0xff] }
 0x709   : > { %12717 = vmatprep.mubr.msk.f32.mxu1 %vm1131_vm6, %v16386_v0  ;;  %13327 = vmatpush3.bf16.msra.mxu1 %v16248_v61  ;;  %17793 = vst [vmem:[#allocation79_spill] sm:$0xff] %v16402_v9  ;;  %v16414_v61 = vld [vmem:[#allocation3 + $0x62] sm:$0xff] }
 0x70a   : > { %13329 = vmatprep.subr.bf16.mxu1 %v13328_v1  ;;  %17796 = vst [vmem:[#allocation82_spill] sm:$0xff] %v16414_v61 }
 0x70c   : > { %12718 = vmatmul.mubr.msk.f32.gmra.mrb[132].mxu1 %vm1131_vm6, %v16393_v52 }
 0x70d   : > { %12720 = vmatprep.mubr.msk.f32.mxu1 %vm1131_vm6, %v16397_v53  ;;  %13331 = vmatpush3.bf16.msra.mxu1 %v13328_v1  ;;  %v16418_v1 = vld [vmem:[#allocation3 + $0x6a] sm:$0xff]  ;;  %v10945_v53 = vld [vmem:[%s17472_s7 + $0xa8] sm:$0xff] }
 0x70e   : > { %13333 = vmatprep.subr.bf16.mxu1 %v16391_v46  ;;  %17797 = vst [vmem:[#allocation83_spill] sm:$0xff] %v16418_v1 }
 0x710   : > { %12721 = vmatmul.mubr.msk.f32.gmra.mrb[134].mxu1 %vm1131_vm6, %v16402_v9  ;;  %v16422_v9 = vld [vmem:[#allocation3 + $0x7a] sm:$0xff] }
 0x711   : > { %12723 = vmatprep.mubr.msk.f32.mxu1 %vm1131_vm6, %v16406_v43  ;;  %17798 = vst [vmem:[#allocation84_spill] sm:$0xff] %v16422_v9  ;;  %v16426_v43 = vld [vmem:[#allocation3 + $0x82] sm:$0xff] }
 0x712   : > { %17799 = vst [vmem:[#allocation85_spill] sm:$0xff] %v16426_v43 }
 0x714   : > { %12724 = vmatmul.mubr.msk.f32.gmra.mrb[136].mxu1 %vm1131_vm6, %v16410_v58  ;;  %v16430_v58 = vld [vmem:[#allocation3 + $0x92] sm:$0xff] }
 0x715   : > { %12726 = vmatprep.mubr.msk.f32.mxu1 %vm1131_vm6, %v16414_v61  ;;  %17800 = vst [vmem:[#allocation86_spill] sm:$0xff] %v16430_v58  ;;  %v16434_v61 = vld [vmem:[#allocation3 + $0x9a] sm:$0xff] }
 0x716   : > { %17801 = vst [vmem:[#allocation87_spill] sm:$0xff] %v16434_v61 }
 0x718   : > { %12727 = vmatmul.mubr.msk.f32.gmra.mrb[138].mxu1 %vm1131_vm6, %v16418_v1  ;;  %v16438_v1 = vld [vmem:[#allocation3 + $0xaa] sm:$0xff] }
 0x719   : > { %12729 = vmatprep.mubr.msk.f32.mxu1 %vm1131_vm6, %v16422_v9  ;;  %17802 = vst [vmem:[#allocation88_spill] sm:$0xff] %v16438_v1  ;;  %v16442_v9 = vld [vmem:[#allocation3 + $0xb2] sm:$0xff] }
 0x71a   : > { %17803 = vst [vmem:[#allocation89_spill] sm:$0xff] %v16442_v9 }
 0x71c   : > { %12730 = vmatmul.mubr.msk.f32.gmra.mrb[140].mxu1 %vm1131_vm6, %v16426_v43  ;;  %v16446_v43 = vld [vmem:[#allocation3 + $0xc2] sm:$0xff] }
 0x71d   : > { %12732 = vmatprep.mubr.msk.f32.mxu1 %vm1131_vm6, %v16430_v58  ;;  %17804 = vst [vmem:[#allocation90_spill] sm:$0xff] %v16446_v43  ;;  %v16450_v58 = vld [vmem:[#allocation3 + $0xca] sm:$0xff] }
 0x71e   : > { %17805 = vst [vmem:[#allocation91_spill] sm:$0xff] %v16450_v58 }
 0x720   : > { %12733 = vmatmul.mubr.msk.f32.gmra.mrb[142].mxu1 %vm1131_vm6, %v16434_v61  ;;  %v16454_v61 = vld [vmem:[#allocation3 + $0xda] sm:$0xff] }
 0x721   : > { %12735 = vmatprep.mubr.msk.f32.mxu1 %vm1131_vm6, %v16438_v1  ;;  %17806 = vst [vmem:[#allocation92_spill] sm:$0xff] %v16454_v61  ;;  %v16458_v1 = vld [vmem:[#allocation3 + $0xe2] sm:$0xff] }
 0x722   : > { %17807 = vst [vmem:[#allocation93_spill] sm:$0xff] %v16458_v1 }
 0x724   : > { %12736 = vmatmul.mubr.msk.f32.gmra.mrb[144].mxu1 %vm1131_vm6, %v16442_v9  ;;  %v16462_v9 = vld [vmem:[#allocation3 + $0xf2] sm:$0xff] }
 0x725   : > { %12738 = vmatprep.mubr.msk.f32.mxu1 %vm1131_vm6, %v16446_v43  ;;  %17808 = vst [vmem:[#allocation94_spill] sm:$0xff] %v16462_v9  ;;  %v16466_v43 = vld [vmem:[#allocation3 + $0xfa] sm:$0xff] }
 0x726   : > { %17809 = vst [vmem:[#allocation95_spill] sm:$0xff] %v16466_v43 }
 0x728   : > { %12739 = vmatmul.mubr.msk.f32.gmra.mrb[146].mxu1 %vm1131_vm6, %v16450_v58  ;;  %v16470_v58 = vld [vmem:[#allocation3 + $0x10a] sm:$0xff] }
 0x729   : > { %12741 = vmatprep.mubr.msk.f32.mxu1 %vm1131_vm6, %v16454_v61  ;;  %17810 = vst [vmem:[#allocation96_spill] sm:$0xff] %v16470_v58  ;;  %v16474_v61 = vld [vmem:[#allocation3 + $0x112] sm:$0xff] }
 0x72a   : > { %17811 = vst [vmem:[#allocation97_spill] sm:$0xff] %v16474_v61 }
 0x72c   : > { %12742 = vmatmul.mubr.msk.f32.gmra.mrb[148].mxu1 %vm1131_vm6, %v16458_v1  ;;  %v16478_v1 = vld [vmem:[#allocation3 + $0x122] sm:$0xff] }
 0x72d   : > { %12744 = vmatprep.mubr.msk.f32.mxu1 %vm1131_vm6, %v16462_v9  ;;  %17812 = vst [vmem:[#allocation98_spill] sm:$0xff] %v16478_v1  ;;  %v16482_v9 = vld [vmem:[#allocation3 + $0x12a] sm:$0xff] }
 0x72e   : > { %17813 = vst [vmem:[#allocation99_spill] sm:$0xff] %v16482_v9 }
 0x730   : > { %12745 = vmatmul.mubr.msk.f32.gmra.mrb[150].mxu1 %vm1131_vm6, %v16466_v43  ;;  %v16486_v43 = vld [vmem:[#allocation3 + $0x13a] sm:$0xff] }
 0x731   : > { %12747 = vmatprep.mubr.msk.f32.mxu1 %vm1131_vm6, %v16470_v58  ;;  %17814 = vst [vmem:[#allocation100_spill] sm:$0xff] %v16486_v43  ;;  %v16490_v58 = vld [vmem:[#allocation3 + $0x142] sm:$0xff] }
 0x732   : > { %17815 = vst [vmem:[#allocation101_spill] sm:$0xff] %v16490_v58 }
 0x734   : > { %12748 = vmatmul.mubr.msk.f32.gmra.mrb[152].mxu1 %vm1131_vm6, %v16474_v61  ;;  %v16494_v61 = vld [vmem:[#allocation3 + $0x152] sm:$0xff] }
 0x735   : > { %12750 = vmatprep.mubr.msk.f32.mxu1 %vm1131_vm6, %v16478_v1  ;;  %17816 = vst [vmem:[#allocation102_spill] sm:$0xff] %v16494_v61  ;;  %v16498_v1 = vld [vmem:[#allocation3 + $0x15a] sm:$0xff] }
 0x736   : > { %17817 = vst [vmem:[#allocation103_spill] sm:$0xff] %v16498_v1 }
 0x738   : > { %12751 = vmatmul.mubr.msk.f32.gmra.mrb[154].mxu1 %vm1131_vm6, %v16482_v9  ;;  %v16502_v9 = vld [vmem:[#allocation3 + $0x16a] sm:$0xff] }
 0x739   : > { %12753 = vmatprep.mubr.msk.f32.mxu1 %vm1131_vm6, %v16486_v43  ;;  %17818 = vst [vmem:[#allocation104_spill] sm:$0xff] %v16502_v9  ;;  %v16506_v43 = vld [vmem:[#allocation3 + $0x172] sm:$0xff] }
 0x73a   : > { %17819 = vst [vmem:[#allocation105_spill] sm:$0xff] %v16506_v43 }
 0x73c   : > { %12754 = vmatmul.mubr.msk.f32.gmra.mrb[156].mxu1 %vm1131_vm6, %v16490_v58  ;;  %v10910_v58 = vld [vmem:[%s17472_s7 + $0x90] sm:$0xff] }
 0x73d   : > { %12756 = vmatprep.mubr.msk.f32.mxu1 %vm1131_vm6, %v16494_v61  ;;  %v10911_v61 = vld [vmem:[%s17472_s7 + $0x98] sm:$0xff] }
 0x740   : > { %12757 = vmatmul.mubr.msk.f32.gmra.mrb[158].mxu1 %vm1131_vm6, %v16498_v1  ;;  %v13336_v1 = vpack.c.bf16 %v10911_v61, %v10910_v58  ;;  %v10980_v58 = vld [vmem:[%s17472_s7 + $0xc0] sm:$0xff]  ;;  %v10981_v61 = vld [vmem:[%s17472_s7 + $0xc8] sm:$0xff] }
 0x741   : > { %12759 = vmatprep.mubr.msk.f32.mxu1 %vm1131_vm6, %v16502_v9  ;;  %v10944_v9 = vld [vmem:[%s17472_s7 + $0xa0] sm:$0xff] }
 0x744   : > { %12760 = vmatmul.mubr.msk.f32.gmra.mrb[160].mxu1 %vm1131_vm6, %v16506_v43  ;;  %v13340_v43 = vpack.c.bf16 %v10945_v53, %v10944_v9  ;;  %v10947_v53 = vld [vmem:[%s17472_s7 + $0xb8] sm:$0xff] }
 0x745   : > { %12770 = vmatprep.mubr.msk.f32.mxu1 %vm1131_vm6, %v16242_v38  ;;  %v16587_v38 = vld [vmem:[#allocation3 + $0x188] sm:$0xff] }
 0x748   : > { %12771 = vmatmul.mubr.msk.f32.vlgmr.msra.gmra.mrb[130].mxu1 %vm1131_vm6, %v16250_v23  ;;  %v16583_v23 = vld [vmem:[#allocation3 + $0x180] sm:$0xff] }
 0x749   : > { %12773 = vmatprep.mubr.msk.f32.mxu1 %vm1131_vm6, %v16255_v25  ;;  %13335 = vmatpush3.bf16.msra.mxu1 %v16391_v46  ;;  %v10946_v46 = vld [vmem:[%s17472_s7 + $0xb0] sm:$0xff] }
 0x74a   : > { %13337 = vmatprep.subr.bf16.mxu1 %v13336_v1  ;;  %v13344_v9 = vpack.c.bf16 %v10947_v53, %v10946_v46  ;;  %v17840_v46 = vld [vmem:[#allocation93_spill] sm:$0xff]  ;;  %v17841_v53 = vld [vmem:[#allocation94_spill] sm:$0xff] }
 0x74c   : > { %12774 = vmatmul.mubr.msk.f32.gmra.mrb[132].mxu1 %vm1131_vm6, %v16260_v4 }
 0x74d   : > { %12776 = vmatprep.mubr.msk.f32.mxu1 %vm1131_vm6, %v16266_v39  ;;  %13339 = vmatpush3.bf16.msra.mxu1 %v13336_v1  ;;  %v13348_v1 = vpack.c.bf16 %v10981_v61, %v10980_v58  ;;  %v17843_v58 = vld [vmem:[#allocation96_spill] sm:$0xff]  ;;  %v17844_v61 = vld [vmem:[#allocation97_spill] sm:$0xff] }
 0x74e   : > { %13341 = vmatprep.subr.bf16.mxu1 %v13340_v43 }
 0x750   : > { %12777 = vmatmul.mubr.msk.f32.gmra.mrb[134].mxu1 %vm1131_vm6, %v16270_v26 }
 0x751   : > { %12779 = vmatprep.mubr.msk.f32.mxu1 %vm1131_vm6, %v16275_v6 }
 0x754   : > { %12780 = vmatmul.mubr.msk.f32.gmra.mrb[136].mxu1 %vm1131_vm6, %v16279_v8 }
 0x755   : > { %12782 = vmatprep.mubr.msk.f32.mxu1 %vm1131_vm6, %v16284_v48 }
 0x758   : > { %12783 = vmatmul.mubr.msk.f32.gmra.mrb[138].mxu1 %vm1131_vm6, %v16288_v28 }
 0x759   : > { %12785 = vmatprep.mubr.msk.f32.mxu1 %vm1131_vm6, %v16292_v11 }
 0x75c   : > { %12786 = vmatmul.mubr.msk.f32.gmra.mrb[140].mxu1 %vm1131_vm6, %v16296_v34 }
 0x75d   : > { %12788 = vmatprep.mubr.msk.f32.mxu1 %vm1131_vm6, %v16300_v37 }
 0x760   : > { %12789 = vmatmul.mubr.msk.f32.gmra.mrb[142].mxu1 %vm1131_vm6, %v16304_v59 }
 0x761   : > { %12791 = vmatprep.mubr.msk.f32.mxu1 %vm1131_vm6, %v16308_v42 }
 0x764   : > { %12792 = vmatmul.mubr.msk.f32.gmra.mrb[144].mxu1 %vm1131_vm6, %v16312_v15 }
 0x765   : > { %12794 = vmatprep.mubr.msk.f32.mxu1 %vm1131_vm6, %v16316_v17 }
 0x768   : > { %12795 = vmatmul.mubr.msk.f32.gmra.mrb[146].mxu1 %vm1131_vm6, %v16320_v13 }
 0x769   : > { %12797 = vmatprep.mubr.msk.f32.mxu1 %vm1131_vm6, %v16324_v2 }
 0x76c   : > { %12798 = vmatmul.mubr.msk.f32.gmra.mrb[148].mxu1 %vm1131_vm6, %v16328_v5 }
 0x76d   : > { %12800 = vmatprep.mubr.msk.f32.mxu1 %vm1131_vm6, %v16332_v7 }
 0x770   : > { %12801 = vmatmul.mubr.msk.f32.gmra.mrb[150].mxu1 %vm1131_vm6, %v16336_v51 }
 0x771   : > { %12803 = vmatprep.mubr.msk.f32.mxu1 %vm1131_vm6, %v16340_v55 }
 0x774   : > { %12804 = vmatmul.mubr.msk.f32.gmra.mrb[152].mxu1 %vm1131_vm6, %v16344_v41 }
 0x775   : > { %12806 = vmatprep.mubr.msk.f32.mxu1 %vm1131_vm6, %v16348_v45 }
 0x778   : > { %12807 = vmatmul.mubr.msk.f32.gmra.mrb[154].mxu1 %vm1131_vm6, %v16352_v19 }
 0x779   : > { %12809 = vmatprep.mubr.msk.f32.mxu1 %vm1131_vm6, %v16356_v20 }
 0x77c   : > { %12810 = vmatmul.mubr.msk.f32.gmra.mrb[156].mxu1 %vm1131_vm6, %v16360_v50 }
 0x77d   : > { %12812 = vmatprep.mubr.msk.f32.mxu1 %vm1131_vm6, %v16364_v54 }
 0x780   : > { %12813 = vmatmul.mubr.msk.f32.gmra.mrb[158].mxu1 %vm1131_vm6, %v16368_v22 }
 0x781   : > { %12815 = vmatprep.mubr.msk.f32.mxu1 %vm1131_vm6, %v16583_v23 }
 0x784   : > { %12816 = vmatmul.mubr.msk.f32.gmra.mrb[160].mxu1 %vm1131_vm6, %v16587_v38 }
 0x785   : > { %12826 = vmatprep.mubr.msk.f32.mxu1 %vm1131_vm6, %v16052_v29 }
 0x788   : > { %12827 = vmatmul.mubr.msk.f32.vlgmr.msra.gmra.mrb[130].mxu1 %vm1131_vm6, %v16063_v60  ;;  %v11016_v60 = vld [vmem:[%s17472_s7 + $0xe0] sm:$0xff] }
 0x789   : > { %12829 = vmatprep.mubr.msk.f32.mxu1 %vm1131_vm6, %v16069_v24  ;;  %13343 = vmatpush3.bf16.msra.mxu1 %v13340_v43  ;;  %v10983_v24 = vld [vmem:[%s17472_s7 + $0xd8] sm:$0xff] }
 0x78a   : > { %13345 = vmatprep.subr.bf16.mxu1 %v13344_v9  ;;  %v17839_v43 = vld [vmem:[#allocation92_spill] sm:$0xff] }
 0x78c   : > { %12830 = vmatmul.mubr.msk.f32.gmra.mrb[132].mxu1 %vm1131_vm6, %v16074_v32  ;;  %v10982_v32 = vld [vmem:[%s17472_s7 + $0xd0] sm:$0xff] }
 0x78d   : > { %12832 = vmatprep.mubr.msk.f32.mxu1 %vm1131_vm6, %v16079_v49  ;;  %13347 = vmatpush3.bf16.msra.mxu1 %v13344_v9  ;;  %v13352_v29 = vpack.c.bf16 %v10983_v24, %v10982_v32  ;;  %v11017_v49 = vld [vmem:[%s17472_s7 + $0xe8] sm:$0xff]  ;;  %v17842_v9 = vld [vmem:[#allocation95_spill] sm:$0xff]  ;;  %v17851_v32 = vld [vmem:[#allocation104_spill] sm:$0xff] }
 0x78e   : > { %13349 = vmatprep.subr.bf16.mxu1 %v13348_v1  ;;  %v17852_v24 = vld [vmem:[#allocation105_spill] sm:$0xff] }
 0x790   : > { %12833 = vmatmul.mubr.msk.f32.gmra.mrb[134].mxu1 %vm1131_vm6, %v16084_v30  ;;  %v17825_v30 = vld [vmem:[#allocation78_spill] sm:$0xff] }
 0x791   : > { %12835 = vmatprep.mubr.msk.f32.mxu1 %vm1131_vm6, %v16091_v47  ;;  %v13356_v47 = vpack.c.bf16 %v11017_v49, %v11016_v60  ;;  %v16747_v60 = vld [vmem:[#allocation3 + $0x18a] sm:$0xff]  ;;  %v11018_v49 = vld [vmem:[%s17472_s7 + $0xf0] sm:$0xff] }
 0x794   : > { %12836 = vmatmul.mubr.msk.f32.gmra.mrb[136].mxu1 %vm1131_vm6, %v16096_v27  ;;  %v17826_v27 = vld [vmem:[#allocation79_spill] sm:$0xff] }
 0x795   : > { %12838 = vmatprep.mubr.msk.f32.mxu1 %vm1131_vm6, %v16102_v63  ;;  %v17828_v63 = vld [vmem:[#allocation81_spill] sm:$0xff] }
 0x798   : > { %12839 = vmatmul.mubr.msk.f32.gmra.mrb[138].mxu1 %vm1131_vm6, %v16107_v62  ;;  %v16667_v62 = vld [vmem:[#allocation3 + $0x189] sm:$0xff] }
 0x799   : > { %12841 = vmatprep.mubr.msk.f32.mxu1 %vm1131_vm6, %v16113_v16  ;;  %v16663_v16 = vld [vmem:[#allocation3 + $0x181] sm:$0xff] }
 0x79c   : > { %12842 = vmatmul.mubr.msk.f32.gmra.mrb[140].mxu1 %vm1131_vm6, %v16118_v14  ;;  %v17824_v14 = vld [vmem:[#allocation77_spill] sm:$0xff] }
 0x79d   : > { %12844 = vmatprep.mubr.msk.f32.mxu1 %vm1131_vm6, %v16123_v33  ;;  %v17829_v33 = vld [vmem:[#allocation82_spill] sm:$0xff] }
 0x7a0   : > { %12845 = vmatmul.mubr.msk.f32.gmra.mrb[142].mxu1 %vm1131_vm6, %v16128_v57  ;;  %v17830_v57 = vld [vmem:[#allocation83_spill] sm:$0xff] }
 0x7a1   : > { %12847 = vmatprep.mubr.msk.f32.mxu1 %vm1131_vm6, %v16143_v40  ;;  %v17831_v40 = vld [vmem:[#allocation84_spill] sm:$0xff] }
 0x7a4   : > { %12848 = vmatmul.mubr.msk.f32.gmra.mrb[144].mxu1 %vm1131_vm6, %v16149_v18  ;;  %v17832_v18 = vld [vmem:[#allocation85_spill] sm:$0xff] }
 0x7a5   : > { %12850 = vmatprep.mubr.msk.f32.mxu1 %vm1131_vm6, %v16155_v21  ;;  %v17823_v21 = vld [vmem:[#allocation76_spill] sm:$0xff] }
 0x7a8   : > { %12851 = vmatmul.mubr.msk.f32.gmra.mrb[146].mxu1 %vm1131_vm6, %v16160_v12  ;;  %v17820_v12 = vld [vmem:[#allocation73_spill] sm:$0xff] }
 0x7a9   : > { %12853 = vmatprep.mubr.msk.f32.mxu1 %vm1131_vm6, %v16166_v36  ;;  %v17821_v36 = vld [vmem:[#allocation74_spill] sm:$0xff] }
 0x7aa   : > { %17854 = vst [vmem:[#allocation74_spill] sm:$0xff] %v16747_v60 }
 0x7ac   : > { %12854 = vmatmul.mubr.msk.f32.gmra.mrb[148].mxu1 %vm1131_vm6, %v16171_v31  ;;  %v17822_v31 = vld [vmem:[#allocation75_spill] sm:$0xff] }
 0x7ad   : > { %12856 = vmatprep.mubr.msk.f32.mxu1 %vm1131_vm6, %v16176_v35  ;;  %v17833_v35 = vld [vmem:[#allocation86_spill] sm:$0xff] }
 0x7b0   : > { %12857 = vmatmul.mubr.msk.f32.gmra.mrb[150].mxu1 %vm1131_vm6, %v16181_v44  ;;  %v17834_v44 = vld [vmem:[#allocation87_spill] sm:$0xff] }
 0x7b1   : > { %12859 = vmatprep.mubr.msk.f32.mxu1 %vm1131_vm6, %v16188_v10  ;;  %v17835_v10 = vld [vmem:[#allocation88_spill] sm:$0xff] }
 0x7b4   : > { %12860 = vmatmul.mubr.msk.f32.gmra.mrb[152].mxu1 %vm1131_vm6, %v16193_v56  ;;  %v17836_v56 = vld [vmem:[#allocation89_spill] sm:$0xff] }
 0x7b5   : > { %12862 = vmatprep.mubr.msk.f32.mxu1 %vm1131_vm6, %v16199_v3  ;;  %v17837_v3 = vld [vmem:[#allocation90_spill] sm:$0xff] }
 0x7b8   : > { %12863 = vmatmul.mubr.msk.f32.gmra.mrb[154].mxu1 %vm1131_vm6, %v17820_v12  ;;  %v17846_v12 = vld [vmem:[#allocation99_spill] sm:$0xff] }
 0x7b9   : > { %12865 = vmatprep.mubr.msk.f32.mxu1 %vm1131_vm6, %v17821_v36  ;;  %v17847_v36 = vld [vmem:[#allocation100_spill] sm:$0xff] }
 0x7bc   : > { %12866 = vmatmul.mubr.msk.f32.gmra.mrb[156].mxu1 %vm1131_vm6, %v17822_v31  ;;  %v17848_v31 = vld [vmem:[#allocation101_spill] sm:$0xff] }
 0x7bd   : > { %12868 = vmatprep.mubr.msk.f32.mxu1 %vm1131_vm6, %v17823_v21  ;;  %v17849_v21 = vld [vmem:[#allocation102_spill] sm:$0xff] }
 0x7c0   : > { %12869 = vmatmul.mubr.msk.f32.gmra.mrb[158].mxu1 %vm1131_vm6, %v17824_v14  ;;  %v17850_v14 = vld [vmem:[#allocation103_spill] sm:$0xff] }
 0x7c1   : > { %12871 = vmatprep.mubr.msk.f32.mxu1 %vm1131_vm6, %v16663_v16 }
 0x7c4   : > { %12872 = vmatmul.mubr.msk.f32.gmra.mrb[160].mxu1 %vm1131_vm6, %v16667_v62 }
 0x7c5   : > { %12882 = vmatprep.mubr.msk.f32.mxu1 %vm1131_vm6, %v16386_v0  ;;  %v17827_v0 = vld [vmem:[#allocation80_spill] sm:$0xff] }
 0x7c8   : > { %12883 = vmatmul.mubr.msk.f32.vlgmr.msra.gmra.mrb[130].mxu1 %vm1131_vm6, %v16393_v52  ;;  %v17838_v52 = vld [vmem:[#allocation91_spill] sm:$0xff] }
 0x7c9   : > { %12885 = vmatprep.mubr.msk.f32.mxu1 %vm1131_vm6, %v17825_v30  ;;  %13351 = vmatpush3.bf16.msra.mxu1 %v13348_v1  ;;  %v17845_v1 = vld [vmem:[#allocation98_spill] sm:$0xff] }
 0x7ca   : > { %13353 = vmatprep.subr.bf16.mxu1 %v13352_v29 }
 0x7cc   : > { %12886 = vmatmul.mubr.msk.f32.gmra.mrb[132].mxu1 %vm1131_vm6, %v17826_v27 }
 0x7cd   : > { %12888 = vmatprep.mubr.msk.f32.mxu1 %vm1131_vm6, %v17827_v0  ;;  %13355 = vmatpush3.bf16.msra.mxu1 %v13352_v29  ;;  %v16743_v29 = vld [vmem:[#allocation3 + $0x182] sm:$0xff] }
 0x7ce   : > { %13357 = vmatprep.subr.bf16.mxu1 %v13356_v47  ;;  %17853 = vst [vmem:[#allocation73_spill] sm:$0xff] %v16743_v29 }
 0x7d0   : > { %12889 = vmatmul.mubr.msk.f32.gmra.mrb[134].mxu1 %vm1131_vm6, %v17828_v63 }
 0x7d1   : > { %12891 = vmatprep.mubr.msk.f32.mxu1 %vm1131_vm6, %v17829_v33 }
 0x7d4   : > { %12892 = vmatmul.mubr.msk.f32.gmra.mrb[136].mxu1 %vm1131_vm6, %v17830_v57 }
 0x7d5   : > { %12894 = vmatprep.mubr.msk.f32.mxu1 %vm1131_vm6, %v17831_v40 }
 0x7d8   : > { %12895 = vmatmul.mubr.msk.f32.gmra.mrb[138].mxu1 %vm1131_vm6, %v17832_v18 }
 0x7d9   : > { %12897 = vmatprep.mubr.msk.f32.mxu1 %vm1131_vm6, %v17833_v35 }
 0x7dc   : > { %12898 = vmatmul.mubr.msk.f32.gmra.mrb[140].mxu1 %vm1131_vm6, %v17834_v44 }
 0x7dd   : > { %12900 = vmatprep.mubr.msk.f32.mxu1 %vm1131_vm6, %v17835_v10 }
 0x7e0   : > { %12901 = vmatmul.mubr.msk.f32.gmra.mrb[142].mxu1 %vm1131_vm6, %v17836_v56 }
 0x7e1   : > { %12903 = vmatprep.mubr.msk.f32.mxu1 %vm1131_vm6, %v17837_v3 }
 0x7e4   : > { %12904 = vmatmul.mubr.msk.f32.gmra.mrb[144].mxu1 %vm1131_vm6, %v17838_v52 }
 0x7e5   : > { %12906 = vmatprep.mubr.msk.f32.mxu1 %vm1131_vm6, %v17839_v43 }
 0x7e8   : > { %12907 = vmatmul.mubr.msk.f32.gmra.mrb[146].mxu1 %vm1131_vm6, %v17840_v46 }
 0x7e9   : > { %12909 = vmatprep.mubr.msk.f32.mxu1 %vm1131_vm6, %v17841_v53 }
 0x7ec   : > { %12910 = vmatmul.mubr.msk.f32.gmra.mrb[148].mxu1 %vm1131_vm6, %v17842_v9 }
 0x7ed   : > { %12912 = vmatprep.mubr.msk.f32.mxu1 %vm1131_vm6, %v17843_v58 }
 0x7f0   : > { %12913 = vmatmul.mubr.msk.f32.gmra.mrb[150].mxu1 %vm1131_vm6, %v17844_v61 }
 0x7f1   : > { %12915 = vmatprep.mubr.msk.f32.mxu1 %vm1131_vm6, %v17845_v1 }
 0x7f4   : > { %12916 = vmatmul.mubr.msk.f32.gmra.mrb[152].mxu1 %vm1131_vm6, %v17846_v12 }
 0x7f5   : > { %12918 = vmatprep.mubr.msk.f32.mxu1 %vm1131_vm6, %v17847_v36 }
 0x7f8   : > { %12919 = vmatmul.mubr.msk.f32.gmra.mrb[154].mxu1 %vm1131_vm6, %v17848_v31 }
 0x7f9   : > { %12921 = vmatprep.mubr.msk.f32.mxu1 %vm1131_vm6, %v17849_v21 }
 0x7fc   : > { %12922 = vmatmul.mubr.msk.f32.gmra.mrb[156].mxu1 %vm1131_vm6, %v17850_v14  ;;  %v11019_v14 = vld [vmem:[%s17472_s7 + $0xf8] sm:$0xff] }
 0x7fd   : > { %12924 = vmatprep.mubr.msk.f32.mxu1 %vm1131_vm6, %v17851_v32  ;;  %v11053_v32 = vld [vmem:[%s17472_s7 + $0x108] sm:$0xff] }
 0x800   : > { %12925 = vmatmul.mubr.msk.f32.gmra.mrb[158].mxu1 %vm1131_vm6, %v17852_v24  ;;  %v13360_v24 = vpack.c.bf16 %v11019_v14, %v11018_v49  ;;  %v8281_v14 = vld [vmem:[#allocation3 + $0x141] sm:$0xff]  ;;  %v8288_v49 = vld [vmem:[#allocation3 + $0x199] sm:$0xff] }
 0x801   : > { %12927 = vmatprep.mubr.msk.f32.mxu1 %vm1131_vm6, %v16743_v29  ;;  %v11052_v29 = vld [vmem:[%s17472_s7 + $0x100] sm:$0xff] }
 0x804   : > { %12928 = vmatmul.mubr.msk.f32.gmra.mrb[160].mxu1 %vm1131_vm6, %v16747_v60  ;;  %v13364_v60 = vpack.c.bf16 %v11053_v32, %v11052_v29  ;;  %v8282_v32 = vld [vmem:[#allocation3 + $0x151] sm:$0xff]  ;;  %v8284_v29 = vld [vmem:[#allocation3 + $0x169] sm:$0xff] }
 0x805   : > { %12938 = vmatprep.mubr.msk.f32.mxu1 %vm1131_vm6, %v16255_v25  ;;  %v8268_v25 = vld [vmem:[#allocation3 + $0xa9] sm:$0xff] }
 0x808   : > { %12939 = vmatmul.mubr.msk.f32.vlgmr.msra.gmra.mrb[130].mxu1 %vm1131_vm6, %v16260_v4  ;;  %v8269_v4 = vld [vmem:[#allocation3 + $0xb1] sm:$0xff] }
 0x809   : > { %12941 = vmatprep.mubr.msk.f32.mxu1 %vm1131_vm6, %v16266_v39  ;;  %13359 = vmatpush3.bf16.msra.mxu1 %v13356_v47  ;;  %v8270_v39 = vld [vmem:[#allocation3 + $0xc1] sm:$0xff]  ;;  %v8280_v47 = vld [vmem:[#allocation3 + $0x139] sm:$0xff] }
 0x80a   : > { %13361 = vmatprep.subr.bf16.mxu1 %v13360_v24 }
 0x80c   : > { %12942 = vmatmul.mubr.msk.f32.gmra.mrb[132].mxu1 %vm1131_vm6, %v16270_v26  ;;  %v8271_v26 = vld [vmem:[#allocation3 + $0xc9] sm:$0xff] }
 0x80d   : > { %12944 = vmatprep.mubr.msk.f32.mxu1 %vm1131_vm6, %v16275_v6  ;;  %13363 = vmatpush3.bf16.msra.mxu1 %v13360_v24  ;;  %v8272_v6 = vld [vmem:[#allocation3 + $0xd9] sm:$0xff] }
 0x80e   : > { %13365 = vmatprep.subr.bf16.mxu1 %v13364_v60  ;;  %v8283_v24 = vld [vmem:[#allocation3 + $0x159] sm:$0xff] }
 0x810   : > { %12945 = vmatmul.mubr.msk.f32.gmra.mrb[134].mxu1 %vm1131_vm6, %v16279_v8  ;;  %v8273_v8 = vld [vmem:[#allocation3 + $0xe1] sm:$0xff] }
 0x811   : > { %12947 = vmatprep.mubr.msk.f32.mxu1 %vm1131_vm6, %v16284_v48  ;;  %v8267_v48 = vld [vmem:[#allocation3 + $0x99] sm:$0xff] }
 0x814   : > { %12948 = vmatmul.mubr.msk.f32.gmra.mrb[136].mxu1 %vm1131_vm6, %v16288_v28  ;;  %v8274_v28 = vld [vmem:[#allocation3 + $0xf1] sm:$0xff] }
 0x815   : > { %12950 = vmatprep.mubr.msk.f32.mxu1 %vm1131_vm6, %v16292_v11  ;;  %v8275_v11 = vld [vmem:[#allocation3 + $0xf9] sm:$0xff] }
 0x818   : > { %12951 = vmatmul.mubr.msk.f32.gmra.mrb[138].mxu1 %vm1131_vm6, %v16296_v34  ;;  %v8276_v34 = vld [vmem:[#allocation3 + $0x109] sm:$0xff] }
 0x819   : > { %12953 = vmatprep.mubr.msk.f32.mxu1 %vm1131_vm6, %v16300_v37  ;;  %v8277_v37 = vld [vmem:[#allocation3 + $0x111] sm:$0xff] }
 0x81c   : > { %12954 = vmatmul.mubr.msk.f32.gmra.mrb[140].mxu1 %vm1131_vm6, %v16304_v59  ;;  %v8265_v59 = vld [vmem:[#allocation3 + $0x81] sm:$0xff] }
 0x81d   : > { %12956 = vmatprep.mubr.msk.f32.mxu1 %vm1131_vm6, %v16308_v42  ;;  %v8266_v42 = vld [vmem:[#allocation3 + $0x91] sm:$0xff] }
 0x820   : > { %12957 = vmatmul.mubr.msk.f32.gmra.mrb[142].mxu1 %vm1131_vm6, %v16312_v15  ;;  %v8263_v15 = vld [vmem:[#allocation3 + $0x69] sm:$0xff] }
 0x821   : > { %12959 = vmatprep.mubr.msk.f32.mxu1 %vm1131_vm6, %v16316_v17  ;;  %v8264_v17 = vld [vmem:[#allocation3 + $0x79] sm:$0xff] }
 0x824   : > { %12960 = vmatmul.mubr.msk.f32.gmra.mrb[144].mxu1 %vm1131_vm6, %v16320_v13  ;;  %v8261_v13 = vld [vmem:[#allocation3 + $0x51] sm:$0xff] }
 0x825   : > { %12962 = vmatprep.mubr.msk.f32.mxu1 %vm1131_vm6, %v16324_v2  ;;  %v8262_v2 = vld [vmem:[#allocation3 + $0x61] sm:$0xff] }
 0x828   : > { %12963 = vmatmul.mubr.msk.f32.gmra.mrb[146].mxu1 %vm1131_vm6, %v16328_v5  ;;  %v8259_v5 = vld [vmem:[#allocation3 + $0x39] sm:$0xff] }
 0x829   : > { %12965 = vmatprep.mubr.msk.f32.mxu1 %vm1131_vm6, %v16332_v7  ;;  %v8260_v7 = vld [vmem:[#allocation3 + $0x49] sm:$0xff] }
 0x82c   : > { %12966 = vmatmul.mubr.msk.f32.gmra.mrb[148].mxu1 %vm1131_vm6, %v16336_v51 }
 0x82d   : > { %12968 = vmatprep.mubr.msk.f32.mxu1 %vm1131_vm6, %v16340_v55 }
 0x830   : > { %12969 = vmatmul.mubr.msk.f32.gmra.mrb[150].mxu1 %vm1131_vm6, %v16344_v41  ;;  %v7898_v41 = vld [vmem:[#allocation3 + $0x198] sm:$0xff] }
 0x831   : > { %12971 = vmatprep.mubr.msk.f32.mxu1 %vm1131_vm6, %v16348_v45  ;;  %v9667_v45 = vld [vmem:[%s17476_s11 + $0x8] sm:$0xff] }
 0x834   : > { %12972 = vmatmul.mubr.msk.f32.gmra.mrb[152].mxu1 %vm1131_vm6, %v16352_v19  ;;  %v7899_v19 = vld [vmem:[#allocation3 + $0x1a0] sm:$0xff] }
 0x835   : > { %12974 = vmatprep.mubr.msk.f32.mxu1 %vm1131_vm6, %v16356_v20  ;;  %v9666_v20 = vld [vmem:[%s17476_s11] sm:$0xff] }
 0x836   : > { %v13380_v51 = vpack.c.bf16 %v9667_v45, %v9666_v20 }
 0x838   : > { %12975 = vmatmul.mubr.msk.f32.gmra.mrb[154].mxu1 %vm1131_vm6, %v16360_v50  ;;  %v11054_v50 = vld [vmem:[%s17472_s7 + $0x110] sm:$0xff]  ;;  %13381 = vmatprep.subr.bf16.mxu0 %v13380_v51 }
 0x839   : > { %12977 = vmatprep.mubr.msk.f32.mxu1 %vm1131_vm6, %v16364_v54  ;;  %v11055_v54 = vld [vmem:[%s17472_s7 + $0x118] sm:$0xff]  ;;  %13383 = vmatpush3.bf16.msra.mxu0 %v13380_v51 }
 0x83a   : > { %v13368_v55 = vpack.c.bf16 %v11055_v54, %v11054_v50 }
 0x83c   : > { %12978 = vmatmul.mubr.msk.f32.gmra.mrb[156].mxu1 %vm1131_vm6, %v16368_v22  ;;  %v8258_v22 = vld [vmem:[#allocation3 + $0x31] sm:$0xff] }
 0x83d   : > { %12980 = vmatprep.mubr.msk.f32.mxu1 %vm1131_vm6, %v16583_v23  ;;  %v8278_v23 = vld [vmem:[#allocation3 + $0x121] sm:$0xff] }
 0x840   : > { %12981 = vmatmul.mubr.msk.f32.gmra.mrb[158].mxu1 %vm1131_vm6, %v16587_v38  ;;  %v8279_v38 = vld [vmem:[#allocation3 + $0x129] sm:$0xff] }
 0x841   : > { %12983 = vmatprep.mubr.msk.f32.mxu1 %vm1131_vm6, %v7898_v41  ;;  %v8289_v41 = vld [vmem:[#allocation3 + $0x1a1] sm:$0xff] }
 0x844   : > { %12984 = vmatmul.mubr.msk.f32.gmra.mrb[160].mxu1 %vm1131_vm6, %v7899_v19 }
 0x845   : > { %12994 = vmatprep.mubr.msk.f32.mxu1 %vm1131_vm6, %v8258_v22 }
 0x848   : > { %12995 = vmatmul.mubr.msk.f32.vlgmr.msra.gmra.mrb[130].mxu1 %vm1131_vm6, %v8259_v5 }
 0x849   : > { %12997 = vmatprep.mubr.msk.f32.mxu1 %vm1131_vm6, %v8260_v7  ;;  %13367 = vmatpush3.bf16.msra.mxu1 %v13364_v60  ;;  %v8285_v60 = vld [vmem:[#allocation3 + $0x171] sm:$0xff] }
 0x84a   : > { %13369 = vmatprep.subr.bf16.mxu1 %v13368_v55 }
 0x84c   : > { %12998 = vmatmul.mubr.msk.f32.gmra.mrb[132].mxu1 %vm1131_vm6, %v8261_v13 }
 0x84d   : > { %13000 = vmatprep.mubr.msk.f32.mxu1 %vm1131_vm6, %v8262_v2  ;;  %13371 = vmatpush3.bf16.msra.mxu1 %v13368_v55 }
 0x850   : > { %13001 = vmatmul.mubr.msk.f32.gmra.mrb[134].mxu1 %vm1131_vm6, %v8263_v15 }
 0x851   : > { %13003 = vmatprep.mubr.msk.f32.mxu1 %vm1131_vm6, %v8264_v17 }
 0x854   : > { %13004 = vmatmul.mubr.msk.f32.gmra.mrb[136].mxu1 %vm1131_vm6, %v8265_v59 }
 0x855   : > { %13006 = vmatprep.mubr.msk.f32.mxu1 %vm1131_vm6, %v8266_v42 }
 0x858   : > { %13007 = vmatmul.mubr.msk.f32.gmra.mrb[138].mxu1 %vm1131_vm6, %v8267_v48 }
 0x859   : > { %13009 = vmatprep.mubr.msk.f32.mxu1 %vm1131_vm6, %v8268_v25 }
 0x85c   : > { %13010 = vmatmul.mubr.msk.f32.gmra.mrb[140].mxu1 %vm1131_vm6, %v8269_v4 }
 0x85d   : > { %13012 = vmatprep.mubr.msk.f32.mxu1 %vm1131_vm6, %v8270_v39 }
 0x860   : > { %13013 = vmatmul.mubr.msk.f32.gmra.mrb[142].mxu1 %vm1131_vm6, %v8271_v26 }
 0x861   : > { %13015 = vmatprep.mubr.msk.f32.mxu1 %vm1131_vm6, %v8272_v6 }
 0x864   : > { %13016 = vmatmul.mubr.msk.f32.gmra.mrb[144].mxu1 %vm1131_vm6, %v8273_v8 }
 0x865   : > { %13018 = vmatprep.mubr.msk.f32.mxu1 %vm1131_vm6, %v8274_v28 }
 0x868   : > { %13019 = vmatmul.mubr.msk.f32.gmra.mrb[146].mxu1 %vm1131_vm6, %v8275_v11 }
 0x869   : > { %13021 = vmatprep.mubr.msk.f32.mxu1 %vm1131_vm6, %v8276_v34 }
 0x86c   : > { %13022 = vmatmul.mubr.msk.f32.gmra.mrb[148].mxu1 %vm1131_vm6, %v8277_v37 }
 0x86d   : > { %13024 = vmatprep.mubr.msk.f32.mxu1 %vm1131_vm6, %v8278_v23 }
 0x870   : > { %13025 = vmatmul.mubr.msk.f32.gmra.mrb[150].mxu1 %vm1131_vm6, %v8279_v38 }
 0x871   : > { %13027 = vmatprep.mubr.msk.f32.mxu1 %vm1131_vm6, %v8280_v47 }
 0x874   : > { %13028 = vmatmul.mubr.msk.f32.gmra.mrb[152].mxu1 %vm1131_vm6, %v8281_v14 }
 0x875   : > { %13030 = vmatprep.mubr.msk.f32.mxu1 %vm1131_vm6, %v8282_v32 }
 0x878   : > { %13031 = vmatmul.mubr.msk.f32.gmra.mrb[154].mxu1 %vm1131_vm6, %v8283_v24 }
 0x879   : > { %13033 = vmatprep.mubr.msk.f32.mxu1 %vm1131_vm6, %v8284_v29 }
 0x87c   : > { %13034 = vmatmul.mubr.msk.f32.gmra.mrb[156].mxu1 %vm1131_vm6, %v8285_v60 }
 0x87d   : > { %13036 = vmatprep.mubr.msk.f32.mxu1 %vm1131_vm6, %v16663_v16  ;;  %v17855_v16 = vld [vmem:[#allocation103_spill] sm:$0xff] }
 0x880   : > { %13037 = vmatmul.mubr.msk.f32.gmra.mrb[158].mxu1 %vm1131_vm6, %v16667_v62  ;;  %v17856_v62 = vld [vmem:[#allocation104_spill] sm:$0xff] }
 0x881   : > { %13039 = vmatprep.mubr.msk.f32.mxu1 %vm1131_vm6, %v8288_v49 }
 0x884   : > { %13040 = vmatmul.mubr.msk.f32.gmra.mrb[160].mxu1 %vm1131_vm6, %v8289_v41 }
 0x885   : > { %13050 = vmatprep.mubr.msk.f32.mxu1 %vm1131_vm6, %v17825_v30  ;;  %v17857_v30 = vld [vmem:[#allocation105_spill] sm:$0xff] }
 0x888   : > { %13051 = vmatmul.mubr.msk.f32.vlgmr.msra.gmra.mrb[130].mxu1 %vm1131_vm6, %v17826_v27  ;;  %v17858_v27 = vld [vmem:[#allocation73_spill] sm:$0xff] }
 0x889   : > { %13053 = vmatprep.mubr.msk.f32.mxu1 %vm1131_vm6, %v17827_v0  ;;  %v17859_v0 = vld [vmem:[#allocation74_spill] sm:$0xff] }
 0x88c   : > { %13054 = vmatmul.mubr.msk.f32.gmra.mrb[132].mxu1 %vm1131_vm6, %v17828_v63  ;;  %v8678_v63 = vld [vmem:[#allocation3 + $0x19a] sm:$0xff] }
 0x88d   : > { %13056 = vmatprep.mubr.msk.f32.mxu1 %vm1131_vm6, %v17829_v33  ;;  %v8679_v33 = vld [vmem:[#allocation3 + $0x1a2] sm:$0xff] }
 0x890   : > { %13057 = vmatmul.mubr.msk.f32.gmra.mrb[134].mxu1 %vm1131_vm6, %v17830_v57  ;;  %v9668_v57 = vld [vmem:[%s17476_s11 + $0x10] sm:$0xff] }
 0x891   : > { %13059 = vmatprep.mubr.msk.f32.mxu1 %vm1131_vm6, %v17831_v40  ;;  %v9669_v40 = vld [vmem:[%s17476_s11 + $0x18] sm:$0xff] }
 0x894   : > { %13060 = vmatmul.mubr.msk.f32.gmra.mrb[136].mxu1 %vm1131_vm6, %v17832_v18  ;;  %v13384_v18 = vpack.c.bf16 %v9669_v40, %v9668_v57 }
 0x895   : > { %13062 = vmatprep.mubr.msk.f32.mxu1 %vm1131_vm6, %v17833_v35  ;;  %v16942_v35 = vld [vmem:[%s17473_s8] ss:$0 sm:$0xff] }
 0x896   : > { %13385 = vmatprep.subr.bf16.mxu0 %v13384_v18 }
 0x897   : > { %13387 = vmatpush3.bf16.msra.mxu0 %v13384_v18 }
 0x898   : > { %13063 = vmatmul.mubr.msk.f32.gmra.mrb[138].mxu1 %vm1131_vm6, %v17834_v44 }
 0x899   : > { %13065 = vmatprep.mubr.msk.f32.mxu1 %vm1131_vm6, %v17835_v10 }
 0x89c   : > { %13066 = vmatmul.mubr.msk.f32.gmra.mrb[140].mxu1 %vm1131_vm6, %v17836_v56 }
 0x89d   : > { %13068 = vmatprep.mubr.msk.f32.mxu1 %vm1131_vm6, %v17837_v3 }
 0x8a0   : > { %13069 = vmatmul.mubr.msk.f32.gmra.mrb[142].mxu1 %vm1131_vm6, %v17838_v52 }
 0x8a1   : > { %13071 = vmatprep.mubr.msk.f32.mxu1 %vm1131_vm6, %v17839_v43 }
 0x8a4   : > { %13072 = vmatmul.mubr.msk.f32.gmra.mrb[144].mxu1 %vm1131_vm6, %v17840_v46 }
 0x8a5   : > { %13074 = vmatprep.mubr.msk.f32.mxu1 %vm1131_vm6, %v17841_v53 }
 0x8a8   : > { %13075 = vmatmul.mubr.msk.f32.gmra.mrb[146].mxu1 %vm1131_vm6, %v17842_v9 }
 0x8a9   : > { %13077 = vmatprep.mubr.msk.f32.mxu1 %vm1131_vm6, %v17843_v58 }
 0x8ac   : > { %13078 = vmatmul.mubr.msk.f32.gmra.mrb[148].mxu1 %vm1131_vm6, %v17844_v61 }
 0x8ad   : > { %13080 = vmatprep.mubr.msk.f32.mxu1 %vm1131_vm6, %v17845_v1 }
 0x8b0   : > { %13081 = vmatmul.mubr.msk.f32.gmra.mrb[150].mxu1 %vm1131_vm6, %v17846_v12 }
 0x8b1   : > { %13083 = vmatprep.mubr.msk.f32.mxu1 %vm1131_vm6, %v17847_v36 }
 0x8b4   : > { %13084 = vmatmul.mubr.msk.f32.gmra.mrb[152].mxu1 %vm1131_vm6, %v17848_v31 }
 0x8b5   : > { %13086 = vmatprep.mubr.msk.f32.mxu1 %vm1131_vm6, %v17849_v21 }
 0x8b8   : > { %13087 = vmatmul.mubr.msk.f32.gmra.mrb[154].mxu1 %vm1131_vm6, %v17855_v16 }
 0x8b9   : > { %13089 = vmatprep.mubr.msk.f32.mxu1 %vm1131_vm6, %v17856_v62 }
 0x8bc   : > { %13090 = vmatmul.mubr.msk.f32.gmra.mrb[156].mxu1 %vm1131_vm6, %v17857_v30 }
 0x8bd   : > { %13092 = vmatprep.mubr.msk.f32.mxu1 %vm1131_vm6, %v17858_v27 }
 0x8c0   : > { %13093 = vmatmul.mubr.msk.f32.gmra.mrb[158].mxu1 %vm1131_vm6, %v17859_v0 }
 0x8c1   : > { %13095 = vmatprep.mubr.msk.f32.mxu1 %vm1131_vm6, %v8678_v63 }
 0x8c4   : > { %13096 = vmatmul.mubr.msk.f32.gmra.mrb[160].mxu1 %vm1131_vm6, %v8679_v33 }
 0x95b   : > { %v13052_v44 = vpop.f32.mrb[130].mxu1 }
 0x95c   : > { %v9046_v10 = vadd.f32 %v13052_v44, %v16942_v35  ;;  %v8847_v56 = vpop.f32.mrb[131].mxu1 }
 0x95d   : > { %v9045_v3 = vadd.f32 %v16942_v35, %v8847_v56 }
 0x95e   : > { %v9078_v52 = vmax.f32 %v9046_v10, 0.0 }
 0x95f   : > { %v9077_v43 = vmax.f32 %v9045_v3, 0.0  ;;  %v13055_v46 = vpop.f32.mrb[132].mxu1 }
 0x960   : > { %v9048_v53 = vadd.f32 %v13055_v46, %v16942_v35  ;;  %9143 = vrot.lane.b32.xlu0 %v9078_v52, %s17640_s23  ;;  %v8857_v9 = vpop.f32.mrb[133].mxu1 }
 0x961   : > { %v9047_v58 = vadd.f32 %v16942_v35, %v8857_v9  ;;  %13162 = vmatprep.mubr.msk.f32.mxu0 %vm1131_vm6, %v9077_v43 }
 0x962   : > { %v9080_v61 = vmax.f32 %v9048_v53, 0.0  ;;  %13163 = vmatmul.mubr.msk.f32.vlgmr.msra.gmra.mrb[130].mxu0 %vm1131_vm6, %v9078_v52 }
 0x963   : > { %v9079_v1 = vmax.f32 %v9047_v58, 0.0  ;;  %v13058_v12 = vpop.f32.mrb[134].mxu1 }
 0x964   : > { %v9050_v36 = vadd.f32 %v13058_v12, %v16942_v35  ;;  %9141 = vrot.lane.b32.xlu0 %v9077_v43, %s17640_s23  ;;  %9147 = vrot.lane.b32.xlu1 %v9080_v61, %s17640_s23  ;;  %v8867_v31 = vpop.f32.mrb[135].mxu1 }
 0x965   : > { %v9049_v21 = vadd.f32 %v16942_v35, %v8867_v31  ;;  %13165 = vmatprep.mubr.msk.f32.mxu0 %vm1131_vm6, %v9079_v1 }
 0x966   : > { %13166 = vmatmul.mubr.msk.f32.gmra.mrb[132].mxu0 %vm1131_vm6, %v9080_v61  ;;  %v9082_v54 = vmax.f32 %v9050_v36, 0.0 }
 0x967   : > { %v9081_v19 = vmax.f32 %v9049_v21, 0.0  ;;  %v13061_v50 = vpop.f32.mrb[136].mxu1 }
 0x968   : > { %v9052_v22 = vadd.f32 %v13061_v50, %v16942_v35  ;;  %9145 = vrot.lane.b32.xlu1 %v9079_v1, %s17640_s23  ;;  %v8877_v20 = vpop.f32.mrb[137].mxu1 }
 0x969   : > { %v9051_v45 = vadd.f32 %v16942_v35, %v8877_v20  ;;  %9149 = vrot.lane.b32.xlu0 %v9081_v19, %s17640_s23  ;;  %13168 = vmatprep.mubr.msk.f32.mxu0 %vm1131_vm6, %v9081_v19 }
 0x96a   : > { %13169 = vmatmul.mubr.msk.f32.gmra.mrb[134].mxu0 %vm1131_vm6, %v9082_v54  ;;  %v9084_v5 = vmax.f32 %v9052_v22, 0.0 }
 0x96b   : > { %v9083_v51 = vmax.f32 %v9051_v45, 0.0  ;;  %v13064_v55 = vpop.f32.mrb[138].mxu1 }
 0x96c   : > { %v9054_v7 = vadd.f32 %v13064_v55, %v16942_v35  ;;  %9151 = vrot.lane.b32.xlu1 %v9082_v54, %s17640_s23  ;;  %v8887_v13 = vpop.f32.mrb[139].mxu1 }
 0x96d   : > { %v9053_v2 = vadd.f32 %v16942_v35, %v8887_v13  ;;  %9153 = vrot.lane.b32.xlu0 %v9083_v51, %s17640_s23  ;;  %13171 = vmatprep.mubr.msk.f32.mxu0 %vm1131_vm6, %v9083_v51 }
 0x96e   : > { %13172 = vmatmul.mubr.msk.f32.gmra.mrb[136].mxu0 %vm1131_vm6, %v9084_v5  ;;  %v9086_v59 = vmax.f32 %v9054_v7, 0.0 }
 0x96f   : > { %v9085_v15 = vmax.f32 %v9053_v2, 0.0  ;;  %v13067_v17 = vpop.f32.mrb[140].mxu1 }
 0x970   : > { %v9056_v42 = vadd.f32 %v13067_v17, %v16942_v35  ;;  %9155 = vrot.lane.b32.xlu1 %v9084_v5, %s17640_s23  ;;  %v8897_v48 = vpop.f32.mrb[141].mxu1 }
 0x971   : > { %v9055_v25 = vadd.f32 %v16942_v35, %v8897_v48  ;;  %9157 = vrot.lane.b32.xlu0 %v9085_v15, %s17640_s23  ;;  %13174 = vmatprep.mubr.msk.f32.mxu0 %vm1131_vm6, %v9085_v15 }
 0x972   : > { %13175 = vmatmul.mubr.msk.f32.gmra.mrb[138].mxu0 %vm1131_vm6, %v9086_v59  ;;  %v9088_v26 = vmax.f32 %v9056_v42, 0.0 }
 0x973   : > { %v9087_v4 = vmax.f32 %v9055_v25, 0.0  ;;  %v13070_v39 = vpop.f32.mrb[142].mxu1  ;;  %v17860_v25 = vld [vmem:[#allocation9_spill] sm:$0xff] }
 0x974   : > { %v9058_v6 = vadd.f32 %v13070_v39, %v16942_v35  ;;  %9159 = vrot.lane.b32.xlu1 %v9086_v59, %s17640_s23  ;;  %v8907_v8 = vpop.f32.mrb[143].mxu1 }
 0x975   : > { %v9057_v28 = vadd.f32 %v16942_v35, %v8907_v8  ;;  %9161 = vrot.lane.b32.xlu0 %v9087_v4, %s17640_s23  ;;  %13177 = vmatprep.mubr.msk.f32.mxu0 %vm1131_vm6, %v9087_v4 }
 0x976   : > { %13178 = vmatmul.mubr.msk.f32.gmra.mrb[140].mxu0 %vm1131_vm6, %v9088_v26  ;;  %v9090_v37 = vmax.f32 %v9058_v6, 0.0  ;;  %v17861_v6 = vld [vmem:[#allocation10_spill] sm:$0xff] }
 0x977   : > { %v9089_v11 = vmax.f32 %v9057_v28, 0.0  ;;  %v13073_v34 = vpop.f32.mrb[144].mxu1  ;;  %v17862_v28 = vld [vmem:[#allocation11_spill] sm:$0xff] }
 0x978   : > { %v9060_v23 = vadd.f32 %v13073_v34, %v16942_v35  ;;  %9163 = vrot.lane.b32.xlu1 %v9088_v26, %s17640_s23  ;;  %v8917_v38 = vpop.f32.mrb[145].mxu1 }
 0x979   : > { %v9059_v47 = vadd.f32 %v16942_v35, %v8917_v38  ;;  %9165 = vrot.lane.b32.xlu0 %v9089_v11, %s17640_s23  ;;  %13180 = vmatprep.mubr.msk.f32.mxu0 %vm1131_vm6, %v9089_v11 }
 0x97a   : > { %13181 = vmatmul.mubr.msk.f32.gmra.mrb[142].mxu0 %vm1131_vm6, %v9090_v37  ;;  %v9092_v24 = vmax.f32 %v9060_v23, 0.0 }
 0x97b   : > { %v9091_v14 = vmax.f32 %v9059_v47, 0.0  ;;  %v13076_v32 = vpop.f32.mrb[146].mxu1  ;;  %v17864_v47 = vld [vmem:[#allocation14_spill] sm:$0xff] }
 0x97c   : > { %v9062_v29 = vadd.f32 %v13076_v32, %v16942_v35  ;;  %9167 = vrot.lane.b32.xlu1 %v9090_v37, %s17640_s23  ;;  %v8927_v60 = vpop.f32.mrb[147].mxu1  ;;  %v17863_v37 = vld [vmem:[#allocation12_spill] sm:$0xff] }
 0x97d   : > { %v9061_v49 = vadd.f32 %v16942_v35, %v8927_v60  ;;  %9169 = vrot.lane.b32.xlu0 %v9091_v14, %s17640_s23  ;;  %13183 = vmatprep.mubr.msk.f32.mxu0 %vm1131_vm6, %v9091_v14 }
 0x97e   : > { %13184 = vmatmul.mubr.msk.f32.gmra.mrb[144].mxu0 %vm1131_vm6, %v9092_v24  ;;  %v9094_v62 = vmax.f32 %v9062_v29, 0.0 }
 0x97f   : > { %v9093_v41 = vmax.f32 %v9061_v49, 0.0  ;;  %v13079_v16 = vpop.f32.mrb[148].mxu1  ;;  %v17866_v49 = vld [vmem:[#allocation16_spill] sm:$0xff] }
 0x980   : > { %v9064_v30 = vadd.f32 %v13079_v16, %v16942_v35  ;;  %9171 = vrot.lane.b32.xlu1 %v9092_v24, %s17640_s23  ;;  %v8937_v27 = vpop.f32.mrb[149].mxu1  ;;  %v17865_v24 = vld [vmem:[#allocation13_spill] sm:$0xff] }
 0x981   : > { %v9063_v0 = vadd.f32 %v16942_v35, %v8937_v27  ;;  %9173 = vrot.lane.b32.xlu0 %v9093_v41, %s17640_s23  ;;  %13186 = vmatprep.mubr.msk.f32.mxu0 %vm1131_vm6, %v9093_v41 }
 0x982   : > { %13187 = vmatmul.mubr.msk.f32.gmra.mrb[146].mxu0 %vm1131_vm6, %v9094_v62  ;;  %v9096_v57 = vmax.f32 %v9064_v30, 0.0 }
 0x983   : > { %v9095_v63 = vmax.f32 %v9063_v0, 0.0  ;;  %v13082_v33 = vpop.f32.mrb[150].mxu1  ;;  %v17868_v0 = vld [vmem:[#allocation18_spill] sm:$0xff] }
 0x984   : > { %v9066_v40 = vadd.f32 %v13082_v33, %v16942_v35  ;;  %9175 = vrot.lane.b32.xlu1 %v9094_v62, %s17640_s23  ;;  %v8947_v18 = vpop.f32.mrb[151].mxu1  ;;  %v17867_v62 = vld [vmem:[#allocation15_spill] sm:$0xff] }
 0x985   : > { %v9065_v44 = vadd.f32 %v16942_v35, %v8947_v18  ;;  %9177 = vrot.lane.b32.xlu0 %v9095_v63, %s17640_s23  ;;  %13189 = vmatprep.mubr.msk.f32.mxu0 %vm1131_vm6, %v9095_v63 }
 0x986   : > { %13190 = vmatmul.mubr.msk.f32.gmra.mrb[148].mxu0 %vm1131_vm6, %v9096_v57  ;;  %v9098_v3 = vmax.f32 %v9066_v40, 0.0 }
 0x987   : > { %v9097_v10 = vmax.f32 %v9065_v44, 0.0  ;;  %v13085_v56 = vpop.f32.mrb[152].mxu1  ;;  %v17870_v44 = vld [vmem:[#allocation20_spill] sm:$0xff] }
 0x988   : > { %v9068_v52 = vadd.f32 %v13085_v56, %v16942_v35  ;;  %9179 = vrot.lane.b32.xlu1 %v9096_v57, %s17640_s23  ;;  %v8957_v43 = vpop.f32.mrb[153].mxu1  ;;  %v17869_v57 = vld [vmem:[#allocation17_spill] sm:$0xff] }
 0x989   : > { %v9067_v46 = vadd.f32 %v16942_v35, %v8957_v43  ;;  %9181 = vrot.lane.b32.xlu0 %v9097_v10, %s17640_s23  ;;  %13192 = vmatprep.mubr.msk.f32.mxu0 %vm1131_vm6, %v9097_v10 }
 0x98a   : > { %13193 = vmatmul.mubr.msk.f32.gmra.mrb[150].mxu0 %vm1131_vm6, %v9098_v3  ;;  %v9100_v58 = vmax.f32 %v9068_v52, 0.0 }
 0x98b   : > { %v9099_v53 = vmax.f32 %v9067_v46, 0.0  ;;  %v13088_v9 = vpop.f32.mrb[154].mxu1  ;;  %v17872_v46 = vld [vmem:[#allocation22_spill] sm:$0xff] }
 0x98c   : > { %v9070_v61 = vadd.f32 %v13088_v9, %v16942_v35  ;;  %9183 = vrot.lane.b32.xlu1 %v9098_v3, %s17640_s23  ;;  %v8967_v1 = vpop.f32.mrb[155].mxu1  ;;  %v17871_v3 = vld [vmem:[#allocation19_spill] sm:$0xff] }
 0x98d   : > { %v9069_v12 = vadd.f32 %v16942_v35, %v8967_v1  ;;  %9185 = vrot.lane.b32.xlu0 %v9099_v53, %s17640_s23  ;;  %13195 = vmatprep.mubr.msk.f32.mxu0 %vm1131_vm6, %v9099_v53 }
 0x98e   : > { %13196 = vmatmul.mubr.msk.f32.gmra.mrb[152].mxu0 %vm1131_vm6, %v9100_v58  ;;  %v9102_v21 = vmax.f32 %v9070_v61, 0.0 }
 0x98f   : > { %v9101_v36 = vmax.f32 %v9069_v12, 0.0  ;;  %v13091_v31 = vpop.f32.mrb[156].mxu1  ;;  %v17874_v12 = vld [vmem:[#allocation24_spill] sm:$0xff] }
 0x990   : > { %v9072_v19 = vadd.f32 %v13091_v31, %v16942_v35  ;;  %9187 = vrot.lane.b32.xlu1 %v9100_v58, %s17640_s23  ;;  %v8977_v50 = vpop.f32.mrb[157].mxu1  ;;  %v17873_v58 = vld [vmem:[#allocation21_spill] sm:$0xff] }
 0x991   : > { %v9071_v54 = vadd.f32 %v16942_v35, %v8977_v50  ;;  %9189 = vrot.lane.b32.xlu0 %v9101_v36, %s17640_s23  ;;  %13198 = vmatprep.mubr.msk.f32.mxu0 %vm1131_vm6, %v9101_v36 }
 0x992   : > { %13199 = vmatmul.mubr.msk.f32.gmra.mrb[154].mxu0 %vm1131_vm6, %v9102_v21  ;;  %v9104_v45 = vmax.f32 %v9072_v19, 0.0 }
 0x993   : > { %v9103_v22 = vmax.f32 %v9071_v54, 0.0  ;;  %v13094_v20 = vpop.f32.mrb[158].mxu1  ;;  %v17876_v54 = vld [vmem:[#allocation26_spill] sm:$0xff] }
 0x994   : > { %v9074_v51 = vadd.f32 %v13094_v20, %v16942_v35  ;;  %9191 = vrot.lane.b32.xlu1 %v9102_v21, %s17640_s23  ;;  %v8987_v55 = vpop.f32.mrb[159].mxu1  ;;  %v17875_v21 = vld [vmem:[#allocation23_spill] sm:$0xff] }
 0x995   : > { %v9073_v5 = vadd.f32 %v16942_v35, %v8987_v55  ;;  %9193 = vrot.lane.b32.xlu0 %v9103_v22, %s17640_s23  ;;  %13201 = vmatprep.mubr.msk.f32.mxu0 %vm1131_vm6, %v9103_v22 }
 0x996   : > { %13202 = vmatmul.mubr.msk.f32.gmra.mrb[156].mxu0 %vm1131_vm6, %v9104_v45  ;;  %v9106_v2 = vmax.f32 %v9074_v51, 0.0 }
 0x997   : > { %v9105_v7 = vmax.f32 %v9073_v5, 0.0  ;;  %v13097_v13 = vpop.f32.mrb[160].mxu1  ;;  %v17878_v5 = vld [vmem:[#allocation28_spill] sm:$0xff] }
 0x998   : > { %v9076_v15 = vadd.f32 %v13097_v13, %v16942_v35  ;;  %9195 = vrot.lane.b32.xlu1 %v9104_v45, %s17640_s23  ;;  %v8997_v17 = vpop.f32.mrb[161].mxu1  ;;  %v17877_v45 = vld [vmem:[#allocation25_spill] sm:$0xff] }
 0x999   : > { %v9075_v59 = vadd.f32 %v16942_v35, %v8997_v17  ;;  %9197 = vrot.lane.b32.xlu0 %v9105_v7, %s17640_s23  ;;  %13204 = vmatprep.mubr.msk.f32.mxu0 %vm1131_vm6, %v9105_v7 }
 0x99a   : > { %13205 = vmatmul.mubr.msk.f32.gmra.mrb[158].mxu0 %vm1131_vm6, %v9106_v2  ;;  %v9108_v48 = vmax.f32 %v9076_v15, 0.0 }
 0x99b   : > { %v9107_v42 = vmax.f32 %v9075_v59, 0.0  ;;  %v17880_v59 = vld [vmem:[#allocation30_spill] sm:$0xff] }
 0x99c   : > { %9199 = vrot.lane.b32.xlu1 %v9106_v2, %s17640_s23  ;;  %v17879_v2 = vld [vmem:[#allocation27_spill] sm:$0xff] }
 0x99d   : > { %9201 = vrot.lane.b32.xlu0 %v9107_v42, %s17640_s23  ;;  %13207 = vmatprep.mubr.msk.f32.mxu0 %vm1131_vm6, %v9107_v42 }
 0x99e   : > { %13208 = vmatmul.mubr.msk.f32.gmra.mrb[160].mxu0 %vm1131_vm6, %v9108_v48 }
 0x9a0   : > { %9203 = vrot.lane.b32.xlu1 %v9108_v48, %s17640_s23 }
 0x9d2   : > { %v9144_v35 = vpop.permute.xlu0 %9143 }
 0x9d3   : > { %v9238_v4 = vsel %vm1131_vm6, %v17860_v25, %v9144_v35  ;;  %v17881_v35 = vld [vmem:[#allocation29_spill] sm:$0xff] }
 0x9d4   : > { %9271 = vst.msk [vmem:[%s17045_s19 + $0x8] sm:$0xff] %vm9269_vm1, %v9238_v4 }
 0x9d6   : > { %v9142_v39 = vpop.permute.xlu0 %9141  ;;  %v9148_v26 = vpop.permute.xlu1 %9147 }
 0x9d7   : > { %v9237_v8 = vsel %vm1131_vm6, %v17861_v6, %v9142_v39  ;;  %v9240_v11 = vsel %vm1131_vm6, %v17862_v28, %v9148_v26  ;;  %v17882_v39 = vld [vmem:[#allocation32_spill] sm:$0xff] }
 0x9d8   : > { %9270 = vst.msk [vmem:[%s17045_s19] sm:$0xff] %vm9269_vm1, %v9237_v8  ;;  %9273 = vst.msk [vmem:[%s17045_s19 + $0x18] sm:$0xff] %vm9269_vm1, %v9240_v11  ;;  %v17883_v8 = vld [vmem:[#allocation31_spill] sm:$0xff] }
 0x9da   : > { %v9146_v34 = vpop.permute.xlu1 %9145 }
 0x9db   : > { %v9239_v23 = vsel %vm1131_vm6, %v17863_v37, %v9146_v34  ;;  %v9150_v38 = vpop.permute.xlu0 %9149  ;;  %v17884_v34 = vld [vmem:[#allocation34_spill] sm:$0xff] }
 0x9dc   : > { %9272 = vst.msk [vmem:[%s17045_s19 + $0x10] sm:$0xff] %vm9269_vm1, %v9239_v23  ;;  %v9241_v14 = vsel %vm1131_vm6, %v17864_v47, %v9150_v38  ;;  %v17885_v38 = vld [vmem:[#allocation33_spill] sm:$0xff] }
 0x9dd   : > { %9274 = vst.msk [vmem:[%s17045_s19 + $0x20] sm:$0xff] %vm9269_vm1, %v9241_v14 }
 0x9de   : > { %v9152_v32 = vpop.permute.xlu1 %9151 }
 0x9df   : > { %v9242_v29 = vsel %vm1131_vm6, %v17865_v24, %v9152_v32  ;;  %v9154_v60 = vpop.permute.xlu0 %9153  ;;  %v17886_v32 = vld [vmem:[#allocation36_spill] sm:$0xff] }
 0x9e0   : > { %9275 = vst.msk [vmem:[%s17045_s19 + $0x28] sm:$0xff] %vm9269_vm1, %v9242_v29  ;;  %v9243_v41 = vsel %vm1131_vm6, %v17866_v49, %v9154_v60  ;;  %v17887_v60 = vld [vmem:[#allocation35_spill] sm:$0xff] }
 0x9e1   : > { %9276 = vst.msk [vmem:[%s17045_s19 + $0x30] sm:$0xff] %vm9269_vm1, %v9243_v41 }
 0x9e2   : > { %v9156_v16 = vpop.permute.xlu1 %9155 }
 0x9e3   : > { %v9244_v30 = vsel %vm1131_vm6, %v17867_v62, %v9156_v16  ;;  %v9158_v27 = vpop.permute.xlu0 %9157  ;;  %v17888_v16 = vld [vmem:[#allocation38_spill] sm:$0xff] }
 0x9e4   : > { %9277 = vst.msk [vmem:[%s17045_s19 + $0x38] sm:$0xff] %vm9269_vm1, %v9244_v30  ;;  %v9245_v63 = vsel %vm1131_vm6, %v17868_v0, %v9158_v27  ;;  %v17889_v27 = vld [vmem:[#allocation37_spill] sm:$0xff] }
 0x9e5   : > { %9278 = vst.msk [vmem:[%s17045_s19 + $0x40] sm:$0xff] %vm9269_vm1, %v9245_v63 }
 0x9e6   : > { %v9160_v33 = vpop.permute.xlu1 %9159 }
 0x9e7   : > { %v9246_v40 = vsel %vm1131_vm6, %v17869_v57, %v9160_v33  ;;  %v9162_v18 = vpop.permute.xlu0 %9161  ;;  %v17890_v33 = vld [vmem:[#allocation40_spill] sm:$0xff] }
 0x9e8   : > { %9279 = vst.msk [vmem:[%s17045_s19 + $0x48] sm:$0xff] %vm9269_vm1, %v9246_v40  ;;  %v9247_v10 = vsel %vm1131_vm6, %v17870_v44, %v9162_v18  ;;  %v17891_v18 = vld [vmem:[#allocation39_spill] sm:$0xff] }
 0x9e9   : > { %9280 = vst.msk [vmem:[%s17045_s19 + $0x50] sm:$0xff] %vm9269_vm1, %v9247_v10  ;;  %v17176_v10 = vld [vmem:[%s17477_s12] ss:$0 sm:$0xff] }
 0x9ea   : > { %v9164_v56 = vpop.permute.xlu1 %9163 }
 0x9eb   : > { %v9248_v52 = vsel %vm1131_vm6, %v17871_v3, %v9164_v56  ;;  %v9166_v43 = vpop.permute.xlu0 %9165 }
 0x9ec   : > { %9281 = vst.msk [vmem:[%s17045_s19 + $0x58] sm:$0xff] %vm9269_vm1, %v9248_v52  ;;  %v9249_v53 = vsel %vm1131_vm6, %v17872_v46, %v9166_v43 }
 0x9ed   : > { %9282 = vst.msk [vmem:[%s17045_s19 + $0x60] sm:$0xff] %vm9269_vm1, %v9249_v53 }
 0x9ee   : > { %v9168_v9 = vpop.permute.xlu1 %9167 }
 0x9ef   : > { %v9250_v61 = vsel %vm1131_vm6, %v17873_v58, %v9168_v9  ;;  %v9170_v1 = vpop.permute.xlu0 %9169 }
 0x9f0   : > { %9283 = vst.msk [vmem:[%s17045_s19 + $0x68] sm:$0xff] %vm9269_vm1, %v9250_v61  ;;  %v9251_v36 = vsel %vm1131_vm6, %v17874_v12, %v9170_v1 }
 0x9f1   : > { %9284 = vst.msk [vmem:[%s17045_s19 + $0x70] sm:$0xff] %vm9269_vm1, %v9251_v36 }
 0x9f2   : > { %v9172_v31 = vpop.permute.xlu1 %9171 }
 0x9f3   : > { %v9252_v19 = vsel %vm1131_vm6, %v17875_v21, %v9172_v31  ;;  %v9174_v50 = vpop.permute.xlu0 %9173 }
 0x9f4   : > { %9285 = vst.msk [vmem:[%s17045_s19 + $0x78] sm:$0xff] %vm9269_vm1, %v9252_v19  ;;  %v9253_v22 = vsel %vm1131_vm6, %v17876_v54, %v9174_v50 }
 0x9f5   : > { %9286 = vst.msk [vmem:[%s17045_s19 + $0x80] sm:$0xff] %vm9269_vm1, %v9253_v22 }
 0x9f6   : > { %v9176_v20 = vpop.permute.xlu1 %9175 }
 0x9f7   : > { %v9254_v51 = vsel %vm1131_vm6, %v17877_v45, %v9176_v20  ;;  %v9178_v55 = vpop.permute.xlu0 %9177 }
 0x9f8   : > { %9287 = vst.msk [vmem:[%s17045_s19 + $0x88] sm:$0xff] %vm9269_vm1, %v9254_v51  ;;  %v9255_v7 = vsel %vm1131_vm6, %v17878_v5, %v9178_v55 }
 0x9f9   : > { %9288 = vst.msk [vmem:[%s17045_s19 + $0x90] sm:$0xff] %vm9269_vm1, %v9255_v7 }
 0x9fa   : > { %v9180_v13 = vpop.permute.xlu1 %9179 }
 0x9fb   : > { %v9256_v15 = vsel %vm1131_vm6, %v17879_v2, %v9180_v13  ;;  %v9182_v17 = vpop.permute.xlu0 %9181 }
 0x9fc   : > { %9289 = vst.msk [vmem:[%s17045_s19 + $0x98] sm:$0xff] %vm9269_vm1, %v9256_v15  ;;  %v9257_v42 = vsel %vm1131_vm6, %v17880_v59, %v9182_v17 }
 0x9fd   : > { %9290 = vst.msk [vmem:[%s17045_s19 + $0xa0] sm:$0xff] %vm9269_vm1, %v9257_v42 }
 0x9fe   : > { %v9184_v48 = vpop.permute.xlu1 %9183 }
 0x9ff   : > { %v9258_v25 = vsel %vm1131_vm6, %v17881_v35, %v9184_v48  ;;  %v9186_v4 = vpop.permute.xlu0 %9185 }
 0xa00   : > { %9291 = vst.msk [vmem:[%s17045_s19 + $0xa8] sm:$0xff] %vm9269_vm1, %v9258_v25  ;;  %v9259_v26 = vsel %vm1131_vm6, %v17882_v39, %v9186_v4 }
 0xa01   : > { %9292 = vst.msk [vmem:[%s17045_s19 + $0xb0] sm:$0xff] %vm9269_vm1, %v9259_v26 }
 0xa02   : > { %v9188_v6 = vpop.permute.xlu1 %9187 }
 0xa03   : > { %v9260_v28 = vsel %vm1131_vm6, %v17883_v8, %v9188_v6  ;;  %v9190_v11 = vpop.permute.xlu0 %9189 }
 0xa04   : > { %9293 = vst.msk [vmem:[%s17045_s19 + $0xb8] sm:$0xff] %vm9269_vm1, %v9260_v28  ;;  %v9261_v37 = vsel %vm1131_vm6, %v17884_v34, %v9190_v11 }
 0xa05   : > { %9294 = vst.msk [vmem:[%s17045_s19 + $0xc0] sm:$0xff] %vm9269_vm1, %v9261_v37 }
 0xa06   : > { %v9192_v23 = vpop.permute.xlu1 %9191 }
 0xa07   : > { %v9262_v47 = vsel %vm1131_vm6, %v17885_v38, %v9192_v23  ;;  %v9194_v14 = vpop.permute.xlu0 %9193 }
 0xa08   : > { %9295 = vst.msk [vmem:[%s17045_s19 + $0xc8] sm:$0xff] %vm9269_vm1, %v9262_v47  ;;  %v9263_v24 = vsel %vm1131_vm6, %v17886_v32, %v9194_v14 }
 0xa09   : > { %9296 = vst.msk [vmem:[%s17045_s19 + $0xd0] sm:$0xff] %vm9269_vm1, %v9263_v24 }
 0xa0a   : > { %v9196_v29 = vpop.permute.xlu1 %9195 }
 0xa0b   : > { %v9264_v49 = vsel %vm1131_vm6, %v17887_v60, %v9196_v29  ;;  %v9198_v41 = vpop.permute.xlu0 %9197 }
 0xa0c   : > { %9297 = vst.msk [vmem:[%s17045_s19 + $0xd8] sm:$0xff] %vm9269_vm1, %v9264_v49  ;;  %v9265_v62 = vsel %vm1131_vm6, %v17888_v16, %v9198_v41 }
 0xa0d   : > { %9298 = vst.msk [vmem:[%s17045_s19 + $0xe0] sm:$0xff] %vm9269_vm1, %v9265_v62 }
 0xa0e   : > { %v9200_v30 = vpop.permute.xlu1 %9199 }
 0xa0f   : > { %v9266_v0 = vsel %vm1131_vm6, %v17889_v27, %v9200_v30  ;;  %v9202_v63 = vpop.permute.xlu0 %9201 }
 0xa10   : > { %9299 = vst.msk [vmem:[%s17045_s19 + $0xe8] sm:$0xff] %vm9269_vm1, %v9266_v0  ;;  %v9267_v57 = vsel %vm1131_vm6, %v17890_v33, %v9202_v63 }
 0xa11   : > { %9300 = vst.msk [vmem:[%s17045_s19 + $0xf0] sm:$0xff] %vm9269_vm1, %v9267_v57 }
 0xa12   : > { %v9204_v40 = vpop.permute.xlu1 %9203 }
 0xa13   : > { %v9268_v44 = vsel %vm1131_vm6, %v17891_v18, %v9204_v40 }
 0xa14   : > { %9301 = vst.msk [vmem:[%s17045_s19 + $0xf8] sm:$0xff] %vm9269_vm1, %v9268_v44  ;;  %s13949_s19 = scalar_lea.vmem %s17239_s20, 4096 }
 0xa15   : > { %p13950_p11 = scmp.ne.s32.totalorder %s17239_s20, %s13949_s19  ;;  %p13957_p1 = scmp.lt.s32.totalorder %s13955_s28, %s13949_s19 }
 0xa17   : > { %p13951_p12 = pnand %p13950_p11, %p14143_p5  ;;  %p13958_p2 = por %p13957_p1, %p13956_p0 }
 0xa19   : > { %p13952_p13 = pneg %p13951_p12 }
 0xa1b   : > { %p13959_p3 = pnand %p13958_p2, %p13952_p13 }
 0xa35   : > { %v13164_v56 = vpop.f32.mrb[130].mxu0 }
 0xa36   : > { %v9813_v3 = vadd.f32 %v13164_v56, %v17176_v10  ;;  %v9807_v52 = vpop.f32.mrb[131].mxu0 }
 0xa37   : > { %v9808_v43 = vadd.f32 %v17176_v10, %v9807_v52 }
 0xa38   : > { %v9967_v46 = vmax.f32 %v9813_v3, 0.0 }
 0xa39   : > { %v9966_v53 = vmax.f32 %v9808_v43, 0.0  ;;  %v13167_v9 = vpop.f32.mrb[132].mxu0 }
 0xa3a   : > { %v9823_v58 = vadd.f32 %v13167_v9, %v17176_v10  ;;  %v9817_v61 = vpop.f32.mrb[133].mxu0  ;;  %10032 = vrot.lane.b32.xlu1 %v9967_v46, %s17640_s23 }
 0xa3b   : > { %v9818_v1 = vadd.f32 %v17176_v10, %v9817_v61  ;;  %10030 = vrot.lane.b32.xlu0 %v9966_v53, %s17640_s23 }
 0xa3c   : > { %v9969_v12 = vmax.f32 %v9823_v58, 0.0 }
 0xa3d   : > { %v9968_v36 = vmax.f32 %v9818_v1, 0.0  ;;  %v13170_v31 = vpop.f32.mrb[134].mxu0 }
 0xa3e   : > { %v9833_v21 = vadd.f32 %v13170_v31, %v17176_v10  ;;  %v9827_v19 = vpop.f32.mrb[135].mxu0  ;;  %10036 = vrot.lane.b32.xlu1 %v9969_v12, %s17640_s23 }
 0xa3f   : > { %v9828_v50 = vadd.f32 %v17176_v10, %v9827_v19  ;;  %10034 = vrot.lane.b32.xlu0 %v9968_v36, %s17640_s23 }
 0xa40   : > { %v9971_v54 = vmax.f32 %v9833_v21, 0.0 }
 0xa41   : > { %v9970_v22 = vmax.f32 %v9828_v50, 0.0  ;;  %v13173_v20 = vpop.f32.mrb[136].mxu0 }
 0xa42   : > { %v9843_v45 = vadd.f32 %v13173_v20, %v17176_v10  ;;  %v9837_v51 = vpop.f32.mrb[137].mxu0  ;;  %10040 = vrot.lane.b32.xlu1 %v9971_v54, %s17640_s23 }
 0xa43   : > { %v9838_v55 = vadd.f32 %v17176_v10, %v9837_v51  ;;  %10038 = vrot.lane.b32.xlu0 %v9970_v22, %s17640_s23 }
 0xa44   : > { %v9973_v5 = vmax.f32 %v9843_v45, 0.0 }
 0xa45   : > { %v9972_v7 = vmax.f32 %v9838_v55, 0.0  ;;  %v13176_v13 = vpop.f32.mrb[138].mxu0 }
 0xa46   : > { %v9853_v2 = vadd.f32 %v13176_v13, %v17176_v10  ;;  %v9847_v15 = vpop.f32.mrb[139].mxu0  ;;  %10044 = vrot.lane.b32.xlu1 %v9973_v5, %s17640_s23 }
 0xa47   : > { %v9848_v17 = vadd.f32 %v17176_v10, %v9847_v15  ;;  %10042 = vrot.lane.b32.xlu0 %v9972_v7, %s17640_s23 }
 0xa48   : > { %v9975_v59 = vmax.f32 %v9853_v2, 0.0 }
 0xa49   : > { %v9974_v42 = vmax.f32 %v9848_v17, 0.0  ;;  %v13179_v48 = vpop.f32.mrb[140].mxu0 }
 0xa4a   : > { %v9863_v35 = vadd.f32 %v13179_v48, %v17176_v10  ;;  %v9857_v25 = vpop.f32.mrb[141].mxu0  ;;  %10048 = vrot.lane.b32.xlu1 %v9975_v59, %s17640_s23 }
 0xa4b   : > { %v9858_v4 = vadd.f32 %v17176_v10, %v9857_v25  ;;  %10046 = vrot.lane.b32.xlu0 %v9974_v42, %s17640_s23 }
 0xa4c   : > { %v9977_v39 = vmax.f32 %v9863_v35, 0.0 }
 0xa4d   : > { %v9976_v26 = vmax.f32 %v9858_v4, 0.0  ;;  %v13182_v6 = vpop.f32.mrb[142].mxu0 }
 0xa4e   : > { %v9873_v8 = vadd.f32 %v13182_v6, %v17176_v10  ;;  %v9867_v28 = vpop.f32.mrb[143].mxu0  ;;  %10052 = vrot.lane.b32.xlu1 %v9977_v39, %s17640_s23 }
 0xa4f   : > { %v9868_v11 = vadd.f32 %v17176_v10, %v9867_v28  ;;  %10050 = vrot.lane.b32.xlu0 %v9976_v26, %s17640_s23 }
 0xa50   : > { %v9979_v34 = vmax.f32 %v9873_v8, 0.0 }
 0xa51   : > { %v9978_v37 = vmax.f32 %v9868_v11, 0.0  ;;  %v13185_v23 = vpop.f32.mrb[144].mxu0 }
 0xa52   : > { %v9883_v38 = vadd.f32 %v13185_v23, %v17176_v10  ;;  %v9877_v47 = vpop.f32.mrb[145].mxu0  ;;  %10056 = vrot.lane.b32.xlu1 %v9979_v34, %s17640_s23 }
 0xa53   : > { %v9878_v14 = vadd.f32 %v17176_v10, %v9877_v47  ;;  %10054 = vrot.lane.b32.xlu0 %v9978_v37, %s17640_s23 }
 0xa54   : > { %v9981_v32 = vmax.f32 %v9883_v38, 0.0 }
 0xa55   : > { %v9980_v24 = vmax.f32 %v9878_v14, 0.0  ;;  %v13188_v29 = vpop.f32.mrb[146].mxu0 }
 0xa56   : > { %v9893_v60 = vadd.f32 %v13188_v29, %v17176_v10  ;;  %v9887_v49 = vpop.f32.mrb[147].mxu0  ;;  %10060 = vrot.lane.b32.xlu1 %v9981_v32, %s17640_s23 }
 0xa57   : > { %v9888_v41 = vadd.f32 %v17176_v10, %v9887_v49  ;;  %10058 = vrot.lane.b32.xlu0 %v9980_v24, %s17640_s23 }
 0xa58   : > { %v9983_v16 = vmax.f32 %v9893_v60, 0.0 }
 0xa59   : > { %v9982_v62 = vmax.f32 %v9888_v41, 0.0  ;;  %v13191_v30 = vpop.f32.mrb[148].mxu0 }
 0xa5a   : > { %v9903_v27 = vadd.f32 %v13191_v30, %v17176_v10  ;;  %v9897_v0 = vpop.f32.mrb[149].mxu0  ;;  %10064 = vrot.lane.b32.xlu1 %v9983_v16, %s17640_s23 }
 0xa5b   : > { %v9898_v63 = vadd.f32 %v17176_v10, %v9897_v0  ;;  %10062 = vrot.lane.b32.xlu0 %v9982_v62, %s17640_s23 }
 0xa5c   : > { %v9985_v33 = vmax.f32 %v9903_v27, 0.0 }
 0xa5d   : > { %v9984_v57 = vmax.f32 %v9898_v63, 0.0  ;;  %v13194_v40 = vpop.f32.mrb[150].mxu0 }
 0xa5e   : > { %v9913_v18 = vadd.f32 %v13194_v40, %v17176_v10  ;;  %v9907_v44 = vpop.f32.mrb[151].mxu0  ;;  %10068 = vrot.lane.b32.xlu1 %v9985_v33, %s17640_s23 }
 0xa5f   : > { %v9908_v56 = vadd.f32 %v17176_v10, %v9907_v44  ;;  %10066 = vrot.lane.b32.xlu0 %v9984_v57, %s17640_s23 }
 0xa60   : > { %v9987_v3 = vmax.f32 %v9913_v18, 0.0 }
 0xa61   : > { %v9986_v52 = vmax.f32 %v9908_v56, 0.0  ;;  %v13197_v43 = vpop.f32.mrb[152].mxu0 }
 0xa62   : > { %v9923_v46 = vadd.f32 %v13197_v43, %v17176_v10  ;;  %v9917_v53 = vpop.f32.mrb[153].mxu0  ;;  %10072 = vrot.lane.b32.xlu1 %v9987_v3, %s17640_s23 }
 0xa63   : > { %v9918_v9 = vadd.f32 %v17176_v10, %v9917_v53  ;;  %10070 = vrot.lane.b32.xlu0 %v9986_v52, %s17640_s23 }
 0xa64   : > { %v9989_v58 = vmax.f32 %v9923_v46, 0.0 }
 0xa65   : > { %v9988_v61 = vmax.f32 %v9918_v9, 0.0  ;;  %v13200_v1 = vpop.f32.mrb[154].mxu0 }
 0xa66   : > { %v9933_v12 = vadd.f32 %v13200_v1, %v17176_v10  ;;  %v9927_v36 = vpop.f32.mrb[155].mxu0  ;;  %10076 = vrot.lane.b32.xlu1 %v9989_v58, %s17640_s23 }
 0xa67   : > { %v9928_v31 = vadd.f32 %v17176_v10, %v9927_v36  ;;  %10074 = vrot.lane.b32.xlu0 %v9988_v61, %s17640_s23 }
 0xa68   : > { %v9991_v21 = vmax.f32 %v9933_v12, 0.0 }
 0xa69   : > { %v9990_v19 = vmax.f32 %v9928_v31, 0.0  ;;  %v13203_v50 = vpop.f32.mrb[156].mxu0 }
 0xa6a   : > { %v9943_v54 = vadd.f32 %v13203_v50, %v17176_v10  ;;  %v9937_v22 = vpop.f32.mrb[157].mxu0  ;;  %10080 = vrot.lane.b32.xlu1 %v9991_v21, %s17640_s23 }
 0xa6b   : > { %v9938_v20 = vadd.f32 %v17176_v10, %v9937_v22  ;;  %10078 = vrot.lane.b32.xlu0 %v9990_v19, %s17640_s23 }
 0xa6c   : > { %v9993_v45 = vmax.f32 %v9943_v54, 0.0 }
 0xa6d   : > { %v9992_v51 = vmax.f32 %v9938_v20, 0.0  ;;  %v13206_v55 = vpop.f32.mrb[158].mxu0 }
 0xa6e   : > { %v9953_v5 = vadd.f32 %v13206_v55, %v17176_v10  ;;  %v9947_v7 = vpop.f32.mrb[159].mxu0  ;;  %10084 = vrot.lane.b32.xlu1 %v9993_v45, %s17640_s23 }
 0xa6f   : > { %v9948_v13 = vadd.f32 %v17176_v10, %v9947_v7  ;;  %10082 = vrot.lane.b32.xlu0 %v9992_v51, %s17640_s23 }
 0xa70   : > { %v9995_v2 = vmax.f32 %v9953_v5, 0.0 }
 0xa71   : > { %13962 = shalt.err (!%p13959_p3)
}
 0xa72   : > { %s13963_s2 = scalar_lea.hbm %s17236_s18, 4096  ;;  %s13967_s1 = scalar_lea.hbm %s17480_s15, 8192 }
 0xa73   : > { %p13964_p4 = scmp.ne.s32.totalorder %s17236_s18, %s13963_s2  ;;  %p13968_p9 = scmp.lt.u32.totalorder %s17236_s18, %s17480_s15 }
 0xa74   : > { %p13969_p10 = scmp.lt.u32.totalorder %s13967_s1, %s13963_s2  ;;  %p13971_p12 = scmp.lt.u32.totalorder %s13963_s2, %s17236_s18 }
 0xa75   : > { %p13965_p7 = pnand %p13964_p4, %p14143_p5 }
 0xa76   : > { %p13970_p11 = por %p13969_p10, %p13968_p9 }
 0xa77   : > { %p13966_p8 = pneg %p13965_p7 }
 0xa78   : > { %p13972_p13 = por %p13971_p12, %p13970_p11 }
 0xa7a   : > { %p13973_p0 = pnand %p13972_p13, %p13966_p8 }
 0xa7c   : > { %13976 = shalt.err (!%p13973_p0)
}
 0xa7d   : > { %s14018_s19 = smov 128   ;;  %s14019_s28 = smov 8   ;;  %v9994_v15 = vmax.f32 %v9948_v13, 0.0  ;;  %v13209_v17 = vpop.f32.mrb[160].mxu0  ;;  %v17280_v4 = vld [vmem:[%s17475_s10] ss:$0 sm:$0xff] }
 0xa7e   : > { %13904 = dma.vmem_to_hbm [thread:$0]  (%p14143_p5), %s17239_s20, 4096, %s17236_s18, %s17247_s25, %s14018_s19, %s14018_s19, %s14019_s28   ;;  %v9963_v59 = vadd.f32 %v13209_v17, %v17176_v10  ;;  %v9957_v42 = vpop.f32.mrb[161].mxu0  ;;  %v17893_v39 = vld [vmem:[#allocation41_spill] sm:$0xff]  ;;  %v17894_v6 = vld [vmem:[#allocation42_spill] sm:$0xff]  ;;  %v17895_v28 = vld [vmem:[#allocation43_spill] sm:$0xff] }
 0xa7f   : > { %s17892_s23 = smov 32   ;;  %v9958_v48 = vadd.f32 %v17176_v10, %v9957_v42  ;;  %v9481_v26 = vadd.f32 %v17893_v39, %v17280_v4  ;;  %v9476_v8 = vadd.f32 %v17280_v4, %v17894_v6  ;;  %v9491_v11 = vadd.f32 %v17895_v28, %v17280_v4  ;;  %s17292_s2 = scalar_lea.vmem %s17481_s16, %s14161_s26  ;;  %v17896_v37 = vld [vmem:[#allocation44_spill] sm:$0xff]  ;;  %v17897_v29 = vld [vmem:[#allocation45_spill] sm:$0xff]  ;;  %v17898_v41 = vld [vmem:[#allocation46_spill] sm:$0xff] }
 0xa80   : > { %10088 = vrot.lane.b32.xlu1 %v9995_v2, %s17892_s23  ;;  %10086 = vrot.lane.b32.xlu0 %v9994_v15, %s17892_s23  ;;  %v9997_v35 = vmax.f32 %v9963_v59, 0.0  ;;  %v9486_v23 = vadd.f32 %v17280_v4, %v17896_v37  ;;  %v9501_v60 = vadd.f32 %v17897_v29, %v17280_v4  ;;  %v9496_v16 = vadd.f32 %v17280_v4, %v17898_v41  ;;  %v17899_v33 = vld [vmem:[#allocation47_spill] sm:$0xff]  ;;  %v17900_v18 = vld [vmem:[#allocation48_spill] sm:$0xff]  ;;  %v17901_v53 = vld [vmem:[#allocation49_spill] sm:$0xff] }
 0xa81   : > { %v9996_v25 = vmax.f32 %v9958_v48, 0.0  ;;  %v9635_v10 = vmax.f32 %v9481_v26, 0.0  ;;  %v9634_v34 = vmax.f32 %v9476_v8, 0.0  ;;  %v9637_v24 = vmax.f32 %v9491_v11, 0.0  ;;  %v17902_v61 = vld [vmem:[#allocation50_spill] sm:$0xff]  ;;  %v17903_v50 = vld [vmem:[#allocation51_spill] sm:$0xff] }
 0xa82   : > { %v9636_v49 = vmax.f32 %v9486_v23, 0.0  ;;  %v9639_v63 = vmax.f32 %v9501_v60, 0.0  ;;  %v9511_v57 = vadd.f32 %v17899_v33, %v17280_v4  ;;  %v9638_v40 = vmax.f32 %v9496_v16, 0.0  ;;  %v17904_v20 = vld [vmem:[#allocation52_spill] sm:$0xff]  ;;  %v17905_v2 = vld [vmem:[#allocation53_spill] sm:$0xff]  ;;  %v17906_v59 = vld [vmem:[#allocation54_spill] sm:$0xff] }
 0xa83   : > { %v9506_v44 = vadd.f32 %v17280_v4, %v17900_v18  ;;  %v9521_v9 = vadd.f32 %v17901_v53, %v17280_v4  ;;  %v9516_v1 = vadd.f32 %v17280_v4, %v17902_v61  ;;  %v9531_v54 = vadd.f32 %v17903_v50, %v17280_v4  ;;  %v17907_v6 = vld [vmem:[#allocation55_spill] sm:$0xff]  ;;  %v17908_v28 = vld [vmem:[#allocation56_spill] sm:$0xff]  ;;  %v17910_v29 = vld [vmem:[#allocation58_spill] sm:$0xff] }
 0xa84   : > { %10092 = vrot.lane.b32.xlu1 %v9997_v35, %s17892_s23  ;;  %10090 = vrot.lane.b32.xlu0 %v9996_v25, %s17892_s23  ;;  %v9641_v46 = vmax.f32 %v9511_v57, 0.0  ;;  %v9526_v45 = vadd.f32 %v17280_v4, %v17904_v20  ;;  %v9541_v15 = vadd.f32 %v17905_v2, %v17280_v4  ;;  %v9536_v42 = vadd.f32 %v17280_v4, %v17906_v59  ;;  %v17912_v33 = vld [vmem:[#allocation60_spill] sm:$0xff]  ;;  %v17914_v53 = vld [vmem:[#allocation62_spill] sm:$0xff] }
 0xa85   : > { %v9640_v58 = vmax.f32 %v9506_v44, 0.0  ;;  %v9643_v19 = vmax.f32 %v9521_v9, 0.0  ;;  %v9642_v22 = vmax.f32 %v9516_v1, 0.0  ;;  %v9645_v13 = vmax.f32 %v9531_v54, 0.0  ;;  %v17916_v50 = vld [vmem:[#allocation64_spill] sm:$0xff]  ;;  %v17918_v2 = vld [vmem:[#allocation66_spill] sm:$0xff] }
 0xa86   : > { %v9644_v17 = vmax.f32 %v9526_v45, 0.0  ;;  %v9647_v26 = vmax.f32 %v9541_v15, 0.0  ;;  %v9551_v8 = vadd.f32 %v17907_v6, %v17280_v4  ;;  %v9546_v11 = vadd.f32 %v17280_v4, %v17908_v28  ;;  %v17920_v6 = vld [vmem:[#allocation68_spill] sm:$0xff] }
 0xa87   : > { %v9556_v60 = vadd.f32 %v17280_v4, %v17910_v29  ;;  %v9566_v57 = vadd.f32 %v17280_v4, %v17912_v33  ;;  %v9576_v9 = vadd.f32 %v17280_v4, %v17914_v53  ;;  %v9586_v54 = vadd.f32 %v17280_v4, %v17916_v50 }
 0xa88   : > { %v9596_v15 = vadd.f32 %v17280_v4, %v17918_v2 }
 0xaac   : > { %v10033_v38 = vpop.permute.xlu1 %10032 }
 0xaad   : > { %v10127_v47 = vsel %vm1131_vm6, %v9635_v10, %v10033_v38  ;;  %v10031_v14 = vpop.permute.xlu0 %10030  ;;  %v9646_v10 = vmax.f32 %v9536_v42, 0.0 }
 0xaae   : > { %10159 = vst.msk [vmem:[%s17292_s2 + $0x8] sm:$0xff] %vm9269_vm1, %v10127_v47  ;;  %v10126_v32 = vsel %vm1131_vm6, %v9634_v34, %v10031_v14  ;;  %v9649_v47 = vmax.f32 %v9551_v8, 0.0  ;;  %v17909_v14 = vld [vmem:[#allocation57_spill] sm:$0xff]  ;;  %v9606_v8 = vadd.f32 %v17280_v4, %v17920_v6 }
 0xaaf   : > { %10158 = vst.msk [vmem:[%s17292_s2] sm:$0xff] %vm9269_vm1, %v10126_v32  ;;  %v9561_v32 = vadd.f32 %v17909_v14, %v17280_v4  ;;  %v17922_v14 = vld [vmem:[#allocation70_spill] sm:$0xff] }
 0xab0   : > { %v10037_v62 = vpop.permute.xlu1 %10036 }
 0xab1   : > { %v10129_v30 = vsel %vm1131_vm6, %v9637_v24, %v10037_v62  ;;  %v10035_v27 = vpop.permute.xlu0 %10034  ;;  %v9648_v24 = vmax.f32 %v9546_v11, 0.0 }
 0xab2   : > { %10161 = vst.msk [vmem:[%s17292_s2 + $0x18] sm:$0xff] %vm9269_vm1, %v10129_v30  ;;  %v10128_v0 = vsel %vm1131_vm6, %v9636_v49, %v10035_v27  ;;  %v9651_v30 = vmax.f32 %v9561_v32, 0.0  ;;  %v17911_v27 = vld [vmem:[#allocation59_spill] sm:$0xff]  ;;  %v9616_v32 = vadd.f32 %v17280_v4, %v17922_v14 }
 0xab3   : > { %10160 = vst.msk [vmem:[%s17292_s2 + $0x10] sm:$0xff] %vm9269_vm1, %v10128_v0  ;;  %v9571_v0 = vadd.f32 %v17911_v27, %v17280_v4  ;;  %v17924_v27 = vld [vmem:[#allocation72_spill] sm:$0xff] }
 0xab4   : > { %v10041_v56 = vpop.permute.xlu1 %10040 }
 0xab5   : > { %v10131_v3 = vsel %vm1131_vm6, %v9639_v63, %v10041_v56  ;;  %v10039_v52 = vpop.permute.xlu0 %10038  ;;  %v9650_v63 = vmax.f32 %v9556_v60, 0.0 }
 0xab6   : > { %10163 = vst.msk [vmem:[%s17292_s2 + $0x28] sm:$0xff] %vm9269_vm1, %v10131_v3  ;;  %v10130_v43 = vsel %vm1131_vm6, %v9638_v40, %v10039_v52  ;;  %v9653_v3 = vmax.f32 %v9571_v0, 0.0  ;;  %v17913_v52 = vld [vmem:[#allocation61_spill] sm:$0xff]  ;;  %v9626_v0 = vadd.f32 %v17280_v4, %v17924_v27 }
 0xab7   : > { %10162 = vst.msk [vmem:[%s17292_s2 + $0x20] sm:$0xff] %vm9269_vm1, %v10130_v43  ;;  %v9581_v43 = vadd.f32 %v17913_v52, %v17280_v4 }
 0xab8   : > { %v10045_v12 = vpop.permute.xlu1 %10044 }
 0xab9   : > { %v10133_v36 = vsel %vm1131_vm6, %v9641_v46, %v10045_v12  ;;  %v10043_v31 = vpop.permute.xlu0 %10042  ;;  %v9652_v46 = vmax.f32 %v9566_v57, 0.0 }
 0xaba   : > { %10165 = vst.msk [vmem:[%s17292_s2 + $0x38] sm:$0xff] %vm9269_vm1, %v10133_v36  ;;  %v10132_v21 = vsel %vm1131_vm6, %v9640_v58, %v10043_v31  ;;  %v9655_v36 = vmax.f32 %v9581_v43, 0.0  ;;  %v17915_v31 = vld [vmem:[#allocation63_spill] sm:$0xff] }
 0xabb   : > { %10164 = vst.msk [vmem:[%s17292_s2 + $0x30] sm:$0xff] %vm9269_vm1, %v10132_v21  ;;  %v9591_v21 = vadd.f32 %v17915_v31, %v17280_v4 }
 0xabc   : > { %v10049_v51 = vpop.permute.xlu1 %10048 }
 0xabd   : > { %v10135_v55 = vsel %vm1131_vm6, %v9643_v19, %v10049_v51  ;;  %v10047_v5 = vpop.permute.xlu0 %10046  ;;  %v9654_v19 = vmax.f32 %v9576_v9, 0.0 }
 0xabe   : > { %10167 = vst.msk [vmem:[%s17292_s2 + $0x48] sm:$0xff] %vm9269_vm1, %v10135_v55  ;;  %v10134_v7 = vsel %vm1131_vm6, %v9642_v22, %v10047_v5  ;;  %v9657_v55 = vmax.f32 %v9591_v21, 0.0  ;;  %v17917_v5 = vld [vmem:[#allocation65_spill] sm:$0xff] }
 0xabf   : > { %10166 = vst.msk [vmem:[%s17292_s2 + $0x40] sm:$0xff] %vm9269_vm1, %v10134_v7  ;;  %v9601_v7 = vadd.f32 %v17917_v5, %v17280_v4 }
 0xac0   : > { %v10053_v48 = vpop.permute.xlu1 %10052 }
 0xac1   : > { %v10137_v35 = vsel %vm1131_vm6, %v9645_v13, %v10053_v48  ;;  %v10051_v25 = vpop.permute.xlu0 %10050  ;;  %v9656_v13 = vmax.f32 %v9586_v54, 0.0 }
 0xac2   : > { %10169 = vst.msk [vmem:[%s17292_s2 + $0x58] sm:$0xff] %vm9269_vm1, %v10137_v35  ;;  %v10136_v39 = vsel %vm1131_vm6, %v9644_v17, %v10051_v25  ;;  %v9659_v35 = vmax.f32 %v9601_v7, 0.0  ;;  %v17919_v25 = vld [vmem:[#allocation67_spill] sm:$0xff] }
 0xac3   : > { %10168 = vst.msk [vmem:[%s17292_s2 + $0x50] sm:$0xff] %vm9269_vm1, %v10136_v39  ;;  %v9611_v39 = vadd.f32 %v17919_v25, %v17280_v4 }
 0xac4   : > { %v10057_v34 = vpop.permute.xlu1 %10056 }
 0xac5   : > { %v10139_v37 = vsel %vm1131_vm6, %v9647_v26, %v10057_v34  ;;  %v10055_v23 = vpop.permute.xlu0 %10054  ;;  %v9658_v26 = vmax.f32 %v9596_v15, 0.0 }
 0xac6   : > { %10171 = vst.msk [vmem:[%s17292_s2 + $0x68] sm:$0xff] %vm9269_vm1, %v10139_v37  ;;  %v10138_v38 = vsel %vm1131_vm6, %v9646_v10, %v10055_v23  ;;  %v9661_v37 = vmax.f32 %v9611_v39, 0.0  ;;  %v17921_v23 = vld [vmem:[#allocation69_spill] sm:$0xff] }
 0xac7   : > { %10170 = vst.msk [vmem:[%s17292_s2 + $0x60] sm:$0xff] %vm9269_vm1, %v10138_v38  ;;  %v9621_v38 = vadd.f32 %v17921_v23, %v17280_v4 }
 0xac8   : > { %v10061_v49 = vpop.permute.xlu1 %10060 }
 0xac9   : > { %v10141_v41 = vsel %vm1131_vm6, %v9649_v47, %v10061_v49  ;;  %v10059_v16 = vpop.permute.xlu0 %10058  ;;  %v9660_v47 = vmax.f32 %v9606_v8, 0.0 }
 0xaca   : > { %10173 = vst.msk [vmem:[%s17292_s2 + $0x78] sm:$0xff] %vm9269_vm1, %v10141_v41  ;;  %v10140_v62 = vsel %vm1131_vm6, %v9648_v24, %v10059_v16  ;;  %v9663_v41 = vmax.f32 %v9621_v38, 0.0  ;;  %v17923_v16 = vld [vmem:[#allocation71_spill] sm:$0xff] }
 0xacb   : > { %10172 = vst.msk [vmem:[%s17292_s2 + $0x70] sm:$0xff] %vm9269_vm1, %v10140_v62  ;;  %v9631_v62 = vadd.f32 %v17923_v16, %v17280_v4 }
 0xacc   : > { %v10065_v40 = vpop.permute.xlu1 %10064 }
 0xacd   : > { %v10143_v18 = vsel %vm1131_vm6, %v9651_v30, %v10065_v40  ;;  %v10063_v44 = vpop.permute.xlu0 %10062  ;;  %v9662_v30 = vmax.f32 %v9616_v32, 0.0 }
 0xace   : > { %10175 = vst.msk [vmem:[%s17292_s2 + $0x88] sm:$0xff] %vm9269_vm1, %v10143_v18  ;;  %v10142_v56 = vsel %vm1131_vm6, %v9650_v63, %v10063_v44  ;;  %v9665_v18 = vmax.f32 %v9631_v62, 0.0  ;;  %v9664_v44 = vmax.f32 %v9626_v0, 0.0 }
 0xacf   : > { %10174 = vst.msk [vmem:[%s17292_s2 + $0x80] sm:$0xff] %vm9269_vm1, %v10142_v56 }
 0xad0   : > { %v10069_v58 = vpop.permute.xlu1 %10068 }
 0xad1   : > { %v10145_v61 = vsel %vm1131_vm6, %v9653_v3, %v10069_v58  ;;  %v10067_v1 = vpop.permute.xlu0 %10066 }
 0xad2   : > { %10177 = vst.msk [vmem:[%s17292_s2 + $0x98] sm:$0xff] %vm9269_vm1, %v10145_v61  ;;  %v10144_v12 = vsel %vm1131_vm6, %v9652_v46, %v10067_v1 }
 0xad3   : > { %10176 = vst.msk [vmem:[%s17292_s2 + $0x90] sm:$0xff] %vm9269_vm1, %v10144_v12 }
 0xad4   : > { %v10073_v22 = vpop.permute.xlu1 %10072 }
 0xad5   : > { %v10147_v20 = vsel %vm1131_vm6, %v9655_v36, %v10073_v22  ;;  %v10071_v45 = vpop.permute.xlu0 %10070 }
 0xad6   : > { %10179 = vst.msk [vmem:[%s17292_s2 + $0xa8] sm:$0xff] %vm9269_vm1, %v10147_v20  ;;  %v10146_v51 = vsel %vm1131_vm6, %v9654_v19, %v10071_v45 }
 0xad7   : > { %10178 = vst.msk [vmem:[%s17292_s2 + $0xa0] sm:$0xff] %vm9269_vm1, %v10146_v51 }
 0xad8   : > { %v10077_v17 = vpop.permute.xlu1 %10076 }
 0xad9   : > { %v10149_v59 = vsel %vm1131_vm6, %v9657_v55, %v10077_v17  ;;  %v10075_v42 = vpop.permute.xlu0 %10074 }
 0xada   : > { %10181 = vst.msk [vmem:[%s17292_s2 + $0xb8] sm:$0xff] %vm9269_vm1, %v10149_v59  ;;  %v10148_v48 = vsel %vm1131_vm6, %v9656_v13, %v10075_v42 }
 0xadb   : > { %10180 = vst.msk [vmem:[%s17292_s2 + $0xb0] sm:$0xff] %vm9269_vm1, %v10148_v48 }
 0xadc   : > { %v10081_v10 = vpop.permute.xlu1 %10080 }
 0xadd   : > { %v10151_v28 = vsel %vm1131_vm6, %v9659_v35, %v10081_v10  ;;  %v10079_v11 = vpop.permute.xlu0 %10078 }
 0xade   : > { %10183 = vst.msk [vmem:[%s17292_s2 + $0xc8] sm:$0xff] %vm9269_vm1, %v10151_v28  ;;  %v10150_v34 = vsel %vm1131_vm6, %v9658_v26, %v10079_v11 }
 0xadf   : > { %10182 = vst.msk [vmem:[%s17292_s2 + $0xc0] sm:$0xff] %vm9269_vm1, %v10150_v34 }
 0xae0   : > { %v10085_v24 = vpop.permute.xlu1 %10084 }
 0xae1   : > { %v10153_v29 = vsel %vm1131_vm6, %v9661_v37, %v10085_v24  ;;  %v10083_v60 = vpop.permute.xlu0 %10082 }
 0xae2   : > { %10185 = vst.msk [vmem:[%s17292_s2 + $0xd8] sm:$0xff] %vm9269_vm1, %v10153_v29  ;;  %v10152_v49 = vsel %vm1131_vm6, %v9660_v47, %v10083_v60 }
 0xae3   : > { %10184 = vst.msk [vmem:[%s17292_s2 + $0xd0] sm:$0xff] %vm9269_vm1, %v10152_v49 }
 0xaf2   : > { %v10089_v63 = vpop.permute.xlu1 %10088  ;;  %v10087_v57 = vpop.permute.xlu0 %10086 }
 0xaf3   : > { %v10155_v33 = vsel %vm1131_vm6, %v9663_v41, %v10089_v63  ;;  %v10154_v40 = vsel %vm1131_vm6, %v9662_v30, %v10087_v57 }
 0xaf4   : > { %10187 = vst.msk [vmem:[%s17292_s2 + $0xe8] sm:$0xff] %vm9269_vm1, %v10155_v33  ;;  %10186 = vst.msk [vmem:[%s17292_s2 + $0xe0] sm:$0xff] %vm9269_vm1, %v10154_v40 }
 0xaf6   : > { %v10093_v56 = vpop.permute.xlu1 %10092  ;;  %v10091_v52 = vpop.permute.xlu0 %10090 }
 0xaf7   : > { %v10157_v3 = vsel %vm1131_vm6, %v9665_v18, %v10093_v56  ;;  %v10156_v4 = vsel %vm1131_vm6, %v9664_v44, %v10091_v52 }
 0xaf8   : > { %10189 = vst.msk [vmem:[%s17292_s2 + $0xf8] sm:$0xff] %vm9269_vm1, %v10157_v3  ;;  %10188 = vst.msk [vmem:[%s17292_s2 + $0xf0] sm:$0xff] %vm9269_vm1, %v10156_v4 }
 0xaf9 PF: > { %p13910_p5 = scmp.ge.s32.totalorder %s14011_s24, 2  ;;  %s10259_s26 = sand.u32 1, %s13999_s21  }
 0xafa   : > { %s10260_s29 = scalar_lea.sflag [#allocation5], %s10259_s26 }
 0xafb   : > { %p13907_p1 = pnand %p13910_p5, %p14147_p6 }
 0xafd   : > { %13994 = dma.done.wait (!%p13907_p1), %s10260_s29, 4096  }
 0xafe   : > { %13996 = vsyncadd (!%p13907_p1), %s10260_s29, 4294963200  ;;  %s17925_s30 = sld [smem:[#allocation7_spill]]  ;;  %s17926_s23 = sld [smem:[#allocation8_spill]] }
 0xaff   : > { %p27_p2 = scmp.ge.s32.totalorder %s14130_s27, 4   ;;  %s17927_s21 = smov %s14003_s22 }
 0xb00   : > { %s17929_s24 = smov %s14130_s27 }
 0xb01   :  { %29 = sbr.rel (!%p27_p2) target bundleno = 8 (0x8), region = 196 }
 0xb04   : > { %s17928_s22 = smov %s17925_s30 }
 0xb08   :  { %10273 = vsyncpa [#allocation5], 1 }
 0xb09   :  { %10275 = vsyncpa [#allocation5 + $0x1], 1 }

</bundles_post_ra>
